<compile_context>
chip_gen: v5e
topology: v5e:2x2
jax: 0.10.0
libtpu: 0.0.40
codegen_flags: <defaults>
</compile_context>

<pallas_src>
import numpy as np

import jax
import jax.numpy as jnp
from jax.experimental import pallas as pl
from jax.experimental.pallas import tpu as pltpu


COMPUTE_DTYPE = jnp.bfloat16   # MXU operands; accumulation stays float32.

# ---- layout constants ------------------------------------------------------
_ROW_PAD = 64                  # each 28-px image row padded to 64 lanes
_XW = 30 * _ROW_PAD            # 1920 = [zero row, 28 image rows, zero row] * 64
_A1_ROW = 256                  # conv1 out row: 14 pos * 16 ch = 224 -> 256
_A1_W = 14 * _A1_ROW           # 3584
_A2_ROW = 256                  # conv2 out row: 7 pos * 32 ch = 224 -> 256
_A2_W = 7 * _A2_ROW            # 1792
_OUT = 128


# ---------------------------------------------------------------------------
# Fused kernel: conv1 (14 banded GEMMs) -> conv2 (7 banded GEMMs) -> fc.
# ---------------------------------------------------------------------------
def _fused_forward_kernel(x_ref, w1_ref, b1_ref, w2_ref, b2_ref, w3_ref, b3_ref,
                          o_ref, a1_ref, a2_ref):
    # x_ref : [tb, 1920] bf16   padded image rows (64 lanes each, zero top row)
    # w1_ref: [256, 256] bf16   shared conv1 band matrix (rows 192..255 zero)
    # w2_ref: [768, 256] bf16   shared conv2 band matrix
    # w3_ref: [1792, 128] bf16  fc weight permuted to padded (h, w, c) order
    # b*_ref: [1, N] f32        per-row biases (pad lanes zero)
    # a1_ref: [tb, 3584] bf16   conv1 activations (scratch)
    # a2_ref: [tb, 1792] bf16   conv2 activations (scratch)
    cdt = w1_ref.dtype

    # Stage 1: conv1 + ReLU, one banded GEMM per output spatial row.
    for i in range(14):
        xa = x_ref[:, pl.ds(128 * i, 256)]          # image rows 2i-1 .. 2i+2
        h = jnp.dot(xa, w1_ref[...], preferred_element_type=jnp.float32)
        h = jnp.maximum(h + b1_ref[...], 0.0)
        a1_ref[:, pl.ds(_A1_ROW * i, _A1_ROW)] = h.astype(cdt)

    # Stage 2: conv2 + ReLU, one banded GEMM per output spatial row.
    for j in range(7):
        if j == 0:
            # top row: input rows {0, 1}; drop the weight rows of row -1 (pad)
            xa = a1_ref[:, pl.ds(0, 2 * _A1_ROW)]
            w = w2_ref[pl.ds(_A1_ROW, 2 * _A1_ROW), :]
        else:
            xa = a1_ref[:, pl.ds(_A1_ROW * (2 * j - 1), 3 * _A1_ROW)]
            w = w2_ref[...]
        h = jnp.dot(xa, w, preferred_element_type=jnp.float32)
        h = jnp.maximum(h + b2_ref[...], 0.0)
        a2_ref[:, pl.ds(_A2_ROW * j, _A2_ROW)] = h.astype(cdt)

    # Stage 3: fc + ReLU (lane-dense [tb, 128] output).
    h = jnp.dot(a2_ref[...], w3_ref[...], preferred_element_type=jnp.float32)
    o_ref[...] = jnp.maximum(h + b3_ref[...], 0.0).astype(o_ref.dtype)


def _round_up(x, m):
    return (x + m - 1) // m * m


def _fused_forward_pallas(xf, tb, p):
    """xf: [bp, 1920] compute dtype, bp a multiple of tb (tb multiple of 8)."""
    bp = xf.shape[0]

    macs_per_row = 14 * 256 * 256 + (2 * 256 + 6 * 3 * 256) * 256 + _A2_W * _OUT
    flops = 2 * bp * macs_per_row
    bytes_accessed = (
        xf.size * xf.dtype.itemsize
        + sum(int(a.size) * a.dtype.itemsize
              for a in (p["w1"], p["b1"], p["w2"], p["b2"], p["w3"], p["b3"]))
        + bp * _OUT * 4)

    return pl.pallas_call(
        _fused_forward_kernel,
        out_shape=jax.ShapeDtypeStruct((bp, _OUT), jnp.float32),
        grid=(bp // tb,),
        in_specs=[
            pl.BlockSpec((tb, _XW), lambda i: (i, 0)),       # streaming input
            pl.BlockSpec((256, 256), lambda i: (0, 0)),      # conv1 band (resident)
            pl.BlockSpec((1, 256), lambda i: (0, 0)),
            pl.BlockSpec((768, 256), lambda i: (0, 0)),      # conv2 band (resident)
            pl.BlockSpec((1, 256), lambda i: (0, 0)),
            pl.BlockSpec((_A2_W, _OUT), lambda i: (0, 0)),   # fc weight (resident)
            pl.BlockSpec((1, _OUT), lambda i: (0, 0)),
        ],
        out_specs=pl.BlockSpec((tb, _OUT), lambda i: (i, 0)),
        scratch_shapes=[pltpu.VMEM((tb, _A1_W), COMPUTE_DTYPE),
                        pltpu.VMEM((tb, _A2_W), COMPUTE_DTYPE)],
        compiler_params=pltpu.CompilerParams(
            dimension_semantics=("parallel",),
            vmem_limit_bytes=48 * 1024 * 1024),
        cost_estimate=pl.CostEstimate(
            flops=flops, transcendentals=0, bytes_accessed=bytes_accessed),
    )(xf, p["w1"], p["b1"], p["w2"], p["b2"], p["w3"], p["b3"])


# ---------------------------------------------------------------------------
# One-time parameter preparation (outside the jitted forward).
# ---------------------------------------------------------------------------
def prepare_params(params, compute_dtype=COMPUTE_DTYPE):
    w1 = np.asarray(params["conv1_w"], np.float32)   # [16, 1, 3, 3]
    w2 = np.asarray(params["conv2_w"], np.float32)   # [32, 16, 3, 3]
    fw = np.asarray(params["fc_w"], np.float32)      # [128, 1568] (c,h,w order)
    cb1 = np.asarray(params["conv1_b"], np.float32)  # [16]
    cb2 = np.asarray(params["conv2_b"], np.float32)  # [32]
    fb = np.asarray(params["fc_b"], np.float32)      # [128]

    # conv1 band matrix: 4 consecutive 64-wide padded image rows (2i-1..2i+2,
    # last row unused -> zero rows) -> one 256-wide act1 row (14 pos * 16 ch).
    W1 = np.zeros((256, 256), np.float32)
    for oc in range(14):
        for di in range(3):
            for dj in range(3):
                ic = 2 * oc + dj - 1
                if 0 <= ic < 28:
                    W1[_ROW_PAD * di + ic, 16 * oc:16 * oc + 16] = w1[:, 0, di, dj]

    # conv2 band matrix: 3 consecutive 256-wide act1 rows (2j-1..2j+1) ->
    # one 256-wide act2 row (7 pos * 32 ch). Kernel uses W2[256:] for j == 0.
    W2 = np.zeros((3 * _A1_ROW, 256), np.float32)
    for oc in range(7):
        for di in range(3):
            for dj in range(3):
                ip = 2 * oc + dj - 1
                if 0 <= ip < 14:
                    for ci in range(16):
                        W2[_A1_ROW * di + 16 * ip + ci,
                           32 * oc:32 * oc + 32] = w2[:, ci, di, dj]

    # fc weight: torch flatten is (c, h, w); our act2 lane is 256*h + 32*w + c.
    W3 = np.zeros((_A2_W, _OUT), np.float32)
    for h in range(7):
        for w in range(7):
            for c in range(32):
                W3[_A2_ROW * h + 32 * w + c, :] = fw[:, c * 49 + 7 * h + w]

    B1 = np.zeros((1, 256), np.float32)
    B1[0, :224] = np.tile(cb1, 14)
    B2 = np.zeros((1, 256), np.float32)
    B2[0, :224] = np.tile(cb2, 7)
    B3 = fb[None, :]

    return {"w1": jnp.asarray(W1, compute_dtype),
            "w2": jnp.asarray(W2, compute_dtype),
            "w3": jnp.asarray(W3, compute_dtype),
            "b1": jnp.asarray(B1, jnp.float32),
            "b2": jnp.asarray(B2, jnp.float32),
            "b3": jnp.asarray(B3, jnp.float32)}


# ---------------------------------------------------------------------------
# DeepSVDD forward
# ---------------------------------------------------------------------------
def init_params(key):
    k1, k2, k3, k4, k5, k6 = jax.random.split(key, 6)
    scale = 0.05
    return {
        "conv1_w": scale * jax.random.normal(k1, (16, 1, 3, 3), jnp.float32),
        "conv1_b": scale * jax.random.normal(k2, (16,), jnp.float32),
        "conv2_w": scale * jax.random.normal(k3, (32, 16, 3, 3), jnp.float32),
        "conv2_b": scale * jax.random.normal(k4, (32,), jnp.float32),
        "fc_w": scale * jax.random.normal(k5, (128, 32 * 7 * 7), jnp.float32),
        "fc_b": scale * jax.random.normal(k6, (128,), jnp.float32),
    }


@jax.jit
def deep_svdd_forward(prepped, x):
    # x: [B, 1, 28, 28] float32 (NCHW, as in the torch module).
    b = x.shape[0]
    assert x.shape[1:] == (1, 28, 28)
    # Pad each 28-px row to 64 lanes and prepend/append a zero row -> [B, 1920].
    xr = x.reshape(b, 28, 28)
    xr = jnp.pad(xr, ((0, 0), (1, 1), (0, _ROW_PAD - 28)))
    xf = xr.reshape(b, _XW).astype(COMPUTE_DTYPE)

    # Batch tile: multiple of 8, capped at 512, and >=2 grid steps for large B
    # so v7x's second TensorCore is used (grid axis is "parallel").
    bp8 = _round_up(b, 8)
    tb = min(512, max(8, _round_up(-(-bp8 // 2), 8)))
    bp = _round_up(b, tb)
    if bp != b:
        xf = jnp.pad(xf, ((0, bp - b), (0, 0)))

    out = _fused_forward_pallas(xf, tb, prepped)
    return out[:b]


def _reference_forward(params, x):
    """Pure-XLA float32 reference matching the PyTorch module exactly."""
    dn = ("NCHW", "OIHW", "NCHW")
    h = jax.lax.conv_general_dilated(
        x, params["conv1_w"], window_strides=(2, 2),
        padding=((1, 1), (1, 1)), dimension_numbers=dn)
    h = jax.nn.relu(h + params["conv1_b"][None, :, None, None])
    h = jax.lax.conv_general_dilated(
        h, params["conv2_w"], window_strides=(2, 2),
        padding=((1, 1), (1, 1)), dimension_numbers=dn)
    h = jax.nn.relu(h + params["conv2_b"][None, :, None, None])
    h = h.reshape(x.shape[0], -1)            # torch Flatten: (C, H, W) order
    return jax.nn.relu(h @ params["fc_w"].T + params["fc_b"])


if __name__ == "__main__":
    key = jax.random.PRNGKey(0)
    pkey, xkey, x2key = jax.random.split(key, 3)
    params = init_params(pkey)
    prepped = prepare_params(params)

    # Small deterministic example (batch=2), as the module implies 1x28x28.
    x = jax.random.normal(xkey, (2, 1, 28, 28), jnp.float32)
    out = jax.block_until_ready(deep_svdd_forward(prepped, x))

    assert out.shape == (2, 128), out.shape
    assert out.dtype == jnp.float32
    assert bool(jnp.all(out >= 0.0))          # ReLU output

    ref = _reference_forward(params, x)
    max_err = float(jnp.max(jnp.abs(out - ref)))
    assert max_err < 5e-2, f"max abs error {max_err}"

    # Second check: batch not a multiple of the tile -> exercises the multi-step
    # grid and batch padding paths.
    x2 = jax.random.normal(x2key, (50, 1, 28, 28), jnp.float32)
    out2 = jax.block_until_ready(deep_svdd_forward(prepped, x2))
    ref2 = _reference_forward(params, x2)
    max_err2 = float(jnp.max(jnp.abs(out2 - ref2)))
    assert out2.shape == (50, 128)
    assert max_err2 < 5e-2, f"max abs error {max_err2}"

    print("KERNEL_OK")
</pallas_src>

<mosaic_0001>
module attributes {stable_mosaic.version = 11 : i64} {
  func.func @_fused_forward_kernel(%arg0: i32, %arg1: memref<8x1920xbf16, #tpu.memory_space<vmem>>, %arg2: memref<256x256xbf16, #tpu.memory_space<vmem>>, %arg3: memref<1x256xf32, #tpu.memory_space<vmem>>, %arg4: memref<768x256xbf16, #tpu.memory_space<vmem>>, %arg5: memref<1x256xf32, #tpu.memory_space<vmem>>, %arg6: memref<1792x128xbf16, #tpu.memory_space<vmem>>, %arg7: memref<1x128xf32, #tpu.memory_space<vmem>>, %arg8: memref<8x128xf32, #tpu.memory_space<vmem>>, %arg9: memref<8x3584xbf16, #tpu.memory_space<vmem>>, %arg10: memref<8x1792xbf16, #tpu.memory_space<vmem>>) attributes {dimension_semantics = [#tpu.dimension_semantics<parallel>], iteration_bounds = array<i64: 1>, scalar_prefetch = 0 : i64, scratch_operands = 2 : i64, tpu.core_type = #tpu.core_type<tc>, window_params = [{transform_indices = @transform_0, window_bounds = array<i64: 8, 1920>}, {pipeline_mode = #tpu.pipeline_mode<synchronous>, transform_indices = @transform_1, window_bounds = array<i64: 256, 256>}, {pipeline_mode = #tpu.pipeline_mode<synchronous>, transform_indices = @transform_2, window_bounds = array<i64: 1, 256>}, {pipeline_mode = #tpu.pipeline_mode<synchronous>, transform_indices = @transform_3, window_bounds = array<i64: 768, 256>}, {pipeline_mode = #tpu.pipeline_mode<synchronous>, transform_indices = @transform_4, window_bounds = array<i64: 1, 256>}, {pipeline_mode = #tpu.pipeline_mode<synchronous>, transform_indices = @transform_5, window_bounds = array<i64: 1792, 128>}, {pipeline_mode = #tpu.pipeline_mode<synchronous>, transform_indices = @transform_6, window_bounds = array<i64: 1, 128>}, {transform_indices = @transform_7, window_bounds = array<i64: 8, 128>}]} {
    %c0 = arith.constant 0 : index
    %c0_0 = arith.constant 0 : index
    %0 = vector.load %arg1[%c0, %c0_0] : memref<8x1920xbf16, #tpu.memory_space<vmem>>, vector<8x256xbf16>
    %c0_1 = arith.constant 0 : index
    %c0_2 = arith.constant 0 : index
    %1 = vector.load %arg2[%c0_1, %c0_2] : memref<256x256xbf16, #tpu.memory_space<vmem>>, vector<256x256xbf16>
    %cst = arith.constant dense<0.000000e+00> : vector<8x256xf32>
    %2 = tpu.matmul %0, %1, %cst {dimension_numbers = #tpu.dot_dimension_numbers<[1], [0], [0], [1], [0, 0, 1, 1], [], []>} : vector<8x256xbf16>, vector<256x256xbf16>, vector<8x256xf32> -> vector<8x256xf32>
    %c0_3 = arith.constant 0 : index
    %c0_4 = arith.constant 0 : index
    %3 = vector.load %arg3[%c0_3, %c0_4] : memref<1x256xf32, #tpu.memory_space<vmem>>, vector<1x256xf32>
    %4 = vector.broadcast %3 : vector<1x256xf32> to vector<8x256xf32>
    %5 = arith.addf %2, %4 : vector<8x256xf32>
    %cst_5 = arith.constant 0.000000e+00 : f32
    %6 = vector.broadcast %cst_5 : f32 to vector<8x256xf32>
    %7 = arith.maximumf %5, %6 : vector<8x256xf32>
    %8 = arith.truncf %7 : vector<8x256xf32> to vector<8x256xbf16>
    %c0_6 = arith.constant 0 : index
    %c0_7 = arith.constant 0 : index
    %9 = vector.load %arg9[%c0_6, %c0_7] : memref<8x3584xbf16, #tpu.memory_space<vmem>>, vector<8x256xbf16>
    tpu.vector_store %arg9[%c0_6, %c0_7], %8 {strides = array<i32>} : memref<8x3584xbf16, #tpu.memory_space<vmem>>, vector<8x256xbf16>,
    %c0_8 = arith.constant 0 : index
    %c128 = arith.constant 128 : index
    %10 = vector.load %arg1[%c0_8, %c128] : memref<8x1920xbf16, #tpu.memory_space<vmem>>, vector<8x256xbf16>
    %c0_9 = arith.constant 0 : index
    %c0_10 = arith.constant 0 : index
    %11 = vector.load %arg2[%c0_9, %c0_10] : memref<256x256xbf16, #tpu.memory_space<vmem>>, vector<256x256xbf16>
    %cst_11 = arith.constant dense<0.000000e+00> : vector<8x256xf32>
    %12 = tpu.matmul %10, %11, %cst_11 {dimension_numbers = #tpu.dot_dimension_numbers<[1], [0], [0], [1], [0, 0, 1, 1], [], []>} : vector<8x256xbf16>, vector<256x256xbf16>, vector<8x256xf32> -> vector<8x256xf32>
    %c0_12 = arith.constant 0 : index
    %c0_13 = arith.constant 0 : index
    %13 = vector.load %arg3[%c0_12, %c0_13] : memref<1x256xf32, #tpu.memory_space<vmem>>, vector<1x256xf32>
    %14 = vector.broadcast %13 : vector<1x256xf32> to vector<8x256xf32>
    %15 = arith.addf %12, %14 : vector<8x256xf32>
    %cst_14 = arith.constant 0.000000e+00 : f32
    %16 = vector.broadcast %cst_14 : f32 to vector<8x256xf32>
    %17 = arith.maximumf %15, %16 : vector<8x256xf32>
    %18 = arith.truncf %17 : vector<8x256xf32> to vector<8x256xbf16>
    %c0_15 = arith.constant 0 : index
    %c256 = arith.constant 256 : index
    %19 = vector.load %arg9[%c0_15, %c256] : memref<8x3584xbf16, #tpu.memory_space<vmem>>, vector<8x256xbf16>
    tpu.vector_store %arg9[%c0_15, %c256], %18 {strides = array<i32>} : memref<8x3584xbf16, #tpu.memory_space<vmem>>, vector<8x256xbf16>,
    %c0_16 = arith.constant 0 : index
    %c256_17 = arith.constant 256 : index
    %20 = vector.load %arg1[%c0_16, %c256_17] : memref<8x1920xbf16, #tpu.memory_space<vmem>>, vector<8x256xbf16>
    %c0_18 = arith.constant 0 : index
    %c0_19 = arith.constant 0 : index
    %21 = vector.load %arg2[%c0_18, %c0_19] : memref<256x256xbf16, #tpu.memory_space<vmem>>, vector<256x256xbf16>
    %cst_20 = arith.constant dense<0.000000e+00> : vector<8x256xf32>
    %22 = tpu.matmul %20, %21, %cst_20 {dimension_numbers = #tpu.dot_dimension_numbers<[1], [0], [0], [1], [0, 0, 1, 1], [], []>} : vector<8x256xbf16>, vector<256x256xbf16>, vector<8x256xf32> -> vector<8x256xf32>
    %c0_21 = arith.constant 0 : index
    %c0_22 = arith.constant 0 : index
    %23 = vector.load %arg3[%c0_21, %c0_22] : memref<1x256xf32, #tpu.memory_space<vmem>>, vector<1x256xf32>
    %24 = vector.broadcast %23 : vector<1x256xf32> to vector<8x256xf32>
    %25 = arith.addf %22, %24 : vector<8x256xf32>
    %cst_23 = arith.constant 0.000000e+00 : f32
    %26 = vector.broadcast %cst_23 : f32 to vector<8x256xf32>
    %27 = arith.maximumf %25, %26 : vector<8x256xf32>
    %28 = arith.truncf %27 : vector<8x256xf32> to vector<8x256xbf16>
    %c0_24 = arith.constant 0 : index
    %c512 = arith.constant 512 : index
    %29 = vector.load %arg9[%c0_24, %c512] : memref<8x3584xbf16, #tpu.memory_space<vmem>>, vector<8x256xbf16>
    tpu.vector_store %arg9[%c0_24, %c512], %28 {strides = array<i32>} : memref<8x3584xbf16, #tpu.memory_space<vmem>>, vector<8x256xbf16>,
    %c0_25 = arith.constant 0 : index
    %c384 = arith.constant 384 : index
    %30 = vector.load %arg1[%c0_25, %c384] : memref<8x1920xbf16, #tpu.memory_space<vmem>>, vector<8x256xbf16>
    %c0_26 = arith.constant 0 : index
    %c0_27 = arith.constant 0 : index
    %31 = vector.load %arg2[%c0_26, %c0_27] : memref<256x256xbf16, #tpu.memory_space<vmem>>, vector<256x256xbf16>
    %cst_28 = arith.constant dense<0.000000e+00> : vector<8x256xf32>
    %32 = tpu.matmul %30, %31, %cst_28 {dimension_numbers = #tpu.dot_dimension_numbers<[1], [0], [0], [1], [0, 0, 1, 1], [], []>} : vector<8x256xbf16>, vector<256x256xbf16>, vector<8x256xf32> -> vector<8x256xf32>
    %c0_29 = arith.constant 0 : index
    %c0_30 = arith.constant 0 : index
    %33 = vector.load %arg3[%c0_29, %c0_30] : memref<1x256xf32, #tpu.memory_space<vmem>>, vector<1x256xf32>
    %34 = vector.broadcast %33 : vector<1x256xf32> to vector<8x256xf32>
    %35 = arith.addf %32, %34 : vector<8x256xf32>
    %cst_31 = arith.constant 0.000000e+00 : f32
    %36 = vector.broadcast %cst_31 : f32 to vector<8x256xf32>
    %37 = arith.maximumf %35, %36 : vector<8x256xf32>
    %38 = arith.truncf %37 : vector<8x256xf32> to vector<8x256xbf16>
    %c0_32 = arith.constant 0 : index
    %c768 = arith.constant 768 : index
    %39 = vector.load %arg9[%c0_32, %c768] : memref<8x3584xbf16, #tpu.memory_space<vmem>>, vector<8x256xbf16>
    tpu.vector_store %arg9[%c0_32, %c768], %38 {strides = array<i32>} : memref<8x3584xbf16, #tpu.memory_space<vmem>>, vector<8x256xbf16>,
    %c0_33 = arith.constant 0 : index
    %c512_34 = arith.constant 512 : index
    %40 = vector.load %arg1[%c0_33, %c512_34] : memref<8x1920xbf16, #tpu.memory_space<vmem>>, vector<8x256xbf16>
    %c0_35 = arith.constant 0 : index
    %c0_36 = arith.constant 0 : index
    %41 = vector.load %arg2[%c0_35, %c0_36] : memref<256x256xbf16, #tpu.memory_space<vmem>>, vector<256x256xbf16>
    %cst_37 = arith.constant dense<0.000000e+00> : vector<8x256xf32>
    %42 = tpu.matmul %40, %41, %cst_37 {dimension_numbers = #tpu.dot_dimension_numbers<[1], [0], [0], [1], [0, 0, 1, 1], [], []>} : vector<8x256xbf16>, vector<256x256xbf16>, vector<8x256xf32> -> vector<8x256xf32>
    %c0_38 = arith.constant 0 : index
    %c0_39 = arith.constant 0 : index
    %43 = vector.load %arg3[%c0_38, %c0_39] : memref<1x256xf32, #tpu.memory_space<vmem>>, vector<1x256xf32>
    %44 = vector.broadcast %43 : vector<1x256xf32> to vector<8x256xf32>
    %45 = arith.addf %42, %44 : vector<8x256xf32>
    %cst_40 = arith.constant 0.000000e+00 : f32
    %46 = vector.broadcast %cst_40 : f32 to vector<8x256xf32>
    %47 = arith.maximumf %45, %46 : vector<8x256xf32>
    %48 = arith.truncf %47 : vector<8x256xf32> to vector<8x256xbf16>
    %c0_41 = arith.constant 0 : index
    %c1024 = arith.constant 1024 : index
    %49 = vector.load %arg9[%c0_41, %c1024] : memref<8x3584xbf16, #tpu.memory_space<vmem>>, vector<8x256xbf16>
    tpu.vector_store %arg9[%c0_41, %c1024], %48 {strides = array<i32>} : memref<8x3584xbf16, #tpu.memory_space<vmem>>, vector<8x256xbf16>,
    %c0_42 = arith.constant 0 : index
    %c640 = arith.constant 640 : index
    %50 = vector.load %arg1[%c0_42, %c640] : memref<8x1920xbf16, #tpu.memory_space<vmem>>, vector<8x256xbf16>
    %c0_43 = arith.constant 0 : index
    %c0_44 = arith.constant 0 : index
    %51 = vector.load %arg2[%c0_43, %c0_44] : memref<256x256xbf16, #tpu.memory_space<vmem>>, vector<256x256xbf16>
    %cst_45 = arith.constant dense<0.000000e+00> : vector<8x256xf32>
    %52 = tpu.matmul %50, %51, %cst_45 {dimension_numbers = #tpu.dot_dimension_numbers<[1], [0], [0], [1], [0, 0, 1, 1], [], []>} : vector<8x256xbf16>, vector<256x256xbf16>, vector<8x256xf32> -> vector<8x256xf32>
    %c0_46 = arith.constant 0 : index
    %c0_47 = arith.constant 0 : index
    %53 = vector.load %arg3[%c0_46, %c0_47] : memref<1x256xf32, #tpu.memory_space<vmem>>, vector<1x256xf32>
    %54 = vector.broadcast %53 : vector<1x256xf32> to vector<8x256xf32>
    %55 = arith.addf %52, %54 : vector<8x256xf32>
    %cst_48 = arith.constant 0.000000e+00 : f32
    %56 = vector.broadcast %cst_48 : f32 to vector<8x256xf32>
    %57 = arith.maximumf %55, %56 : vector<8x256xf32>
    %58 = arith.truncf %57 : vector<8x256xf32> to vector<8x256xbf16>
    %c0_49 = arith.constant 0 : index
    %c1280 = arith.constant 1280 : index
    %59 = vector.load %arg9[%c0_49, %c1280] : memref<8x3584xbf16, #tpu.memory_space<vmem>>, vector<8x256xbf16>
    tpu.vector_store %arg9[%c0_49, %c1280], %58 {strides = array<i32>} : memref<8x3584xbf16, #tpu.memory_space<vmem>>, vector<8x256xbf16>,
    %c0_50 = arith.constant 0 : index
    %c768_51 = arith.constant 768 : index
    %60 = vector.load %arg1[%c0_50, %c768_51] : memref<8x1920xbf16, #tpu.memory_space<vmem>>, vector<8x256xbf16>
    %c0_52 = arith.constant 0 : index
    %c0_53 = arith.constant 0 : index
    %61 = vector.load %arg2[%c0_52, %c0_53] : memref<256x256xbf16, #tpu.memory_space<vmem>>, vector<256x256xbf16>
    %cst_54 = arith.constant dense<0.000000e+00> : vector<8x256xf32>
    %62 = tpu.matmul %60, %61, %cst_54 {dimension_numbers = #tpu.dot_dimension_numbers<[1], [0], [0], [1], [0, 0, 1, 1], [], []>} : vector<8x256xbf16>, vector<256x256xbf16>, vector<8x256xf32> -> vector<8x256xf32>
    %c0_55 = arith.constant 0 : index
    %c0_56 = arith.constant 0 : index
    %63 = vector.load %arg3[%c0_55, %c0_56] : memref<1x256xf32, #tpu.memory_space<vmem>>, vector<1x256xf32>
    %64 = vector.broadcast %63 : vector<1x256xf32> to vector<8x256xf32>
    %65 = arith.addf %62, %64 : vector<8x256xf32>
    %cst_57 = arith.constant 0.000000e+00 : f32
    %66 = vector.broadcast %cst_57 : f32 to vector<8x256xf32>
    %67 = arith.maximumf %65, %66 : vector<8x256xf32>
    %68 = arith.truncf %67 : vector<8x256xf32> to vector<8x256xbf16>
    %c0_58 = arith.constant 0 : index
    %c1536 = arith.constant 1536 : index
    %69 = vector.load %arg9[%c0_58, %c1536] : memref<8x3584xbf16, #tpu.memory_space<vmem>>, vector<8x256xbf16>
    tpu.vector_store %arg9[%c0_58, %c1536], %68 {strides = array<i32>} : memref<8x3584xbf16, #tpu.memory_space<vmem>>, vector<8x256xbf16>,
    %c0_59 = arith.constant 0 : index
    %c896 = arith.constant 896 : index
    %70 = vector.load %arg1[%c0_59, %c896] : memref<8x1920xbf16, #tpu.memory_space<vmem>>, vector<8x256xbf16>
    %c0_60 = arith.constant 0 : index
    %c0_61 = arith.constant 0 : index
    %71 = vector.load %arg2[%c0_60, %c0_61] : memref<256x256xbf16, #tpu.memory_space<vmem>>, vector<256x256xbf16>
    %cst_62 = arith.constant dense<0.000000e+00> : vector<8x256xf32>
    %72 = tpu.matmul %70, %71, %cst_62 {dimension_numbers = #tpu.dot_dimension_numbers<[1], [0], [0], [1], [0, 0, 1, 1], [], []>} : vector<8x256xbf16>, vector<256x256xbf16>, vector<8x256xf32> -> vector<8x256xf32>
    %c0_63 = arith.constant 0 : index
    %c0_64 = arith.constant 0 : index
    %73 = vector.load %arg3[%c0_63, %c0_64] : memref<1x256xf32, #tpu.memory_space<vmem>>, vector<1x256xf32>
    %74 = vector.broadcast %73 : vector<1x256xf32> to vector<8x256xf32>
    %75 = arith.addf %72, %74 : vector<8x256xf32>
    %cst_65 = arith.constant 0.000000e+00 : f32
    %76 = vector.broadcast %cst_65 : f32 to vector<8x256xf32>
    %77 = arith.maximumf %75, %76 : vector<8x256xf32>
    %78 = arith.truncf %77 : vector<8x256xf32> to vector<8x256xbf16>
    %c0_66 = arith.constant 0 : index
    %c1792 = arith.constant 1792 : index
    %79 = vector.load %arg9[%c0_66, %c1792] : memref<8x3584xbf16, #tpu.memory_space<vmem>>, vector<8x256xbf16>
    tpu.vector_store %arg9[%c0_66, %c1792], %78 {strides = array<i32>} : memref<8x3584xbf16, #tpu.memory_space<vmem>>, vector<8x256xbf16>,
    %c0_67 = arith.constant 0 : index
    %c1024_68 = arith.constant 1024 : index
    %80 = vector.load %arg1[%c0_67, %c1024_68] : memref<8x1920xbf16, #tpu.memory_space<vmem>>, vector<8x256xbf16>
    %c0_69 = arith.constant 0 : index
    %c0_70 = arith.constant 0 : index
    %81 = vector.load %arg2[%c0_69, %c0_70] : memref<256x256xbf16, #tpu.memory_space<vmem>>, vector<256x256xbf16>
    %cst_71 = arith.constant dense<0.000000e+00> : vector<8x256xf32>
    %82 = tpu.matmul %80, %81, %cst_71 {dimension_numbers = #tpu.dot_dimension_numbers<[1], [0], [0], [1], [0, 0, 1, 1], [], []>} : vector<8x256xbf16>, vector<256x256xbf16>, vector<8x256xf32> -> vector<8x256xf32>
    %c0_72 = arith.constant 0 : index
    %c0_73 = arith.constant 0 : index
    %83 = vector.load %arg3[%c0_72, %c0_73] : memref<1x256xf32, #tpu.memory_space<vmem>>, vector<1x256xf32>
    %84 = vector.broadcast %83 : vector<1x256xf32> to vector<8x256xf32>
    %85 = arith.addf %82, %84 : vector<8x256xf32>
    %cst_74 = arith.constant 0.000000e+00 : f32
    %86 = vector.broadcast %cst_74 : f32 to vector<8x256xf32>
    %87 = arith.maximumf %85, %86 : vector<8x256xf32>
    %88 = arith.truncf %87 : vector<8x256xf32> to vector<8x256xbf16>
    %c0_75 = arith.constant 0 : index
    %c2048 = arith.constant 2048 : index
    %89 = vector.load %arg9[%c0_75, %c2048] : memref<8x3584xbf16, #tpu.memory_space<vmem>>, vector<8x256xbf16>
    tpu.vector_store %arg9[%c0_75, %c2048], %88 {strides = array<i32>} : memref<8x3584xbf16, #tpu.memory_space<vmem>>, vector<8x256xbf16>,
    %c0_76 = arith.constant 0 : index
    %c1152 = arith.constant 1152 : index
    %90 = vector.load %arg1[%c0_76, %c1152] : memref<8x1920xbf16, #tpu.memory_space<vmem>>, vector<8x256xbf16>
    %c0_77 = arith.constant 0 : index
    %c0_78 = arith.constant 0 : index
    %91 = vector.load %arg2[%c0_77, %c0_78] : memref<256x256xbf16, #tpu.memory_space<vmem>>, vector<256x256xbf16>
    %cst_79 = arith.constant dense<0.000000e+00> : vector<8x256xf32>
    %92 = tpu.matmul %90, %91, %cst_79 {dimension_numbers = #tpu.dot_dimension_numbers<[1], [0], [0], [1], [0, 0, 1, 1], [], []>} : vector<8x256xbf16>, vector<256x256xbf16>, vector<8x256xf32> -> vector<8x256xf32>
    %c0_80 = arith.constant 0 : index
    %c0_81 = arith.constant 0 : index
    %93 = vector.load %arg3[%c0_80, %c0_81] : memref<1x256xf32, #tpu.memory_space<vmem>>, vector<1x256xf32>
    %94 = vector.broadcast %93 : vector<1x256xf32> to vector<8x256xf32>
    %95 = arith.addf %92, %94 : vector<8x256xf32>
    %cst_82 = arith.constant 0.000000e+00 : f32
    %96 = vector.broadcast %cst_82 : f32 to vector<8x256xf32>
    %97 = arith.maximumf %95, %96 : vector<8x256xf32>
    %98 = arith.truncf %97 : vector<8x256xf32> to vector<8x256xbf16>
    %c0_83 = arith.constant 0 : index
    %c2304 = arith.constant 2304 : index
    %99 = vector.load %arg9[%c0_83, %c2304] : memref<8x3584xbf16, #tpu.memory_space<vmem>>, vector<8x256xbf16>
    tpu.vector_store %arg9[%c0_83, %c2304], %98 {strides = array<i32>} : memref<8x3584xbf16, #tpu.memory_space<vmem>>, vector<8x256xbf16>,
    %c0_84 = arith.constant 0 : index
    %c1280_85 = arith.constant 1280 : index
    %100 = vector.load %arg1[%c0_84, %c1280_85] : memref<8x1920xbf16, #tpu.memory_space<vmem>>, vector<8x256xbf16>
    %c0_86 = arith.constant 0 : index
    %c0_87 = arith.constant 0 : index
    %101 = vector.load %arg2[%c0_86, %c0_87] : memref<256x256xbf16, #tpu.memory_space<vmem>>, vector<256x256xbf16>
    %cst_88 = arith.constant dense<0.000000e+00> : vector<8x256xf32>
    %102 = tpu.matmul %100, %101, %cst_88 {dimension_numbers = #tpu.dot_dimension_numbers<[1], [0], [0], [1], [0, 0, 1, 1], [], []>} : vector<8x256xbf16>, vector<256x256xbf16>, vector<8x256xf32> -> vector<8x256xf32>
    %c0_89 = arith.constant 0 : index
    %c0_90 = arith.constant 0 : index
    %103 = vector.load %arg3[%c0_89, %c0_90] : memref<1x256xf32, #tpu.memory_space<vmem>>, vector<1x256xf32>
    %104 = vector.broadcast %103 : vector<1x256xf32> to vector<8x256xf32>
    %105 = arith.addf %102, %104 : vector<8x256xf32>
    %cst_91 = arith.constant 0.000000e+00 : f32
    %106 = vector.broadcast %cst_91 : f32 to vector<8x256xf32>
    %107 = arith.maximumf %105, %106 : vector<8x256xf32>
    %108 = arith.truncf %107 : vector<8x256xf32> to vector<8x256xbf16>
    %c0_92 = arith.constant 0 : index
    %c2560 = arith.constant 2560 : index
    %109 = vector.load %arg9[%c0_92, %c2560] : memref<8x3584xbf16, #tpu.memory_space<vmem>>, vector<8x256xbf16>
    tpu.vector_store %arg9[%c0_92, %c2560], %108 {strides = array<i32>} : memref<8x3584xbf16, #tpu.memory_space<vmem>>, vector<8x256xbf16>,
    %c0_93 = arith.constant 0 : index
    %c1408 = arith.constant 1408 : index
    %110 = vector.load %arg1[%c0_93, %c1408] : memref<8x1920xbf16, #tpu.memory_space<vmem>>, vector<8x256xbf16>
    %c0_94 = arith.constant 0 : index
    %c0_95 = arith.constant 0 : index
    %111 = vector.load %arg2[%c0_94, %c0_95] : memref<256x256xbf16, #tpu.memory_space<vmem>>, vector<256x256xbf16>
    %cst_96 = arith.constant dense<0.000000e+00> : vector<8x256xf32>
    %112 = tpu.matmul %110, %111, %cst_96 {dimension_numbers = #tpu.dot_dimension_numbers<[1], [0], [0], [1], [0, 0, 1, 1], [], []>} : vector<8x256xbf16>, vector<256x256xbf16>, vector<8x256xf32> -> vector<8x256xf32>
    %c0_97 = arith.constant 0 : index
    %c0_98 = arith.constant 0 : index
    %113 = vector.load %arg3[%c0_97, %c0_98] : memref<1x256xf32, #tpu.memory_space<vmem>>, vector<1x256xf32>
    %114 = vector.broadcast %113 : vector<1x256xf32> to vector<8x256xf32>
    %115 = arith.addf %112, %114 : vector<8x256xf32>
    %cst_99 = arith.constant 0.000000e+00 : f32
    %116 = vector.broadcast %cst_99 : f32 to vector<8x256xf32>
    %117 = arith.maximumf %115, %116 : vector<8x256xf32>
    %118 = arith.truncf %117 : vector<8x256xf32> to vector<8x256xbf16>
    %c0_100 = arith.constant 0 : index
    %c2816 = arith.constant 2816 : index
    %119 = vector.load %arg9[%c0_100, %c2816] : memref<8x3584xbf16, #tpu.memory_space<vmem>>, vector<8x256xbf16>
    tpu.vector_store %arg9[%c0_100, %c2816], %118 {strides = array<i32>} : memref<8x3584xbf16, #tpu.memory_space<vmem>>, vector<8x256xbf16>,
    %c0_101 = arith.constant 0 : index
    %c1536_102 = arith.constant 1536 : index
    %120 = vector.load %arg1[%c0_101, %c1536_102] : memref<8x1920xbf16, #tpu.memory_space<vmem>>, vector<8x256xbf16>
    %c0_103 = arith.constant 0 : index
    %c0_104 = arith.constant 0 : index
    %121 = vector.load %arg2[%c0_103, %c0_104] : memref<256x256xbf16, #tpu.memory_space<vmem>>, vector<256x256xbf16>
    %cst_105 = arith.constant dense<0.000000e+00> : vector<8x256xf32>
    %122 = tpu.matmul %120, %121, %cst_105 {dimension_numbers = #tpu.dot_dimension_numbers<[1], [0], [0], [1], [0, 0, 1, 1], [], []>} : vector<8x256xbf16>, vector<256x256xbf16>, vector<8x256xf32> -> vector<8x256xf32>
    %c0_106 = arith.constant 0 : index
    %c0_107 = arith.constant 0 : index
    %123 = vector.load %arg3[%c0_106, %c0_107] : memref<1x256xf32, #tpu.memory_space<vmem>>, vector<1x256xf32>
    %124 = vector.broadcast %123 : vector<1x256xf32> to vector<8x256xf32>
    %125 = arith.addf %122, %124 : vector<8x256xf32>
    %cst_108 = arith.constant 0.000000e+00 : f32
    %126 = vector.broadcast %cst_108 : f32 to vector<8x256xf32>
    %127 = arith.maximumf %125, %126 : vector<8x256xf32>
    %128 = arith.truncf %127 : vector<8x256xf32> to vector<8x256xbf16>
    %c0_109 = arith.constant 0 : index
    %c3072 = arith.constant 3072 : index
    %129 = vector.load %arg9[%c0_109, %c3072] : memref<8x3584xbf16, #tpu.memory_space<vmem>>, vector<8x256xbf16>
    tpu.vector_store %arg9[%c0_109, %c3072], %128 {strides = array<i32>} : memref<8x3584xbf16, #tpu.memory_space<vmem>>, vector<8x256xbf16>,
    %c0_110 = arith.constant 0 : index
    %c1664 = arith.constant 1664 : index
    %130 = vector.load %arg1[%c0_110, %c1664] : memref<8x1920xbf16, #tpu.memory_space<vmem>>, vector<8x256xbf16>
    %c0_111 = arith.constant 0 : index
    %c0_112 = arith.constant 0 : index
    %131 = vector.load %arg2[%c0_111, %c0_112] : memref<256x256xbf16, #tpu.memory_space<vmem>>, vector<256x256xbf16>
    %cst_113 = arith.constant dense<0.000000e+00> : vector<8x256xf32>
    %132 = tpu.matmul %130, %131, %cst_113 {dimension_numbers = #tpu.dot_dimension_numbers<[1], [0], [0], [1], [0, 0, 1, 1], [], []>} : vector<8x256xbf16>, vector<256x256xbf16>, vector<8x256xf32> -> vector<8x256xf32>
    %c0_114 = arith.constant 0 : index
    %c0_115 = arith.constant 0 : index
    %133 = vector.load %arg3[%c0_114, %c0_115] : memref<1x256xf32, #tpu.memory_space<vmem>>, vector<1x256xf32>
    %134 = vector.broadcast %133 : vector<1x256xf32> to vector<8x256xf32>
    %135 = arith.addf %132, %134 : vector<8x256xf32>
    %cst_116 = arith.constant 0.000000e+00 : f32
    %136 = vector.broadcast %cst_116 : f32 to vector<8x256xf32>
    %137 = arith.maximumf %135, %136 : vector<8x256xf32>
    %138 = arith.truncf %137 : vector<8x256xf32> to vector<8x256xbf16>
    %c0_117 = arith.constant 0 : index
    %c3328 = arith.constant 3328 : index
    %139 = vector.load %arg9[%c0_117, %c3328] : memref<8x3584xbf16, #tpu.memory_space<vmem>>, vector<8x256xbf16>
    tpu.vector_store %arg9[%c0_117, %c3328], %138 {strides = array<i32>} : memref<8x3584xbf16, #tpu.memory_space<vmem>>, vector<8x256xbf16>,
    %c0_118 = arith.constant 0 : index
    %c0_119 = arith.constant 0 : index
    %140 = vector.load %arg9[%c0_118, %c0_119] : memref<8x3584xbf16, #tpu.memory_space<vmem>>, vector<8x512xbf16>
    %c256_120 = arith.constant 256 : index
    %c0_121 = arith.constant 0 : index
    %141 = vector.load %arg4[%c256_120, %c0_121] : memref<768x256xbf16, #tpu.memory_space<vmem>>, vector<512x256xbf16>
    %cst_122 = arith.constant dense<0.000000e+00> : vector<8x256xf32>
    %142 = tpu.matmul %140, %141, %cst_122 {dimension_numbers = #tpu.dot_dimension_numbers<[1], [0], [0], [1], [0, 0, 1, 1], [], []>} : vector<8x512xbf16>, vector<512x256xbf16>, vector<8x256xf32> -> vector<8x256xf32>
    %c0_123 = arith.constant 0 : index
    %c0_124 = arith.constant 0 : index
    %143 = vector.load %arg5[%c0_123, %c0_124] : memref<1x256xf32, #tpu.memory_space<vmem>>, vector<1x256xf32>
    %144 = vector.broadcast %143 : vector<1x256xf32> to vector<8x256xf32>
    %145 = arith.addf %142, %144 : vector<8x256xf32>
    %cst_125 = arith.constant 0.000000e+00 : f32
    %146 = vector.broadcast %cst_125 : f32 to vector<8x256xf32>
    %147 = arith.maximumf %145, %146 : vector<8x256xf32>
    %148 = arith.truncf %147 : vector<8x256xf32> to vector<8x256xbf16>
    %c0_126 = arith.constant 0 : index
    %c0_127 = arith.constant 0 : index
    %149 = vector.load %arg10[%c0_126, %c0_127] : memref<8x1792xbf16, #tpu.memory_space<vmem>>, vector<8x256xbf16>
    tpu.vector_store %arg10[%c0_126, %c0_127], %148 {strides = array<i32>} : memref<8x1792xbf16, #tpu.memory_space<vmem>>, vector<8x256xbf16>,
    %c0_128 = arith.constant 0 : index
    %c256_129 = arith.constant 256 : index
    %150 = vector.load %arg9[%c0_128, %c256_129] : memref<8x3584xbf16, #tpu.memory_space<vmem>>, vector<8x768xbf16>
    %c0_130 = arith.constant 0 : index
    %c0_131 = arith.constant 0 : index
    %151 = vector.load %arg4[%c0_130, %c0_131] : memref<768x256xbf16, #tpu.memory_space<vmem>>, vector<768x256xbf16>
    %cst_132 = arith.constant dense<0.000000e+00> : vector<8x256xf32>
    %152 = tpu.matmul %150, %151, %cst_132 {dimension_numbers = #tpu.dot_dimension_numbers<[1], [0], [0], [1], [0, 0, 1, 1], [], []>} : vector<8x768xbf16>, vector<768x256xbf16>, vector<8x256xf32> -> vector<8x256xf32>
    %c0_133 = arith.constant 0 : index
    %c0_134 = arith.constant 0 : index
    %153 = vector.load %arg5[%c0_133, %c0_134] : memref<1x256xf32, #tpu.memory_space<vmem>>, vector<1x256xf32>
    %154 = vector.broadcast %153 : vector<1x256xf32> to vector<8x256xf32>
    %155 = arith.addf %152, %154 : vector<8x256xf32>
    %cst_135 = arith.constant 0.000000e+00 : f32
    %156 = vector.broadcast %cst_135 : f32 to vector<8x256xf32>
    %157 = arith.maximumf %155, %156 : vector<8x256xf32>
    %158 = arith.truncf %157 : vector<8x256xf32> to vector<8x256xbf16>
    %c0_136 = arith.constant 0 : index
    %c256_137 = arith.constant 256 : index
    %159 = vector.load %arg10[%c0_136, %c256_137] : memref<8x1792xbf16, #tpu.memory_space<vmem>>, vector<8x256xbf16>
    tpu.vector_store %arg10[%c0_136, %c256_137], %158 {strides = array<i32>} : memref<8x1792xbf16, #tpu.memory_space<vmem>>, vector<8x256xbf16>,
    %c0_138 = arith.constant 0 : index
    %c768_139 = arith.constant 768 : index
    %160 = vector.load %arg9[%c0_138, %c768_139] : memref<8x3584xbf16, #tpu.memory_space<vmem>>, vector<8x768xbf16>
    %c0_140 = arith.constant 0 : index
    %c0_141 = arith.constant 0 : index
    %161 = vector.load %arg4[%c0_140, %c0_141] : memref<768x256xbf16, #tpu.memory_space<vmem>>, vector<768x256xbf16>
    %cst_142 = arith.constant dense<0.000000e+00> : vector<8x256xf32>
    %162 = tpu.matmul %160, %161, %cst_142 {dimension_numbers = #tpu.dot_dimension_numbers<[1], [0], [0], [1], [0, 0, 1, 1], [], []>} : vector<8x768xbf16>, vector<768x256xbf16>, vector<8x256xf32> -> vector<8x256xf32>
    %c0_143 = arith.constant 0 : index
    %c0_144 = arith.constant 0 : index
    %163 = vector.load %arg5[%c0_143, %c0_144] : memref<1x256xf32, #tpu.memory_space<vmem>>, vector<1x256xf32>
    %164 = vector.broadcast %163 : vector<1x256xf32> to vector<8x256xf32>
    %165 = arith.addf %162, %164 : vector<8x256xf32>
    %cst_145 = arith.constant 0.000000e+00 : f32
    %166 = vector.broadcast %cst_145 : f32 to vector<8x256xf32>
    %167 = arith.maximumf %165, %166 : vector<8x256xf32>
    %168 = arith.truncf %167 : vector<8x256xf32> to vector<8x256xbf16>
    %c0_146 = arith.constant 0 : index
    %c512_147 = arith.constant 512 : index
    %169 = vector.load %arg10[%c0_146, %c512_147] : memref<8x1792xbf16, #tpu.memory_space<vmem>>, vector<8x256xbf16>
    tpu.vector_store %arg10[%c0_146, %c512_147], %168 {strides = array<i32>} : memref<8x1792xbf16, #tpu.memory_space<vmem>>, vector<8x256xbf16>,
    %c0_148 = arith.constant 0 : index
    %c1280_149 = arith.constant 1280 : index
    %170 = vector.load %arg9[%c0_148, %c1280_149] : memref<8x3584xbf16, #tpu.memory_space<vmem>>, vector<8x768xbf16>
    %c0_150 = arith.constant 0 : index
    %c0_151 = arith.constant 0 : index
    %171 = vector.load %arg4[%c0_150, %c0_151] : memref<768x256xbf16, #tpu.memory_space<vmem>>, vector<768x256xbf16>
    %cst_152 = arith.constant dense<0.000000e+00> : vector<8x256xf32>
    %172 = tpu.matmul %170, %171, %cst_152 {dimension_numbers = #tpu.dot_dimension_numbers<[1], [0], [0], [1], [0, 0, 1, 1], [], []>} : vector<8x768xbf16>, vector<768x256xbf16>, vector<8x256xf32> -> vector<8x256xf32>
    %c0_153 = arith.constant 0 : index
    %c0_154 = arith.constant 0 : index
    %173 = vector.load %arg5[%c0_153, %c0_154] : memref<1x256xf32, #tpu.memory_space<vmem>>, vector<1x256xf32>
    %174 = vector.broadcast %173 : vector<1x256xf32> to vector<8x256xf32>
    %175 = arith.addf %172, %174 : vector<8x256xf32>
    %cst_155 = arith.constant 0.000000e+00 : f32
    %176 = vector.broadcast %cst_155 : f32 to vector<8x256xf32>
    %177 = arith.maximumf %175, %176 : vector<8x256xf32>
    %178 = arith.truncf %177 : vector<8x256xf32> to vector<8x256xbf16>
    %c0_156 = arith.constant 0 : index
    %c768_157 = arith.constant 768 : index
    %179 = vector.load %arg10[%c0_156, %c768_157] : memref<8x1792xbf16, #tpu.memory_space<vmem>>, vector<8x256xbf16>
    tpu.vector_store %arg10[%c0_156, %c768_157], %178 {strides = array<i32>} : memref<8x1792xbf16, #tpu.memory_space<vmem>>, vector<8x256xbf16>,
    %c0_158 = arith.constant 0 : index
    %c1792_159 = arith.constant 1792 : index
    %180 = vector.load %arg9[%c0_158, %c1792_159] : memref<8x3584xbf16, #tpu.memory_space<vmem>>, vector<8x768xbf16>
    %c0_160 = arith.constant 0 : index
    %c0_161 = arith.constant 0 : index
    %181 = vector.load %arg4[%c0_160, %c0_161] : memref<768x256xbf16, #tpu.memory_space<vmem>>, vector<768x256xbf16>
    %cst_162 = arith.constant dense<0.000000e+00> : vector<8x256xf32>
    %182 = tpu.matmul %180, %181, %cst_162 {dimension_numbers = #tpu.dot_dimension_numbers<[1], [0], [0], [1], [0, 0, 1, 1], [], []>} : vector<8x768xbf16>, vector<768x256xbf16>, vector<8x256xf32> -> vector<8x256xf32>
    %c0_163 = arith.constant 0 : index
    %c0_164 = arith.constant 0 : index
    %183 = vector.load %arg5[%c0_163, %c0_164] : memref<1x256xf32, #tpu.memory_space<vmem>>, vector<1x256xf32>
    %184 = vector.broadcast %183 : vector<1x256xf32> to vector<8x256xf32>
    %185 = arith.addf %182, %184 : vector<8x256xf32>
    %cst_165 = arith.constant 0.000000e+00 : f32
    %186 = vector.broadcast %cst_165 : f32 to vector<8x256xf32>
    %187 = arith.maximumf %185, %186 : vector<8x256xf32>
    %188 = arith.truncf %187 : vector<8x256xf32> to vector<8x256xbf16>
    %c0_166 = arith.constant 0 : index
    %c1024_167 = arith.constant 1024 : index
    %189 = vector.load %arg10[%c0_166, %c1024_167] : memref<8x1792xbf16, #tpu.memory_space<vmem>>, vector<8x256xbf16>
    tpu.vector_store %arg10[%c0_166, %c1024_167], %188 {strides = array<i32>} : memref<8x1792xbf16, #tpu.memory_space<vmem>>, vector<8x256xbf16>,
    %c0_168 = arith.constant 0 : index
    %c2304_169 = arith.constant 2304 : index
    %190 = vector.load %arg9[%c0_168, %c2304_169] : memref<8x3584xbf16, #tpu.memory_space<vmem>>, vector<8x768xbf16>
    %c0_170 = arith.constant 0 : index
    %c0_171 = arith.constant 0 : index
    %191 = vector.load %arg4[%c0_170, %c0_171] : memref<768x256xbf16, #tpu.memory_space<vmem>>, vector<768x256xbf16>
    %cst_172 = arith.constant dense<0.000000e+00> : vector<8x256xf32>
    %192 = tpu.matmul %190, %191, %cst_172 {dimension_numbers = #tpu.dot_dimension_numbers<[1], [0], [0], [1], [0, 0, 1, 1], [], []>} : vector<8x768xbf16>, vector<768x256xbf16>, vector<8x256xf32> -> vector<8x256xf32>
    %c0_173 = arith.constant 0 : index
    %c0_174 = arith.constant 0 : index
    %193 = vector.load %arg5[%c0_173, %c0_174] : memref<1x256xf32, #tpu.memory_space<vmem>>, vector<1x256xf32>
    %194 = vector.broadcast %193 : vector<1x256xf32> to vector<8x256xf32>
    %195 = arith.addf %192, %194 : vector<8x256xf32>
    %cst_175 = arith.constant 0.000000e+00 : f32
    %196 = vector.broadcast %cst_175 : f32 to vector<8x256xf32>
    %197 = arith.maximumf %195, %196 : vector<8x256xf32>
    %198 = arith.truncf %197 : vector<8x256xf32> to vector<8x256xbf16>
    %c0_176 = arith.constant 0 : index
    %c1280_177 = arith.constant 1280 : index
    %199 = vector.load %arg10[%c0_176, %c1280_177] : memref<8x1792xbf16, #tpu.memory_space<vmem>>, vector<8x256xbf16>
    tpu.vector_store %arg10[%c0_176, %c1280_177], %198 {strides = array<i32>} : memref<8x1792xbf16, #tpu.memory_space<vmem>>, vector<8x256xbf16>,
    %c0_178 = arith.constant 0 : index
    %c2816_179 = arith.constant 2816 : index
    %200 = vector.load %arg9[%c0_178, %c2816_179] : memref<8x3584xbf16, #tpu.memory_space<vmem>>, vector<8x768xbf16>
    %c0_180 = arith.constant 0 : index
    %c0_181 = arith.constant 0 : index
    %201 = vector.load %arg4[%c0_180, %c0_181] : memref<768x256xbf16, #tpu.memory_space<vmem>>, vector<768x256xbf16>
    %cst_182 = arith.constant dense<0.000000e+00> : vector<8x256xf32>
    %202 = tpu.matmul %200, %201, %cst_182 {dimension_numbers = #tpu.dot_dimension_numbers<[1], [0], [0], [1], [0, 0, 1, 1], [], []>} : vector<8x768xbf16>, vector<768x256xbf16>, vector<8x256xf32> -> vector<8x256xf32>
    %c0_183 = arith.constant 0 : index
    %c0_184 = arith.constant 0 : index
    %203 = vector.load %arg5[%c0_183, %c0_184] : memref<1x256xf32, #tpu.memory_space<vmem>>, vector<1x256xf32>
    %204 = vector.broadcast %203 : vector<1x256xf32> to vector<8x256xf32>
    %205 = arith.addf %202, %204 : vector<8x256xf32>
    %cst_185 = arith.constant 0.000000e+00 : f32
    %206 = vector.broadcast %cst_185 : f32 to vector<8x256xf32>
    %207 = arith.maximumf %205, %206 : vector<8x256xf32>
    %208 = arith.truncf %207 : vector<8x256xf32> to vector<8x256xbf16>
    %c0_186 = arith.constant 0 : index
    %c1536_187 = arith.constant 1536 : index
    %209 = vector.load %arg10[%c0_186, %c1536_187] : memref<8x1792xbf16, #tpu.memory_space<vmem>>, vector<8x256xbf16>
    tpu.vector_store %arg10[%c0_186, %c1536_187], %208 {strides = array<i32>} : memref<8x1792xbf16, #tpu.memory_space<vmem>>, vector<8x256xbf16>,
    %c0_188 = arith.constant 0 : index
    %c0_189 = arith.constant 0 : index
    %210 = vector.load %arg10[%c0_188, %c0_189] : memref<8x1792xbf16, #tpu.memory_space<vmem>>, vector<8x1792xbf16>
    %c0_190 = arith.constant 0 : index
    %c0_191 = arith.constant 0 : index
    %211 = vector.load %arg6[%c0_190, %c0_191] : memref<1792x128xbf16, #tpu.memory_space<vmem>>, vector<1792x128xbf16>
    %cst_192 = arith.constant dense<0.000000e+00> : vector<8x128xf32>
    %212 = tpu.matmul %210, %211, %cst_192 {dimension_numbers = #tpu.dot_dimension_numbers<[1], [0], [0], [1], [0, 0, 1, 1], [], []>} : vector<8x1792xbf16>, vector<1792x128xbf16>, vector<8x128xf32> -> vector<8x128xf32>
    %c0_193 = arith.constant 0 : index
    %c0_194 = arith.constant 0 : index
    %213 = vector.load %arg7[%c0_193, %c0_194] : memref<1x128xf32, #tpu.memory_space<vmem>>, vector<1x128xf32>
    %214 = vector.broadcast %213 : vector<1x128xf32> to vector<8x128xf32>
    %215 = arith.addf %212, %214 : vector<8x128xf32>
    %cst_195 = arith.constant 0.000000e+00 : f32
    %216 = vector.broadcast %cst_195 : f32 to vector<8x128xf32>
    %217 = arith.maximumf %215, %216 : vector<8x128xf32>
    %c0_196 = arith.constant 0 : index
    %c0_197 = arith.constant 0 : index
    %218 = vector.load %arg8[%c0_196, %c0_197] : memref<8x128xf32, #tpu.memory_space<vmem>>, vector<8x128xf32>
    tpu.vector_store %arg8[%c0_196, %c0_197], %217 {strides = array<i32>} : memref<8x128xf32, #tpu.memory_space<vmem>>, vector<8x128xf32>,
    return
  }
  func.func @transform_0(%arg0: i32) -> (i32, i32) {
    %c0_i32 = arith.constant 0 : i32
    %c0_i32_0 = arith.constant 0 : i32
    return %arg0, %c0_i32 : i32, i32
  }
  func.func @transform_1(%arg0: i32) -> (i32, i32) {
    %c0_i32 = arith.constant 0 : i32
    %c0_i32_0 = arith.constant 0 : i32
    %c0_i32_1 = arith.constant 0 : i32
    return %c0_i32, %c0_i32_0 : i32, i32
  }
  func.func @transform_2(%arg0: i32) -> (i32, i32) {
    %c0_i32 = arith.constant 0 : i32
    %c0_i32_0 = arith.constant 0 : i32
    %c0_i32_1 = arith.constant 0 : i32
    return %c0_i32, %c0_i32_0 : i32, i32
  }
  func.func @transform_3(%arg0: i32) -> (i32, i32) {
    %c0_i32 = arith.constant 0 : i32
    %c0_i32_0 = arith.constant 0 : i32
    %c0_i32_1 = arith.constant 0 : i32
    return %c0_i32, %c0_i32_0 : i32, i32
  }
  func.func @transform_4(%arg0: i32) -> (i32, i32) {
    %c0_i32 = arith.constant 0 : i32
    %c0_i32_0 = arith.constant 0 : i32
    %c0_i32_1 = arith.constant 0 : i32
    return %c0_i32, %c0_i32_0 : i32, i32
  }
  func.func @transform_5(%arg0: i32) -> (i32, i32) {
    %c0_i32 = arith.constant 0 : i32
    %c0_i32_0 = arith.constant 0 : i32
    %c0_i32_1 = arith.constant 0 : i32
    return %c0_i32, %c0_i32_0 : i32, i32
  }
  func.func @transform_6(%arg0: i32) -> (i32, i32) {
    %c0_i32 = arith.constant 0 : i32
    %c0_i32_0 = arith.constant 0 : i32
    %c0_i32_1 = arith.constant 0 : i32
    return %c0_i32, %c0_i32_0 : i32, i32
  }
  func.func @transform_7(%arg0: i32) -> (i32, i32) {
    %c0_i32 = arith.constant 0 : i32
    %c0_i32_0 = arith.constant 0 : i32
    return %arg0, %c0_i32 : i32, i32
  }
}

</mosaic_0001>

<bundles_post_ra>
// kernel: deep_svdd_forward.1
= control target key start
LH: loop header
LB: loop body
LE: loop exit
PB: predicated region body
PF: predicated region fallthrough
CT: control target
= control target key end

     0   :  { %12 = vsyncpa [#allocation5], 0  ;;  %s19207_s0 = inlined_call_operand.vmem [shape: bf16[8,1920], index: 0, kind: input, shape index: {}]   ;;  %s19208_s1 = inlined_call_operand.vmem [shape: bf16[256,256], index: 1, kind: input, shape index: {}]   ;;  %s19209_s2 = inlined_call_operand.vmem [shape: f32[1,256], index: 2, kind: input, shape index: {}]   ;;  %s19210_s3 = inlined_call_operand.hbm [shape: bf16[768,256], index: 3, kind: input, shape index: {}]   ;;  %s19211_s4 = inlined_call_operand.vmem [shape: f32[1,256], index: 4, kind: input, shape index: {}]   ;;  %s19212_s5 = inlined_call_operand.hbm [shape: bf16[1792,128], index: 5, kind: input, shape index: {}]   ;;  %s19213_s6 = inlined_call_operand.vmem [shape: f32[1,128], index: 6, kind: input, shape index: {}]   ;;  %s19214_s7 = inlined_call_operand.vmem [shape: f32[8,128], index: 7, kind: output, shape index: {}]  }
   0x1   :  { %s24_s26 = sshll.u32 %s19210_s3, 4  ;;  %s25_s26 = int_to_ptr.hbm [resolvable:$true] %s24_s26 }
   0x2   :  { %13 = vsyncpa [#allocation7], 0  ;;  %s16041_s27 = smov [#allocation4]   ;;  %s39_s8 = sshll.u32 %s19212_s5, 4  ;;  %s40_s8 = int_to_ptr.hbm [resolvable:$true] %s39_s8 }
   0x3   :  { %s26_s28 = sshll.u32 %s16041_s27, 4  ;;  %s16042_s9 = smov 128   ;;  %s27_s28 = int_to_ptr.vmem [resolvable:$true] %s26_s28 }
   0x4   :  { %s16043_s10 = smov 8   ;;  %s16044_s11 = smov [#allocation6]  }
   0x5   :  { %32 = dma.hbm_to_vmem [thread:$0]  %s25_s26, 12288, %s27_s28, [#allocation5], %s16042_s9, %s16042_s9, %s16043_s10  }
   0x6   :  { %s41_s12 = sshll.u32 %s16044_s11, 4  ;;  %s16045_s13 = smov 64   ;;  %s42_s12 = int_to_ptr.vmem [resolvable:$true] %s41_s12 }
   0x7   :  { %s16046_s14 = smov 4  }
   0x8   :  { %47 = dma.hbm_to_vmem [thread:$0]  %s40_s8, 14336, %s42_s12, [#allocation7], %s16045_s13, %s16045_s13, %s16046_s14  }
   0x9   :  { %16037 = dma.done.wait [#allocation5], 12288  }
   0xa   :  { %16038 = vsyncadd [#allocation5], 4294955008 }
   0xb   :  { %16039 = dma.done.wait [#allocation7], 14336  }
   0xc   :  { %16040 = vsyncadd [#allocation7], 4294952960  ;;  %v10040_v0 = vld [vmem:[%s19208_s1 + $0x70] sm:$0xf]  ;;  %v14797_v1 = vld [vmem:[%s19208_s1 + $0x74] sm:$0xf0] }
   0xd   :  { %v10104_v2 = vld [vmem:[%s19208_s1 + $0xf0] sm:$0xf]  ;;  %v10041_v3 = vor.u32 %v14797_v1, %v10040_v0  ;;  %v14813_v4 = vld [vmem:[%s19208_s1 + $0xf4] sm:$0xf0]  ;;  %v14796_v5 = vld [vmem:[%s19208_s1 + $0x74] sm:$0xf] }
   0xe   :  { %v10042_v6 = vld [vmem:[%s19208_s1 + $0x78] sm:$0xf0]  ;;  %v10105_v7 = vor.u32 %v14813_v4, %v10104_v2  ;;  %v14812_v9 = vld [vmem:[%s19208_s1 + $0xf4] sm:$0xf]  ;;  %v10032_v11 = vld [vmem:[%s19208_s1 + $0x60] sm:$0xf] }
   0xf   :  { %v10045_v8 = vor.u32 %v14796_v5, %v10042_v6  ;;  %v10106_v10 = vld [vmem:[%s19208_s1 + $0xf8] sm:$0xf0]  ;;  %264 = vmatpush.bf16.msra.mxu0 %v10041_v3  ;;  %v14795_v13 = vld [vmem:[%s19208_s1 + $0x64] sm:$0xf0]  ;;  %v10096_v14 = vld [vmem:[%s19208_s1 + $0xe0] sm:$0xf] }
  0x10   :  { %v10109_v12 = vor.u32 %v14812_v9, %v10106_v10  ;;  %v14811_v15 = vld [vmem:[%s19208_s1 + $0xe4] sm:$0xf0]  ;;  %277 = vmatpush.bf16.msra.mxu1 %v10105_v7  ;;  %v10033_v16 = vor.u32 %v14795_v13, %v10032_v11  ;;  %v14794_v18 = vld [vmem:[%s19208_s1 + $0x64] sm:$0xf]  ;;  %v10034_v19 = vld [vmem:[%s19208_s1 + $0x68] sm:$0xf0] }
  0x11   :  { %290 = vmatpush.bf16.msra.mxu2 %v10045_v8  ;;  %v10097_v17 = vor.u32 %v14811_v15, %v10096_v14  ;;  %v14810_v20 = vld [vmem:[%s19208_s1 + $0xe4] sm:$0xf]  ;;  %v10037_v21 = vor.u32 %v14794_v18, %v10034_v19  ;;  %v10098_v22 = vld [vmem:[%s19208_s1 + $0xe8] sm:$0xf0]  ;;  %v10024_v23 = vld [vmem:[%s19208_s1 + $0x50] sm:$0xf] }
  0x12   :  { %303 = vmatpush.bf16.msra.mxu3 %v10109_v12  ;;  %v14793_v24 = vld [vmem:[%s19208_s1 + $0x54] sm:$0xf0]  ;;  %v10101_v25 = vor.u32 %v14810_v20, %v10098_v22  ;;  %v10088_v26 = vld [vmem:[%s19208_s1 + $0xd0] sm:$0xf]  ;;  %v14792_v28 = vld [vmem:[%s19208_s1 + $0x54] sm:$0xf] }
  0x13   :  { %v14809_v27 = vld [vmem:[%s19208_s1 + $0xd4] sm:$0xf0]  ;;  %265 = vmatpush.bf16.msra.mxu0 %v10033_v16  ;;  %v10025_v29 = vor.u32 %v14793_v24, %v10024_v23  ;;  %v10026_v30 = vld [vmem:[%s19208_s1 + $0x58] sm:$0xf0]  ;;  %v14808_v31 = vld [vmem:[%s19208_s1 + $0xd4] sm:$0xf] }
  0x14   :  { %v10090_v32 = vld [vmem:[%s19208_s1 + $0xd8] sm:$0xf0]  ;;  %278 = vmatpush.bf16.msra.mxu1 %v10097_v17  ;;  %v10089_v33 = vor.u32 %v14809_v27, %v10088_v26  ;;  %v10029_v34 = vor.u32 %v14792_v28, %v10026_v30  ;;  %v10016_v35 = vld [vmem:[%s19208_s1 + $0x40] sm:$0xf]  ;;  %v14791_v36 = vld [vmem:[%s19208_s1 + $0x44] sm:$0xf0] }
  0x15   :  { %291 = vmatpush.bf16.msra.mxu2 %v10037_v21  ;;  %v10080_v37 = vld [vmem:[%s19208_s1 + $0xc0] sm:$0xf]  ;;  %v10093_v38 = vor.u32 %v14808_v31, %v10090_v32  ;;  %v14807_v39 = vld [vmem:[%s19208_s1 + $0xc4] sm:$0xf0]  ;;  %v14790_v40 = vld [vmem:[%s19208_s1 + $0x44] sm:$0xf]  ;;  %v10017_v44 = vor.u32 %v14791_v36, %v10016_v35 }
  0x16   :  { %304 = vmatpush.bf16.msra.mxu3 %v10101_v25  ;;  %v10018_v41 = vld [vmem:[%s19208_s1 + $0x48] sm:$0xf0]  ;;  %v14806_v42 = vld [vmem:[%s19208_s1 + $0xc4] sm:$0xf]  ;;  %v10081_v45 = vor.u32 %v14807_v39, %v10080_v37  ;;  %v10008_v47 = vld [vmem:[%s19208_s1 + $0x30] sm:$0xf] }
  0x17   :  { %v10082_v43 = vld [vmem:[%s19208_s1 + $0xc8] sm:$0xf0]  ;;  %266 = vmatpush.bf16.msra.mxu0 %v10025_v29  ;;  %v10021_v46 = vor.u32 %v14790_v40, %v10018_v41  ;;  %v14789_v48 = vld [vmem:[%s19208_s1 + $0x34] sm:$0xf0]  ;;  %v10072_v49 = vld [vmem:[%s19208_s1 + $0xb0] sm:$0xf] }
  0x18   :  { %279 = vmatpush.bf16.msra.mxu1 %v10089_v33  ;;  %v10085_v50 = vor.u32 %v14806_v42, %v10082_v43  ;;  %v14805_v51 = vld [vmem:[%s19208_s1 + $0xb4] sm:$0xf0]  ;;  %v14788_v52 = vld [vmem:[%s19208_s1 + $0x34] sm:$0xf]  ;;  %v10010_v53 = vld [vmem:[%s19208_s1 + $0x38] sm:$0xf0]  ;;  %v10009_v56 = vor.u32 %v14789_v48, %v10008_v47 }
  0x19   :  { %292 = vmatpush.bf16.msra.mxu2 %v10029_v34  ;;  %v14804_v54 = vld [vmem:[%s19208_s1 + $0xb4] sm:$0xf]  ;;  %v10074_v55 = vld [vmem:[%s19208_s1 + $0xb8] sm:$0xf0]  ;;  %v10073_v57 = vor.u32 %v14805_v51, %v10072_v49  ;;  %v10013_v58 = vor.u32 %v14788_v52, %v10010_v53  ;;  %v10000_v59 = vld [vmem:[%s19208_s1 + $0x20] sm:$0xf] }
  0x1a   :  { %305 = vmatpush.bf16.msra.mxu3 %v10093_v38  ;;  %v14787_v60 = vld [vmem:[%s19208_s1 + $0x24] sm:$0xf0]  ;;  %v10064_v61 = vld [vmem:[%s19208_s1 + $0xa0] sm:$0xf]  ;;  %v10077_v62 = vor.u32 %v14804_v54, %v10074_v55  ;;  %v14786_v0 = vld [vmem:[%s19208_s1 + $0x24] sm:$0xf] }
  0x1b   :  { %267 = vmatpush.bf16.msra.mxu0 %v10017_v44  ;;  %v14803_v63 = vld [vmem:[%s19208_s1 + $0xa4] sm:$0xf0]  ;;  %v10002_v1 = vld [vmem:[%s19208_s1 + $0x28] sm:$0xf0]  ;;  %v14802_v2 = vld [vmem:[%s19208_s1 + $0xa4] sm:$0xf]  ;;  %v10001_v4 = vor.u32 %v14787_v60, %v10000_v59 }
  0x1c   :  { %280 = vmatpush.bf16.msra.mxu1 %v10081_v45  ;;  %v10066_v3 = vld [vmem:[%s19208_s1 + $0xa8] sm:$0xf0]  ;;  %v10065_v5 = vor.u32 %v14803_v63, %v10064_v61  ;;  %v10005_v6 = vor.u32 %v14786_v0, %v10002_v1  ;;  %v9992_v7 = vld [vmem:[%s19208_s1 + $0x10] sm:$0xf]  ;;  %v14785_v8 = vld [vmem:[%s19208_s1 + $0x14] sm:$0xf0] }
  0x1d   :  { %293 = vmatpush.bf16.msra.mxu2 %v10021_v46  ;;  %v10056_v9 = vld [vmem:[%s19208_s1 + $0x90] sm:$0xf]  ;;  %v10069_v10 = vor.u32 %v14802_v2, %v10066_v3  ;;  %v14801_v11 = vld [vmem:[%s19208_s1 + $0x94] sm:$0xf0]  ;;  %v14784_v12 = vld [vmem:[%s19208_s1 + $0x14] sm:$0xf]  ;;  %v9993_v16 = vor.u32 %v14785_v8, %v9992_v7 }
  0x1e   :  { %306 = vmatpush.bf16.msra.mxu3 %v10085_v50  ;;  %v9994_v13 = vld [vmem:[%s19208_s1 + $0x18] sm:$0xf0]  ;;  %v14800_v14 = vld [vmem:[%s19208_s1 + $0x94] sm:$0xf]  ;;  %v9984_v17 = vld [vmem:[%s19208_s1] sm:$0xf]  ;;  %v10057_v19 = vor.u32 %v14801_v11, %v10056_v9 }
  0x1f   :  { %268 = vmatpush.bf16.msra.mxu0 %v10009_v56  ;;  %v10058_v15 = vld [vmem:[%s19208_s1 + $0x98] sm:$0xf0]  ;;  %v14783_v18 = vld [vmem:[%s19208_s1 + $0x4] sm:$0xf0]  ;;  %v9997_v20 = vor.u32 %v14784_v12, %v9994_v13  ;;  %v10048_v21 = vld [vmem:[%s19208_s1 + $0x80] sm:$0xf] }
  0x20   :  { %281 = vmatpush.bf16.msra.mxu1 %v10073_v57  ;;  %v14799_v22 = vld [vmem:[%s19208_s1 + $0x84] sm:$0xf0]  ;;  %v14782_v23 = vld [vmem:[%s19208_s1 + $0x4] sm:$0xf]  ;;  %v10061_v24 = vor.u32 %v14800_v14, %v10058_v15  ;;  %v9986_v25 = vld [vmem:[%s19208_s1 + $0x8] sm:$0xf0]  ;;  %v9985_v31 = vor.u32 %v14783_v18, %v9984_v17 }
  0x21   :  { %294 = vmatpush.bf16.msra.mxu2 %v10013_v58  ;;  %v14798_v26 = vld [vmem:[%s19208_s1 + $0x84] sm:$0xf]  ;;  %v10050_v27 = vld [vmem:[%s19208_s1 + $0x88] sm:$0xf0]  ;;  %v10168_v28 = vld [vmem:[%s19208_s1 + $0x70] sm:$0xf]  ;;  %v10049_v35 = vor.u32 %v14799_v22, %v10048_v21  ;;  %v9989_v36 = vor.u32 %v14782_v23, %v9986_v25 }
  0x22   :  { %307 = vmatpush.bf16.msra.mxu3 %v10077_v62  ;;  %v14829_v29 = vld [vmem:[%s19208_s1 + $0x74] sm:$0xf0]  ;;  %v10232_v30 = vld [vmem:[%s19208_s1 + $0xf0] sm:$0xf]  ;;  %v14828_v33 = vld [vmem:[%s19208_s1 + $0x74] sm:$0xf]  ;;  %v10053_v39 = vor.u32 %v14798_v26, %v10050_v27 }
  0x23   :  { %269 = vmatpush.bf16.msra.mxu0 %v10001_v4  ;;  %v14845_v32 = vld [vmem:[%s19208_s1 + $0xf4] sm:$0xf0]  ;;  %v10170_v34 = vld [vmem:[%s19208_s1 + $0x78] sm:$0xf0]  ;;  %v14844_v37 = vld [vmem:[%s19208_s1 + $0xf4] sm:$0xf]  ;;  %v10169_v40 = vor.u32 %v14829_v29, %v10168_v28 }
  0x24   :  { %282 = vmatpush.bf16.msra.mxu1 %v10065_v5  ;;  %v10234_v38 = vld [vmem:[%s19208_s1 + $0xf8] sm:$0xf0]  ;;  %v10233_v41 = vor.u32 %v14845_v32, %v10232_v30  ;;  %v10173_v42 = vor.u32 %v14828_v33, %v10170_v34  ;;  %v10160_v43 = vld [vmem:[%s19208_s1 + $0x60] sm:$0xf]  ;;  %v14827_v44 = vld [vmem:[%s19208_s1 + $0x64] sm:$0xf0] }
  0x25   :  { %295 = vmatpush.bf16.msra.mxu2 %v10005_v6  ;;  %v10224_v45 = vld [vmem:[%s19208_s1 + $0xe0] sm:$0xf]  ;;  %v10237_v46 = vor.u32 %v14844_v37, %v10234_v38  ;;  %v14843_v47 = vld [vmem:[%s19208_s1 + $0xe4] sm:$0xf0]  ;;  %v14826_v48 = vld [vmem:[%s19208_s1 + $0x64] sm:$0xf]  ;;  %v10161_v52 = vor.u32 %v14827_v44, %v10160_v43 }
  0x26   :  { %308 = vmatpush.bf16.msra.mxu3 %v10069_v10  ;;  %v10162_v49 = vld [vmem:[%s19208_s1 + $0x68] sm:$0xf0]  ;;  %v14842_v50 = vld [vmem:[%s19208_s1 + $0xe4] sm:$0xf]  ;;  %v10225_v53 = vor.u32 %v14843_v47, %v10224_v45  ;;  %v10152_v55 = vld [vmem:[%s19208_s1 + $0x50] sm:$0xf] }
  0x27   :  { %270 = vmatpush.bf16.msra.mxu0 %v9993_v16  ;;  %v10226_v51 = vld [vmem:[%s19208_s1 + $0xe8] sm:$0xf0]  ;;  %v10165_v54 = vor.u32 %v14826_v48, %v10162_v49  ;;  %v14825_v56 = vld [vmem:[%s19208_s1 + $0x54] sm:$0xf0]  ;;  %v10216_v57 = vld [vmem:[%s19208_s1 + $0xd0] sm:$0xf] }
  0x28   :  { %283 = vmatpush.bf16.msra.mxu1 %v10057_v19  ;;  %v10229_v58 = vor.u32 %v14842_v50, %v10226_v51  ;;  %v14841_v59 = vld [vmem:[%s19208_s1 + $0xd4] sm:$0xf0]  ;;  %v14824_v60 = vld [vmem:[%s19208_s1 + $0x54] sm:$0xf]  ;;  %v10154_v61 = vld [vmem:[%s19208_s1 + $0x58] sm:$0xf0]  ;;  %v10153_v0 = vor.u32 %v14825_v56, %v10152_v55 }
  0x29   :  { %296 = vmatpush.bf16.msra.mxu2 %v9997_v20  ;;  %v14840_v62 = vld [vmem:[%s19208_s1 + $0xd4] sm:$0xf]  ;;  %v10218_v63 = vld [vmem:[%s19208_s1 + $0xd8] sm:$0xf0]  ;;  %v58_v1 = vld [vmem:[%s19207_s0] sm:$0xff]  ;;  %v10217_v2 = vor.u32 %v14841_v59, %v10216_v57  ;;  %v10157_v3 = vor.u32 %v14824_v60, %v10154_v61 }
  0x2a   :  { %309 = vmatpush.bf16.msra.mxu3 %v10061_v24  ;;  %v10144_v4 = vld [vmem:[%s19208_s1 + $0x40] sm:$0xf]  ;;  %v14823_v5 = vld [vmem:[%s19208_s1 + $0x44] sm:$0xf0]  ;;  %v98_v7 = vunpack.c.l.b16 %v58_v1  ;;  %v99_v8 = vunpack.c.h.b16 %v58_v1  ;;  %v10221_v9 = vor.u32 %v14840_v62, %v10218_v63  ;;  %v14822_v11 = vld [vmem:[%s19208_s1 + $0x44] sm:$0xf] }
  0x2b   :  { %271 = vmatpush.bf16.msra.mxu0 %v9985_v31  ;;  %v10208_v6 = vld [vmem:[%s19208_s1 + $0xc0] sm:$0xf]  ;;  %v14839_v10 = vld [vmem:[%s19208_s1 + $0xc4] sm:$0xf0]  ;;  %v10146_v12 = vld [vmem:[%s19208_s1 + $0x48] sm:$0xf0]  ;;  %v10145_v17 = vor.u32 %v14823_v5, %v10144_v4 }
  0x2c   :  { %284 = vmatpush.bf16.msra.mxu1 %v10049_v35  ;;  %v14838_v13 = vld [vmem:[%s19208_s1 + $0xc4] sm:$0xf]  ;;  %v10210_v14 = vld [vmem:[%s19208_s1 + $0xc8] sm:$0xf0]  ;;  %v100_v15 = vpack.c.b16 %v98_v7, %v98_v7  ;;  %v101_v16 = vpack.c.b16 %v99_v8, %v99_v8  ;;  %v10209_v18 = vor.u32 %v14839_v10, %v10208_v6  ;;  %v10149_v19 = vor.u32 %v14822_v11, %v10146_v12  ;;  %v10136_v20 = vld [vmem:[%s19208_s1 + $0x30] sm:$0xf] }
  0x2d   :  { %297 = vmatpush.bf16.msra.mxu2 %v9989_v36  ;;  %v14821_v21 = vld [vmem:[%s19208_s1 + $0x34] sm:$0xf0]  ;;  %v10200_v22 = vld [vmem:[%s19208_s1 + $0xb0] sm:$0xf]  ;;  %v10213_v23 = vor.u32 %v14838_v13, %v10210_v14  ;;  %v14820_v25 = vld [vmem:[%s19208_s1 + $0x34] sm:$0xf] }
  0x2e   :  { %310 = vmatpush.bf16.msra.mxu3 %v10053_v39  ;;  %v14837_v24 = vld [vmem:[%s19208_s1 + $0xb4] sm:$0xf0]  ;;  %v10138_v26 = vld [vmem:[%s19208_s1 + $0x38] sm:$0xf0]  ;;  %v14836_v27 = vld [vmem:[%s19208_s1 + $0xb4] sm:$0xf]  ;;  %272 = vmatmul.bf16.vlgmr.msra.gmra.mxu0 %v100_v15  ;;  %v10137_v29 = vor.u32 %v14821_v21, %v10136_v20 }
  0x2f   :  { %526 = vmatpush.bf16.msrb.mxu0 %v10169_v40  ;;  %v10202_v28 = vld [vmem:[%s19208_s1 + $0xb8] sm:$0xf0]  ;;  %285 = vmatmul.bf16.vlgmr.msra.gmra.mxu1 %v101_v16  ;;  %v10201_v30 = vor.u32 %v14837_v24, %v10200_v22  ;;  %v10141_v31 = vor.u32 %v14820_v25, %v10138_v26  ;;  %v10128_v32 = vld [vmem:[%s19208_s1 + $0x20] sm:$0xf]  ;;  %v14819_v33 = vld [vmem:[%s19208_s1 + $0x24] sm:$0xf0] }
  0x30   :  { %539 = vmatpush.bf16.msrb.mxu1 %v10233_v41  ;;  %298 = vmatmul.bf16.vlgmr.msra.gmra.mxu2 %v100_v15  ;;  %v10192_v34 = vld [vmem:[%s19208_s1 + $0xa0] sm:$0xf]  ;;  %v10205_v35 = vor.u32 %v14836_v27, %v10202_v28  ;;  %v14835_v36 = vld [vmem:[%s19208_s1 + $0xa4] sm:$0xf0]  ;;  %v14818_v37 = vld [vmem:[%s19208_s1 + $0x24] sm:$0xf]  ;;  %v10129_v41 = vor.u32 %v14819_v33, %v10128_v32 }
  0x31   :  { %552 = vmatpush.bf16.msrb.mxu2 %v10173_v42  ;;  %311 = vmatmul.bf16.vlgmr.msra.gmra.mxu3 %v101_v16  ;;  %v10130_v38 = vld [vmem:[%s19208_s1 + $0x28] sm:$0xf0]  ;;  %v14834_v39 = vld [vmem:[%s19208_s1 + $0xa4] sm:$0xf]  ;;  %v10193_v42 = vor.u32 %v14835_v36, %v10192_v34  ;;  %v10120_v44 = vld [vmem:[%s19208_s1 + $0x10] sm:$0xf] }
  0x32   :  { %565 = vmatpush.bf16.msrb.mxu3 %v10237_v46  ;;  %v10194_v40 = vld [vmem:[%s19208_s1 + $0xa8] sm:$0xf0]  ;;  %v10133_v43 = vor.u32 %v14818_v37, %v10130_v38  ;;  %v14817_v45 = vld [vmem:[%s19208_s1 + $0x14] sm:$0xf0]  ;;  %v10184_v46 = vld [vmem:[%s19208_s1 + $0x90] sm:$0xf] }
  0x33   :  { %527 = vmatpush.bf16.msrb.mxu0 %v10161_v52  ;;  %v10197_v47 = vor.u32 %v14834_v39, %v10194_v40  ;;  %v14833_v48 = vld [vmem:[%s19208_s1 + $0x94] sm:$0xf0]  ;;  %v14816_v49 = vld [vmem:[%s19208_s1 + $0x14] sm:$0xf]  ;;  %v10122_v50 = vld [vmem:[%s19208_s1 + $0x18] sm:$0xf0] }
  0x34   :  { %540 = vmatpush.bf16.msrb.mxu1 %v10225_v53  ;;  %v14832_v51 = vld [vmem:[%s19208_s1 + $0x94] sm:$0xf]  ;;  %v10186_v52 = vld [vmem:[%s19208_s1 + $0x98] sm:$0xf0]  ;;  %v10121_v53 = vor.u32 %v14817_v45, %v10120_v44  ;;  %v14815_v55 = vld [vmem:[%s19208_s1 + $0x4] sm:$0xf0]  ;;  %v10185_v56 = vor.u32 %v14833_v48, %v10184_v46  ;;  %v10125_v57 = vor.u32 %v14816_v49, %v10122_v50 }
  0x35   :  { %553 = vmatpush.bf16.msrb.mxu2 %v10165_v54  ;;  %v10112_v54 = vld [vmem:[%s19208_s1] sm:$0xf]  ;;  %v14831_v59 = vld [vmem:[%s19208_s1 + $0x84] sm:$0xf0]  ;;  %v14814_v60 = vld [vmem:[%s19208_s1 + $0x4] sm:$0xf]  ;;  %v10189_v61 = vor.u32 %v14832_v51, %v10186_v52 }
  0x36   :  { %566 = vmatpush.bf16.msrb.mxu3 %v10229_v58  ;;  %v10176_v58 = vld [vmem:[%s19208_s1 + $0x80] sm:$0xf]  ;;  %v10114_v62 = vld [vmem:[%s19208_s1 + $0x8] sm:$0xf0]  ;;  %v14830_v63 = vld [vmem:[%s19208_s1 + $0x84] sm:$0xf]  ;;  %v10113_v4 = vor.u32 %v14815_v55, %v10112_v54 }
  0x37   :  { %528 = vmatpush.bf16.msrb.mxu0 %v10153_v0  ;;  %v10178_v0 = vld [vmem:[%s19208_s1 + $0x88] sm:$0xf0]  ;;  %v10296_v1 = vld [vmem:[%s19208_s1 + $0x70] sm:$0xf]  ;;  %v14877_v5 = vld [vmem:[%s19208_s1 + $0xf4] sm:$0xf0]  ;;  %v10177_v8 = vor.u32 %v14831_v59, %v10176_v58 }
  0x38   :  { %541 = vmatpush.bf16.msrb.mxu1 %v10217_v2  ;;  %v14861_v2 = vld [vmem:[%s19208_s1 + $0x74] sm:$0xf0]  ;;  %v14860_v6 = vld [vmem:[%s19208_s1 + $0x74] sm:$0xf]  ;;  %v10298_v7 = vld [vmem:[%s19208_s1 + $0x78] sm:$0xf0]  ;;  %v10181_v12 = vor.u32 %v14830_v63, %v10178_v0 }
  0x39   :  { %554 = vmatpush.bf16.msrb.mxu2 %v10157_v3  ;;  %v10360_v3 = vld [vmem:[%s19208_s1 + $0xf0] sm:$0xf]  ;;  %v14876_v10 = vld [vmem:[%s19208_s1 + $0xf4] sm:$0xf]  ;;  %v10362_v11 = vld [vmem:[%s19208_s1 + $0xf8] sm:$0xf0]  ;;  %v10297_v13 = vor.u32 %v14861_v2, %v10296_v1  ;;  %v10301_v16 = vor.u32 %v14860_v6, %v10298_v7 }
  0x3a   :  { %567 = vmatpush.bf16.msrb.mxu3 %v10221_v9  ;;  %v10117_v9 = vor.u32 %v14814_v60, %v10114_v62  ;;  %v320_v14 = vld [vmem:[%s19207_s0 + $0x4] sm:$0xff]  ;;  %v10361_v15 = vor.u32 %v14877_v5, %v10360_v3  ;;  %v10365_v22 = vor.u32 %v14876_v10, %v10362_v11  ;;  %v10290_v25 = vld [vmem:[%s19208_s1 + $0x68] sm:$0xf0]  ;;  %v10280_v33 = vld [vmem:[%s19208_s1 + $0x50] sm:$0xf] }
  0x3b   :  { %529 = vmatpush.bf16.msrb.mxu0 %v10145_v17  ;;  %v10288_v17 = vld [vmem:[%s19208_s1 + $0x60] sm:$0xf]  ;;  %v360_v20 = vunpack.c.l.b16 %v320_v14  ;;  %v361_v21 = vunpack.c.h.b16 %v320_v14  ;;  %v14858_v24 = vld [vmem:[%s19208_s1 + $0x64] sm:$0xf]  ;;  %v10354_v27 = vld [vmem:[%s19208_s1 + $0xe8] sm:$0xf0] }
  0x3c   :  { %542 = vmatpush.bf16.msrb.mxu1 %v10209_v18  ;;  %v14859_v18 = vld [vmem:[%s19208_s1 + $0x64] sm:$0xf0]  ;;  %v14874_v26 = vld [vmem:[%s19208_s1 + $0xe4] sm:$0xf]  ;;  %v10293_v32 = vor.u32 %v14858_v24, %v10290_v25  ;;  %v14857_v34 = vld [vmem:[%s19208_s1 + $0x54] sm:$0xf0] }
  0x3d   :  { %555 = vmatpush.bf16.msrb.mxu2 %v10149_v19  ;;  %v10352_v19 = vld [vmem:[%s19208_s1 + $0xe0] sm:$0xf]  ;;  %v362_v28 = vpack.c.b16 %v360_v20, %v360_v20  ;;  %v10357_v36 = vor.u32 %v14874_v26, %v10354_v27  ;;  %v14873_v37 = vld [vmem:[%s19208_s1 + $0xd4] sm:$0xf0]  ;;  %v14856_v38 = vld [vmem:[%s19208_s1 + $0x54] sm:$0xf] }
  0x3e   :  { %568 = vmatpush.bf16.msrb.mxu3 %v10213_v23  ;;  %v14875_v23 = vld [vmem:[%s19208_s1 + $0xe4] sm:$0xf0]  ;;  %v10282_v39 = vld [vmem:[%s19208_s1 + $0x58] sm:$0xf0]  ;;  %v14872_v40 = vld [vmem:[%s19208_s1 + $0xd4] sm:$0xf] }
  0x3f   :  { %530 = vmatpush.bf16.msrb.mxu0 %v10137_v29  ;;  %v363_v29 = vpack.c.b16 %v361_v21, %v361_v21  ;;  %v10285_v44 = vor.u32 %v14856_v38, %v10282_v39  ;;  %v10272_v45 = vld [vmem:[%s19208_s1 + $0x40] sm:$0xf]  ;;  %v14855_v46 = vld [vmem:[%s19208_s1 + $0x44] sm:$0xf0]  ;;  %v14854_v50 = vld [vmem:[%s19208_s1 + $0x44] sm:$0xf] }
  0x40   :  { %543 = vmatpush.bf16.msrb.mxu1 %v10201_v30  ;;  %v10289_v30 = vor.u32 %v14859_v18, %v10288_v17  ;;  %v14871_v49 = vld [vmem:[%s19208_s1 + $0xc4] sm:$0xf0]  ;;  %v10274_v51 = vld [vmem:[%s19208_s1 + $0x48] sm:$0xf0]  ;;  %v14870_v52 = vld [vmem:[%s19208_s1 + $0xc4] sm:$0xf]  ;;  %v10273_v54 = vor.u32 %v14855_v46, %v10272_v45 }
  0x41   :  { %556 = vmatpush.bf16.msrb.mxu2 %v10141_v31  ;;  %v10353_v31 = vor.u32 %v14875_v23, %v10352_v19  ;;  %v14853_v58 = vld [vmem:[%s19208_s1 + $0x34] sm:$0xf0]  ;;  %v10328_v59 = vld [vmem:[%s19208_s1 + $0xb0] sm:$0xf]  ;;  %v14852_v62 = vld [vmem:[%s19208_s1 + $0x34] sm:$0xf] }
  0x42   :  { %569 = vmatpush.bf16.msrb.mxu3 %v10205_v35  ;;  %v10344_v35 = vld [vmem:[%s19208_s1 + $0xd0] sm:$0xf]  ;;  %v10266_v63 = vld [vmem:[%s19208_s1 + $0x38] sm:$0xf0]  ;;  %v14868_v0 = vld [vmem:[%s19208_s1 + $0xb4] sm:$0xf] }
  0x43   :  { %531 = vmatpush.bf16.msrb.mxu0 %v10129_v41  ;;  %v10346_v41 = vld [vmem:[%s19208_s1 + $0xd8] sm:$0xf0]  ;;  %v10256_v5 = vld [vmem:[%s19208_s1 + $0x20] sm:$0xf]  ;;  %v14851_v6 = vld [vmem:[%s19208_s1 + $0x24] sm:$0xf0] }
  0x44   :  { %544 = vmatpush.bf16.msrb.mxu1 %v10193_v42  ;;  %v10281_v42 = vor.u32 %v14857_v34, %v10280_v33  ;;  %v10349_v48 = vor.u32 %v14872_v40, %v10346_v41  ;;  %v10330_v1 = vld [vmem:[%s19208_s1 + $0xb8] sm:$0xf0]  ;;  %v10320_v7 = vld [vmem:[%s19208_s1 + $0xa0] sm:$0xf]  ;;  %v14850_v10 = vld [vmem:[%s19208_s1 + $0x24] sm:$0xf]  ;;  %v10257_v14 = vor.u32 %v14851_v6, %v10256_v5 }
  0x45   :  { %557 = vmatpush.bf16.msrb.mxu2 %v10133_v43  ;;  %v10345_v43 = vor.u32 %v14873_v37, %v10344_v35  ;;  %v10258_v11 = vld [vmem:[%s19208_s1 + $0x28] sm:$0xf0]  ;;  %v10248_v17 = vld [vmem:[%s19208_s1 + $0x10] sm:$0xf]  ;;  %v14849_v18 = vld [vmem:[%s19208_s1 + $0x14] sm:$0xf0] }
  0x46   :  { %570 = vmatpush.bf16.msrb.mxu3 %v10197_v47  ;;  %v10336_v47 = vld [vmem:[%s19208_s1 + $0xc0] sm:$0xf]  ;;  %v10312_v19 = vld [vmem:[%s19208_s1 + $0x90] sm:$0xf]  ;;  %v14865_v21 = vld [vmem:[%s19208_s1 + $0x94] sm:$0xf0]  ;;  %v10249_v26 = vor.u32 %v14849_v18, %v10248_v17 }
  0x47   :  { %532 = vmatpush.bf16.msrb.mxu0 %v10121_v53  ;;  %v10338_v53 = vld [vmem:[%s19208_s1 + $0xc8] sm:$0xf0]  ;;  %v10337_v55 = vor.u32 %v14871_v49, %v10336_v47  ;;  %v10250_v23 = vld [vmem:[%s19208_s1 + $0x18] sm:$0xf0]  ;;  %v14864_v24 = vld [vmem:[%s19208_s1 + $0x94] sm:$0xf] }
  0x48   :  { %545 = vmatpush.bf16.msrb.mxu1 %v10185_v56  ;;  %v10277_v56 = vor.u32 %v14854_v50, %v10274_v51  ;;  %v10341_v60 = vor.u32 %v14870_v52, %v10338_v53  ;;  %v10314_v25 = vld [vmem:[%s19208_s1 + $0x98] sm:$0xf0]  ;;  %v10240_v27 = vld [vmem:[%s19208_s1] sm:$0xf]  ;;  %v14846_v33 = vld [vmem:[%s19208_s1 + $0x4] sm:$0xf] }
  0x49   :  { %558 = vmatpush.bf16.msrb.mxu2 %v10125_v57  ;;  %v10264_v57 = vld [vmem:[%s19208_s1 + $0x30] sm:$0xf]  ;;  %v582_v34 = vld [vmem:[%s19207_s0 + $0x8] sm:$0xff]  ;;  %v10317_v35 = vor.u32 %v14864_v24, %v10314_v25  ;;  %v14862_v37 = vld [vmem:[%s19208_s1 + $0x84] sm:$0xf] }
  0x4a   :  { %571 = vmatpush.bf16.msrb.mxu3 %v10189_v61  ;;  %v14869_v61 = vld [vmem:[%s19208_s1 + $0xb4] sm:$0xf0]  ;;  %v10265_v2 = vor.u32 %v14853_v58, %v10264_v57  ;;  %v10306_v38 = vld [vmem:[%s19208_s1 + $0x88] sm:$0xf0]  ;;  %v10424_v39 = vld [vmem:[%s19208_s1 + $0x70] sm:$0xf]  ;;  %v622_v46 = vunpack.c.l.b16 %v582_v34  ;;  %v623_v51 = vunpack.c.h.b16 %v582_v34 }
  0x4b   :  { %533 = vmatpush.bf16.msrb.mxu0 %v10113_v4  ;;  %v10329_v3 = vor.u32 %v14869_v61, %v10328_v59  ;;  %v10269_v4 = vor.u32 %v14852_v62, %v10266_v63  ;;  %v14893_v40 = vld [vmem:[%s19208_s1 + $0x74] sm:$0xf0]  ;;  %v10488_v41 = vld [vmem:[%s19208_s1 + $0xf0] sm:$0xf]  ;;  %v10426_v45 = vld [vmem:[%s19208_s1 + $0x78] sm:$0xf0]  ;;  %v10309_v52 = vor.u32 %v14862_v37, %v10306_v38 }
  0x4c   :  { %546 = vmatpush.bf16.msrb.mxu1 %v10177_v8  ;;  %v10333_v8 = vor.u32 %v14868_v0, %v10330_v1  ;;  %v14908_v49 = vld [vmem:[%s19208_s1 + $0xf4] sm:$0xf]  ;;  %v10490_v50 = vld [vmem:[%s19208_s1 + $0xf8] sm:$0xf0]  ;;  %v10425_v53 = vor.u32 %v14893_v40, %v10424_v39  ;;  %v14891_v57 = vld [vmem:[%s19208_s1 + $0x64] sm:$0xf0]  ;;  %v624_v63 = vpack.c.b16 %v622_v46, %v622_v46 }
  0x4d   :  { %559 = vmatpush.bf16.msrb.mxu2 %v10117_v9  ;;  %v14867_v9 = vld [vmem:[%s19208_s1 + $0xa4] sm:$0xf0]  ;;  %v10480_v58 = vld [vmem:[%s19208_s1 + $0xe0] sm:$0xf]  ;;  %v10493_v59 = vor.u32 %v14908_v49, %v10490_v50  ;;  %v14890_v61 = vld [vmem:[%s19208_s1 + $0x64] sm:$0xf] }
  0x4e   :  { %572 = vmatpush.bf16.msrb.mxu3 %v10181_v12  ;;  %534 = vmatmul.bf16.vlgmr.msrb.gmra.mxu0 %v362_v28  ;;  %v14866_v12 = vld [vmem:[%s19208_s1 + $0xa4] sm:$0xf]  ;;  %v10418_v62 = vld [vmem:[%s19208_s1 + $0x68] sm:$0xf0]  ;;  %v10408_v6 = vld [vmem:[%s19208_s1 + $0x50] sm:$0xf] }
  0x4f   :  { %788 = vmatpush.bf16.msra.mxu0 %v10297_v13  ;;  %547 = vmatmul.bf16.vlgmr.msrb.gmra.mxu1 %v363_v29  ;;  %v10322_v13 = vld [vmem:[%s19208_s1 + $0xa8] sm:$0xf0]  ;;  %v14906_v0 = vld [vmem:[%s19208_s1 + $0xe4] sm:$0xf]  ;;  %v10421_v5 = vor.u32 %v14890_v61, %v10418_v62  ;;  %v10400_v18 = vld [vmem:[%s19208_s1 + $0x40] sm:$0xf] }
  0x50   :  { %801 = vmatpush.bf16.msra.mxu1 %v10361_v15  ;;  %560 = vmatmul.bf16.vlgmr.msrb.gmra.mxu2 %v362_v28  ;;  %v10321_v15 = vor.u32 %v14867_v9, %v10320_v7  ;;  %v10325_v20 = vor.u32 %v14866_v12, %v10322_v13  ;;  %v14847_v28 = vld [vmem:[%s19208_s1 + $0x4] sm:$0xf0]  ;;  %v10482_v1 = vld [vmem:[%s19208_s1 + $0xe8] sm:$0xf0]  ;;  %v14889_v7 = vld [vmem:[%s19208_s1 + $0x54] sm:$0xf0] }
  0x51   :  { %814 = vmatpush.bf16.msra.mxu2 %v10301_v16  ;;  %573 = vmatmul.bf16.vlgmr.msrb.gmra.mxu3 %v363_v29  ;;  %v10261_v16 = vor.u32 %v14850_v10, %v10258_v11  ;;  %v10304_v29 = vld [vmem:[%s19208_s1 + $0x80] sm:$0xf]  ;;  %v10485_v9 = vor.u32 %v14906_v0, %v10482_v1  ;;  %v14905_v10 = vld [vmem:[%s19208_s1 + $0xd4] sm:$0xf0]  ;;  %v14888_v11 = vld [vmem:[%s19208_s1 + $0x54] sm:$0xf] }
  0x52   :  { %827 = vmatpush.bf16.msra.mxu3 %v10365_v22  ;;  %v14848_v22 = vld [vmem:[%s19208_s1 + $0x14] sm:$0xf]  ;;  %v10410_v12 = vld [vmem:[%s19208_s1 + $0x58] sm:$0xf0]  ;;  %v10402_v24 = vld [vmem:[%s19208_s1 + $0x48] sm:$0xf0] }
  0x53   :  { %789 = vmatpush.bf16.msra.mxu0 %v10289_v30  ;;  %v10313_v30 = vor.u32 %v14865_v21, %v10312_v19  ;;  %v14904_v13 = vld [vmem:[%s19208_s1 + $0xd4] sm:$0xf]  ;;  %v10413_v17 = vor.u32 %v14888_v11, %v10410_v12  ;;  %v14887_v19 = vld [vmem:[%s19208_s1 + $0x44] sm:$0xf0]  ;;  %v14902_v25 = vld [vmem:[%s19208_s1 + $0xc4] sm:$0xf] }
  0x54   :  { %802 = vmatpush.bf16.msra.mxu1 %v10353_v31  ;;  %v10253_v31 = vor.u32 %v14848_v22, %v10250_v23  ;;  %v14903_v22 = vld [vmem:[%s19208_s1 + $0xc4] sm:$0xf0]  ;;  %v14886_v23 = vld [vmem:[%s19208_s1 + $0x44] sm:$0xf]  ;;  %v14901_v34 = vld [vmem:[%s19208_s1 + $0xb4] sm:$0xf0] }
  0x55   :  { %815 = vmatpush.bf16.msra.mxu2 %v10293_v32  ;;  %v14863_v32 = vld [vmem:[%s19208_s1 + $0x84] sm:$0xf0]  ;;  %v14900_v37 = vld [vmem:[%s19208_s1 + $0xb4] sm:$0xf]  ;;  %v10458_v38 = vld [vmem:[%s19208_s1 + $0xb8] sm:$0xf0] }
  0x56   :  { %828 = vmatpush.bf16.msra.mxu3 %v10357_v36  ;;  %v10242_v36 = vld [vmem:[%s19208_s1 + $0x8] sm:$0xf0]  ;;  %v10305_v47 = vor.u32 %v14863_v32, %v10304_v29  ;;  %v10405_v29 = vor.u32 %v14886_v23, %v10402_v24  ;;  %v10456_v32 = vld [vmem:[%s19208_s1 + $0xb0] sm:$0xf]  ;;  %v14899_v46 = vld [vmem:[%s19208_s1 + $0xa4] sm:$0xf0] }
  0x57   :  { %790 = vmatpush.bf16.msra.mxu0 %v10281_v42  ;;  %v10241_v42 = vor.u32 %v14847_v28, %v10240_v27  ;;  %v10401_v27 = vor.u32 %v14887_v19, %v10400_v18  ;;  %v10457_v40 = vor.u32 %v14901_v34, %v10456_v32  ;;  %v14898_v49 = vld [vmem:[%s19208_s1 + $0xa4] sm:$0xf]  ;;  %v10450_v50 = vld [vmem:[%s19208_s1 + $0xa8] sm:$0xf0]  ;;  %v14896_v61 = vld [vmem:[%s19208_s1 + $0x94] sm:$0xf] }
  0x58   :  { %803 = vmatpush.bf16.msra.mxu1 %v10345_v43  ;;  %v14909_v43 = vld [vmem:[%s19208_s1 + $0xf4] sm:$0xf0]  ;;  %v10442_v62 = vld [vmem:[%s19208_s1 + $0x98] sm:$0xf0]  ;;  %v10368_v0 = vld [vmem:[%s19208_s1] sm:$0xf] }
  0x59   :  { %816 = vmatpush.bf16.msra.mxu2 %v10285_v44  ;;  %v14892_v44 = vld [vmem:[%s19208_s1 + $0x74] sm:$0xf]  ;;  %v14879_v1 = vld [vmem:[%s19208_s1 + $0x4] sm:$0xf0]  ;;  %v10434_v11 = vld [vmem:[%s19208_s1 + $0x88] sm:$0xf0] }
  0x5a   :  { %829 = vmatpush.bf16.msra.mxu3 %v10349_v48  ;;  %v10245_v48 = vor.u32 %v14846_v33, %v10242_v36  ;;  %v10394_v36 = vld [vmem:[%s19208_s1 + $0x38] sm:$0xf0]  ;;  %v10552_v12 = vld [vmem:[%s19208_s1 + $0x70] sm:$0xf]  ;;  %v14922_v34 = vld [vmem:[%s19208_s1 + $0x64] sm:$0xf] }
  0x5b   :  { %791 = vmatpush.bf16.msra.mxu0 %v10273_v54  ;;  %v10489_v54 = vor.u32 %v14909_v43, %v10488_v41  ;;  %v14883_v43 = vld [vmem:[%s19208_s1 + $0x24] sm:$0xf0]  ;;  %v10554_v18 = vld [vmem:[%s19208_s1 + $0x78] sm:$0xf0] }
  0x5c   :  { %804 = vmatpush.bf16.msra.mxu1 %v10337_v55  ;;  %v10429_v55 = vor.u32 %v14892_v44, %v10426_v45  ;;  %v10448_v44 = vld [vmem:[%s19208_s1 + $0xa0] sm:$0xf]  ;;  %v10461_v45 = vor.u32 %v14900_v37, %v10458_v38  ;;  %v10618_v23 = vld [vmem:[%s19208_s1 + $0xf8] sm:$0xf0]  ;;  %v14938_v37 = vld [vmem:[%s19208_s1 + $0xe4] sm:$0xf] }
  0x5d   :  { %817 = vmatpush.bf16.msra.mxu2 %v10277_v56  ;;  %v10416_v56 = vld [vmem:[%s19208_s1 + $0x60] sm:$0xf]  ;;  %v10610_v38 = vld [vmem:[%s19208_s1 + $0xe8] sm:$0xf0] }
  0x5e   :  { %830 = vmatpush.bf16.msra.mxu3 %v10341_v60  ;;  %v14907_v60 = vld [vmem:[%s19208_s1 + $0xe4] sm:$0xf0] }
  0x5f   :  { %792 = vmatpush.bf16.msra.mxu0 %v10265_v2  ;;  %v625_v2 = vpack.c.b16 %v623_v51, %v623_v51 }
  0x60   :  { %805 = vmatpush.bf16.msra.mxu1 %v10329_v3  ;;  %v10417_v3 = vor.u32 %v14891_v57, %v10416_v56  ;;  %v10440_v56 = vld [vmem:[%s19208_s1 + $0x90] sm:$0xf]  ;;  %v10453_v57 = vor.u32 %v14898_v49, %v10450_v50  ;;  %v10538_v49 = vld [vmem:[%s19208_s1 + $0x58] sm:$0xf0]  ;;  %v14936_v50 = vld [vmem:[%s19208_s1 + $0xd4] sm:$0xf] }
  0x61   :  { %818 = vmatpush.bf16.msra.mxu2 %v10269_v4  ;;  %v10481_v4 = vor.u32 %v14907_v60, %v10480_v58  ;;  %v14897_v58 = vld [vmem:[%s19208_s1 + $0x94] sm:$0xf0]  ;;  %v10378_v60 = vld [vmem:[%s19208_s1 + $0x18] sm:$0xf0] }
  0x62   :  { %831 = vmatpush.bf16.msra.mxu3 %v10333_v8  ;;  %v10472_v8 = vld [vmem:[%s19208_s1 + $0xd0] sm:$0xf] }
  0x63   :  { %793 = vmatpush.bf16.msra.mxu0 %v10257_v14  ;;  %v10474_v14 = vld [vmem:[%s19208_s1 + $0xd8] sm:$0xf0] }
  0x64   :  { %806 = vmatpush.bf16.msra.mxu1 %v10321_v15  ;;  %v10409_v15 = vor.u32 %v14889_v7, %v10408_v6  ;;  %v10477_v21 = vor.u32 %v14904_v13, %v10474_v14  ;;  %v14878_v6 = vld [vmem:[%s19208_s1 + $0x4] sm:$0xf]  ;;  %v844_v7 = vld [vmem:[%s19207_s0 + $0xc] sm:$0xff]  ;;  %v14925_v13 = vld [vmem:[%s19208_s1 + $0x74] sm:$0xf0] }
  0x65   :  { %819 = vmatpush.bf16.msra.mxu2 %v10261_v16  ;;  %v10473_v16 = vor.u32 %v14905_v10, %v10472_v8  ;;  %v10445_v8 = vor.u32 %v14896_v61, %v10442_v62  ;;  %v14894_v10 = vld [vmem:[%s19208_s1 + $0x84] sm:$0xf]  ;;  %v10616_v14 = vld [vmem:[%s19208_s1 + $0xf0] sm:$0xf]  ;;  %v884_v19 = vunpack.c.l.b16 %v844_v7  ;;  %v885_v24 = vunpack.c.h.b16 %v844_v7  ;;  %v10530_v61 = vld [vmem:[%s19208_s1 + $0x48] sm:$0xf0] }
  0x66   :  { %832 = vmatpush.bf16.msra.mxu3 %v10325_v20  ;;  %v10464_v20 = vld [vmem:[%s19208_s1 + $0xc0] sm:$0xf]  ;;  %v14934_v62 = vld [vmem:[%s19208_s1 + $0xc4] sm:$0xf]  ;;  %v14933_v7 = vld [vmem:[%s19208_s1 + $0xb4] sm:$0xf0] }
  0x67   :  { %794 = vmatpush.bf16.msra.mxu0 %v10249_v26  ;;  %v10466_v26 = vld [vmem:[%s19208_s1 + $0xc8] sm:$0xf0]  ;;  %v10465_v28 = vor.u32 %v14903_v22, %v10464_v20  ;;  %v14940_v22 = vld [vmem:[%s19208_s1 + $0xf4] sm:$0xf] }
  0x68   :  { %807 = vmatpush.bf16.msra.mxu1 %v10313_v30  ;;  %v10392_v30 = vld [vmem:[%s19208_s1 + $0x30] sm:$0xf]  ;;  %v10469_v33 = vor.u32 %v14902_v25, %v10466_v26  ;;  %v10437_v25 = vor.u32 %v14894_v10, %v10434_v11  ;;  %v10553_v26 = vor.u32 %v14925_v13, %v10552_v12  ;;  %v10621_v32 = vor.u32 %v14940_v22, %v10618_v23  ;;  %v14932_v10 = vld [vmem:[%s19208_s1 + $0xb4] sm:$0xf]  ;;  %v10586_v11 = vld [vmem:[%s19208_s1 + $0xb8] sm:$0xf0] }
  0x69   :  { %820 = vmatpush.bf16.msra.mxu2 %v10253_v31  ;;  %v14885_v31 = vld [vmem:[%s19208_s1 + $0x34] sm:$0xf0]  ;;  %v14930_v22 = vld [vmem:[%s19208_s1 + $0xa4] sm:$0xf]  ;;  %v10578_v23 = vld [vmem:[%s19208_s1 + $0xa8] sm:$0xf0] }
  0x6a   :  { %833 = vmatpush.bf16.msra.mxu3 %v10317_v35  ;;  %v14884_v35 = vld [vmem:[%s19208_s1 + $0x34] sm:$0xf]  ;;  %v10393_v39 = vor.u32 %v14885_v31, %v10392_v30  ;;  %v14923_v30 = vld [vmem:[%s19208_s1 + $0x64] sm:$0xf0]  ;;  %v10608_v31 = vld [vmem:[%s19208_s1 + $0xe0] sm:$0xf] }
  0x6b   :  { %795 = vmatpush.bf16.msra.mxu0 %v10241_v42  ;;  %v10397_v41 = vor.u32 %v14884_v35, %v10394_v36  ;;  %v10384_v42 = vld [vmem:[%s19208_s1 + $0x20] sm:$0xf]  ;;  %v10546_v35 = vld [vmem:[%s19208_s1 + $0x68] sm:$0xf0]  ;;  %v886_v36 = vpack.c.b16 %v884_v19, %v884_v19  ;;  %v14931_v19 = vld [vmem:[%s19208_s1 + $0xa4] sm:$0xf0] }
  0x6c   :  { %808 = vmatpush.bf16.msra.mxu1 %v10305_v47  ;;  %v14882_v47 = vld [vmem:[%s19208_s1 + $0x24] sm:$0xf]  ;;  %v10385_v51 = vor.u32 %v14883_v43, %v10384_v42  ;;  %v10549_v42 = vor.u32 %v14922_v34, %v10546_v35  ;;  %v10536_v43 = vld [vmem:[%s19208_s1 + $0x50] sm:$0xf]  ;;  %v14928_v34 = vld [vmem:[%s19208_s1 + $0x94] sm:$0xf] }
  0x6d   :  { %821 = vmatpush.bf16.msra.mxu2 %v10245_v48  ;;  %v10386_v48 = vld [vmem:[%s19208_s1 + $0x28] sm:$0xf0]  ;;  %v10570_v35 = vld [vmem:[%s19208_s1 + $0x98] sm:$0xf0] }
  0x6e   :  { %834 = vmatpush.bf16.msra.mxu3 %v10309_v52  ;;  %796 = vmatmul.bf16.vlgmr.msra.gmra.mxu0 %v624_v63  ;;  %v10449_v52 = vor.u32 %v14899_v46, %v10448_v44  ;;  %v14921_v44 = vld [vmem:[%s19208_s1 + $0x54] sm:$0xf0]  ;;  %v10613_v46 = vor.u32 %v14938_v37, %v10610_v38  ;;  %v10496_v37 = vld [vmem:[%s19208_s1] sm:$0xf]  ;;  %v14911_v38 = vld [vmem:[%s19208_s1 + $0x4] sm:$0xf0] }
  0x6f   :  { %1050 = vmatpush.bf16.msrb.mxu0 %v10425_v53  ;;  %809 = vmatmul.bf16.vlgmr.msra.gmra.mxu1 %v625_v2  ;;  %v10389_v53 = vor.u32 %v14882_v47, %v10386_v48  ;;  %v14937_v47 = vld [vmem:[%s19208_s1 + $0xd4] sm:$0xf0]  ;;  %v14920_v48 = vld [vmem:[%s19208_s1 + $0x54] sm:$0xf] }
  0x70   :  { %1063 = vmatpush.bf16.msrb.mxu1 %v10489_v54  ;;  %822 = vmatmul.bf16.vlgmr.msra.gmra.mxu2 %v624_v63  ;;  %v10376_v54 = vld [vmem:[%s19208_s1 + $0x10] sm:$0xf] }
  0x71   :  { %1076 = vmatpush.bf16.msrb.mxu2 %v10429_v55  ;;  %835 = vmatmul.bf16.vlgmr.msra.gmra.mxu3 %v625_v2  ;;  %v14881_v55 = vld [vmem:[%s19208_s1 + $0x14] sm:$0xf0]  ;;  %v10432_v2 = vld [vmem:[%s19208_s1 + $0x80] sm:$0xf] }
  0x72   :  { %1089 = vmatpush.bf16.msrb.mxu3 %v10493_v59  ;;  %v14880_v59 = vld [vmem:[%s19208_s1 + $0x14] sm:$0xf]  ;;  %v10377_v63 = vor.u32 %v14881_v55, %v10376_v54  ;;  %v10541_v54 = vor.u32 %v14920_v48, %v10538_v49  ;;  %v10528_v55 = vld [vmem:[%s19208_s1 + $0x40] sm:$0xf]  ;;  %v10562_v48 = vld [vmem:[%s19208_s1 + $0x88] sm:$0xf0] }
  0x73   :  { %1051 = vmatpush.bf16.msrb.mxu0 %v10417_v3  ;;  %v10441_v3 = vor.u32 %v14897_v58, %v10440_v56  ;;  %v14919_v56 = vld [vmem:[%s19208_s1 + $0x44] sm:$0xf0]  ;;  %v10680_v49 = vld [vmem:[%s19208_s1 + $0x70] sm:$0xf] }
  0x74   :  { %1064 = vmatpush.bf16.msrb.mxu1 %v10481_v4  ;;  %v10381_v4 = vor.u32 %v14880_v59, %v10378_v60  ;;  %v14935_v59 = vld [vmem:[%s19208_s1 + $0xc4] sm:$0xf0]  ;;  %v14918_v60 = vld [vmem:[%s19208_s1 + $0x44] sm:$0xf] }
  0x75   :  { %1077 = vmatpush.bf16.msrb.mxu2 %v10421_v5  ;;  %v14895_v5 = vld [vmem:[%s19208_s1 + $0x84] sm:$0xf0] }
  0x76   :  { %1090 = vmatpush.bf16.msrb.mxu3 %v10485_v9  ;;  %v10370_v9 = vld [vmem:[%s19208_s1 + $0x8] sm:$0xf0]  ;;  %v10433_v20 = vor.u32 %v14895_v5, %v10432_v2  ;;  %v10533_v2 = vor.u32 %v14918_v60, %v10530_v61  ;;  %v10584_v5 = vld [vmem:[%s19208_s1 + $0xb0] sm:$0xf]  ;;  %v10746_v60 = vld [vmem:[%s19208_s1 + $0xf8] sm:$0xf0] }
  0x77   :  { %1052 = vmatpush.bf16.msrb.mxu0 %v10409_v15  ;;  %v10369_v15 = vor.u32 %v14879_v1, %v10368_v0  ;;  %v10529_v0 = vor.u32 %v14919_v56, %v10528_v55  ;;  %v10585_v13 = vor.u32 %v14933_v7, %v10584_v5  ;;  %v10682_v55 = vld [vmem:[%s19208_s1 + $0x78] sm:$0xf0]  ;;  %v14954_v7 = vld [vmem:[%s19208_s1 + $0x64] sm:$0xf] }
  0x78   :  { %1065 = vmatpush.bf16.msrb.mxu1 %v10473_v16  ;;  %v14941_v16 = vld [vmem:[%s19208_s1 + $0xf4] sm:$0xf0] }
  0x79   :  { %1078 = vmatpush.bf16.msrb.mxu2 %v10413_v17  ;;  %v14924_v17 = vld [vmem:[%s19208_s1 + $0x74] sm:$0xf] }
  0x7a   :  { %1091 = vmatpush.bf16.msrb.mxu3 %v10477_v21  ;;  %v10373_v21 = vor.u32 %v14878_v6, %v10370_v9  ;;  %v10522_v9 = vld [vmem:[%s19208_s1 + $0x38] sm:$0xf0] }
  0x7b   :  { %1053 = vmatpush.bf16.msrb.mxu0 %v10401_v27  ;;  %v10617_v27 = vor.u32 %v14941_v16, %v10616_v14  ;;  %v14915_v16 = vld [vmem:[%s19208_s1 + $0x24] sm:$0xf0] }
  0x7c   :  { %1066 = vmatpush.bf16.msrb.mxu1 %v10465_v28  ;;  %v10557_v28 = vor.u32 %v14924_v17, %v10554_v18  ;;  %v10576_v17 = vld [vmem:[%s19208_s1 + $0xa0] sm:$0xf]  ;;  %v10589_v18 = vor.u32 %v14932_v10, %v10586_v11  ;;  %v14970_v10 = vld [vmem:[%s19208_s1 + $0xe4] sm:$0xf]  ;;  %v10738_v11 = vld [vmem:[%s19208_s1 + $0xe8] sm:$0xf0] }
  0x7d   :  { %1079 = vmatpush.bf16.msrb.mxu2 %v10405_v29  ;;  %v10544_v29 = vld [vmem:[%s19208_s1 + $0x60] sm:$0xf] }
  0x7e   :  { %1092 = vmatpush.bf16.msrb.mxu3 %v10469_v33  ;;  %v14939_v33 = vld [vmem:[%s19208_s1 + $0xe4] sm:$0xf0] }
  0x7f   :  { %1054 = vmatpush.bf16.msrb.mxu0 %v10393_v39  ;;  %v887_v39 = vpack.c.b16 %v885_v24, %v885_v24 }
  0x80   :  { %1067 = vmatpush.bf16.msrb.mxu1 %v10457_v40  ;;  %v10545_v40 = vor.u32 %v14923_v30, %v10544_v29  ;;  %v10568_v29 = vld [vmem:[%s19208_s1 + $0x90] sm:$0xf]  ;;  %v10581_v30 = vor.u32 %v14930_v22, %v10578_v23  ;;  %v10666_v22 = vld [vmem:[%s19208_s1 + $0x58] sm:$0xf0]  ;;  %v14968_v23 = vld [vmem:[%s19208_s1 + $0xd4] sm:$0xf] }
  0x81   :  { %1080 = vmatpush.bf16.msrb.mxu2 %v10397_v41  ;;  %v10609_v41 = vor.u32 %v14939_v33, %v10608_v31  ;;  %v14929_v31 = vld [vmem:[%s19208_s1 + $0x94] sm:$0xf0]  ;;  %v10506_v33 = vld [vmem:[%s19208_s1 + $0x18] sm:$0xf0] }
  0x82   :  { %1093 = vmatpush.bf16.msrb.mxu3 %v10461_v45  ;;  %v10600_v45 = vld [vmem:[%s19208_s1 + $0xd0] sm:$0xf] }
  0x83   :  { %1055 = vmatpush.bf16.msrb.mxu0 %v10385_v51  ;;  %v10602_v51 = vld [vmem:[%s19208_s1 + $0xd8] sm:$0xf0] }
  0x84   :  { %1068 = vmatpush.bf16.msrb.mxu1 %v10449_v52  ;;  %v10537_v52 = vor.u32 %v14921_v44, %v10536_v43  ;;  %v10605_v58 = vor.u32 %v14936_v50, %v10602_v51  ;;  %v14910_v43 = vld [vmem:[%s19208_s1 + $0x4] sm:$0xf]  ;;  %v1106_v44 = vld [vmem:[%s19207_s0 + $0x10] sm:$0xff]  ;;  %v14957_v50 = vld [vmem:[%s19208_s1 + $0x74] sm:$0xf0] }
  0x85   :  { %1081 = vmatpush.bf16.msrb.mxu2 %v10389_v53  ;;  %v10601_v53 = vor.u32 %v14937_v47, %v10600_v45  ;;  %v10573_v45 = vor.u32 %v14928_v34, %v10570_v35  ;;  %v14926_v47 = vld [vmem:[%s19208_s1 + $0x84] sm:$0xf]  ;;  %v10744_v51 = vld [vmem:[%s19208_s1 + $0xf0] sm:$0xf]  ;;  %v1146_v56 = vunpack.c.l.b16 %v1106_v44  ;;  %v1147_v61 = vunpack.c.h.b16 %v1106_v44  ;;  %v10658_v34 = vld [vmem:[%s19208_s1 + $0x48] sm:$0xf0] }
  0x86   :  { %1094 = vmatpush.bf16.msrb.mxu3 %v10453_v57  ;;  %v10592_v57 = vld [vmem:[%s19208_s1 + $0xc0] sm:$0xf]  ;;  %v14966_v35 = vld [vmem:[%s19208_s1 + $0xc4] sm:$0xf] }
  0x87   :  { %1056 = vmatpush.bf16.msrb.mxu0 %v10377_v63  ;;  %v10594_v63 = vld [vmem:[%s19208_s1 + $0xc8] sm:$0xf0]  ;;  %v10593_v1 = vor.u32 %v14935_v59, %v10592_v57  ;;  %v14972_v59 = vld [vmem:[%s19208_s1 + $0xf4] sm:$0xf] }
  0x88   :  { %1069 = vmatpush.bf16.msrb.mxu1 %v10441_v3  ;;  %v10520_v3 = vld [vmem:[%s19208_s1 + $0x30] sm:$0xf]  ;;  %v10597_v6 = vor.u32 %v14934_v62, %v10594_v63  ;;  %v10565_v62 = vor.u32 %v14926_v47, %v10562_v48  ;;  %v10681_v63 = vor.u32 %v14957_v50, %v10680_v49  ;;  %v10749_v5 = vor.u32 %v14972_v59, %v10746_v60  ;;  %v91_v47 = vld [vmem:[%s19209_s2] sm:$0x3]  ;;  %v14964_v48 = vld [vmem:[%s19208_s1 + $0xb4] sm:$0xf] }
  0x89   :  { %1082 = vmatpush.bf16.msrb.mxu2 %v10381_v4  ;;  %v14917_v4 = vld [vmem:[%s19208_s1 + $0x34] sm:$0xf0]  ;;  %v10714_v49 = vld [vmem:[%s19208_s1 + $0xb8] sm:$0xf0]  ;;  %v14946_v59 = vld [vmem:[%s19208_s1 + $0x24] sm:$0xf] }
  0x8a   :  { %1095 = vmatpush.bf16.msrb.mxu3 %v10445_v8  ;;  %v14916_v8 = vld [vmem:[%s19208_s1 + $0x34] sm:$0xf]  ;;  %v10521_v12 = vor.u32 %v14917_v4, %v10520_v3  ;;  %v14955_v3 = vld [vmem:[%s19208_s1 + $0x64] sm:$0xf0]  ;;  %v10736_v4 = vld [vmem:[%s19208_s1 + $0xe0] sm:$0xf] }
  0x8b   :  { %1057 = vmatpush.bf16.msrb.mxu0 %v10369_v15  ;;  %v10525_v14 = vor.u32 %v14916_v8, %v10522_v9  ;;  %v10512_v15 = vld [vmem:[%s19208_s1 + $0x20] sm:$0xf]  ;;  %v10674_v8 = vld [vmem:[%s19208_s1 + $0x68] sm:$0xf0]  ;;  %v1148_v9 = vpack.c.b16 %v1146_v56, %v1146_v56  ;;  %v93_v56 = vperm.slane %v91_v47, 0 }
  0x8c   :  { %1070 = vmatpush.bf16.msrb.mxu1 %v10433_v20  ;;  %v14914_v20 = vld [vmem:[%s19208_s1 + $0x24] sm:$0xf]  ;;  %v10513_v24 = vor.u32 %v14915_v16, %v10512_v15  ;;  %v10677_v15 = vor.u32 %v14954_v7, %v10674_v8  ;;  %v10664_v16 = vld [vmem:[%s19208_s1 + $0x50] sm:$0xf]  ;;  %v10642_v60 = vld [vmem:[%s19208_s1 + $0x28] sm:$0xf0] }
  0x8d   :  { %1083 = vmatpush.bf16.msrb.mxu2 %v10373_v21  ;;  %v10514_v21 = vld [vmem:[%s19208_s1 + $0x28] sm:$0xf0] }
  0x8e   :  { %1096 = vmatpush.bf16.msrb.mxu3 %v10437_v25  ;;  %1058 = vmatmul.bf16.vlgmr.msrb.gmra.mxu0 %v886_v36  ;;  %v10577_v25 = vor.u32 %v14931_v19, %v10576_v17  ;;  %v14953_v17 = vld [vmem:[%s19208_s1 + $0x54] sm:$0xf0]  ;;  %v10741_v19 = vor.u32 %v14970_v10, %v10738_v11  ;;  %v14944_v10 = vld [vmem:[%s19208_s1 + $0x14] sm:$0xf]  ;;  %v10634_v11 = vld [vmem:[%s19208_s1 + $0x18] sm:$0xf0] }
  0x8f   :  { %1312 = vmatpush.bf16.msra.mxu0 %v10553_v26  ;;  %1071 = vmatmul.bf16.vlgmr.msrb.gmra.mxu1 %v887_v39  ;;  %v10517_v26 = vor.u32 %v14914_v20, %v10514_v21  ;;  %v14969_v20 = vld [vmem:[%s19208_s1 + $0xd4] sm:$0xf0]  ;;  %v14952_v21 = vld [vmem:[%s19208_s1 + $0x54] sm:$0xf] }
  0x90   :  { %1325 = vmatpush.bf16.msra.mxu1 %v10617_v27  ;;  %1084 = vmatmul.bf16.vlgmr.msrb.gmra.mxu2 %v886_v36  ;;  %v10504_v27 = vld [vmem:[%s19208_s1 + $0x10] sm:$0xf] }
  0x91   :  { %1338 = vmatpush.bf16.msra.mxu2 %v10557_v28  ;;  %1097 = vmatmul.bf16.vlgmr.msrb.gmra.mxu3 %v887_v39  ;;  %v14913_v28 = vld [vmem:[%s19208_s1 + $0x14] sm:$0xf0]  ;;  %v10560_v39 = vld [vmem:[%s19208_s1 + $0x80] sm:$0xf] }
  0x92   :  { %1351 = vmatpush.bf16.msra.mxu3 %v10621_v32  ;;  %v14912_v32 = vld [vmem:[%s19208_s1 + $0x14] sm:$0xf]  ;;  %v10505_v36 = vor.u32 %v14913_v28, %v10504_v27  ;;  %v10669_v27 = vor.u32 %v14952_v21, %v10666_v22  ;;  %v10656_v28 = vld [vmem:[%s19208_s1 + $0x40] sm:$0xf]  ;;  %v10637_v22 = vor.u32 %v14944_v10, %v10634_v11  ;;  %v15001_v10 = vld [vmem:[%s19208_s1 + $0xd4] sm:$0xf0] }
  0x93   :  { %1313 = vmatpush.bf16.msra.mxu0 %v10545_v40  ;;  %v10569_v40 = vor.u32 %v14929_v31, %v10568_v29  ;;  %v14951_v29 = vld [vmem:[%s19208_s1 + $0x44] sm:$0xf0] }
  0x94   :  { %1326 = vmatpush.bf16.msra.mxu1 %v10609_v41  ;;  %v10509_v41 = vor.u32 %v14912_v32, %v10506_v33  ;;  %v14967_v32 = vld [vmem:[%s19208_s1 + $0xc4] sm:$0xf0]  ;;  %v14950_v33 = vld [vmem:[%s19208_s1 + $0x44] sm:$0xf] }
  0x95   :  { %1339 = vmatpush.bf16.msra.mxu2 %v10549_v42  ;;  %v14927_v42 = vld [vmem:[%s19208_s1 + $0x84] sm:$0xf0] }
  0x96   :  { %1352 = vmatpush.bf16.msra.mxu3 %v10613_v46  ;;  %v10498_v46 = vld [vmem:[%s19208_s1 + $0x8] sm:$0xf0]  ;;  %v10561_v57 = vor.u32 %v14927_v42, %v10560_v39  ;;  %v10712_v42 = vld [vmem:[%s19208_s1 + $0xb0] sm:$0xf] }
  0x97   :  { %1314 = vmatpush.bf16.msra.mxu0 %v10537_v52  ;;  %v10497_v52 = vor.u32 %v14911_v38, %v10496_v37  ;;  %v10657_v37 = vor.u32 %v14951_v29, %v10656_v28  ;;  %v10648_v38 = vld [vmem:[%s19208_s1 + $0x30] sm:$0xf]  ;;  %v14958_v28 = vld [vmem:[%s19208_s1 + $0x84] sm:$0xf]  ;;  %v10690_v29 = vld [vmem:[%s19208_s1 + $0x88] sm:$0xf0] }
  0x98   :  { %1327 = vmatpush.bf16.msra.mxu1 %v10601_v53  ;;  %v14973_v53 = vld [vmem:[%s19208_s1 + $0xf4] sm:$0xf0] }
  0x99   :  { %1340 = vmatpush.bf16.msra.mxu2 %v10541_v54  ;;  %v14956_v54 = vld [vmem:[%s19208_s1 + $0x74] sm:$0xf] }
  0x9a   :  { %1353 = vmatpush.bf16.msra.mxu3 %v10605_v58  ;;  %v10501_v58 = vor.u32 %v14910_v43, %v10498_v46  ;;  %v14965_v43 = vld [vmem:[%s19208_s1 + $0xb4] sm:$0xf0]  ;;  %v10650_v46 = vld [vmem:[%s19208_s1 + $0x38] sm:$0xf0] }
  0x9b   :  { %1315 = vmatpush.bf16.msra.mxu0 %v10529_v0  ;;  %v10745_v0 = vor.u32 %v14973_v53, %v10744_v51  ;;  %v10640_v51 = vld [vmem:[%s19208_s1 + $0x20] sm:$0xf] }
  0x9c   :  { %1328 = vmatpush.bf16.msra.mxu1 %v10593_v1  ;;  %v10685_v1 = vor.u32 %v14956_v54, %v10682_v55  ;;  %v14947_v54 = vld [vmem:[%s19208_s1 + $0x24] sm:$0xf0]  ;;  %v10704_v55 = vld [vmem:[%s19208_s1 + $0xa0] sm:$0xf] }
  0x9d   :  { %1341 = vmatpush.bf16.msra.mxu2 %v10533_v2  ;;  %v10672_v2 = vld [vmem:[%s19208_s1 + $0x60] sm:$0xf] }
  0x9e   :  { %1354 = vmatpush.bf16.msra.mxu3 %v10597_v6  ;;  %v14971_v6 = vld [vmem:[%s19208_s1 + $0xe4] sm:$0xf0] }
  0x9f   :  { %1316 = vmatpush.bf16.msra.mxu0 %v10521_v12  ;;  %v1149_v12 = vpack.c.b16 %v1147_v61, %v1147_v61  ;;  %v14962_v61 = vld [vmem:[%s19208_s1 + $0xa4] sm:$0xf] }
  0xa0   :  { %1329 = vmatpush.bf16.msra.mxu1 %v10585_v13  ;;  %v10673_v13 = vor.u32 %v14955_v3, %v10672_v2  ;;  %v10645_v3 = vor.u32 %v14946_v59, %v10642_v60  ;;  %v14986_v59 = vld [vmem:[%s19208_s1 + $0x64] sm:$0xf]  ;;  %v10802_v60 = vld [vmem:[%s19208_s1 + $0x68] sm:$0xf0] }
  0xa1   :  { %1342 = vmatpush.bf16.msra.mxu2 %v10525_v14  ;;  %v10737_v14 = vor.u32 %v14971_v6, %v10736_v4  ;;  %v14945_v4 = vld [vmem:[%s19208_s1 + $0x14] sm:$0xf0] }
  0xa2   :  { %1355 = vmatpush.bf16.msra.mxu3 %v10589_v18  ;;  %v10728_v18 = vld [vmem:[%s19208_s1 + $0xd0] sm:$0xf]  ;;  %v14961_v6 = vld [vmem:[%s19208_s1 + $0x94] sm:$0xf0] }
  0xa3   :  { %1317 = vmatpush.bf16.msra.mxu0 %v10513_v24  ;;  %v10730_v24 = vld [vmem:[%s19208_s1 + $0xd8] sm:$0xf0] }
  0xa4   :  { %1330 = vmatpush.bf16.msra.mxu1 %v10577_v25  ;;  %v10665_v25 = vor.u32 %v14953_v17, %v10664_v16  ;;  %v10733_v31 = vor.u32 %v14968_v23, %v10730_v24  ;;  %v14942_v23 = vld [vmem:[%s19208_s1 + $0x4] sm:$0xf]  ;;  %v10626_v24 = vld [vmem:[%s19208_s1 + $0x8] sm:$0xf0] }
  0xa5   :  { %1343 = vmatpush.bf16.msra.mxu2 %v10517_v26  ;;  %v10729_v26 = vor.u32 %v14969_v20, %v10728_v18  ;;  %v14943_v18 = vld [vmem:[%s19208_s1 + $0x4] sm:$0xf0] }
  0xa6   :  { %1356 = vmatpush.bf16.msra.mxu3 %v10581_v30  ;;  %v10720_v30 = vld [vmem:[%s19208_s1 + $0xc0] sm:$0xf]  ;;  %v14959_v20 = vld [vmem:[%s19208_s1 + $0x84] sm:$0xf0] }
  0xa7   :  { %1318 = vmatpush.bf16.msra.mxu0 %v10505_v36  ;;  %v10722_v36 = vld [vmem:[%s19208_s1 + $0xc8] sm:$0xf0]  ;;  %v10721_v39 = vor.u32 %v14967_v32, %v10720_v30  ;;  %v10808_v30 = vld [vmem:[%s19208_s1 + $0x70] sm:$0xf] }
  0xa8   :  { %1331 = vmatpush.bf16.msra.mxu1 %v10569_v40  ;;  %v10661_v40 = vor.u32 %v14950_v33, %v10658_v34  ;;  %v10725_v44 = vor.u32 %v14966_v35, %v10722_v36  ;;  %v14989_v33 = vld [vmem:[%s19208_s1 + $0x74] sm:$0xf0]  ;;  %v10872_v34 = vld [vmem:[%s19208_s1 + $0xf0] sm:$0xf] }
  0xa9   :  { %1344 = vmatpush.bf16.msra.mxu2 %v10509_v41  ;;  %v14949_v41 = vld [vmem:[%s19208_s1 + $0x34] sm:$0xf0] }
  0xaa   :  { %1357 = vmatpush.bf16.msra.mxu3 %v10573_v45  ;;  %v14948_v45 = vld [vmem:[%s19208_s1 + $0x34] sm:$0xf]  ;;  %v10649_v50 = vor.u32 %v14949_v41, %v10648_v38  ;;  %v15005_v35 = vld [vmem:[%s19208_s1 + $0xf4] sm:$0xf0]  ;;  %v10810_v38 = vld [vmem:[%s19208_s1 + $0x78] sm:$0xf0] }
  0xab   :  { %1319 = vmatpush.bf16.msra.mxu0 %v10497_v52  ;;  %v10713_v52 = vor.u32 %v14965_v43, %v10712_v42  ;;  %v10653_v53 = vor.u32 %v14948_v45, %v10650_v46  ;;  %v15004_v45 = vld [vmem:[%s19208_s1 + $0xf4] sm:$0xf]  ;;  %v10874_v46 = vld [vmem:[%s19208_s1 + $0xf8] sm:$0xf0] }
  0xac   :  { %1332 = vmatpush.bf16.msra.mxu1 %v10561_v57  ;;  %v10717_v57 = vor.u32 %v14964_v48, %v10714_v49  ;;  %v286_v8 = vpop.f32.mrf.mxu1  ;;  %v10693_v49 = vor.u32 %v14958_v28, %v10690_v29  ;;  %v14998_v28 = vld [vmem:[%s19208_s1 + $0xc4] sm:$0xf]  ;;  %v10850_v29 = vld [vmem:[%s19208_s1 + $0xc8] sm:$0xf0] }
  0xad   :  { %1345 = vmatpush.bf16.msra.mxu2 %v10501_v58  ;;  %v14963_v58 = vld [vmem:[%s19208_s1 + $0xa4] sm:$0xf0] }
  0xae   :  { %1358 = vmatpush.bf16.msra.mxu3 %v10565_v62  ;;  %1320 = vmatmul.bf16.vlgmr.msra.gmra.mxu0 %v1148_v9  ;;  %v10706_v62 = vld [vmem:[%s19208_s1 + $0xa8] sm:$0xf0]  ;;  %v10705_v2 = vor.u32 %v14963_v58, %v10704_v55  ;;  %v14987_v55 = vld [vmem:[%s19208_s1 + $0x64] sm:$0xf0] }
  0xaf   :  { %1574 = vmatpush.bf16.msrb.mxu0 %v10681_v63  ;;  %1333 = vmatmul.bf16.vlgmr.msra.gmra.mxu1 %v1149_v12  ;;  %v10641_v63 = vor.u32 %v14947_v54, %v10640_v51  ;;  %v10800_v54 = vld [vmem:[%s19208_s1 + $0x60] sm:$0xf]  ;;  %v15003_v58 = vld [vmem:[%s19208_s1 + $0xe4] sm:$0xf0] }
  0xb0   :  { %1587 = vmatpush.bf16.msrb.mxu1 %v10745_v0  ;;  %1346 = vmatmul.bf16.vlgmr.msra.gmra.mxu2 %v1148_v9  ;;  %v10632_v0 = vld [vmem:[%s19208_s1 + $0x10] sm:$0xf]  ;;  %v10709_v9 = vor.u32 %v14962_v61, %v10706_v62 }
  0xb1   :  { %1600 = vmatpush.bf16.msrb.mxu2 %v10685_v1  ;;  %1359 = vmatmul.bf16.vlgmr.msra.gmra.mxu3 %v1149_v12  ;;  %v273_v1 = vpop.f32.mrf.mxu0  ;;  %v94_v12 = vperm.slane %v91_v47, 1  ;;  %v10633_v17 = vor.u32 %v14945_v4, %v10632_v0  ;;  %v10866_v0 = vld [vmem:[%s19208_s1 + $0xe8] sm:$0xf0]  ;;  %v10792_v4 = vld [vmem:[%s19208_s1 + $0x50] sm:$0xf] }
  0xb2   :  { %1613 = vmatpush.bf16.msrb.mxu3 %v10749_v5  ;;  %v10696_v5 = vld [vmem:[%s19208_s1 + $0x90] sm:$0xf]  ;;  %v274_v7 = vadd.f32 %v273_v1, %v93_v56  ;;  %v10864_v56 = vld [vmem:[%s19208_s1 + $0xe0] sm:$0xf] }
  0xb3   :  { %1575 = vmatpush.bf16.msrb.mxu0 %v10673_v13  ;;  %v14960_v13 = vld [vmem:[%s19208_s1 + $0x94] sm:$0xf]  ;;  %v10697_v21 = vor.u32 %v14961_v6, %v10696_v5  ;;  %v10865_v6 = vor.u32 %v15003_v58, %v10864_v56  ;;  %v14978_v56 = vld [vmem:[%s19208_s1 + $0x24] sm:$0xf] }
  0xb4   :  { %1588 = vmatpush.bf16.msrb.mxu1 %v10737_v14  ;;  %v10698_v14 = vld [vmem:[%s19208_s1 + $0x98] sm:$0xf0]  ;;  %v287_v16 = vadd.f32 %v286_v8, %v274_v7  ;;  %v312_v32 = vpop.f32.mrf.mxu3  ;;  %v288_v47 = vpop.f32.mrf.mxu1  ;;  %v10805_v7 = vor.u32 %v14986_v59, %v10802_v60  ;;  %v14985_v8 = vld [vmem:[%s19208_s1 + $0x54] sm:$0xf0]  ;;  %v14994_v60 = vld [vmem:[%s19208_s1 + $0xa4] sm:$0xf] }
  0xb5   :  { %1601 = vmatpush.bf16.msrb.mxu2 %v10677_v15  ;;  %v10624_v15 = vld [vmem:[%s19208_s1] sm:$0xf] }
  0xb6   :  { %1614 = vmatpush.bf16.msrb.mxu3 %v10741_v19  ;;  %v10688_v19 = vld [vmem:[%s19208_s1 + $0x80] sm:$0xf]  ;;  %v10625_v36 = vor.u32 %v14943_v18, %v10624_v15  ;;  %v15000_v15 = vld [vmem:[%s19208_s1 + $0xd4] sm:$0xf] }
  0xb7   :  { %1576 = vmatpush.bf16.msrb.mxu0 %v10665_v25  ;;  %v299_v25 = vpop.f32.mrf.mxu2  ;;  %v10689_v43 = vor.u32 %v14959_v20, %v10688_v19  ;;  %v10784_v18 = vld [vmem:[%s19208_s1 + $0x40] sm:$0xf] }
  0xb8   :  { %1589 = vmatpush.bf16.msrb.mxu1 %v10729_v26  ;;  %v1368_v26 = vld [vmem:[%s19207_s0 + $0x14] sm:$0xff] }
  0xb9   :  { %1602 = vmatpush.bf16.msrb.mxu2 %v10669_v27  ;;  %v10701_v27 = vor.u32 %v14960_v13, %v10698_v14  ;;  %v275_v41 = vpop.f32.mrf.mxu0  ;;  %v1408_v42 = vunpack.c.l.b16 %v1368_v26  ;;  %v1409_v48 = vunpack.c.h.b16 %v1368_v26  ;;  %v10794_v13 = vld [vmem:[%s19208_s1 + $0x58] sm:$0xf0]  ;;  %v353_v14 = vld [vmem:[%s19209_s2] sm:$0x3]  ;;  %v14982_v26 = vld [vmem:[%s19208_s1 + $0x44] sm:$0xf] }
  0xba   :  { %1615 = vmatpush.bf16.msrb.mxu3 %v10733_v31  ;;  %v300_v31 = vadd.f32 %v299_v25, %v94_v12  ;;  %v14984_v12 = vld [vmem:[%s19208_s1 + $0x54] sm:$0xf]  ;;  %v14999_v25 = vld [vmem:[%s19208_s1 + $0xc4] sm:$0xf0] }
  0xbb   :  { %1577 = vmatpush.bf16.msrb.mxu0 %v10657_v37  ;;  %v14988_v37 = vld [vmem:[%s19208_s1 + $0x74] sm:$0xf]  ;;  %v1410_v62 = vpack.c.b16 %v1408_v42, %v1408_v42  ;;  %v10797_v20 = vor.u32 %v14984_v12, %v10794_v13  ;;  %v10778_v42 = vld [vmem:[%s19208_s1 + $0x38] sm:$0xf0] }
  0xbc   :  { %1590 = vmatpush.bf16.msrb.mxu1 %v10721_v39  ;;  %v316_v39 = vmax.f32 %v287_v16, 0.0  ;;  %v314_v5 = vpop.f32.mrf.mxu3  ;;  %v10858_v16 = vld [vmem:[%s19208_s1 + $0xd8] sm:$0xf0]  ;;  %v14980_v41 = vld [vmem:[%s19208_s1 + $0x34] sm:$0xf] }
  0xbd   :  { %1603 = vmatpush.bf16.msrb.mxu2 %v10661_v40  ;;  %v313_v40 = vadd.f32 %v312_v32, %v300_v31  ;;  %v10776_v31 = vld [vmem:[%s19208_s1 + $0x30] sm:$0xf]  ;;  %v10762_v12 = vld [vmem:[%s19208_s1 + $0x18] sm:$0xf0] }
  0xbe   :  { %1616 = vmatpush.bf16.msrb.mxu3 %v10725_v44  ;;  %v10629_v44 = vor.u32 %v14942_v23, %v10626_v24  ;;  %v355_v23 = vperm.slane %v353_v14, 0  ;;  %v10861_v24 = vor.u32 %v15000_v15, %v10858_v16  ;;  %v10826_v15 = vld [vmem:[%s19208_s1 + $0x98] sm:$0xf0] }
  0xbf   :  { %1578 = vmatpush.bf16.msrb.mxu0 %v10649_v50  ;;  %v10809_v50 = vor.u32 %v14989_v33, %v10808_v30  ;;  %v317_v51 = vmax.f32 %v313_v40, 0.0  ;;  %v301_v1 = vpop.f32.mrf.mxu2  ;;  %v10853_v40 = vor.u32 %v14998_v28, %v10850_v29  ;;  %v10754_v28 = vld [vmem:[%s19208_s1 + $0x8] sm:$0xf0]  ;;  %v14990_v29 = vld [vmem:[%s19208_s1 + $0x84] sm:$0xf] }
  0xc0   :  { %1591 = vmatpush.bf16.msrb.mxu1 %v10713_v52  ;;  %v10873_v52 = vor.u32 %v15005_v35, %v10872_v34  ;;  %v14981_v35 = vld [vmem:[%s19208_s1 + $0x34] sm:$0xf0] }
  0xc1   :  { %1604 = vmatpush.bf16.msrb.mxu2 %v10653_v53  ;;  %v10813_v53 = vor.u32 %v14988_v37, %v10810_v38  ;;  %v17308_v61 = vpack.c.bf16 %v317_v51, %v316_v39  ;;  %v14997_v37 = vld [vmem:[%s19208_s1 + $0xb4] sm:$0xf0]  ;;  %v10777_v47 = vor.u32 %v14981_v35, %v10776_v31  ;;  %v14979_v51 = vld [vmem:[%s19208_s1 + $0x24] sm:$0xf0] }
  0xc2   :  { %1617 = vmatpush.bf16.msrb.mxu3 %v10717_v57  ;;  %v10877_v57 = vor.u32 %v15004_v45, %v10874_v46  ;;  %v10842_v45 = vld [vmem:[%s19208_s1 + $0xb8] sm:$0xf0] }
  0xc3   :  { %1579 = vmatpush.bf16.msrb.mxu0 %v10641_v63  ;;  %v15002_v63 = vld [vmem:[%s19208_s1 + $0xe4] sm:$0xf] }
  0xc4   :  { %1592 = vmatpush.bf16.msrb.mxu1 %v10705_v2  ;;  %v1411_v2 = vpack.c.b16 %v1409_v48, %v1409_v48  ;;  %v10869_v11 = vor.u32 %v15002_v63, %v10866_v0  ;;  %v10760_v0 = vld [vmem:[%s19208_s1 + $0x10] sm:$0xf] }
  0xc5   :  { %1605 = vmatpush.bf16.msrb.mxu2 %v10645_v3  ;;  %v10801_v3 = vor.u32 %v14987_v55, %v10800_v54  ;;  %v14995_v55 = vld [vmem:[%s19208_s1 + $0xa4] sm:$0xf0] }
  0xc6   :  { %1618 = vmatpush.bf16.msrb.mxu3 %v10709_v9  ;;  %v10856_v9 = vld [vmem:[%s19208_s1 + $0xd0] sm:$0xf] }
  0xc7   :  { %1580 = vmatpush.bf16.msrb.mxu0 %v10633_v17  ;;  %v10793_v17 = vor.u32 %v14985_v8, %v10792_v4  ;;  %v10857_v19 = vor.u32 %v15001_v10, %v10856_v9  ;;  %v14993_v8 = vld [vmem:[%s19208_s1 + $0x94] sm:$0xf0] }
  0xc8   :  { %1593 = vmatpush.bf16.msrb.mxu1 %v10697_v21  ;;  %v14983_v21 = vld [vmem:[%s19208_s1 + $0x44] sm:$0xf0] }
  0xc9   :  { %1606 = vmatpush.bf16.msrb.mxu2 %v10637_v22  ;;  %v10848_v22 = vld [vmem:[%s19208_s1 + $0xc0] sm:$0xf]  ;;  %v10785_v30 = vor.u32 %v14983_v21, %v10784_v18  ;;  %v14975_v18 = vld [vmem:[%s19208_s1 + $0x4] sm:$0xf0] }
  0xca   :  { %1619 = vmatpush.bf16.msrb.mxu3 %v10701_v27  ;;  %v10786_v27 = vld [vmem:[%s19208_s1 + $0x48] sm:$0xf0]  ;;  %v10849_v33 = vor.u32 %v14999_v25, %v10848_v22 }
  0xcb   :  { %1581 = vmatpush.bf16.msrb.mxu0 %v10625_v36  ;;  %v535_v32 = vpop.f32.mrf.mxu0  ;;  %v10789_v34 = vor.u32 %v14982_v26, %v10786_v27  ;;  %v10840_v36 = vld [vmem:[%s19208_s1 + $0xb0] sm:$0xf]  ;;  %v1630_v26 = vld [vmem:[%s19207_s0 + $0x18] sm:$0xff] }
  0xcc   :  { %1594 = vmatpush.bf16.msrb.mxu1 %v10689_v43  ;;  %v536_v38 = vadd.f32 %v535_v32, %v355_v23  ;;  %v548_v39 = vpop.f32.mrf.mxu1  ;;  %v356_v43 = vperm.slane %v353_v14, 1  ;;  %v10841_v48 = vor.u32 %v14997_v37, %v10840_v36  ;;  %v14992_v14 = vld [vmem:[%s19208_s1 + $0x94] sm:$0xf]  ;;  %v14991_v23 = vld [vmem:[%s19208_s1 + $0x84] sm:$0xf0] }
  0xcd   :  { %1607 = vmatpush.bf16.msrb.mxu2 %v10629_v44  ;;  %v14996_v44 = vld [vmem:[%s19208_s1 + $0xb4] sm:$0xf]  ;;  %v10829_v27 = vor.u32 %v14992_v14, %v10826_v15  ;;  %v10936_v32 = vld [vmem:[%s19208_s1 + $0x70] sm:$0xf]  ;;  %v15037_v36 = vld [vmem:[%s19208_s1 + $0xf4] sm:$0xf0] }
  0xce   :  { %1620 = vmatpush.bf16.msrb.mxu3 %v10693_v49  ;;  %1582 = vmatmul.bf16.vlgmr.msrb.gmra.mxu0 %v1410_v62  ;;  %v549_v46 = vadd.f32 %v548_v39, %v536_v38  ;;  %v10781_v49 = vor.u32 %v14980_v41, %v10778_v42  ;;  %v10845_v54 = vor.u32 %v14996_v44, %v10842_v45  ;;  %v15020_v37 = vld [vmem:[%s19208_s1 + $0x74] sm:$0xf]  ;;  %v10938_v38 = vld [vmem:[%s19208_s1 + $0x78] sm:$0xf0]  ;;  %v1670_v39 = vunpack.c.l.b16 %v1630_v26  ;;  %v15015_v14 = vld [vmem:[%s19208_s1 + $0x44] sm:$0xf0] }
  0xcf   :  { %1836 = vmatpush.bf16.msra.mxu0 %v10809_v50  ;;  %1595 = vmatmul.bf16.vlgmr.msrb.gmra.mxu1 %v1411_v2  ;;  %v10768_v50 = vld [vmem:[%s19208_s1 + $0x20] sm:$0xf]  ;;  %v15036_v42 = vld [vmem:[%s19208_s1 + $0xf4] sm:$0xf]  ;;  %v1671_v44 = vunpack.c.h.b16 %v1630_v26 }
  0xd0   :  { %1849 = vmatpush.bf16.msra.mxu1 %v10873_v52  ;;  %1608 = vmatmul.bf16.vlgmr.msrb.gmra.mxu2 %v1410_v62  ;;  %v10832_v52 = vld [vmem:[%s19208_s1 + $0xa0] sm:$0xf]  ;;  %v10834_v62 = vld [vmem:[%s19208_s1 + $0xa8] sm:$0xf0]  ;;  %v10769_v63 = vor.u32 %v14979_v51, %v10768_v50  ;;  %v578_v1 = vmax.f32 %v549_v46, 0.0 }
  0xd1   :  { %1862 = vmatpush.bf16.msra.mxu2 %v10813_v53  ;;  %1621 = vmatmul.bf16.vlgmr.msrb.gmra.mxu3 %v1411_v2  ;;  %v10833_v4 = vor.u32 %v14995_v55, %v10832_v52  ;;  %v10837_v10 = vor.u32 %v14994_v60, %v10834_v62  ;;  %v15019_v50 = vld [vmem:[%s19208_s1 + $0x64] sm:$0xf0]  ;;  %v10992_v51 = vld [vmem:[%s19208_s1 + $0xe0] sm:$0xf]  ;;  %v10930_v55 = vld [vmem:[%s19208_s1 + $0x68] sm:$0xf0] }
  0xd2   :  { %1875 = vmatpush.bf16.msra.mxu3 %v10877_v57  ;;  %v10770_v57 = vld [vmem:[%s19208_s1 + $0x28] sm:$0xf0]  ;;  %v10920_v62 = vld [vmem:[%s19208_s1 + $0x50] sm:$0xf]  ;;  %v10976_v15 = vld [vmem:[%s19208_s1 + $0xc0] sm:$0xf] }
  0xd3   :  { %1837 = vmatpush.bf16.msra.mxu0 %v10801_v3  ;;  %v561_v53 = vpop.f32.mrf.mxu2  ;;  %v537_v3 = vpop.f32.mrf.mxu0  ;;  %v10773_v5 = vor.u32 %v14978_v56, %v10770_v57  ;;  %v1672_v56 = vpack.c.b16 %v1670_v39, %v1670_v39  ;;  %v15034_v57 = vld [vmem:[%s19208_s1 + $0xe4] sm:$0xf]  ;;  %v10970_v39 = vld [vmem:[%s19208_s1 + $0xb8] sm:$0xf0] }
  0xd4   :  { %1850 = vmatpush.bf16.msra.mxu1 %v10865_v6  ;;  %v562_v58 = vadd.f32 %v561_v53, %v356_v43  ;;  %v574_v59 = vpop.f32.mrf.mxu3  ;;  %v14977_v6 = vld [vmem:[%s19208_s1 + $0x14] sm:$0xf0]  ;;  %v550_v9 = vpop.f32.mrf.mxu1  ;;  %v11002_v43 = vld [vmem:[%s19208_s1 + $0xf8] sm:$0xf0]  ;;  %v15035_v53 = vld [vmem:[%s19208_s1 + $0xe4] sm:$0xf0] }
  0xd5   :  { %1863 = vmatpush.bf16.msra.mxu2 %v10805_v7  ;;  %v10824_v7 = vld [vmem:[%s19208_s1 + $0x90] sm:$0xf]  ;;  %v10761_v16 = vor.u32 %v14977_v6, %v10760_v0  ;;  %v11005_v52 = vor.u32 %v15036_v42, %v11002_v43  ;;  %v15033_v3 = vld [vmem:[%s19208_s1 + $0xd4] sm:$0xf0]  ;;  %v10922_v6 = vld [vmem:[%s19208_s1 + $0x58] sm:$0xf0] }
  0xd6   :  { %1876 = vmatpush.bf16.msra.mxu3 %v10869_v11  ;;  %v575_v2 = vadd.f32 %v574_v59, %v562_v58  ;;  %v14976_v11 = vld [vmem:[%s19208_s1 + $0x14] sm:$0xf]  ;;  %v10825_v21 = vor.u32 %v14993_v8, %v10824_v7  ;;  %v10994_v58 = vld [vmem:[%s19208_s1 + $0xe8] sm:$0xf0]  ;;  %v1673_v59 = vpack.c.b16 %v1671_v44, %v1671_v44  ;;  %v615_v7 = vld [vmem:[%s19209_s2] sm:$0x3] }
  0xd7   :  { %1838 = vmatpush.bf16.msra.mxu0 %v10793_v17  ;;  %v10752_v17 = vld [vmem:[%s19208_s1] sm:$0xf]  ;;  %v10765_v22 = vor.u32 %v14976_v11, %v10762_v12  ;;  %v15032_v8 = vld [vmem:[%s19208_s1 + $0xd4] sm:$0xf]  ;;  %v10986_v9 = vld [vmem:[%s19208_s1 + $0xd8] sm:$0xf0] }
  0xd8   :  { %1851 = vmatpush.bf16.msra.mxu1 %v10857_v19  ;;  %v579_v13 = vmax.f32 %v575_v2, 0.0  ;;  %v10816_v19 = vld [vmem:[%s19208_s1 + $0x80] sm:$0xf]  ;;  %v10753_v35 = vor.u32 %v14975_v18, %v10752_v17  ;;  %v10984_v2 = vld [vmem:[%s19208_s1 + $0xd0] sm:$0xf]  ;;  %v10989_v17 = vor.u32 %v15032_v8, %v10986_v9 }
  0xd9   :  { %1864 = vmatpush.bf16.msra.mxu2 %v10797_v20  ;;  %v10912_v11 = vld [vmem:[%s19208_s1 + $0x40] sm:$0xf]  ;;  %v10985_v12 = vor.u32 %v15033_v3, %v10984_v2  ;;  %v15031_v18 = vld [vmem:[%s19208_s1 + $0xc4] sm:$0xf0]  ;;  %v15025_v2 = vld [vmem:[%s19208_s1 + $0x94] sm:$0xf0] }
  0xda   :  { %1877 = vmatpush.bf16.msra.mxu3 %v10861_v24  ;;  %v17448_v20 = vpack.c.bf16 %v579_v13, %v578_v1  ;;  %v14974_v24 = vld [vmem:[%s19208_s1 + $0x4] sm:$0xf]  ;;  %v15017_v1 = vld [vmem:[%s19208_s1 + $0x54] sm:$0xf0]  ;;  %v10896_v44 = vld [vmem:[%s19208_s1 + $0x20] sm:$0xf] }
  0xdb   :  { %1839 = vmatpush.bf16.msra.mxu0 %v10785_v30  ;;  %v563_v25 = vpop.f32.mrf.mxu2  ;;  %v10818_v30 = vld [vmem:[%s19208_s1 + $0x88] sm:$0xf0]  ;;  %v10757_v41 = vor.u32 %v14974_v24, %v10754_v28  ;;  %v10913_v24 = vor.u32 %v15015_v14, %v10912_v11  ;;  %v15024_v8 = vld [vmem:[%s19208_s1 + $0x94] sm:$0xf]  ;;  %v10954_v9 = vld [vmem:[%s19208_s1 + $0x98] sm:$0xf0] }
  0xdc   :  { %1852 = vmatpush.bf16.msra.mxu1 %v10849_v33  ;;  %v576_v31 = vpop.f32.mrf.mxu3  ;;  %v15021_v33 = vld [vmem:[%s19208_s1 + $0x74] sm:$0xf0]  ;;  %v10821_v45 = vor.u32 %v14990_v29, %v10818_v30  ;;  %v10904_v25 = vld [vmem:[%s19208_s1 + $0x30] sm:$0xf]  ;;  %v10880_v11 = vld [vmem:[%s19208_s1] sm:$0xf] }
  0xdd   :  { %1865 = vmatpush.bf16.msra.mxu2 %v10789_v34  ;;  %v11000_v34 = vld [vmem:[%s19208_s1 + $0xf0] sm:$0xf]  ;;  %v10937_v46 = vor.u32 %v15021_v33, %v10936_v32  ;;  %v15013_v29 = vld [vmem:[%s19208_s1 + $0x34] sm:$0xf0] }
  0xde   :  { %1878 = vmatpush.bf16.msra.mxu3 %v10853_v40  ;;  %v10817_v40 = vor.u32 %v14991_v23, %v10816_v19  ;;  %v15014_v19 = vld [vmem:[%s19208_s1 + $0x44] sm:$0xf]  ;;  %v10978_v23 = vld [vmem:[%s19208_s1 + $0xc8] sm:$0xf0]  ;;  %v10968_v30 = vld [vmem:[%s19208_s1 + $0xb0] sm:$0xf] }
  0xdf   :  { %1840 = vmatpush.bf16.msra.mxu0 %v10777_v47  ;;  %v11001_v47 = vor.u32 %v15037_v36, %v11000_v34  ;;  %v15029_v31 = vld [vmem:[%s19208_s1 + $0xb4] sm:$0xf0]  ;;  %v10906_v36 = vld [vmem:[%s19208_s1 + $0x38] sm:$0xf0] }
  0xe0   :  { %1853 = vmatpush.bf16.msra.mxu1 %v10841_v48  ;;  %v10941_v48 = vor.u32 %v15020_v37, %v10938_v38  ;;  %v618_v37 = vperm.slane %v615_v7, 1  ;;  %v15028_v38 = vld [vmem:[%s19208_s1 + $0xb4] sm:$0xf]  ;;  %v10969_v42 = vor.u32 %v15029_v31, %v10968_v30  ;;  %v15069_v31 = vld [vmem:[%s19208_s1 + $0xf4] sm:$0xf0] }
  0xe1   :  { %1866 = vmatpush.bf16.msra.mxu2 %v10781_v49  ;;  %v10928_v49 = vld [vmem:[%s19208_s1 + $0x60] sm:$0xf] }
  0xe2   :  { %1879 = vmatpush.bf16.msra.mxu3 %v10845_v54  ;;  %v15018_v54 = vld [vmem:[%s19208_s1 + $0x64] sm:$0xf]  ;;  %v10929_v60 = vor.u32 %v15019_v50, %v10928_v49  ;;  %v15027_v49 = vld [vmem:[%s19208_s1 + $0xa4] sm:$0xf0] }
  0xe3   :  { %1841 = vmatpush.bf16.msra.mxu0 %v10769_v63  ;;  %v10993_v63 = vor.u32 %v15035_v53, %v10992_v51  ;;  %v10933_v0 = vor.u32 %v15018_v54, %v10930_v55  ;;  %v15010_v50 = vld [vmem:[%s19208_s1 + $0x24] sm:$0xf]  ;;  %v10898_v51 = vld [vmem:[%s19208_s1 + $0x28] sm:$0xf0] }
  0xe4   :  { %1854 = vmatpush.bf16.msra.mxu1 %v10833_v4  ;;  %v10997_v4 = vor.u32 %v15034_v57, %v10994_v58  ;;  %v15026_v54 = vld [vmem:[%s19208_s1 + $0xa4] sm:$0xf]  ;;  %v10962_v55 = vld [vmem:[%s19208_s1 + $0xa8] sm:$0xf0]  ;;  %v10888_v57 = vld [vmem:[%s19208_s1 + $0x10] sm:$0xf] }
  0xe5   :  { %1867 = vmatpush.bf16.msra.mxu2 %v10773_v5  ;;  %v15016_v5 = vld [vmem:[%s19208_s1 + $0x54] sm:$0xf] }
  0xe6   :  { %1880 = vmatpush.bf16.msra.mxu3 %v10837_v10  ;;  %v10921_v10 = vor.u32 %v15017_v1, %v10920_v62  ;;  %v10925_v13 = vor.u32 %v15016_v5, %v10922_v6  ;;  %v10952_v1 = vld [vmem:[%s19208_s1 + $0x90] sm:$0xf]  ;;  %v15008_v5 = vld [vmem:[%s19208_s1 + $0x14] sm:$0xf]  ;;  %v10890_v6 = vld [vmem:[%s19208_s1 + $0x18] sm:$0xf0] }
  0xe7   :  { %1842 = vmatpush.bf16.msra.mxu0 %v10761_v16  ;;  %v617_v16 = vperm.slane %v615_v7, 0 }
  0xe8   :  { %1855 = vmatpush.bf16.msra.mxu1 %v10825_v21  ;;  %v10914_v21 = vld [vmem:[%s19208_s1 + $0x48] sm:$0xf0] }
  0xe9   :  { %1868 = vmatpush.bf16.msra.mxu2 %v10765_v22  ;;  %v15030_v22 = vld [vmem:[%s19208_s1 + $0xc4] sm:$0xf]  ;;  %v10917_v28 = vor.u32 %v15014_v19, %v10914_v21  ;;  %v1892_v21 = vld [vmem:[%s19207_s0 + $0x1c] sm:$0xff] }
  0xea   :  { %1881 = vmatpush.bf16.msra.mxu3 %v10829_v27  ;;  %v10977_v27 = vor.u32 %v15031_v18, %v10976_v15  ;;  %v10981_v34 = vor.u32 %v15030_v22, %v10978_v23  ;;  %v10953_v15 = vor.u32 %v15025_v2, %v10952_v1  ;;  %v15006_v18 = vld [vmem:[%s19208_s1 + $0x4] sm:$0xf]  ;;  %v10957_v22 = vor.u32 %v15024_v8, %v10954_v9  ;;  %v10882_v23 = vld [vmem:[%s19208_s1 + $0x8] sm:$0xf0]  ;;  %v11050_v1 = vld [vmem:[%s19208_s1 + $0x58] sm:$0xf0] }
  0xeb   :  { %1843 = vmatpush.bf16.msra.mxu0 %v10753_v35  ;;  %v797_v26 = vpop.f32.mrf.mxu0  ;;  %v15012_v35 = vld [vmem:[%s19208_s1 + $0x34] sm:$0xf]  ;;  %v877_v2 = vld [vmem:[%s19209_s2] sm:$0x3]  ;;  %v15047_v9 = vld [vmem:[%s19208_s1 + $0x44] sm:$0xf0] }
  0xec   :  { %1856 = vmatpush.bf16.msra.mxu1 %v10817_v40  ;;  %v798_v32 = vadd.f32 %v797_v26, %v617_v16  ;;  %v810_v33 = vpop.f32.mrf.mxu1  ;;  %v10909_v43 = vor.u32 %v15012_v35, %v10906_v36  ;;  %v10893_v16 = vor.u32 %v15008_v5, %v10890_v6  ;;  %v10885_v36 = vor.u32 %v15006_v18, %v10882_v23  ;;  %v11040_v6 = vld [vmem:[%s19208_s1 + $0x40] sm:$0xf]  ;;  %v11106_v18 = vld [vmem:[%s19208_s1 + $0xc8] sm:$0xf0] }
  0xed   :  { %1869 = vmatpush.bf16.msra.mxu2 %v10757_v41  ;;  %v10905_v41 = vor.u32 %v15013_v29, %v10904_v25  ;;  %v10946_v25 = vld [vmem:[%s19208_s1 + $0x88] sm:$0xf0]  ;;  %v11128_v29 = vld [vmem:[%s19208_s1 + $0xf0] sm:$0xf] }
  0xee   :  { %1882 = vmatpush.bf16.msra.mxu3 %v10821_v45  ;;  %1844 = vmatmul.bf16.vlgmr.msra.gmra.mxu0 %v1672_v56  ;;  %v811_v40 = vadd.f32 %v810_v33, %v798_v32  ;;  %v15011_v45 = vld [vmem:[%s19208_s1 + $0x24] sm:$0xf0]  ;;  %v15052_v32 = vld [vmem:[%s19208_s1 + $0x74] sm:$0xf]  ;;  %v11066_v33 = vld [vmem:[%s19208_s1 + $0x78] sm:$0xf0] }
  0xef   :  { %2098 = vmatpush.bf16.msrb.mxu0 %v10937_v46  ;;  %1857 = vmatmul.bf16.vlgmr.msra.gmra.mxu1 %v1673_v59  ;;  %v10960_v46 = vld [vmem:[%s19208_s1 + $0xa0] sm:$0xf] }
  0xf0   :  { %2111 = vmatpush.bf16.msrb.mxu1 %v11001_v47  ;;  %1870 = vmatmul.bf16.vlgmr.msra.gmra.mxu2 %v1672_v56  ;;  %v10897_v56 = vor.u32 %v15011_v45, %v10896_v44  ;;  %v840_v58 = vmax.f32 %v811_v40, 0.0  ;;  %v10961_v62 = vor.u32 %v15027_v49, %v10960_v46  ;;  %v11056_v44 = vld [vmem:[%s19208_s1 + $0x60] sm:$0xf]  ;;  %v15051_v45 = vld [vmem:[%s19208_s1 + $0x64] sm:$0xf0] }
  0xf1   :  { %2124 = vmatpush.bf16.msrb.mxu2 %v10941_v48  ;;  %1883 = vmatmul.bf16.vlgmr.msra.gmra.mxu3 %v1673_v59  ;;  %v10973_v48 = vor.u32 %v15028_v38, %v10970_v39  ;;  %v11130_v38 = vld [vmem:[%s19208_s1 + $0xf8] sm:$0xf0]  ;;  %v1933_v39 = vunpack.c.h.b16 %v1892_v21  ;;  %v11120_v46 = vld [vmem:[%s19208_s1 + $0xe0] sm:$0xf]  ;;  %v15050_v49 = vld [vmem:[%s19208_s1 + $0x64] sm:$0xf] }
  0xf2   :  { %2137 = vmatpush.bf16.msrb.mxu3 %v11005_v52 }
  0xf3   :  { %2099 = vmatpush.bf16.msrb.mxu0 %v10929_v60  ;;  %v823_v47 = vpop.f32.mrf.mxu2  ;;  %v799_v60 = vpop.f32.mrf.mxu0 }
  0xf4   :  { %2112 = vmatpush.bf16.msrb.mxu1 %v10993_v63  ;;  %v824_v52 = vadd.f32 %v823_v47, %v618_v37  ;;  %v836_v53 = vpop.f32.mrf.mxu3  ;;  %v10901_v63 = vor.u32 %v15010_v50, %v10898_v51  ;;  %v812_v3 = vpop.f32.mrf.mxu1  ;;  %v15068_v37 = vld [vmem:[%s19208_s1 + $0xf4] sm:$0xf]  ;;  %v11058_v50 = vld [vmem:[%s19208_s1 + $0x68] sm:$0xf0]  ;;  %v11112_v60 = vld [vmem:[%s19208_s1 + $0xd0] sm:$0xf] }
  0xf5   :  { %2125 = vmatpush.bf16.msrb.mxu2 %v10933_v0  ;;  %v15009_v0 = vld [vmem:[%s19208_s1 + $0x14] sm:$0xf0]  ;;  %v11133_v47 = vor.u32 %v15068_v37, %v11130_v38  ;;  %v15064_v3 = vld [vmem:[%s19208_s1 + $0xd4] sm:$0xf] }
  0xf6   :  { %2138 = vmatpush.bf16.msrb.mxu3 %v10997_v4  ;;  %v837_v59 = vadd.f32 %v836_v53, %v824_v52  ;;  %v10965_v4 = vor.u32 %v15026_v54, %v10962_v55  ;;  %v15066_v52 = vld [vmem:[%s19208_s1 + $0xe4] sm:$0xf]  ;;  %v11122_v53 = vld [vmem:[%s19208_s1 + $0xe8] sm:$0xf0]  ;;  %v1935_v54 = vpack.c.b16 %v1933_v39, %v1933_v39  ;;  %v11057_v55 = vor.u32 %v15051_v45, %v11056_v44  ;;  %v15059_v45 = vld [vmem:[%s19208_s1 + $0xa4] sm:$0xf0] }
  0xf7   :  { %2100 = vmatpush.bf16.msrb.mxu0 %v10921_v10  ;;  %v10889_v10 = vor.u32 %v15009_v0, %v10888_v57  ;;  %v15048_v0 = vld [vmem:[%s19208_s1 + $0x54] sm:$0xf] }
  0xf8   :  { %2113 = vmatpush.bf16.msrb.mxu1 %v10985_v12  ;;  %v841_v7 = vmax.f32 %v837_v59, 0.0  ;;  %v15007_v12 = vld [vmem:[%s19208_s1 + $0x4] sm:$0xf0]  ;;  %v15049_v59 = vld [vmem:[%s19208_s1 + $0x54] sm:$0xf0]  ;;  %v11053_v8 = vor.u32 %v15048_v0, %v11050_v1 }
  0xf9   :  { %2126 = vmatpush.bf16.msrb.mxu2 %v10925_v13  ;;  %v10944_v13 = vld [vmem:[%s19208_s1 + $0x80] sm:$0xf]  ;;  %v10881_v30 = vor.u32 %v15007_v12, %v10880_v11  ;;  %v879_v11 = vperm.slane %v877_v2, 0  ;;  %v15040_v1 = vld [vmem:[%s19208_s1 + $0x14] sm:$0xf] }
  0xfa   :  { %2139 = vmatpush.bf16.msrb.mxu3 %v10989_v17  ;;  %v17648_v14 = vpack.c.bf16 %v841_v7, %v840_v58  ;;  %v15023_v17 = vld [vmem:[%s19208_s1 + $0x84] sm:$0xf0]  ;;  %v11061_v58 = vor.u32 %v15050_v49, %v11058_v50  ;;  %v15058_v50 = vld [vmem:[%s19208_s1 + $0xa4] sm:$0xf] }
  0xfb   :  { %2101 = vmatpush.bf16.msrb.mxu0 %v10913_v24  ;;  %v825_v19 = vpop.f32.mrf.mxu2  ;;  %v15022_v24 = vld [vmem:[%s19208_s1 + $0x84] sm:$0xf]  ;;  %v10945_v35 = vor.u32 %v15023_v17, %v10944_v13  ;;  %v15063_v13 = vld [vmem:[%s19208_s1 + $0xc4] sm:$0xf0] }
  0xfc   :  { %2114 = vmatpush.bf16.msrb.mxu1 %v10977_v27  ;;  %v838_v26 = vpop.f32.mrf.mxu3  ;;  %v11064_v27 = vld [vmem:[%s19208_s1 + $0x70] sm:$0xf]  ;;  %v10949_v40 = vor.u32 %v15022_v24, %v10946_v25  ;;  %v15062_v17 = vld [vmem:[%s19208_s1 + $0xc4] sm:$0xf]  ;;  %v11041_v19 = vor.u32 %v15047_v9, %v11040_v6  ;;  %v15045_v25 = vld [vmem:[%s19208_s1 + $0x34] sm:$0xf0] }
  0xfd   :  { %2127 = vmatpush.bf16.msrb.mxu2 %v10917_v28  ;;  %v15053_v28 = vld [vmem:[%s19208_s1 + $0x74] sm:$0xf0]  ;;  %v11096_v26 = vld [vmem:[%s19208_s1 + $0xb0] sm:$0xf]  ;;  %v11072_v9 = vld [vmem:[%s19208_s1 + $0x80] sm:$0xf] }
  0xfe   :  { %2140 = vmatpush.bf16.msrb.mxu3 %v10981_v34  ;;  %v1932_v34 = vunpack.c.l.b16 %v1892_v21  ;;  %v11032_v21 = vld [vmem:[%s19208_s1 + $0x30] sm:$0xf] }
  0xff   :  { %2102 = vmatpush.bf16.msrb.mxu0 %v10905_v41  ;;  %v11065_v41 = vor.u32 %v15053_v28, %v11064_v27  ;;  %v15061_v27 = vld [vmem:[%s19208_s1 + $0xb4] sm:$0xf0]  ;;  %v11033_v37 = vor.u32 %v15045_v25, %v11032_v21  ;;  %v15054_v21 = vld [vmem:[%s19208_s1 + $0x84] sm:$0xf] }
 0x100   :  { %2115 = vmatpush.bf16.msrb.mxu1 %v10969_v42  ;;  %v11129_v42 = vor.u32 %v15069_v31, %v11128_v29  ;;  %v1934_v51 = vpack.c.b16 %v1932_v34, %v1932_v34  ;;  %v15044_v31 = vld [vmem:[%s19208_s1 + $0x34] sm:$0xf]  ;;  %v11097_v38 = vor.u32 %v15061_v27, %v11096_v26  ;;  %v15085_v25 = vld [vmem:[%s19208_s1 + $0x74] sm:$0xf0]  ;;  %v11256_v26 = vld [vmem:[%s19208_s1 + $0xf0] sm:$0xf] }
 0x101   :  { %2128 = vmatpush.bf16.msrb.mxu2 %v10909_v43  ;;  %v11069_v43 = vor.u32 %v15052_v32, %v11066_v33  ;;  %v11034_v32 = vld [vmem:[%s19208_s1 + $0x38] sm:$0xf0]  ;;  %v880_v33 = vperm.slane %v877_v2, 1  ;;  %v15060_v34 = vld [vmem:[%s19208_s1 + $0xb4] sm:$0xf] }
 0x102   :  { %2141 = vmatpush.bf16.msrb.mxu3 %v10973_v48  ;;  %v15067_v48 = vld [vmem:[%s19208_s1 + $0xe4] sm:$0xf0]  ;;  %v11037_v39 = vor.u32 %v15044_v31, %v11034_v32  ;;  %v11018_v2 = vld [vmem:[%s19208_s1 + $0x18] sm:$0xf0] }
 0x103   :  { %2103 = vmatpush.bf16.msrb.mxu0 %v10897_v56  ;;  %v11048_v56 = vld [vmem:[%s19208_s1 + $0x50] sm:$0xf]  ;;  %v11121_v57 = vor.u32 %v15067_v48, %v11120_v46  ;;  %v15042_v46 = vld [vmem:[%s19208_s1 + $0x24] sm:$0xf] }
 0x104   :  { %2116 = vmatpush.bf16.msrb.mxu1 %v10961_v62  ;;  %v15065_v62 = vld [vmem:[%s19208_s1 + $0xd4] sm:$0xf0]  ;;  %v11049_v5 = vor.u32 %v15049_v59, %v11048_v56 }
 0x105   :  { %2129 = vmatpush.bf16.msrb.mxu2 %v10901_v63  ;;  %v11125_v63 = vor.u32 %v15066_v52, %v11122_v53  ;;  %v11113_v7 = vor.u32 %v15065_v62, %v11112_v60  ;;  %v11016_v53 = vld [vmem:[%s19208_s1 + $0x10] sm:$0xf]  ;;  %v15041_v59 = vld [vmem:[%s19208_s1 + $0x14] sm:$0xf0] }
 0x106   :  { %2142 = vmatpush.bf16.msrb.mxu3 %v10965_v4  ;;  %v11114_v4 = vld [vmem:[%s19208_s1 + $0xd8] sm:$0xf0]  ;;  %v11080_v60 = vld [vmem:[%s19208_s1 + $0x90] sm:$0xf]  ;;  %v15057_v62 = vld [vmem:[%s19208_s1 + $0x94] sm:$0xf0]  ;;  %v11017_v6 = vor.u32 %v15041_v59, %v11016_v53 }
 0x107   :  { %2104 = vmatpush.bf16.msrb.mxu0 %v10889_v10  ;;  %v11104_v10 = vld [vmem:[%s19208_s1 + $0xc0] sm:$0xf]  ;;  %v11117_v12 = vor.u32 %v15064_v3, %v11114_v4  ;;  %v15056_v4 = vld [vmem:[%s19208_s1 + $0x94] sm:$0xf]  ;;  %v11176_v53 = vld [vmem:[%s19208_s1 + $0x50] sm:$0xf] }
 0x108   :  { %2117 = vmatpush.bf16.msrb.mxu1 %v10953_v15  ;;  %v15046_v15 = vld [vmem:[%s19208_s1 + $0x44] sm:$0xf]  ;;  %v11105_v23 = vor.u32 %v15063_v13, %v11104_v10  ;;  %v15055_v13 = vld [vmem:[%s19208_s1 + $0x84] sm:$0xf0] }
 0x109   :  { %2130 = vmatpush.bf16.msrb.mxu2 %v10893_v16  ;;  %v11042_v16 = vld [vmem:[%s19208_s1 + $0x48] sm:$0xf0]  ;;  %v11073_v32 = vor.u32 %v15055_v13, %v11072_v9 }
 0x10a   :  { %2143 = vmatpush.bf16.msrb.mxu3 %v10957_v22  ;;  %v11045_v24 = vor.u32 %v15046_v15, %v11042_v16  ;;  %v15038_v15 = vld [vmem:[%s19208_s1 + $0x4] sm:$0xf]  ;;  %v11170_v13 = vld [vmem:[%s19208_s1 + $0x48] sm:$0xf0] }
 0x10b   :  { %2105 = vmatpush.bf16.msrb.mxu0 %v10881_v30  ;;  %v1059_v22 = vpop.f32.mrf.mxu0  ;;  %v11109_v30 = vor.u32 %v15062_v17, %v11106_v18  ;;  %v2154_v17 = vld [vmem:[%s19207_s0 + $0x20] sm:$0xff] }
 0x10c   :  { %2118 = vmatpush.bf16.msrb.mxu1 %v10945_v35  ;;  %v1060_v28 = vadd.f32 %v1059_v22, %v879_v11  ;;  %v1072_v29 = vpop.f32.mrf.mxu1  ;;  %v11098_v35 = vld [vmem:[%s19208_s1 + $0xb8] sm:$0xf0]  ;;  %v11081_v11 = vor.u32 %v15057_v62, %v11080_v60  ;;  %v11074_v22 = vld [vmem:[%s19208_s1 + $0x88] sm:$0xf0]  ;;  %v2194_v31 = vunpack.c.l.b16 %v2154_v17  ;;  %v15080_v60 = vld [vmem:[%s19208_s1 + $0x54] sm:$0xf] }
 0x10d   :  { %2131 = vmatpush.bf16.msrb.mxu2 %v10885_v36  ;;  %v11101_v44 = vor.u32 %v15060_v34, %v11098_v35  ;;  %v15100_v34 = vld [vmem:[%s19208_s1 + $0xf4] sm:$0xf]  ;;  %v11258_v35 = vld [vmem:[%s19208_s1 + $0xf8] sm:$0xf0] }
 0x10e   :  { %2144 = vmatpush.bf16.msrb.mxu3 %v10949_v40  ;;  %2106 = vmatmul.bf16.vlgmr.msrb.gmra.mxu0 %v1934_v51  ;;  %v1073_v36 = vadd.f32 %v1072_v29, %v1060_v28  ;;  %v11024_v40 = vld [vmem:[%s19208_s1 + $0x20] sm:$0xf]  ;;  %v15101_v28 = vld [vmem:[%s19208_s1 + $0xf4] sm:$0xf0]  ;;  %v15084_v29 = vld [vmem:[%s19208_s1 + $0x74] sm:$0xf] }
 0x10f   :  { %2360 = vmatpush.bf16.msra.mxu0 %v11065_v41  ;;  %2119 = vmatmul.bf16.vlgmr.msrb.gmra.mxu1 %v1935_v54  ;;  %v15043_v41 = vld [vmem:[%s19208_s1 + $0x24] sm:$0xf0]  ;;  %v11178_v62 = vld [vmem:[%s19208_s1 + $0x58] sm:$0xf0] }
 0x110   :  { %2373 = vmatpush.bf16.msra.mxu1 %v11129_v42  ;;  %2132 = vmatmul.bf16.vlgmr.msrb.gmra.mxu2 %v1934_v51  ;;  %v11088_v42 = vld [vmem:[%s19208_s1 + $0xa0] sm:$0xf]  ;;  %v11090_v51 = vld [vmem:[%s19208_s1 + $0xa8] sm:$0xf0]  ;;  %v11025_v52 = vor.u32 %v15043_v41, %v11024_v40 }
 0x111   :  { %2386 = vmatpush.bf16.msra.mxu2 %v11069_v43  ;;  %2145 = vmatmul.bf16.vlgmr.msrb.gmra.mxu3 %v1935_v54  ;;  %v1102_v54 = vmax.f32 %v1073_v36, 0.0  ;;  %v11093_v0 = vor.u32 %v15058_v50, %v11090_v51  ;;  %v2195_v36 = vunpack.c.h.b16 %v2154_v17  ;;  %v11184_v41 = vld [vmem:[%s19208_s1 + $0x60] sm:$0xf]  ;;  %v11250_v50 = vld [vmem:[%s19208_s1 + $0xe8] sm:$0xf0] }
 0x112   :  { %2399 = vmatpush.bf16.msra.mxu3 %v11133_v47  ;;  %v11026_v47 = vld [vmem:[%s19208_s1 + $0x28] sm:$0xf0] }
 0x113   :  { %2361 = vmatpush.bf16.msra.mxu0 %v11057_v55  ;;  %v1085_v43 = vpop.f32.mrf.mxu2  ;;  %v1061_v56 = vpop.f32.mrf.mxu0  ;;  %v2197_v51 = vpack.c.b16 %v2195_v36, %v2195_v36 }
 0x114   :  { %2374 = vmatpush.bf16.msra.mxu1 %v11121_v57  ;;  %v1086_v48 = vadd.f32 %v1085_v43, %v880_v33  ;;  %v1098_v49 = vpop.f32.mrf.mxu3  ;;  %v11089_v57 = vor.u32 %v15059_v45, %v11088_v42  ;;  %v15083_v42 = vld [vmem:[%s19208_s1 + $0x64] sm:$0xf0]  ;;  %v11248_v43 = vld [vmem:[%s19208_s1 + $0xe0] sm:$0xf]  ;;  %v15081_v56 = vld [vmem:[%s19208_s1 + $0x54] sm:$0xf0] }
 0x115   :  { %2387 = vmatpush.bf16.msra.mxu2 %v11061_v58  ;;  %v11029_v58 = vor.u32 %v15042_v46, %v11026_v47  ;;  %v15099_v45 = vld [vmem:[%s19208_s1 + $0xe4] sm:$0xf0]  ;;  %v15082_v46 = vld [vmem:[%s19208_s1 + $0x64] sm:$0xf]  ;;  %v11186_v47 = vld [vmem:[%s19208_s1 + $0x68] sm:$0xf0] }
 0x116   :  { %2400 = vmatpush.bf16.msra.mxu3 %v11125_v63  ;;  %v1099_v55 = vadd.f32 %v1098_v49, %v1086_v48  ;;  %v1074_v63 = vpop.f32.mrf.mxu1  ;;  %v2196_v48 = vpack.c.b16 %v2194_v31, %v2194_v31  ;;  %v15098_v49 = vld [vmem:[%s19208_s1 + $0xe4] sm:$0xf] }
 0x117   :  { %2362 = vmatpush.bf16.msra.mxu0 %v11049_v5  ;;  %v11082_v5 = vld [vmem:[%s19208_s1 + $0x98] sm:$0xf0]  ;;  %v11253_v59 = vor.u32 %v15098_v49, %v11250_v50  ;;  %v1139_v63 = vld [vmem:[%s19209_s2] sm:$0x3]  ;;  %v11218_v49 = vld [vmem:[%s19208_s1 + $0xa8] sm:$0xf0] }
 0x118   :  { %2375 = vmatpush.bf16.msra.mxu1 %v11113_v7  ;;  %v1103_v3 = vmax.f32 %v1099_v55, 0.0  ;;  %v11008_v7 = vld [vmem:[%s19208_s1] sm:$0xf]  ;;  %v11085_v18 = vor.u32 %v15056_v4, %v11082_v5  ;;  %v11189_v55 = vor.u32 %v15082_v46, %v11186_v47  ;;  %v11181_v5 = vor.u32 %v15080_v60, %v11178_v62 }
 0x119   :  { %2388 = vmatpush.bf16.msra.mxu2 %v11053_v8  ;;  %v15039_v8 = vld [vmem:[%s19208_s1 + $0x4] sm:$0xf0]  ;;  %v1142_v31 = vperm.slane %v1139_v63, 1 }
 0x11a   :  { %2401 = vmatpush.bf16.msra.mxu3 %v11117_v12  ;;  %v17848_v10 = vpack.c.bf16 %v1103_v3, %v1102_v54  ;;  %v11021_v12 = vor.u32 %v15040_v1, %v11018_v2  ;;  %v11009_v27 = vor.u32 %v15039_v8, %v11008_v7  ;;  %v11249_v54 = vor.u32 %v15099_v45, %v11248_v43  ;;  %v11242_v1 = vld [vmem:[%s19208_s1 + $0xd8] sm:$0xf0]  ;;  %v11168_v3 = vld [vmem:[%s19208_s1 + $0x40] sm:$0xf]  ;;  %v15091_v43 = vld [vmem:[%s19208_s1 + $0xa4] sm:$0xf0] }
 0x11b   :  { %2363 = vmatpush.bf16.msra.mxu0 %v11041_v19  ;;  %v1087_v16 = vpop.f32.mrf.mxu2  ;;  %v11010_v19 = vld [vmem:[%s19208_s1 + $0x8] sm:$0xf0]  ;;  %v11177_v2 = vor.u32 %v15081_v56, %v11176_v53  ;;  %v11232_v7 = vld [vmem:[%s19208_s1 + $0xc0] sm:$0xf]  ;;  %v1141_v8 = vperm.slane %v1139_v63, 0 }
 0x11c   :  { %2376 = vmatpush.bf16.msra.mxu1 %v11105_v23  ;;  %v1100_v23 = vpop.f32.mrf.mxu3  ;;  %v11013_v33 = vor.u32 %v15038_v15, %v11010_v19  ;;  %v15094_v15 = vld [vmem:[%s19208_s1 + $0xc4] sm:$0xf]  ;;  %v11234_v16 = vld [vmem:[%s19208_s1 + $0xc8] sm:$0xf0]  ;;  %v15072_v63 = vld [vmem:[%s19208_s1 + $0x14] sm:$0xf] }
 0x11d   :  { %2389 = vmatpush.bf16.msra.mxu2 %v11045_v24  ;;  %v11192_v24 = vld [vmem:[%s19208_s1 + $0x70] sm:$0xf]  ;;  %v15077_v23 = vld [vmem:[%s19208_s1 + $0x34] sm:$0xf0]  ;;  %v11154_v45 = vld [vmem:[%s19208_s1 + $0x28] sm:$0xf0] }
 0x11e   :  { %2402 = vmatpush.bf16.msra.mxu3 %v11109_v30  ;;  %v11194_v30 = vld [vmem:[%s19208_s1 + $0x78] sm:$0xf0] }
 0x11f   :  { %2364 = vmatpush.bf16.msra.mxu0 %v11033_v37  ;;  %v11077_v37 = vor.u32 %v15054_v21, %v11074_v22  ;;  %v11197_v40 = vor.u32 %v15084_v29, %v11194_v30  ;;  %v15076_v29 = vld [vmem:[%s19208_s1 + $0x34] sm:$0xf]  ;;  %v11162_v30 = vld [vmem:[%s19208_s1 + $0x38] sm:$0xf0] }
 0x120   :  { %2377 = vmatpush.bf16.msra.mxu1 %v11097_v38  ;;  %v11193_v38 = vor.u32 %v15085_v25, %v11192_v24  ;;  %v11224_v24 = vld [vmem:[%s19208_s1 + $0xb0] sm:$0xf]  ;;  %v15093_v25 = vld [vmem:[%s19208_s1 + $0xb4] sm:$0xf0] }
 0x121   :  { %2390 = vmatpush.bf16.msra.mxu2 %v11037_v39  ;;  %v11257_v39 = vor.u32 %v15101_v28, %v11256_v26  ;;  %v11237_v28 = vor.u32 %v15094_v15, %v11234_v16  ;;  %v11225_v36 = vor.u32 %v15093_v25, %v11224_v24  ;;  %v2416_v16 = vld [vmem:[%s19207_s0 + $0x24] sm:$0xff]  ;;  %v15117_v24 = vld [vmem:[%s19208_s1 + $0x74] sm:$0xf0]  ;;  %v11384_v25 = vld [vmem:[%s19208_s1 + $0xf0] sm:$0xf] }
 0x122   :  { %2403 = vmatpush.bf16.msra.mxu3 %v11101_v44  ;;  %v11261_v44 = vor.u32 %v15100_v34, %v11258_v35 }
 0x123   :  { %2365 = vmatpush.bf16.msra.mxu0 %v11025_v52  ;;  %v11185_v52 = vor.u32 %v15083_v42, %v11184_v41 }
 0x124   :  { %2378 = vmatpush.bf16.msra.mxu1 %v11089_v57  ;;  %v11240_v57 = vld [vmem:[%s19208_s1 + $0xd0] sm:$0xf] }
 0x125   :  { %2391 = vmatpush.bf16.msra.mxu2 %v11029_v58  ;;  %v15097_v58 = vld [vmem:[%s19208_s1 + $0xd4] sm:$0xf0] }
 0x126   :  { %2404 = vmatpush.bf16.msra.mxu3 %v11093_v0  ;;  %v15096_v0 = vld [vmem:[%s19208_s1 + $0xd4] sm:$0xf]  ;;  %v11241_v4 = vor.u32 %v15097_v58, %v11240_v57  ;;  %v15073_v57 = vld [vmem:[%s19208_s1 + $0x14] sm:$0xf0]  ;;  %v11208_v58 = vld [vmem:[%s19208_s1 + $0x90] sm:$0xf] }
 0x127   :  { %2366 = vmatpush.bf16.msra.mxu0 %v11017_v6  ;;  %v15079_v6 = vld [vmem:[%s19208_s1 + $0x44] sm:$0xf0]  ;;  %v11245_v9 = vor.u32 %v15096_v0, %v11242_v1  ;;  %v11146_v0 = vld [vmem:[%s19208_s1 + $0x18] sm:$0xf0] }
 0x128   :  { %2379 = vmatpush.bf16.msra.mxu1 %v11081_v11  ;;  %v15095_v11 = vld [vmem:[%s19208_s1 + $0xc4] sm:$0xf0]  ;;  %v11169_v17 = vor.u32 %v15079_v6, %v11168_v3  ;;  %v11210_v3 = vld [vmem:[%s19208_s1 + $0x98] sm:$0xf0] }
 0x129   :  { %2392 = vmatpush.bf16.msra.mxu2 %v11021_v12  ;;  %v15078_v12 = vld [vmem:[%s19208_s1 + $0x44] sm:$0xf]  ;;  %v11233_v21 = vor.u32 %v15095_v11, %v11232_v7  ;;  %v15071_v6 = vld [vmem:[%s19208_s1 + $0x4] sm:$0xf0]  ;;  %v11200_v7 = vld [vmem:[%s19208_s1 + $0x80] sm:$0xf]  ;;  %v11149_v11 = vor.u32 %v15072_v63, %v11146_v0 }
 0x12a   :  { %2405 = vmatpush.bf16.msra.mxu3 %v11085_v18  ;;  %v11160_v18 = vld [vmem:[%s19208_s1 + $0x30] sm:$0xf]  ;;  %v11173_v22 = vor.u32 %v15078_v12, %v11170_v13  ;;  %v15087_v12 = vld [vmem:[%s19208_s1 + $0x84] sm:$0xf0]  ;;  %v15070_v13 = vld [vmem:[%s19208_s1 + $0x4] sm:$0xf] }
 0x12b   :  { %2367 = vmatpush.bf16.msra.mxu0 %v11009_v27  ;;  %v1321_v19 = vpop.f32.mrf.mxu0  ;;  %v11161_v35 = vor.u32 %v15077_v23, %v11160_v18  ;;  %v11138_v18 = vld [vmem:[%s19208_s1 + $0x8] sm:$0xf0]  ;;  %v11320_v23 = vld [vmem:[%s19208_s1 + $0x70] sm:$0xf]  ;;  %v15128_v63 = vld [vmem:[%s19208_s1 + $0xd4] sm:$0xf] }
 0x12c   :  { %2380 = vmatpush.bf16.msra.mxu1 %v11073_v32  ;;  %v1322_v26 = vadd.f32 %v1321_v19, %v1141_v8  ;;  %v1334_v27 = vpop.f32.mrf.mxu1  ;;  %v15092_v32 = vld [vmem:[%s19208_s1 + $0xb4] sm:$0xf]  ;;  %v15086_v19 = vld [vmem:[%s19208_s1 + $0x84] sm:$0xf]  ;;  %v11370_v0 = vld [vmem:[%s19208_s1 + $0xd8] sm:$0xf0] }
 0x12d   :  { %2393 = vmatpush.bf16.msra.mxu2 %v11013_v33  ;;  %v11226_v33 = vld [vmem:[%s19208_s1 + $0xb8] sm:$0xf0] }
 0x12e   :  { %2406 = vmatpush.bf16.msra.mxu3 %v11077_v37  ;;  %2368 = vmatmul.bf16.vlgmr.msra.gmra.mxu0 %v2196_v48  ;;  %v1335_v34 = vadd.f32 %v1334_v27, %v1322_v26  ;;  %v11165_v37 = vor.u32 %v15076_v29, %v11162_v30  ;;  %v11229_v42 = vor.u32 %v15092_v32, %v11226_v33  ;;  %v15133_v27 = vld [vmem:[%s19208_s1 + $0xf4] sm:$0xf0]  ;;  %v11322_v29 = vld [vmem:[%s19208_s1 + $0x78] sm:$0xf0]  ;;  %v2456_v30 = vunpack.c.l.b16 %v2416_v16  ;;  %v15132_v33 = vld [vmem:[%s19208_s1 + $0xf4] sm:$0xf] }
 0x12f   :  { %2622 = vmatpush.bf16.msrb.mxu0 %v11193_v38  ;;  %2381 = vmatmul.bf16.vlgmr.msra.gmra.mxu1 %v2197_v51  ;;  %v11152_v38 = vld [vmem:[%s19208_s1 + $0x20] sm:$0xf]  ;;  %v11141_v32 = vor.u32 %v15070_v13, %v11138_v18  ;;  %v11298_v13 = vld [vmem:[%s19208_s1 + $0x48] sm:$0xf0]  ;;  %v11288_v18 = vld [vmem:[%s19208_s1 + $0x30] sm:$0xf] }
 0x130   :  { %2635 = vmatpush.bf16.msrb.mxu1 %v11257_v39  ;;  %2394 = vmatmul.bf16.vlgmr.msra.gmra.mxu2 %v2196_v48  ;;  %v15075_v39 = vld [vmem:[%s19208_s1 + $0x24] sm:$0xf0]  ;;  %v15090_v48 = vld [vmem:[%s19208_s1 + $0xa4] sm:$0xf] }
 0x131   :  { %2648 = vmatpush.bf16.msrb.mxu2 %v11197_v40  ;;  %2407 = vmatmul.bf16.vlgmr.msra.gmra.mxu3 %v2197_v51  ;;  %v11216_v40 = vld [vmem:[%s19208_s1 + $0xa0] sm:$0xf]  ;;  %v11153_v50 = vor.u32 %v15075_v39, %v11152_v38  ;;  %v11144_v51 = vld [vmem:[%s19208_s1 + $0x10] sm:$0xf]  ;;  %v11221_v62 = vor.u32 %v15090_v48, %v11218_v49  ;;  %v11385_v38 = vor.u32 %v15133_v27, %v11384_v25  ;;  %v15130_v48 = vld [vmem:[%s19208_s1 + $0xe4] sm:$0xf] }
 0x132   :  { %2661 = vmatpush.bf16.msrb.mxu3 %v11261_v44  ;;  %v15074_v44 = vld [vmem:[%s19208_s1 + $0x24] sm:$0xf]  ;;  %v11378_v49 = vld [vmem:[%s19208_s1 + $0xe8] sm:$0xf0]  ;;  %v15125_v25 = vld [vmem:[%s19208_s1 + $0xb4] sm:$0xf0] }
 0x133   :  { %2623 = vmatpush.bf16.msrb.mxu0 %v11185_v52  ;;  %v1347_v41 = vpop.f32.mrf.mxu2  ;;  %v1364_v52 = vmax.f32 %v1335_v34, 0.0  ;;  %v11157_v56 = vor.u32 %v15074_v44, %v11154_v45  ;;  %v11386_v34 = vld [vmem:[%s19208_s1 + $0xf8] sm:$0xf0]  ;;  %v15131_v44 = vld [vmem:[%s19208_s1 + $0xe4] sm:$0xf0] }
 0x134   :  { %2636 = vmatpush.bf16.msrb.mxu1 %v11249_v54  ;;  %v1348_v46 = vadd.f32 %v1347_v41, %v1142_v31  ;;  %v1360_v47 = vpop.f32.mrf.mxu3  ;;  %v1323_v54 = vpop.f32.mrf.mxu0  ;;  %v11201_v31 = vor.u32 %v15087_v12, %v11200_v7  ;;  %v15115_v41 = vld [vmem:[%s19208_s1 + $0x64] sm:$0xf0]  ;;  %v15114_v45 = vld [vmem:[%s19208_s1 + $0x64] sm:$0xf] }
 0x135   :  { %2649 = vmatpush.bf16.msrb.mxu2 %v11189_v55  ;;  %v11217_v55 = vor.u32 %v15091_v43, %v11216_v40  ;;  %v1336_v60 = vpop.f32.mrf.mxu1  ;;  %v11312_v40 = vld [vmem:[%s19208_s1 + $0x60] sm:$0xf]  ;;  %v11389_v43 = vor.u32 %v15132_v33, %v11386_v34  ;;  %v15110_v12 = vld [vmem:[%s19208_s1 + $0x44] sm:$0xf]  ;;  %v11354_v33 = vld [vmem:[%s19208_s1 + $0xb8] sm:$0xf0] }
 0x136   :  { %2662 = vmatpush.bf16.msrb.mxu3 %v11253_v59  ;;  %v1361_v53 = vadd.f32 %v1360_v47, %v1348_v46  ;;  %v15089_v59 = vld [vmem:[%s19208_s1 + $0x94] sm:$0xf0]  ;;  %v11314_v46 = vld [vmem:[%s19208_s1 + $0x68] sm:$0xf0]  ;;  %v2458_v47 = vpack.c.b16 %v2456_v30, %v2456_v30  ;;  %v11306_v60 = vld [vmem:[%s19208_s1 + $0x58] sm:$0xf0] }
 0x137   :  { %2624 = vmatpush.bf16.msrb.mxu0 %v11177_v2  ;;  %v15088_v2 = vld [vmem:[%s19208_s1 + $0x94] sm:$0xf]  ;;  %v11317_v54 = vor.u32 %v15114_v45, %v11314_v46  ;;  %v11290_v30 = vld [vmem:[%s19208_s1 + $0x38] sm:$0xf0]  ;;  %v11282_v45 = vld [vmem:[%s19208_s1 + $0x28] sm:$0xf0] }
 0x138   :  { %2637 = vmatpush.bf16.msrb.mxu1 %v11241_v4  ;;  %v1365_v1 = vmax.f32 %v1361_v53, 0.0  ;;  %v11145_v4 = vor.u32 %v15073_v57, %v11144_v51  ;;  %v11313_v51 = vor.u32 %v15115_v41, %v11312_v40  ;;  %v15129_v57 = vld [vmem:[%s19208_s1 + $0xd4] sm:$0xf0]  ;;  %v11344_v40 = vld [vmem:[%s19208_s1 + $0xa0] sm:$0xf] }
 0x139   :  { %2650 = vmatpush.bf16.msrb.mxu2 %v11181_v5  ;;  %v11136_v5 = vld [vmem:[%s19208_s1] sm:$0xf] }
 0x13a   :  { %2663 = vmatpush.bf16.msrb.mxu3 %v11245_v9  ;;  %v18048_v8 = vpack.c.bf16 %v1365_v1, %v1364_v52  ;;  %v11209_v9 = vor.u32 %v15089_v59, %v11208_v58  ;;  %v11137_v26 = vor.u32 %v15071_v6, %v11136_v5  ;;  %v11304_v52 = vld [vmem:[%s19208_s1 + $0x50] sm:$0xf]  ;;  %v11381_v58 = vor.u32 %v15130_v48, %v11378_v49  ;;  %v15112_v59 = vld [vmem:[%s19208_s1 + $0x54] sm:$0xf]  ;;  %v15111_v5 = vld [vmem:[%s19208_s1 + $0x44] sm:$0xf0] }
 0x13b   :  { %2625 = vmatpush.bf16.msrb.mxu0 %v11169_v17  ;;  %v1349_v15 = vpop.f32.mrf.mxu2  ;;  %v11213_v17 = vor.u32 %v15088_v2, %v11210_v3  ;;  %v11296_v2 = vld [vmem:[%s19208_s1 + $0x40] sm:$0xf]  ;;  %v15122_v48 = vld [vmem:[%s19208_s1 + $0xa4] sm:$0xf]  ;;  %v11346_v49 = vld [vmem:[%s19208_s1 + $0xa8] sm:$0xf0] }
 0x13c   :  { %2638 = vmatpush.bf16.msrb.mxu1 %v11233_v21  ;;  %v11202_v21 = vld [vmem:[%s19208_s1 + $0x88] sm:$0xf0]  ;;  %v11360_v6 = vld [vmem:[%s19208_s1 + $0xc0] sm:$0xf]  ;;  %v15126_v15 = vld [vmem:[%s19208_s1 + $0xc4] sm:$0xf] }
 0x13d   :  { %2651 = vmatpush.bf16.msrb.mxu2 %v11173_v22  ;;  %v1362_v22 = vpop.f32.mrf.mxu3 }
 0x13e   :  { %2664 = vmatpush.bf16.msrb.mxu3 %v11237_v28  ;;  %v15116_v28 = vld [vmem:[%s19208_s1 + $0x74] sm:$0xf]  ;;  %v11301_v22 = vor.u32 %v15110_v12, %v11298_v13  ;;  %v15119_v13 = vld [vmem:[%s19208_s1 + $0x84] sm:$0xf0] }
 0x13f   :  { %2626 = vmatpush.bf16.msrb.mxu0 %v11161_v35  ;;  %v2457_v35 = vunpack.c.h.b16 %v2416_v16  ;;  %v11325_v39 = vor.u32 %v15116_v28, %v11322_v29  ;;  %v11362_v16 = vld [vmem:[%s19208_s1 + $0xc8] sm:$0xf0]  ;;  %v15108_v29 = vld [vmem:[%s19208_s1 + $0x34] sm:$0xf] }
 0x140   :  { %2639 = vmatpush.bf16.msrb.mxu1 %v11225_v36  ;;  %v11205_v36 = vor.u32 %v15086_v19, %v11202_v21  ;;  %v11365_v28 = vor.u32 %v15126_v15, %v11362_v16  ;;  %v15102_v15 = vld [vmem:[%s19208_s1 + $0x4] sm:$0xf] }
 0x141   :  { %2652 = vmatpush.bf16.msrb.mxu2 %v11165_v37  ;;  %v11321_v37 = vor.u32 %v15117_v24, %v11320_v23  ;;  %v15109_v23 = vld [vmem:[%s19208_s1 + $0x34] sm:$0xf0]  ;;  %v11352_v24 = vld [vmem:[%s19208_s1 + $0xb0] sm:$0xf] }
 0x142   :  { %2665 = vmatpush.bf16.msrb.mxu3 %v11229_v42  ;;  %v11376_v42 = vld [vmem:[%s19208_s1 + $0xe0] sm:$0xf] }
 0x143   :  { %2627 = vmatpush.bf16.msrb.mxu0 %v11153_v50  ;;  %v2459_v50 = vpack.c.b16 %v2457_v35, %v2457_v35  ;;  %v11377_v53 = vor.u32 %v15131_v44, %v11376_v42  ;;  %v11289_v35 = vor.u32 %v15109_v23, %v11288_v18  ;;  %v15106_v44 = vld [vmem:[%s19208_s1 + $0x24] sm:$0xf] }
 0x144   :  { %2640 = vmatpush.bf16.msrb.mxu1 %v11217_v55  ;;  %v15113_v55 = vld [vmem:[%s19208_s1 + $0x54] sm:$0xf0] }
 0x145   :  { %2653 = vmatpush.bf16.msrb.mxu2 %v11157_v56  ;;  %v11368_v56 = vld [vmem:[%s19208_s1 + $0xd0] sm:$0xf]  ;;  %v11305_v1 = vor.u32 %v15113_v55, %v11304_v52 }
 0x146   :  { %2666 = vmatpush.bf16.msrb.mxu3 %v11221_v62  ;;  %v1401_v62 = vld [vmem:[%s19209_s2] sm:$0x3]  ;;  %v11369_v3 = vor.u32 %v15129_v57, %v11368_v56  ;;  %v11285_v56 = vor.u32 %v15106_v44, %v11282_v45  ;;  %v15105_v57 = vld [vmem:[%s19208_s1 + $0x14] sm:$0xf0]  ;;  %v15163_v45 = vld [vmem:[%s19208_s1 + $0xe4] sm:$0xf0] }
 0x147   :  { %2628 = vmatpush.bf16.msrb.mxu0 %v11145_v4  ;;  %v11309_v4 = vor.u32 %v15112_v59, %v11306_v60  ;;  %v1403_v7 = vperm.slane %v1401_v62, 0  ;;  %v15121_v59 = vld [vmem:[%s19208_s1 + $0x94] sm:$0xf0] }
 0x148   :  { %2641 = vmatpush.bf16.msrb.mxu1 %v11209_v9  ;;  %v11373_v9 = vor.u32 %v15128_v63, %v11370_v0  ;;  %v15104_v63 = vld [vmem:[%s19208_s1 + $0x14] sm:$0xf]  ;;  %v11274_v0 = vld [vmem:[%s19208_s1 + $0x18] sm:$0xf0] }
 0x149   :  { %2654 = vmatpush.bf16.msrb.mxu2 %v11149_v11  ;;  %v15127_v11 = vld [vmem:[%s19208_s1 + $0xc4] sm:$0xf0]  ;;  %v11277_v12 = vor.u32 %v15104_v63, %v11274_v0  ;;  %v1663_v63 = vld [vmem:[%s19209_s2] sm:$0x3]  ;;  %v15160_v0 = vld [vmem:[%s19208_s1 + $0xd4] sm:$0xf] }
 0x14a   :  { %2667 = vmatpush.bf16.msrb.mxu3 %v11213_v17  ;;  %v11297_v17 = vor.u32 %v15111_v5, %v11296_v2  ;;  %v11361_v21 = vor.u32 %v15127_v11, %v11360_v6  ;;  %v15120_v2 = vld [vmem:[%s19208_s1 + $0x94] sm:$0xf]  ;;  %v11264_v5 = vld [vmem:[%s19208_s1] sm:$0xf]  ;;  %v15103_v6 = vld [vmem:[%s19208_s1 + $0x4] sm:$0xf0] }
 0x14b   :  { %2629 = vmatpush.bf16.msrb.mxu0 %v11137_v26  ;;  %v1583_v19 = vpop.f32.mrf.mxu0 }
 0x14c   :  { %2642 = vmatpush.bf16.msrb.mxu1 %v11201_v31  ;;  %v1584_v26 = vadd.f32 %v1583_v19, %v1403_v7  ;;  %v1596_v27 = vpop.f32.mrf.mxu1  ;;  %v1404_v31 = vperm.slane %v1401_v62, 1  ;;  %v11349_v62 = vor.u32 %v15122_v48, %v11346_v49  ;;  %v11328_v7 = vld [vmem:[%s19208_s1 + $0x80] sm:$0xf]  ;;  %v11266_v19 = vld [vmem:[%s19208_s1 + $0x8] sm:$0xf0] }
 0x14d   :  { %2655 = vmatpush.bf16.msrb.mxu2 %v11141_v32  ;;  %v15124_v32 = vld [vmem:[%s19208_s1 + $0xb4] sm:$0xf]  ;;  %v15162_v49 = vld [vmem:[%s19208_s1 + $0xe4] sm:$0xf] }
 0x14e   :  { %2668 = vmatpush.bf16.msrb.mxu3 %v11205_v36  ;;  %2630 = vmatmul.bf16.vlgmr.msrb.gmra.mxu0 %v2458_v47  ;;  %v1597_v34 = vadd.f32 %v1596_v27, %v1584_v26  ;;  %v11353_v36 = vor.u32 %v15125_v25, %v11352_v24  ;;  %v11357_v42 = vor.u32 %v15124_v32, %v11354_v33  ;;  %v11448_v24 = vld [vmem:[%s19208_s1 + $0x70] sm:$0xf]  ;;  %v15149_v25 = vld [vmem:[%s19208_s1 + $0x74] sm:$0xf0] }
 0x14f   :  { %2884 = vmatpush.bf16.msra.mxu0 %v11321_v37  ;;  %2643 = vmatmul.bf16.vlgmr.msrb.gmra.mxu1 %v2459_v50  ;;  %v11293_v37 = vor.u32 %v15108_v29, %v11290_v30  ;;  %v11512_v26 = vld [vmem:[%s19208_s1 + $0xf0] sm:$0xf]  ;;  %v11265_v27 = vor.u32 %v15103_v6, %v11264_v5  ;;  %v15148_v29 = vld [vmem:[%s19208_s1 + $0x74] sm:$0xf]  ;;  %v11450_v30 = vld [vmem:[%s19208_s1 + $0x78] sm:$0xf0]  ;;  %v11329_v32 = vor.u32 %v15119_v13, %v11328_v7 }
 0x150   :  { %2897 = vmatpush.bf16.msra.mxu1 %v11385_v38  ;;  %2656 = vmatmul.bf16.vlgmr.msrb.gmra.mxu2 %v2458_v47  ;;  %v11280_v38 = vld [vmem:[%s19208_s1 + $0x20] sm:$0xf]  ;;  %v1626_v52 = vmax.f32 %v1597_v34, 0.0  ;;  %v11269_v33 = vor.u32 %v15102_v15, %v11266_v19  ;;  %v15164_v34 = vld [vmem:[%s19208_s1 + $0xf4] sm:$0xf] }
 0x151   :  { %2910 = vmatpush.bf16.msra.mxu2 %v11325_v39  ;;  %2669 = vmatmul.bf16.vlgmr.msrb.gmra.mxu3 %v2459_v50  ;;  %v15107_v39 = vld [vmem:[%s19208_s1 + $0x24] sm:$0xf0]  ;;  %v11488_v7 = vld [vmem:[%s19208_s1 + $0xc0] sm:$0xf]  ;;  %v15142_v15 = vld [vmem:[%s19208_s1 + $0x44] sm:$0xf] }
 0x152   :  { %2923 = vmatpush.bf16.msra.mxu3 %v11389_v43  ;;  %v15123_v43 = vld [vmem:[%s19208_s1 + $0xa4] sm:$0xf0]  ;;  %v11281_v50 = vor.u32 %v15107_v39, %v11280_v38  ;;  %v11449_v38 = vor.u32 %v15149_v25, %v11448_v24  ;;  %v15141_v25 = vld [vmem:[%s19208_s1 + $0x34] sm:$0xf0] }
 0x153   :  { %2885 = vmatpush.bf16.msra.mxu0 %v11313_v51  ;;  %v1609_v41 = vpop.f32.mrf.mxu2  ;;  %v11272_v51 = vld [vmem:[%s19208_s1 + $0x10] sm:$0xf]  ;;  %v11345_v55 = vor.u32 %v15123_v43, %v11344_v40  ;;  %v11453_v40 = vor.u32 %v15148_v29, %v11450_v30  ;;  %v11504_v43 = vld [vmem:[%s19208_s1 + $0xe0] sm:$0xf]  ;;  %v15143_v6 = vld [vmem:[%s19208_s1 + $0x44] sm:$0xf0] }
 0x154   :  { %2898 = vmatpush.bf16.msra.mxu1 %v11377_v53  ;;  %v1610_v46 = vadd.f32 %v1609_v41, %v1404_v31  ;;  %v1622_v47 = vpop.f32.mrf.mxu3  ;;  %v1598_v60 = vpop.f32.mrf.mxu1  ;;  %v11440_v41 = vld [vmem:[%s19208_s1 + $0x60] sm:$0xf]  ;;  %v15159_v13 = vld [vmem:[%s19208_s1 + $0xc4] sm:$0xf0] }
 0x155   :  { %2911 = vmatpush.bf16.msra.mxu2 %v11317_v54  ;;  %v1585_v54 = vpop.f32.mrf.mxu0  ;;  %v15144_v60 = vld [vmem:[%s19208_s1 + $0x54] sm:$0xf] }
 0x156   :  { %2924 = vmatpush.bf16.msra.mxu3 %v11381_v58  ;;  %v1623_v53 = vadd.f32 %v1622_v47, %v1610_v46  ;;  %v11336_v58 = vld [vmem:[%s19208_s1 + $0x90] sm:$0xf]  ;;  %v15146_v46 = vld [vmem:[%s19208_s1 + $0x64] sm:$0xf]  ;;  %v11442_v47 = vld [vmem:[%s19208_s1 + $0x68] sm:$0xf0]  ;;  %v11505_v54 = vor.u32 %v15163_v45, %v11504_v43 }
 0x157   :  { %2886 = vmatpush.bf16.msra.mxu0 %v11305_v1  ;;  %v11337_v11 = vor.u32 %v15121_v59, %v11336_v58  ;;  %v15161_v58 = vld [vmem:[%s19208_s1 + $0xd4] sm:$0xf0]  ;;  %v15155_v45 = vld [vmem:[%s19208_s1 + $0xa4] sm:$0xf0] }
 0x158   :  { %2899 = vmatpush.bf16.msra.mxu1 %v11369_v3  ;;  %v1627_v1 = vmax.f32 %v1623_v53, 0.0  ;;  %v11338_v3 = vld [vmem:[%s19208_s1 + $0x98] sm:$0xf0]  ;;  %v11432_v53 = vld [vmem:[%s19208_s1 + $0x50] sm:$0xf] }
 0x159   :  { %2912 = vmatpush.bf16.msra.mxu2 %v11309_v4  ;;  %v11273_v4 = vor.u32 %v15105_v57, %v11272_v51  ;;  %v11341_v18 = vor.u32 %v15120_v2, %v11338_v3  ;;  %v11496_v57 = vld [vmem:[%s19208_s1 + $0xd0] sm:$0xf]  ;;  %v11424_v3 = vld [vmem:[%s19208_s1 + $0x40] sm:$0xf] }
 0x15a   :  { %2925 = vmatpush.bf16.msra.mxu3 %v11373_v9  ;;  %v18248_v9 = vpack.c.bf16 %v1627_v1, %v1626_v52  ;;  %v11498_v1 = vld [vmem:[%s19208_s1 + $0xd8] sm:$0xf0]  ;;  %v11425_v19 = vor.u32 %v15143_v6, %v11424_v3 }
 0x15b   :  { %2887 = vmatpush.bf16.msra.mxu0 %v11297_v17  ;;  %v1611_v16 = vpop.f32.mrf.mxu2  ;;  %v2678_v17 = vld [vmem:[%s19207_s0 + $0x28] sm:$0xff] }
 0x15c   :  { %2900 = vmatpush.bf16.msra.mxu1 %v11361_v21  ;;  %v15118_v21 = vld [vmem:[%s19208_s1 + $0x84] sm:$0xf]  ;;  %v1624_v23 = vpop.f32.mrf.mxu3  ;;  %v2718_v31 = vunpack.c.l.b16 %v2678_v17  ;;  %v11426_v16 = vld [vmem:[%s19208_s1 + $0x48] sm:$0xf0] }
 0x15d   :  { %2913 = vmatpush.bf16.msra.mxu2 %v11301_v22  ;;  %v11330_v22 = vld [vmem:[%s19208_s1 + $0x88] sm:$0xf0]  ;;  %v11489_v23 = vor.u32 %v15159_v13, %v11488_v7  ;;  %v11429_v24 = vor.u32 %v15142_v15, %v11426_v16  ;;  %v11392_v7 = vld [vmem:[%s19208_s1] sm:$0xf] }
 0x15e   :  { %2926 = vmatpush.bf16.msra.mxu3 %v11365_v28  ;;  %v15165_v28 = vld [vmem:[%s19208_s1 + $0xf4] sm:$0xf0]  ;;  %v2720_v48 = vpack.c.b16 %v2718_v31, %v2718_v31  ;;  %v15140_v31 = vld [vmem:[%s19208_s1 + $0x34] sm:$0xf] }
 0x15f   :  { %2888 = vmatpush.bf16.msra.mxu0 %v11289_v35  ;;  %v11514_v35 = vld [vmem:[%s19208_s1 + $0xf8] sm:$0xf0]  ;;  %v11513_v39 = vor.u32 %v15165_v28, %v11512_v26  ;;  %v11480_v26 = vld [vmem:[%s19208_s1 + $0xb0] sm:$0xf] }
 0x160   :  { %2901 = vmatpush.bf16.msra.mxu1 %v11353_v36  ;;  %v2719_v36 = vunpack.c.h.b16 %v2678_v17  ;;  %v11517_v44 = vor.u32 %v15164_v34, %v11514_v35  ;;  %v15158_v17 = vld [vmem:[%s19208_s1 + $0xc4] sm:$0xf]  ;;  %v15156_v34 = vld [vmem:[%s19208_s1 + $0xb4] sm:$0xf]  ;;  %v11482_v35 = vld [vmem:[%s19208_s1 + $0xb8] sm:$0xf0] }
 0x161   :  { %2914 = vmatpush.bf16.msra.mxu2 %v11293_v37  ;;  %v11333_v37 = vor.u32 %v15118_v21, %v11330_v22  ;;  %v11416_v21 = vld [vmem:[%s19208_s1 + $0x30] sm:$0xf] }
 0x162   :  { %2927 = vmatpush.bf16.msra.mxu3 %v11357_v42  ;;  %v15147_v42 = vld [vmem:[%s19208_s1 + $0x64] sm:$0xf0]  ;;  %v2721_v51 = vpack.c.b16 %v2719_v36, %v2719_v36 }
 0x163   :  { %2889 = vmatpush.bf16.msra.mxu0 %v11281_v50  ;;  %v11506_v50 = vld [vmem:[%s19208_s1 + $0xe8] sm:$0xf0]  ;;  %v11441_v52 = vor.u32 %v15147_v42, %v11440_v41  ;;  %v15139_v41 = vld [vmem:[%s19208_s1 + $0x24] sm:$0xf0]  ;;  %v11472_v42 = vld [vmem:[%s19208_s1 + $0xa0] sm:$0xf] }
 0x164   :  { %2902 = vmatpush.bf16.msra.mxu1 %v11345_v55  ;;  %v11445_v55 = vor.u32 %v15146_v46, %v11442_v47  ;;  %v11509_v59 = vor.u32 %v15162_v49, %v11506_v50  ;;  %v15138_v46 = vld [vmem:[%s19208_s1 + $0x24] sm:$0xf]  ;;  %v11410_v47 = vld [vmem:[%s19208_s1 + $0x28] sm:$0xf0] }
 0x165   :  { %2915 = vmatpush.bf16.msra.mxu2 %v11285_v56  ;;  %v15145_v56 = vld [vmem:[%s19208_s1 + $0x54] sm:$0xf0]  ;;  %v15154_v50 = vld [vmem:[%s19208_s1 + $0xa4] sm:$0xf] }
 0x166   :  { %2928 = vmatpush.bf16.msra.mxu3 %v11349_v62  ;;  %v11434_v62 = vld [vmem:[%s19208_s1 + $0x58] sm:$0xf0]  ;;  %v11433_v2 = vor.u32 %v15145_v56, %v11432_v53  ;;  %v11400_v53 = vld [vmem:[%s19208_s1 + $0x10] sm:$0xf] }
 0x167   :  { %2890 = vmatpush.bf16.msra.mxu0 %v11273_v4  ;;  %v11497_v4 = vor.u32 %v15161_v58, %v11496_v57  ;;  %v11437_v5 = vor.u32 %v15144_v60, %v11434_v62  ;;  %v11473_v57 = vor.u32 %v15155_v45, %v11472_v42  ;;  %v11413_v58 = vor.u32 %v15138_v46, %v11410_v47  ;;  %v11464_v60 = vld [vmem:[%s19208_s1 + $0x90] sm:$0xf]  ;;  %v15153_v62 = vld [vmem:[%s19208_s1 + $0x94] sm:$0xf0]  ;;  %v15179_v45 = vld [vmem:[%s19208_s1 + $0x64] sm:$0xf0] }
 0x168   :  { %2903 = vmatpush.bf16.msra.mxu1 %v11337_v11  ;;  %v1665_v11 = vperm.slane %v1663_v63, 0  ;;  %v11465_v15 = vor.u32 %v15153_v62, %v11464_v60  ;;  %v11632_v46 = vld [vmem:[%s19208_s1 + $0xe0] sm:$0xf]  ;;  %v11624_v60 = vld [vmem:[%s19208_s1 + $0xd0] sm:$0xf] }
 0x169   :  { %2916 = vmatpush.bf16.msra.mxu2 %v11277_v12  ;;  %v11501_v12 = vor.u32 %v15160_v0, %v11498_v1  ;;  %v15136_v1 = vld [vmem:[%s19208_s1 + $0x14] sm:$0xf]  ;;  %v15193_v62 = vld [vmem:[%s19208_s1 + $0xd4] sm:$0xf0] }
 0x16a   :  { %2929 = vmatpush.bf16.msra.mxu3 %v11341_v18  ;;  %v11490_v18 = vld [vmem:[%s19208_s1 + $0xc8] sm:$0xf0] }
 0x16b   :  { %2891 = vmatpush.bf16.msra.mxu0 %v11265_v27  ;;  %v1845_v22 = vpop.f32.mrf.mxu0  ;;  %v15157_v27 = vld [vmem:[%s19208_s1 + $0xb4] sm:$0xf0]  ;;  %v11493_v30 = vor.u32 %v15158_v17, %v11490_v18  ;;  %v15151_v17 = vld [vmem:[%s19208_s1 + $0x84] sm:$0xf0]  ;;  %v15134_v18 = vld [vmem:[%s19208_s1 + $0x4] sm:$0xf] }
 0x16c   :  { %2904 = vmatpush.bf16.msra.mxu1 %v11329_v32  ;;  %v1846_v28 = vadd.f32 %v1845_v22, %v1665_v11  ;;  %v1858_v29 = vpop.f32.mrf.mxu1  ;;  %v11418_v32 = vld [vmem:[%s19208_s1 + $0x38] sm:$0xf0]  ;;  %v15135_v11 = vld [vmem:[%s19208_s1 + $0x4] sm:$0xf0] }
 0x16d   :  { %2917 = vmatpush.bf16.msra.mxu2 %v11269_v33  ;;  %v1666_v33 = vperm.slane %v1663_v63, 1 }
 0x16e   :  { %2930 = vmatpush.bf16.msra.mxu3 %v11333_v37  ;;  %2892 = vmatmul.bf16.vlgmr.msra.gmra.mxu0 %v2720_v48  ;;  %v1859_v36 = vadd.f32 %v1858_v29, %v1846_v28  ;;  %v11417_v37 = vor.u32 %v15141_v25, %v11416_v21  ;;  %v2940_v21 = vld [vmem:[%s19207_s0 + $0x2c] sm:$0xff]  ;;  %v15181_v28 = vld [vmem:[%s19208_s1 + $0x74] sm:$0xf0] }
 0x16f   :  { %3146 = vmatpush.bf16.msrb.mxu0 %v11449_v38  ;;  %2905 = vmatmul.bf16.vlgmr.msra.gmra.mxu1 %v2721_v51  ;;  %v11481_v38 = vor.u32 %v15157_v27, %v11480_v26  ;;  %v11458_v25 = vld [vmem:[%s19208_s1 + $0x88] sm:$0xf0]  ;;  %v11576_v27 = vld [vmem:[%s19208_s1 + $0x70] sm:$0xf] }
 0x170   :  { %3159 = vmatpush.bf16.msrb.mxu1 %v11513_v39  ;;  %2918 = vmatmul.bf16.vlgmr.msra.gmra.mxu2 %v2720_v48  ;;  %v11421_v39 = vor.u32 %v15140_v31, %v11418_v32  ;;  %v11640_v29 = vld [vmem:[%s19208_s1 + $0xf0] sm:$0xf]  ;;  %v15197_v31 = vld [vmem:[%s19208_s1 + $0xf4] sm:$0xf0]  ;;  %v15180_v32 = vld [vmem:[%s19208_s1 + $0x74] sm:$0xf] }
 0x171   :  { %3172 = vmatpush.bf16.msrb.mxu2 %v11453_v40  ;;  %2931 = vmatmul.bf16.vlgmr.msra.gmra.mxu3 %v2721_v51  ;;  %v11408_v40 = vld [vmem:[%s19208_s1 + $0x20] sm:$0xf]  ;;  %v11474_v51 = vld [vmem:[%s19208_s1 + $0xa8] sm:$0xf0]  ;;  %v11641_v42 = vor.u32 %v15197_v31, %v11640_v29  ;;  %v15173_v29 = vld [vmem:[%s19208_s1 + $0x34] sm:$0xf0] }
 0x172   :  { %3185 = vmatpush.bf16.msrb.mxu3 %v11517_v44  ;;  %v11485_v44 = vor.u32 %v15156_v34, %v11482_v35  ;;  %v11477_v0 = vor.u32 %v15154_v50, %v11474_v51  ;;  %v2980_v34 = vunpack.c.l.b16 %v2940_v21  ;;  %v11570_v50 = vld [vmem:[%s19208_s1 + $0x68] sm:$0xf0]  ;;  %v15189_v31 = vld [vmem:[%s19208_s1 + $0xb4] sm:$0xf0] }
 0x173   :  { %3147 = vmatpush.bf16.msrb.mxu0 %v11441_v52  ;;  %v1871_v43 = vpop.f32.mrf.mxu2  ;;  %v11409_v52 = vor.u32 %v15139_v41, %v11408_v40  ;;  %v1847_v56 = vpop.f32.mrf.mxu0  ;;  %v11577_v41 = vor.u32 %v15181_v28, %v11576_v27 }
 0x174   :  { %3160 = vmatpush.bf16.msrb.mxu1 %v11505_v54  ;;  %v1872_v48 = vadd.f32 %v1871_v43, %v1666_v33  ;;  %v1884_v49 = vpop.f32.mrf.mxu3  ;;  %v1888_v54 = vmax.f32 %v1859_v36, 0.0  ;;  %v1860_v63 = vpop.f32.mrf.mxu1  ;;  %v11578_v33 = vld [vmem:[%s19208_s1 + $0x78] sm:$0xf0]  ;;  %v2982_v51 = vpack.c.b16 %v2980_v34, %v2980_v34  ;;  %v11560_v56 = vld [vmem:[%s19208_s1 + $0x50] sm:$0xf] }
 0x175   :  { %3173 = vmatpush.bf16.msrb.mxu2 %v11445_v55  ;;  %v11581_v43 = vor.u32 %v15180_v32, %v11578_v33 }
 0x176   :  { %3186 = vmatpush.bf16.msrb.mxu3 %v11509_v59  ;;  %v1885_v55 = vadd.f32 %v1884_v49, %v1872_v48  ;;  %v15137_v59 = vld [vmem:[%s19208_s1 + $0x14] sm:$0xf0]  ;;  %v15195_v48 = vld [vmem:[%s19208_s1 + $0xe4] sm:$0xf0]  ;;  %v15178_v49 = vld [vmem:[%s19208_s1 + $0x64] sm:$0xf] }
 0x177   :  { %3148 = vmatpush.bf16.msrb.mxu0 %v11433_v2  ;;  %v11402_v2 = vld [vmem:[%s19208_s1 + $0x18] sm:$0xf0]  ;;  %v11401_v6 = vor.u32 %v15137_v59, %v11400_v53  ;;  %v11634_v53 = vld [vmem:[%s19208_s1 + $0xe8] sm:$0xf0]  ;;  %v15177_v59 = vld [vmem:[%s19208_s1 + $0x54] sm:$0xf0] }
 0x178   :  { %3161 = vmatpush.bf16.msrb.mxu1 %v11497_v4  ;;  %v1889_v3 = vmax.f32 %v1885_v55, 0.0  ;;  %v15152_v4 = vld [vmem:[%s19208_s1 + $0x94] sm:$0xf]  ;;  %v11405_v16 = vor.u32 %v15136_v1, %v11402_v2  ;;  %v11562_v1 = vld [vmem:[%s19208_s1 + $0x58] sm:$0xf0] }
 0x179   :  { %3174 = vmatpush.bf16.msrb.mxu2 %v11437_v5  ;;  %v11466_v5 = vld [vmem:[%s19208_s1 + $0x98] sm:$0xf0]  ;;  %v1925_v2 = vld [vmem:[%s19209_s2] sm:$0x3] }
 0x17a   :  { %3187 = vmatpush.bf16.msrb.mxu3 %v11501_v12  ;;  %v11456_v12 = vld [vmem:[%s19208_s1 + $0x80] sm:$0xf]  ;;  %v18448_v13 = vpack.c.bf16 %v1889_v3, %v1888_v54  ;;  %v11469_v22 = vor.u32 %v15152_v4, %v11466_v5  ;;  %v15192_v3 = vld [vmem:[%s19208_s1 + $0xd4] sm:$0xf]  ;;  %v11626_v4 = vld [vmem:[%s19208_s1 + $0xd8] sm:$0xf0]  ;;  %v11561_v5 = vor.u32 %v15177_v59, %v11560_v56 }
 0x17b   :  { %3149 = vmatpush.bf16.msrb.mxu0 %v11425_v19  ;;  %v1873_v19 = vpop.f32.mrf.mxu2  ;;  %v11457_v35 = vor.u32 %v15151_v17, %v11456_v12  ;;  %v15175_v12 = vld [vmem:[%s19208_s1 + $0x44] sm:$0xf0]  ;;  %v11629_v17 = vor.u32 %v15192_v3, %v11626_v4 }
 0x17c   :  { %3162 = vmatpush.bf16.msrb.mxu1 %v11489_v23  ;;  %v11394_v23 = vld [vmem:[%s19208_s1 + $0x8] sm:$0xf0]  ;;  %v1886_v26 = vpop.f32.mrf.mxu3  ;;  %v15174_v19 = vld [vmem:[%s19208_s1 + $0x44] sm:$0xf] }
 0x17d   :  { %3175 = vmatpush.bf16.msrb.mxu2 %v11429_v24  ;;  %v15150_v24 = vld [vmem:[%s19208_s1 + $0x84] sm:$0xf]  ;;  %v11397_v36 = vor.u32 %v15134_v18, %v11394_v23  ;;  %v15191_v18 = vld [vmem:[%s19208_s1 + $0xc4] sm:$0xf0]  ;;  %v11618_v23 = vld [vmem:[%s19208_s1 + $0xc8] sm:$0xf0] }
 0x17e   :  { %3188 = vmatpush.bf16.msrb.mxu3 %v11493_v30  ;;  %v11393_v30 = vor.u32 %v15135_v11, %v11392_v7  ;;  %v11461_v40 = vor.u32 %v15150_v24, %v11458_v25  ;;  %v11625_v7 = vor.u32 %v15193_v62, %v11624_v60  ;;  %v11544_v25 = vld [vmem:[%s19208_s1 + $0x30] sm:$0xf] }
 0x17f   :  { %3150 = vmatpush.bf16.msrb.mxu0 %v11417_v37  ;;  %v15196_v37 = vld [vmem:[%s19208_s1 + $0xf4] sm:$0xf] }
 0x180   :  { %3163 = vmatpush.bf16.msrb.mxu1 %v11481_v38  ;;  %v11642_v38 = vld [vmem:[%s19208_s1 + $0xf8] sm:$0xf0] }
 0x181   :  { %3176 = vmatpush.bf16.msrb.mxu2 %v11421_v39  ;;  %v2981_v39 = vunpack.c.h.b16 %v2940_v21  ;;  %v11645_v47 = vor.u32 %v15196_v37, %v11642_v38  ;;  %v11554_v21 = vld [vmem:[%s19208_s1 + $0x48] sm:$0xf0]  ;;  %v1928_v37 = vperm.slane %v1925_v2, 1  ;;  %v15188_v38 = vld [vmem:[%s19208_s1 + $0xb4] sm:$0xf] }
 0x182   :  { %3189 = vmatpush.bf16.msrb.mxu3 %v11485_v44  ;;  %v11568_v44 = vld [vmem:[%s19208_s1 + $0x60] sm:$0xf]  ;;  %v11557_v28 = vor.u32 %v15174_v19, %v11554_v21 }
 0x183   :  { %3151 = vmatpush.bf16.msrb.mxu0 %v11409_v52  ;;  %v15194_v52 = vld [vmem:[%s19208_s1 + $0xe4] sm:$0xf]  ;;  %v2983_v54 = vpack.c.b16 %v2981_v39, %v2981_v39  ;;  %v11569_v55 = vor.u32 %v15179_v45, %v11568_v44  ;;  %v11610_v39 = vld [vmem:[%s19208_s1 + $0xb8] sm:$0xf0]  ;;  %v11536_v44 = vld [vmem:[%s19208_s1 + $0x20] sm:$0xf] }
 0x184   :  { %3164 = vmatpush.bf16.msrb.mxu1 %v11473_v57  ;;  %v11633_v57 = vor.u32 %v15195_v48, %v11632_v46  ;;  %v11637_v63 = vor.u32 %v15194_v52, %v11634_v53  ;;  %v15171_v45 = vld [vmem:[%s19208_s1 + $0x24] sm:$0xf0]  ;;  %v11600_v46 = vld [vmem:[%s19208_s1 + $0xa0] sm:$0xf]  ;;  %v11613_v48 = vor.u32 %v15188_v38, %v11610_v39  ;;  %v11706_v38 = vld [vmem:[%s19208_s1 + $0x78] sm:$0xf0] }
 0x185   :  { %3177 = vmatpush.bf16.msrb.mxu2 %v11413_v58  ;;  %v11573_v58 = vor.u32 %v15178_v49, %v11570_v50  ;;  %v15187_v49 = vld [vmem:[%s19208_s1 + $0xa4] sm:$0xf0]  ;;  %v15170_v50 = vld [vmem:[%s19208_s1 + $0x24] sm:$0xf]  ;;  %v11537_v56 = vor.u32 %v15171_v45, %v11536_v44 }
 0x186   :  { %3190 = vmatpush.bf16.msrb.mxu3 %v11477_v0  ;;  %v15176_v0 = vld [vmem:[%s19208_s1 + $0x54] sm:$0xf]  ;;  %v11601_v62 = vor.u32 %v15187_v49, %v11600_v46  ;;  %v11696_v49 = vld [vmem:[%s19208_s1 + $0x60] sm:$0xf] }
 0x187   :  { %3152 = vmatpush.bf16.msrb.mxu0 %v11401_v6  ;;  %v11552_v6 = vld [vmem:[%s19208_s1 + $0x40] sm:$0xf]  ;;  %v11565_v11 = vor.u32 %v15176_v0, %v11562_v1  ;;  %v15169_v0 = vld [vmem:[%s19208_s1 + $0x14] sm:$0xf0]  ;;  %v11592_v1 = vld [vmem:[%s19208_s1 + $0x90] sm:$0xf] }
 0x188   :  { %3165 = vmatpush.bf16.msrb.mxu1 %v11465_v15  ;;  %v11616_v15 = vld [vmem:[%s19208_s1 + $0xc0] sm:$0xf]  ;;  %v11553_v24 = vor.u32 %v15175_v12, %v11552_v6  ;;  %v11530_v6 = vld [vmem:[%s19208_s1 + $0x18] sm:$0xf0] }
 0x189   :  { %3178 = vmatpush.bf16.msrb.mxu2 %v11405_v16  ;;  %v1927_v16 = vperm.slane %v1925_v2, 0  ;;  %v11617_v27 = vor.u32 %v15191_v18, %v11616_v15  ;;  %v15185_v2 = vld [vmem:[%s19208_s1 + $0x94] sm:$0xf0]  ;;  %v11594_v12 = vld [vmem:[%s19208_s1 + $0x98] sm:$0xf0] }
 0x18a   :  { %3191 = vmatpush.bf16.msrb.mxu3 %v11469_v22  ;;  %v15190_v22 = vld [vmem:[%s19208_s1 + $0xc4] sm:$0xf]  ;;  %v11584_v18 = vld [vmem:[%s19208_s1 + $0x80] sm:$0xf]  ;;  %v11593_v21 = vor.u32 %v15185_v2, %v11592_v1  ;;  %v15209_v1 = vld [vmem:[%s19208_s1 + $0x54] sm:$0xf0] }
 0x18b   :  { %3153 = vmatpush.bf16.msrb.mxu0 %v11393_v30  ;;  %v2107_v26 = vpop.f32.mrf.mxu0  ;;  %v11608_v30 = vld [vmem:[%s19208_s1 + $0xb0] sm:$0xf]  ;;  %v11621_v34 = vor.u32 %v15190_v22, %v11618_v23  ;;  %v15183_v23 = vld [vmem:[%s19208_s1 + $0x84] sm:$0xf0] }
 0x18c   :  { %3166 = vmatpush.bf16.msrb.mxu1 %v11457_v35  ;;  %v2108_v32 = vadd.f32 %v2107_v26, %v1927_v16  ;;  %v2120_v33 = vpop.f32.mrf.mxu1  ;;  %v15172_v35 = vld [vmem:[%s19208_s1 + $0x34] sm:$0xf]  ;;  %v11520_v16 = vld [vmem:[%s19208_s1] sm:$0xf]  ;;  %v11752_v2 = vld [vmem:[%s19208_s1 + $0xd0] sm:$0xf] }
 0x18d   :  { %3179 = vmatpush.bf16.msrb.mxu2 %v11397_v36  ;;  %v11546_v36 = vld [vmem:[%s19208_s1 + $0x38] sm:$0xf0]  ;;  %v3202_v26 = vld [vmem:[%s19207_s0 + $0x30] sm:$0xff] }
 0x18e   :  { %3192 = vmatpush.bf16.msrb.mxu3 %v11461_v40  ;;  %3154 = vmatmul.bf16.vlgmr.msrb.gmra.mxu0 %v2982_v51  ;;  %v2121_v40 = vadd.f32 %v2120_v33, %v2108_v32  ;;  %v11704_v32 = vld [vmem:[%s19208_s1 + $0x70] sm:$0xf]  ;;  %v15213_v33 = vld [vmem:[%s19208_s1 + $0x74] sm:$0xf0]  ;;  %v3242_v39 = vunpack.c.l.b16 %v3202_v26  ;;  %v3243_v44 = vunpack.c.h.b16 %v3202_v26  ;;  %v15206_v26 = vld [vmem:[%s19208_s1 + $0x44] sm:$0xf] }
 0x18f   :  { %3408 = vmatpush.bf16.msra.mxu0 %v11577_v41  ;;  %3167 = vmatmul.bf16.vlgmr.msrb.gmra.mxu1 %v2983_v54  ;;  %v11545_v41 = vor.u32 %v15173_v29, %v11544_v25  ;;  %v15182_v29 = vld [vmem:[%s19208_s1 + $0x84] sm:$0xf]  ;;  %v11705_v46 = vor.u32 %v15213_v33, %v11704_v32 }
 0x190   :  { %3421 = vmatpush.bf16.msra.mxu1 %v11641_v42  ;;  %3180 = vmatmul.bf16.vlgmr.msrb.gmra.mxu2 %v2982_v51  ;;  %v11609_v42 = vor.u32 %v15189_v31, %v11608_v30  ;;  %v11538_v51 = vld [vmem:[%s19208_s1 + $0x28] sm:$0xf0] }
 0x191   :  { %3434 = vmatpush.bf16.msra.mxu2 %v11581_v43  ;;  %3193 = vmatmul.bf16.vlgmr.msrb.gmra.mxu3 %v2983_v54  ;;  %v11549_v43 = vor.u32 %v15172_v35, %v11546_v36  ;;  %v15186_v54 = vld [vmem:[%s19208_s1 + $0xa4] sm:$0xf]  ;;  %v11586_v30 = vld [vmem:[%s19208_s1 + $0x88] sm:$0xf0]  ;;  %v15229_v36 = vld [vmem:[%s19208_s1 + $0xf4] sm:$0xf0] }
 0x192   :  { %3447 = vmatpush.bf16.msra.mxu3 %v11645_v47  ;;  %v11589_v45 = vor.u32 %v15182_v29, %v11586_v30  ;;  %v11746_v29 = vld [vmem:[%s19208_s1 + $0xc8] sm:$0xf0] }
 0x193   :  { %3409 = vmatpush.bf16.msra.mxu0 %v11569_v55  ;;  %v2133_v47 = vpop.f32.mrf.mxu2  ;;  %v11602_v55 = vld [vmem:[%s19208_s1 + $0xa8] sm:$0xf0]  ;;  %v2109_v60 = vpop.f32.mrf.mxu0 }
 0x194   :  { %3422 = vmatpush.bf16.msra.mxu1 %v11633_v57  ;;  %v2134_v52 = vadd.f32 %v2133_v47, %v1928_v37  ;;  %v2146_v53 = vpop.f32.mrf.mxu3  ;;  %v11528_v57 = vld [vmem:[%s19208_s1 + $0x10] sm:$0xf]  ;;  %v2122_v3 = vpop.f32.mrf.mxu1  ;;  %v11605_v4 = vor.u32 %v15186_v54, %v11602_v55  ;;  %v15212_v37 = vld [vmem:[%s19208_s1 + $0x74] sm:$0xf]  ;;  %v15210_v54 = vld [vmem:[%s19208_s1 + $0x64] sm:$0xf] }
 0x195   :  { %3435 = vmatpush.bf16.msra.mxu2 %v11573_v58  ;;  %v2150_v58 = vmax.f32 %v2121_v40, 0.0  ;;  %v11529_v15 = vor.u32 %v15169_v0, %v11528_v57  ;;  %v11585_v40 = vor.u32 %v15183_v23, %v11584_v18  ;;  %v11698_v55 = vld [vmem:[%s19208_s1 + $0x68] sm:$0xf0]  ;;  %v15226_v57 = vld [vmem:[%s19208_s1 + $0xe4] sm:$0xf] }
 0x196   :  { %3448 = vmatpush.bf16.msra.mxu3 %v11637_v63  ;;  %v2147_v59 = vadd.f32 %v2146_v53, %v2134_v52  ;;  %v11541_v63 = vor.u32 %v15170_v50, %v11538_v51  ;;  %v15211_v50 = vld [vmem:[%s19208_s1 + $0x64] sm:$0xf0]  ;;  %v11760_v51 = vld [vmem:[%s19208_s1 + $0xe0] sm:$0xf]  ;;  %v11701_v0 = vor.u32 %v15210_v54, %v11698_v55  ;;  %v15225_v3 = vld [vmem:[%s19208_s1 + $0xd4] sm:$0xf0] }
 0x197   :  { %3410 = vmatpush.bf16.msra.mxu0 %v11561_v5  ;;  %v15168_v5 = vld [vmem:[%s19208_s1 + $0x14] sm:$0xf]  ;;  %v15227_v53 = vld [vmem:[%s19208_s1 + $0xe4] sm:$0xf0]  ;;  %v11697_v60 = vor.u32 %v15211_v50, %v11696_v49  ;;  %v11664_v50 = vld [vmem:[%s19208_s1 + $0x20] sm:$0xf] }
 0x198   :  { %3423 = vmatpush.bf16.msra.mxu1 %v11625_v7  ;;  %v2151_v7 = vmax.f32 %v2147_v59, 0.0  ;;  %v11533_v22 = vor.u32 %v15168_v5, %v11530_v6  ;;  %v3245_v59 = vpack.c.b16 %v3243_v44, %v3243_v44  ;;  %v15208_v5 = vld [vmem:[%s19208_s1 + $0x54] sm:$0xf]  ;;  %v11690_v6 = vld [vmem:[%s19208_s1 + $0x58] sm:$0xf0] }
 0x199   :  { %3436 = vmatpush.bf16.msra.mxu2 %v11565_v11  ;;  %v15184_v11 = vld [vmem:[%s19208_s1 + $0x94] sm:$0xf]  ;;  %v11693_v18 = vor.u32 %v15208_v5, %v11690_v6  ;;  %v15219_v55 = vld [vmem:[%s19208_s1 + $0xa4] sm:$0xf0]  ;;  %v15201_v6 = vld [vmem:[%s19208_s1 + $0x14] sm:$0xf0] }
 0x19a   :  { %3449 = vmatpush.bf16.msra.mxu3 %v11629_v17  ;;  %v15167_v17 = vld [vmem:[%s19208_s1 + $0x4] sm:$0xf0]  ;;  %v18648_v19 = vpack.c.bf16 %v2151_v7, %v2150_v58  ;;  %v11762_v58 = vld [vmem:[%s19208_s1 + $0xe8] sm:$0xf0]  ;;  %v2187_v7 = vld [vmem:[%s19209_s2] sm:$0x3] }
 0x19b   :  { %3411 = vmatpush.bf16.msra.mxu0 %v11553_v24  ;;  %v15166_v24 = vld [vmem:[%s19208_s1 + $0x4] sm:$0xf]  ;;  %v2135_v25 = vpop.f32.mrf.mxu2  ;;  %v11521_v35 = vor.u32 %v15167_v17, %v11520_v16  ;;  %v11680_v16 = vld [vmem:[%s19208_s1 + $0x40] sm:$0xf]  ;;  %v11753_v17 = vor.u32 %v15225_v3, %v11752_v2  ;;  %v2189_v23 = vperm.slane %v2187_v7, 0 }
 0x19c   :  { %3424 = vmatpush.bf16.msra.mxu1 %v11617_v27  ;;  %v11597_v27 = vor.u32 %v15184_v11, %v11594_v12  ;;  %v2148_v31 = vpop.f32.mrf.mxu3  ;;  %v15224_v11 = vld [vmem:[%s19208_s1 + $0xd4] sm:$0xf]  ;;  %v11754_v12 = vld [vmem:[%s19208_s1 + $0xd8] sm:$0xf0]  ;;  %v15223_v25 = vld [vmem:[%s19208_s1 + $0xc4] sm:$0xf0] }
 0x19d   :  { %3437 = vmatpush.bf16.msra.mxu2 %v11557_v28  ;;  %v11522_v28 = vld [vmem:[%s19208_s1 + $0x8] sm:$0xf0]  ;;  %v11672_v31 = vld [vmem:[%s19208_s1 + $0x30] sm:$0xf]  ;;  %v15220_v44 = vld [vmem:[%s19208_s1 + $0xb4] sm:$0xf] }
 0x19e   :  { %3450 = vmatpush.bf16.msra.mxu3 %v11621_v34  ;;  %v11768_v34 = vld [vmem:[%s19208_s1 + $0xf0] sm:$0xf] }
 0x19f   :  { %3412 = vmatpush.bf16.msra.mxu0 %v11545_v41  ;;  %v11525_v41 = vor.u32 %v15166_v24, %v11522_v28  ;;  %v11769_v47 = vor.u32 %v15229_v36, %v11768_v34  ;;  %v11757_v24 = vor.u32 %v15224_v11, %v11754_v12  ;;  %v15222_v28 = vld [vmem:[%s19208_s1 + $0xc4] sm:$0xf]  ;;  %v11736_v36 = vld [vmem:[%s19208_s1 + $0xb0] sm:$0xf]  ;;  %v15217_v11 = vld [vmem:[%s19208_s1 + $0x94] sm:$0xf0] }
 0x1a0   :  { %3425 = vmatpush.bf16.msra.mxu1 %v11609_v42  ;;  %v15228_v42 = vld [vmem:[%s19208_s1 + $0xf4] sm:$0xf] }
 0x1a1   :  { %3438 = vmatpush.bf16.msra.mxu2 %v11549_v43  ;;  %v11770_v43 = vld [vmem:[%s19208_s1 + $0xf8] sm:$0xf0] }
 0x1a2   :  { %3451 = vmatpush.bf16.msra.mxu3 %v11613_v48  ;;  %v11709_v48 = vor.u32 %v15212_v37, %v11706_v38  ;;  %v11773_v52 = vor.u32 %v15228_v42, %v11770_v43  ;;  %v15221_v37 = vld [vmem:[%s19208_s1 + $0xb4] sm:$0xf0]  ;;  %v11674_v42 = vld [vmem:[%s19208_s1 + $0x38] sm:$0xf0]  ;;  %v2190_v43 = vperm.slane %v2187_v7, 1 }
 0x1a3   :  { %3413 = vmatpush.bf16.msra.mxu0 %v11537_v56  ;;  %v3244_v56 = vpack.c.b16 %v3242_v39, %v3242_v39  ;;  %v11720_v7 = vld [vmem:[%s19208_s1 + $0x90] sm:$0xf] }
 0x1a4   :  { %3426 = vmatpush.bf16.msra.mxu1 %v11601_v62  ;;  %v11688_v62 = vld [vmem:[%s19208_s1 + $0x50] sm:$0xf] }
 0x1a5   :  { %3439 = vmatpush.bf16.msra.mxu2 %v11541_v63  ;;  %v11761_v63 = vor.u32 %v15227_v53, %v11760_v51  ;;  %v15203_v51 = vld [vmem:[%s19208_s1 + $0x24] sm:$0xf0] }
 0x1a6   :  { %3452 = vmatpush.bf16.msra.mxu3 %v11605_v4  ;;  %v11765_v4 = vor.u32 %v15226_v57, %v11762_v58  ;;  %v11666_v57 = vld [vmem:[%s19208_s1 + $0x28] sm:$0xf0] }
 0x1a7   :  { %3414 = vmatpush.bf16.msra.mxu0 %v11529_v15  ;;  %v11689_v15 = vor.u32 %v15209_v1, %v11688_v62  ;;  %v11730_v62 = vld [vmem:[%s19208_s1 + $0xa8] sm:$0xf0] }
 0x1a8   :  { %3427 = vmatpush.bf16.msra.mxu1 %v11593_v21  ;;  %v15207_v21 = vld [vmem:[%s19208_s1 + $0x44] sm:$0xf0] }
 0x1a9   :  { %3440 = vmatpush.bf16.msra.mxu2 %v11533_v22  ;;  %v11744_v22 = vld [vmem:[%s19208_s1 + $0xc0] sm:$0xf]  ;;  %v11681_v30 = vor.u32 %v15207_v21, %v11680_v16  ;;  %v15200_v16 = vld [vmem:[%s19208_s1 + $0x14] sm:$0xf] }
 0x1aa   :  { %3453 = vmatpush.bf16.msra.mxu3 %v11597_v27  ;;  %v11682_v27 = vld [vmem:[%s19208_s1 + $0x48] sm:$0xf0]  ;;  %v11745_v33 = vor.u32 %v15223_v25, %v11744_v22  ;;  %v15216_v21 = vld [vmem:[%s19208_s1 + $0x94] sm:$0xf]  ;;  %v11722_v22 = vld [vmem:[%s19208_s1 + $0x98] sm:$0xf0] }
 0x1ab   :  { %3415 = vmatpush.bf16.msra.mxu0 %v11521_v35  ;;  %v2369_v32 = vpop.f32.mrf.mxu0  ;;  %v11685_v34 = vor.u32 %v15206_v26, %v11682_v27  ;;  %v15205_v35 = vld [vmem:[%s19208_s1 + $0x34] sm:$0xf0]  ;;  %v15199_v25 = vld [vmem:[%s19208_s1 + $0x4] sm:$0xf0]  ;;  %v11712_v26 = vld [vmem:[%s19208_s1 + $0x80] sm:$0xf] }
 0x1ac   :  { %3428 = vmatpush.bf16.msra.mxu1 %v11585_v40  ;;  %v2370_v38 = vadd.f32 %v2369_v32, %v2189_v23  ;;  %v2382_v39 = vpop.f32.mrf.mxu1  ;;  %v11749_v40 = vor.u32 %v15222_v28, %v11746_v29  ;;  %v11721_v28 = vor.u32 %v15217_v11, %v11720_v7  ;;  %v15241_v11 = vld [vmem:[#allocation4 + $0x154] sm:$0xf0] }
 0x1ad   :  { %3441 = vmatpush.bf16.msra.mxu2 %v11525_v41  ;;  %v15204_v41 = vld [vmem:[%s19208_s1 + $0x34] sm:$0xf] }
 0x1ae   :  { %3454 = vmatpush.bf16.msra.mxu3 %v11589_v45  ;;  %3416 = vmatmul.bf16.vlgmr.msra.gmra.mxu0 %v3244_v56  ;;  %v11738_v45 = vld [vmem:[%s19208_s1 + $0xb8] sm:$0xf0]  ;;  %v11677_v49 = vor.u32 %v15204_v41, %v11674_v42  ;;  %v11896_v41 = vld [vmem:[#allocation4 + $0x1f0] sm:$0xf] }
 0x1af   :  { %3670 = vmatpush.bf16.msrb.mxu0 %v11705_v46  ;;  %3429 = vmatmul.bf16.vlgmr.msra.gmra.mxu1 %v3245_v59  ;;  %v2383_v46 = vadd.f32 %v2382_v39, %v2370_v38  ;;  %v11741_v54 = vor.u32 %v15220_v44, %v11738_v45  ;;  %v11832_v39 = vld [vmem:[#allocation4 + $0x170] sm:$0xf]  ;;  %v15277_v45 = vld [vmem:[#allocation4 + $0x274] sm:$0xf0] }
 0x1b0   :  { %3683 = vmatpush.bf16.msrb.mxu1 %v11769_v47  ;;  %3442 = vmatmul.bf16.vlgmr.msra.gmra.mxu2 %v3244_v56  ;;  %v11673_v47 = vor.u32 %v15205_v35, %v11672_v31  ;;  %v15202_v56 = vld [vmem:[%s19208_s1 + $0x24] sm:$0xf]  ;;  %v11650_v35 = vld [vmem:[%s19208_s1 + $0x8] sm:$0xf0]  ;;  %v11960_v44 = vld [vmem:[#allocation4 + $0x270] sm:$0xf] }
 0x1b1   :  { %3696 = vmatpush.bf16.msrb.mxu2 %v11709_v48  ;;  %3455 = vmatmul.bf16.vlgmr.msra.gmra.mxu3 %v3245_v59  ;;  %v11737_v48 = vor.u32 %v15221_v37, %v11736_v36  ;;  %v2412_v1 = vmax.f32 %v2383_v46, 0.0  ;;  %v11669_v5 = vor.u32 %v15202_v56, %v11666_v57  ;;  %v15198_v31 = vld [vmem:[%s19208_s1 + $0x4] sm:$0xf]  ;;  %v11714_v37 = vld [vmem:[%s19208_s1 + $0x88] sm:$0xf0] }
 0x1b2   :  { %3709 = vmatpush.bf16.msrb.mxu3 %v11773_v52  ;;  %v11728_v52 = vld [vmem:[%s19208_s1 + $0xa0] sm:$0xf]  ;;  %v15214_v36 = vld [vmem:[%s19208_s1 + $0x84] sm:$0xf]  ;;  %v15243_v57 = vld [vmem:[#allocation4 + $0x164] sm:$0xf0] }
 0x1b3   :  { %3671 = vmatpush.bf16.msrb.mxu0 %v11697_v60  ;;  %v2395_v53 = vpop.f32.mrf.mxu2  ;;  %v15218_v60 = vld [vmem:[%s19208_s1 + $0xa4] sm:$0xf]  ;;  %v2371_v3 = vpop.f32.mrf.mxu0  ;;  %v11824_v56 = vld [vmem:[#allocation4 + $0x160] sm:$0xf] }
 0x1b4   :  { %3684 = vmatpush.bf16.msrb.mxu1 %v11761_v63  ;;  %v2396_v58 = vadd.f32 %v2395_v53, %v2190_v43  ;;  %v2408_v59 = vpop.f32.mrf.mxu3  ;;  %v11665_v63 = vor.u32 %v15203_v51, %v11664_v50  ;;  %v2384_v12 = vpop.f32.mrf.mxu1  ;;  %v15261_v43 = vld [vmem:[#allocation4 + $0x1f4] sm:$0xf0] }
 0x1b5   :  { %3697 = vmatpush.bf16.msrb.mxu2 %v11701_v0  ;;  %v11656_v0 = vld [vmem:[%s19208_s1 + $0x10] sm:$0xf]  ;;  %v15293_v50 = vld [vmem:[#allocation4 + $0x2f4] sm:$0xf0] }
 0x1b6   :  { %3710 = vmatpush.bf16.msrb.mxu3 %v11765_v4  ;;  %v2409_v2 = vadd.f32 %v2408_v59, %v2396_v58  ;;  %v11729_v4 = vor.u32 %v15219_v55, %v11728_v52  ;;  %v11657_v23 = vor.u32 %v15201_v6, %v11656_v0  ;;  %v11717_v52 = vor.u32 %v15214_v36, %v11714_v37  ;;  %v11888_v58 = vld [vmem:[#allocation4 + $0x1e0] sm:$0xf]  ;;  %v11880_v12 = vld [vmem:[#allocation4 + $0x1d0] sm:$0xf]  ;;  %v15287_v37 = vld [vmem:[#allocation4 + $0x2c4] sm:$0xf0] }
 0x1b7   :  { %3672 = vmatpush.bf16.msrb.mxu0 %v11689_v15  ;;  %v11733_v15 = vor.u32 %v15218_v60, %v11730_v62  ;;  %v11961_v55 = vor.u32 %v15277_v45, %v11960_v44  ;;  %v15259_v60 = vld [vmem:[#allocation4 + $0x1e4] sm:$0xf0]  ;;  %v11952_v62 = vld [vmem:[#allocation4 + $0x260] sm:$0xf]  ;;  %v11864_v44 = vld [vmem:[#allocation4 + $0x1b0] sm:$0xf] }
 0x1b8   :  { %3685 = vmatpush.bf16.msrb.mxu1 %v11753_v17  ;;  %v11658_v17 = vld [vmem:[%s19208_s1 + $0x18] sm:$0xf0]  ;;  %v11889_v6 = vor.u32 %v15259_v60, %v11888_v58  ;;  %v12000_v36 = vld [vmem:[#allocation4 + $0x2c0] sm:$0xf]  ;;  %v15253_v45 = vld [vmem:[#allocation4 + $0x1b4] sm:$0xf0] }
 0x1b9   :  { %3698 = vmatpush.bf16.msrb.mxu2 %v11693_v18  ;;  %v2413_v18 = vmax.f32 %v2409_v2, 0.0  ;;  %v11661_v29 = vor.u32 %v15200_v16, %v11658_v17  ;;  %v15291_v2 = vld [vmem:[#allocation4 + $0x2e4] sm:$0xf0]  ;;  %v11944_v17 = vld [vmem:[#allocation4 + $0x250] sm:$0xf] }
 0x1ba   :  { %3711 = vmatpush.bf16.msrb.mxu3 %v11757_v24  ;;  %v11648_v24 = vld [vmem:[%s19208_s1] sm:$0xf] }
 0x1bb   :  { %3673 = vmatpush.bf16.msrb.mxu0 %v11681_v30  ;;  %v18848_v27 = vpack.c.bf16 %v2413_v18, %v2412_v1  ;;  %v15215_v30 = vld [vmem:[%s19208_s1 + $0x84] sm:$0xf0]  ;;  %v2397_v32 = vpop.f32.mrf.mxu2  ;;  %v11649_v42 = vor.u32 %v15199_v25, %v11648_v24  ;;  %v12016_v1 = vld [vmem:[#allocation4 + $0x2e0] sm:$0xf]  ;;  %v15273_v18 = vld [vmem:[#allocation4 + $0x254] sm:$0xf0] }
 0x1bc   :  { %3686 = vmatpush.bf16.msrb.mxu1 %v11745_v33  ;;  %v3464_v33 = vld [vmem:[%s19207_s0 + $0x34] sm:$0xff]  ;;  %v2410_v38 = vpop.f32.mrf.mxu3  ;;  %v12017_v16 = vor.u32 %v15291_v2, %v12016_v1  ;;  %v11808_v25 = vld [vmem:[#allocation4 + $0x140] sm:$0xf]  ;;  %v15267_v2 = vld [vmem:[#allocation4 + $0x224] sm:$0xf0] }
 0x1bd   :  { %3699 = vmatpush.bf16.msrb.mxu2 %v11685_v34  ;;  %v11725_v34 = vor.u32 %v15216_v21, %v11722_v22  ;;  %v3504_v46 = vunpack.c.l.b16 %v3464_v33  ;;  %v3505_v51 = vunpack.c.h.b16 %v3464_v33  ;;  %v2449_v21 = vld [vmem:[%s19209_s2] sm:$0x3]  ;;  %v12008_v22 = vld [vmem:[#allocation4 + $0x2d0] sm:$0xf]  ;;  %v15255_v33 = vld [vmem:[#allocation4 + $0x1c4] sm:$0xf0] }
 0x1be   :  { %3712 = vmatpush.bf16.msrb.mxu3 %v11749_v40  ;;  %v15245_v40 = vld [vmem:[#allocation4 + $0x174] sm:$0xf0]  ;;  %v11792_v58 = vld [vmem:[#allocation4 + $0x120] sm:$0xf] }
 0x1bf   :  { %3674 = vmatpush.bf16.msrb.mxu0 %v11673_v47  ;;  %v11713_v47 = vor.u32 %v15215_v30, %v11712_v26  ;;  %v11833_v53 = vor.u32 %v15245_v40, %v11832_v39  ;;  %v3506_v0 = vpack.c.b16 %v3504_v46, %v3504_v46  ;;  %v3507_v3 = vpack.c.b16 %v3505_v51, %v3505_v51  ;;  %v11872_v30 = vld [vmem:[#allocation4 + $0x1c0] sm:$0xf]  ;;  %v11800_v39 = vld [vmem:[#allocation4 + $0x130] sm:$0xf] }
 0x1c0   :  { %3687 = vmatpush.bf16.msrb.mxu1 %v11737_v48  ;;  %v11653_v48 = vor.u32 %v15198_v31, %v11650_v35  ;;  %v2451_v31 = vperm.slane %v2449_v21, 0  ;;  %v15271_v35 = vld [vmem:[#allocation4 + $0x244] sm:$0xf0]  ;;  %v2452_v51 = vperm.slane %v2449_v21, 1  ;;  %v11856_v60 = vld [vmem:[#allocation4 + $0x1a0] sm:$0xf] }
 0x1c1   :  { %3700 = vmatpush.bf16.msrb.mxu2 %v11677_v49  ;;  %v12024_v49 = vld [vmem:[#allocation4 + $0x2f0] sm:$0xf]  ;;  %v11920_v1 = vld [vmem:[#allocation4 + $0x220] sm:$0xf]  ;;  %v15233_v21 = vld [vmem:[#allocation4 + $0x114] sm:$0xf0] }
 0x1c2   :  { %3713 = vmatpush.bf16.msrb.mxu3 %v11741_v54  ;;  %v11897_v54 = vor.u32 %v15261_v43, %v11896_v41  ;;  %v12025_v59 = vor.u32 %v15293_v50, %v12024_v49  ;;  %v11873_v41 = vor.u32 %v15255_v33, %v11872_v30  ;;  %v15237_v43 = vld [vmem:[#allocation4 + $0x134] sm:$0xf0]  ;;  %v11928_v49 = vld [vmem:[#allocation4 + $0x230] sm:$0xf]  ;;  %v11776_v33 = vld [vmem:[#allocation4 + $0x100] sm:$0xf] }
 0x1c3   :  { %3675 = vmatpush.bf16.msrb.mxu0 %v11665_v63  ;;  %v15275_v63 = vld [vmem:[#allocation4 + $0x264] sm:$0xf0]  ;;  %v15269_v50 = vld [vmem:[#allocation4 + $0x234] sm:$0xf0]  ;;  %v11976_v30 = vld [vmem:[#allocation4 + $0x290] sm:$0xf] }
 0x1c4   :  { %3688 = vmatpush.bf16.msrb.mxu1 %v11729_v4  ;;  %v11825_v4 = vor.u32 %v15243_v57, %v11824_v56  ;;  %v11953_v7 = vor.u32 %v15275_v63, %v11952_v62  ;;  %v11865_v56 = vor.u32 %v15253_v45, %v11864_v44  ;;  %v11929_v57 = vor.u32 %v15269_v50, %v11928_v49  ;;  %v11968_v44 = vld [vmem:[#allocation4 + $0x280] sm:$0xf]  ;;  %v15279_v45 = vld [vmem:[#allocation4 + $0x284] sm:$0xf0]  ;;  %v15260_v49 = vld [vmem:[#allocation4 + $0x1f4] sm:$0xf] }
 0x1c5   :  { %3701 = vmatpush.bf16.msrb.mxu2 %v11669_v5  ;;  %v11816_v5 = vld [vmem:[#allocation4 + $0x150] sm:$0xf] }
 0x1c6   :  { %3714 = vmatpush.bf16.msrb.mxu3 %v11733_v15  ;;  %v15257_v15 = vld [vmem:[#allocation4 + $0x1d4] sm:$0xf0]  ;;  %v11817_v24 = vor.u32 %v15241_v11, %v11816_v5  ;;  %v11984_v5 = vld [vmem:[#allocation4 + $0x2a0] sm:$0xf]  ;;  %v11784_v11 = vld [vmem:[#allocation4 + $0x110] sm:$0xf] }
 0x1c7   :  { %3676 = vmatpush.bf16.msrb.mxu0 %v11657_v23  ;;  %v15289_v23 = vld [vmem:[#allocation4 + $0x2d4] sm:$0xf0]  ;;  %v11881_v26 = vor.u32 %v15257_v15, %v11880_v12 }
 0x1c8   :  { %3689 = vmatpush.bf16.msrb.mxu1 %v11721_v28  ;;  %v11945_v28 = vor.u32 %v15273_v18, %v11944_v17  ;;  %v12009_v32 = vor.u32 %v15289_v23, %v12008_v22  ;;  %v11921_v18 = vor.u32 %v15267_v2, %v11920_v1  ;;  %v11848_v22 = vld [vmem:[#allocation4 + $0x190] sm:$0xf]  ;;  %v15249_v23 = vld [vmem:[#allocation4 + $0x194] sm:$0xf0]  ;;  %v15242_v2 = vld [vmem:[#allocation4 + $0x164] sm:$0xf] }
 0x1c9   :  { %3702 = vmatpush.bf16.msrb.mxu2 %v11661_v29  ;;  %v15239_v29 = vld [vmem:[#allocation4 + $0x144] sm:$0xf0] }
 0x1ca   :  { %3715 = vmatpush.bf16.msrb.mxu3 %v11725_v34  ;;  %v11936_v34 = vld [vmem:[#allocation4 + $0x240] sm:$0xf]  ;;  %v11809_v38 = vor.u32 %v15239_v29, %v11808_v25 }
 0x1cb   :  { %3677 = vmatpush.bf16.msrb.mxu0 %v11649_v42  ;;  %v2631_v40 = vpop.f32.mrf.mxu0  ;;  %v11937_v42 = vor.u32 %v15271_v35, %v11936_v34  ;;  %v15231_v34 = vld [vmem:[#allocation4 + $0x104] sm:$0xf0] }
 0x1cc   :  { %3690 = vmatpush.bf16.msrb.mxu1 %v11713_v47  ;;  %v2632_v46 = vadd.f32 %v2631_v40, %v2451_v31  ;;  %v2644_v47 = vpop.f32.mrf.mxu1  ;;  %v15281_v31 = vld [vmem:[#allocation4 + $0x294] sm:$0xf0]  ;;  %v11904_v40 = vld [vmem:[#allocation4 + $0x200] sm:$0xf]  ;;  %v11777_v50 = vor.u32 %v15231_v34, %v11776_v33  ;;  %v15288_v33 = vld [vmem:[#allocation4 + $0x2d4] sm:$0xf] }
 0x1cd   :  { %3703 = vmatpush.bf16.msrb.mxu2 %v11653_v48  ;;  %v12001_v48 = vor.u32 %v15287_v37, %v12000_v36  ;;  %v11849_v36 = vor.u32 %v15249_v23, %v11848_v22  ;;  %v12010_v34 = vld [vmem:[#allocation4 + $0x2d8] sm:$0xf0] }
 0x1ce   :  { %3716 = vmatpush.bf16.msrb.mxu3 %v11717_v52  ;;  %3678 = vmatmul.bf16.vlgmr.msrb.gmra.mxu0 %v3506_v0  ;;  %v11992_v52 = vld [vmem:[#allocation4 + $0x2b0] sm:$0xf] }
 0x1cf   :  { %4132 = vmatpush.bf16.msra.mxu0 %v11833_v53  ;;  %3691 = vmatmul.bf16.vlgmr.msrb.gmra.mxu1 %v3507_v3  ;;  %v15285_v53 = vld [vmem:[#allocation4 + $0x2b4] sm:$0xf0] }
 0x1d0   :  { %4145 = vmatpush.bf16.msra.mxu1 %v11897_v54  ;;  %3704 = vmatmul.bf16.vlgmr.msrb.gmra.mxu2 %v3506_v0  ;;  %v2645_v54 = vadd.f32 %v2644_v47, %v2632_v46  ;;  %v11993_v63 = vor.u32 %v15285_v53, %v11992_v52  ;;  %v15251_v0 = vld [vmem:[#allocation4 + $0x1a4] sm:$0xf0]  ;;  %v15244_v47 = vld [vmem:[#allocation4 + $0x174] sm:$0xf]  ;;  %v11962_v53 = vld [vmem:[#allocation4 + $0x278] sm:$0xf0] }
 0x1d1   :  { %4158 = vmatpush.bf16.msra.mxu2 %v11961_v55  ;;  %3717 = vmatmul.bf16.vlgmr.msrb.gmra.mxu3 %v3507_v3  ;;  %v11801_v55 = vor.u32 %v15237_v43, %v11800_v39  ;;  %v11857_v17 = vor.u32 %v15251_v0, %v11856_v60  ;;  %v15247_v39 = vld [vmem:[#allocation4 + $0x184] sm:$0xf0]  ;;  %v15276_v52 = vld [vmem:[#allocation4 + $0x274] sm:$0xf]  ;;  %v11969_v60 = vor.u32 %v15279_v45, %v11968_v44  ;;  %v11874_v44 = vld [vmem:[#allocation4 + $0x1c8] sm:$0xf0] }
 0x1d2   :  { %4171 = vmatpush.bf16.msra.mxu3 %v12025_v59  ;;  %v15235_v59 = vld [vmem:[#allocation4 + $0x124] sm:$0xf0]  ;;  %v2674_v12 = vmax.f32 %v2645_v54, 0.0  ;;  %v11965_v1 = vor.u32 %v15276_v52, %v11962_v53  ;;  %v15270_v45 = vld [vmem:[#allocation4 + $0x244] sm:$0xf] }
 0x1d3   :  { %4133 = vmatpush.bf16.msra.mxu0 %v11825_v4  ;;  %v2657_v62 = vpop.f32.mrf.mxu2  ;;  %v15263_v43 = vld [vmem:[#allocation4 + $0x204] sm:$0xf0] }
 0x1d4   :  { %4146 = vmatpush.bf16.msra.mxu1 %v11889_v6  ;;  %v2658_v3 = vadd.f32 %v2657_v62, %v2452_v51  ;;  %v2670_v4 = vpop.f32.mrf.mxu3  ;;  %v15283_v6 = vld [vmem:[#allocation4 + $0x2a4] sm:$0xf0]  ;;  %v11898_v51 = vld [vmem:[#allocation4 + $0x1f8] sm:$0xf0] }
 0x1d5   :  { %4159 = vmatpush.bf16.msra.mxu2 %v11953_v7  ;;  %v11793_v7 = vor.u32 %v15235_v59, %v11792_v58  ;;  %v11985_v25 = vor.u32 %v15283_v6, %v11984_v5  ;;  %v3800_v58 = vunpack.c.l.b16 %v17308_v61  ;;  %v3801_v59 = vunpack.c.h.b16 %v17308_v61  ;;  %v15290_v61 = vld [vmem:[#allocation4 + $0x2e4] sm:$0xf] }
 0x1d6   :  { %4172 = vmatpush.bf16.msra.mxu3 %v12017_v16  ;;  %v2671_v15 = vadd.f32 %v2670_v4, %v2658_v3  ;;  %v2633_v16 = vpop.f32.mrf.mxu0  ;;  %v11901_v0 = vor.u32 %v15260_v49, %v11898_v51  ;;  %v11826_v3 = vld [vmem:[#allocation4 + $0x168] sm:$0xf0]  ;;  %v15258_v4 = vld [vmem:[#allocation4 + $0x1e4] sm:$0xf]  ;;  %v3803_v5 = vunpack.c.h.b16 %v17448_v20 }
 0x1d7   :  { %4134 = vmatpush.bf16.msra.mxu0 %v11817_v24  ;;  %v2646_v24 = vpop.f32.mrf.mxu1  ;;  %v18877_v16 = vpack.c.b16 %v3800_v58, %v3800_v58 }
 0x1d8   :  { %4147 = vmatpush.bf16.msra.mxu1 %v11881_v26  ;;  %v11912_v26 = vld [vmem:[#allocation4 + $0x210] sm:$0xf]  ;;  %v2675_v29 = vmax.f32 %v2671_v15, 0.0  ;;  %v12018_v15 = vld [vmem:[#allocation4 + $0x2e8] sm:$0xf0] }
 0x1d9   :  { %4160 = vmatpush.bf16.msra.mxu2 %v11945_v28  ;;  %v15265_v28 = vld [vmem:[#allocation4 + $0x214] sm:$0xf0]  ;;  %v11818_v24 = vld [vmem:[#allocation4 + $0x158] sm:$0xf0] }
 0x1da   :  { %4173 = vmatpush.bf16.msra.mxu3 %v12009_v32  ;;  %v11785_v32 = vor.u32 %v15233_v21, %v11784_v11  ;;  %v18871_v35 = vpack.c.bf16 %v2675_v29, %v2674_v12  ;;  %v11913_v37 = vor.u32 %v15265_v28, %v11912_v26  ;;  %v15274_v11 = vld [vmem:[#allocation4 + $0x264] sm:$0xf]  ;;  %v11954_v12 = vld [vmem:[#allocation4 + $0x268] sm:$0xf0]  ;;  %v15240_v21 = vld [vmem:[#allocation4 + $0x154] sm:$0xf]  ;;  %v18883_v28 = vpack.c.b16 %v3803_v5, %v3803_v5 }
 0x1db   :  { %4135 = vmatpush.bf16.msra.mxu0 %v11809_v38  ;;  %v11840_v38 = vld [vmem:[#allocation4 + $0x180] sm:$0xf]  ;;  %v11957_v23 = vor.u32 %v15274_v11, %v11954_v12  ;;  %v11882_v26 = vld [vmem:[#allocation4 + $0x1d8] sm:$0xf0]  ;;  %v12021_v29 = vor.u32 %v15290_v61, %v12018_v15  ;;  %v15250_v11 = vld [vmem:[#allocation4 + $0x1a4] sm:$0xf] }
 0x1dc   :  { %4148 = vmatpush.bf16.msra.mxu1 %v11873_v41  ;;  %v2659_v41 = vpop.f32.mrf.mxu2  ;;  %v2672_v46 = vpop.f32.mrf.mxu3  ;;  %v11841_v54 = vor.u32 %v15247_v39, %v11840_v38  ;;  %v11858_v15 = vld [vmem:[#allocation4 + $0x1a8] sm:$0xf0] }
 0x1dd   :  { %4161 = vmatpush.bf16.msra.mxu2 %v11937_v42  ;;  %v11977_v42 = vor.u32 %v15281_v31, %v11976_v30  ;;  %v15272_v30 = vld [vmem:[#allocation4 + $0x254] sm:$0xf]  ;;  %v11946_v31 = vld [vmem:[#allocation4 + $0x258] sm:$0xf0]  ;;  %v15254_v41 = vld [vmem:[#allocation4 + $0x1c4] sm:$0xf] }
 0x1de   :  { %4174 = vmatpush.bf16.msra.mxu3 %v12001_v48  ;;  %v11834_v48 = vld [vmem:[#allocation4 + $0x178] sm:$0xf0]  ;;  %v11949_v39 = vor.u32 %v15272_v30, %v11946_v31  ;;  %v11938_v46 = vld [vmem:[#allocation4 + $0x248] sm:$0xf0]  ;;  %v11877_v52 = vor.u32 %v15254_v41, %v11874_v44  ;;  %v15264_v41 = vld [vmem:[#allocation4 + $0x214] sm:$0xf] }
 0x1df   :  { %4136 = vmatpush.bf16.msra.mxu0 %v11801_v55  ;;  %v11905_v55 = vor.u32 %v15263_v43, %v11904_v40  ;;  %v11837_v62 = vor.u32 %v15244_v47, %v11834_v48  ;;  %v11810_v40 = vld [vmem:[#allocation4 + $0x148] sm:$0xf0]  ;;  %v12013_v43 = vor.u32 %v15288_v33, %v12010_v34  ;;  %v15286_v47 = vld [vmem:[#allocation4 + $0x2c4] sm:$0xf]  ;;  %v11941_v53 = vor.u32 %v15270_v45, %v11938_v46  ;;  %v15280_v44 = vld [vmem:[#allocation4 + $0x294] sm:$0xf] }
 0x1e0   :  { %4149 = vmatpush.bf16.msra.mxu1 %v11865_v56  ;;  %v15292_v56 = vld [vmem:[#allocation4 + $0x2f4] sm:$0xf]  ;;  %v12002_v48 = vld [vmem:[#allocation4 + $0x2c8] sm:$0xf0]  ;;  %v11861_v33 = vor.u32 %v15250_v11, %v11858_v15  ;;  %v11978_v45 = vld [vmem:[#allocation4 + $0x298] sm:$0xf0] }
 0x1e1   :  { %4162 = vmatpush.bf16.msra.mxu2 %v11929_v57  ;;  %v12026_v57 = vld [vmem:[#allocation4 + $0x2f8] sm:$0xf0]  ;;  %v15357_v11 = vld [vmem:[#allocation4 + $0x1f4] sm:$0xf0] }
 0x1e2   :  { %4175 = vmatpush.bf16.msra.mxu3 %v11993_v63  ;;  %v3802_v63 = vunpack.c.l.b16 %v17448_v20  ;;  %v12029_v6 = vor.u32 %v15292_v56, %v12026_v57  ;;  %v11866_v56 = vld [vmem:[#allocation4 + $0x1b8] sm:$0xf0] }
 0x1e3   :  { %4137 = vmatpush.bf16.msra.mxu0 %v11793_v7  ;;  %v11890_v7 = vld [vmem:[#allocation4 + $0x1e8] sm:$0xf0] }
 0x1e4   :  { %4150 = vmatpush.bf16.msra.mxu1 %v11857_v17  ;;  %v18879_v17 = vpack.c.b16 %v3801_v59, %v3801_v59  ;;  %v18881_v22 = vpack.c.b16 %v3802_v63, %v3802_v63  ;;  %v11893_v20 = vor.u32 %v15258_v4, %v11890_v7  ;;  %v12005_v59 = vor.u32 %v15286_v47, %v12002_v48  ;;  %v11794_v7 = vld [vmem:[#allocation4 + $0x128] sm:$0xf0]  ;;  %v15230_v47 = vld [vmem:[#allocation4 + $0x104] sm:$0xf] }
 0x1e5   :  { %4163 = vmatpush.bf16.msra.mxu2 %v11921_v18  ;;  %v11829_v18 = vor.u32 %v15242_v2, %v11826_v3  ;;  %v11778_v48 = vld [vmem:[#allocation4 + $0x108] sm:$0xf0] }
 0x1e6   :  { %4176 = vmatpush.bf16.msra.mxu3 %v11985_v25  ;;  %v15256_v25 = vld [vmem:[#allocation4 + $0x1d4] sm:$0xf] }
 0x1e7   :  { %4138 = vmatpush.bf16.msra.mxu0 %v11785_v32  ;;  %v2711_v32 = vld [vmem:[%s19209_s2] sm:$0x3]  ;;  %v11885_v38 = vor.u32 %v15256_v25, %v11882_v26  ;;  %v11986_v25 = vld [vmem:[#allocation4 + $0x2a8] sm:$0xf0] }
 0x1e8   :  { %4151 = vmatpush.bf16.msra.mxu1 %v11849_v36  ;;  %v11821_v36 = vor.u32 %v15240_v21, %v11818_v24  ;;  %v2714_v63 = vperm.slane %v2711_v32, 1  ;;  %v11922_v21 = vld [vmem:[#allocation4 + $0x228] sm:$0xf0]  ;;  %v15282_v24 = vld [vmem:[#allocation4 + $0x2a4] sm:$0xf] }
 0x1e9   :  { %4164 = vmatpush.bf16.msra.mxu2 %v11913_v37  ;;  %v15238_v37 = vld [vmem:[#allocation4 + $0x144] sm:$0xf] }
 0x1ea   :  { %4177 = vmatpush.bf16.msra.mxu3 %v11977_v42  ;;  %v2713_v42 = vperm.slane %v2711_v32, 0  ;;  %v11813_v49 = vor.u32 %v15238_v37, %v11810_v40  ;;  %v15248_v37 = vld [vmem:[#allocation4 + $0x194] sm:$0xf]  ;;  %v11989_v40 = vor.u32 %v15282_v24, %v11986_v25  ;;  %v15323_v25 = vld [vmem:[#allocation4 + $0xe4] sm:$0xf0] }
 0x1eb   :  { %4139 = vmatpush.bf16.msra.mxu0 %v11777_v50  ;;  %v15236_v50 = vld [vmem:[#allocation4 + $0x134] sm:$0xf]  ;;  %v2893_v51 = vpop.f32.mrf.mxu0 }
 0x1ec   :  { %4152 = vmatpush.bf16.msra.mxu1 %v11841_v54  ;;  %v11802_v54 = vld [vmem:[#allocation4 + $0x138] sm:$0xf0]  ;;  %v2894_v57 = vadd.f32 %v2893_v51, %v2713_v42  ;;  %v2906_v58 = vpop.f32.mrf.mxu1 }
 0x1ed   :  { %4165 = vmatpush.bf16.msra.mxu2 %v11905_v55  ;;  %v15252_v55 = vld [vmem:[#allocation4 + $0x1b4] sm:$0xf]  ;;  %v11805_v3 = vor.u32 %v15236_v50, %v11802_v54  ;;  %v11914_v42 = vld [vmem:[#allocation4 + $0x218] sm:$0xf0]  ;;  %v15262_v54 = vld [vmem:[#allocation4 + $0x204] sm:$0xf] }
 0x1ee   :  { %4178 = vmatpush.bf16.msra.mxu3 %v11969_v60  ;;  %4140 = vmatmul.bf16.vlgmr.msra.gmra.mxu0 %v18877_v16  ;;  %v15268_v60 = vld [vmem:[#allocation4 + $0x234] sm:$0xf]  ;;  %v2907_v2 = vadd.f32 %v2906_v58, %v2894_v57  ;;  %v11869_v4 = vor.u32 %v15252_v55, %v11866_v56  ;;  %v11917_v51 = vor.u32 %v15264_v41, %v11914_v42  ;;  %v11906_v57 = vld [vmem:[#allocation4 + $0x208] sm:$0xf0]  ;;  %v15278_v58 = vld [vmem:[#allocation4 + $0x284] sm:$0xf] }
 0x1ef   :  { %4184 = vmatpush.bf16.msrb.mxu0 %v11837_v62  ;;  %4153 = vmatmul.bf16.vlgmr.msra.gmra.mxu1 %v18879_v17  ;;  %v11930_v62 = vld [vmem:[#allocation4 + $0x238] sm:$0xf0]  ;;  %v11981_v56 = vor.u32 %v15280_v44, %v11978_v45  ;;  %v12200_v41 = vld [vmem:[#allocation4 + $0x150] sm:$0xf]  ;;  %v15337_v42 = vld [vmem:[#allocation4 + $0x154] sm:$0xf0] }
 0x1f0   :  { %4197 = vmatpush.bf16.msrb.mxu1 %v11901_v0  ;;  %4166 = vmatmul.bf16.vlgmr.msra.gmra.mxu2 %v18881_v22  ;;  %v15284_v0 = vld [vmem:[#allocation4 + $0x2b4] sm:$0xf]  ;;  %v11933_v5 = vor.u32 %v15268_v60, %v11930_v62  ;;  %v2936_v30 = vmax.f32 %v2907_v2, 0.0  ;;  %v12088_v62 = vld [vmem:[#allocation4 + $0x70] sm:$0xf] }
 0x1f1   :  { %4210 = vmatpush.bf16.msrb.mxu2 %v11965_v1  ;;  %4179 = vmatmul.bf16.vlgmr.msra.gmra.mxu3 %v18883_v28  ;;  %v11994_v1 = vld [vmem:[#allocation4 + $0x2b8] sm:$0xf0]  ;;  %v15325_v2 = vld [vmem:[#allocation4 + $0xf4] sm:$0xf0]  ;;  %v12264_v44 = vld [vmem:[#allocation4 + $0x1d0] sm:$0xf] }
 0x1f2   :  { %4223 = vmatpush.bf16.msrb.mxu3 %v12029_v6  ;;  %v15234_v6 = vld [vmem:[#allocation4 + $0x124] sm:$0xf]  ;;  %v11997_v61 = vor.u32 %v15284_v0, %v11994_v1  ;;  %v12152_v0 = vld [vmem:[#allocation4 + $0xf0] sm:$0xf]  ;;  %v11781_v1 = vor.u32 %v15230_v47, %v11778_v48  ;;  %v15353_v45 = vld [vmem:[#allocation4 + $0x1d4] sm:$0xf0]  ;;  %v12201_v48 = vor.u32 %v15337_v42, %v12200_v41 }
 0x1f3   :  { %4185 = vmatpush.bf16.msrb.mxu0 %v11829_v18  ;;  %v2919_v12 = vpop.f32.mrf.mxu2  ;;  %v15266_v18 = vld [vmem:[#allocation4 + $0x224] sm:$0xf]  ;;  %v11797_v26 = vor.u32 %v15234_v6, %v11794_v7  ;;  %v2895_v32 = vpop.f32.mrf.mxu0  ;;  %v11909_v6 = vor.u32 %v15262_v54, %v11906_v57  ;;  %v12280_v7 = vld [vmem:[#allocation4 + $0x1f0] sm:$0xf]  ;;  %v12153_v15 = vor.u32 %v15325_v2, %v12152_v0  ;;  %v12064_v47 = vld [vmem:[#allocation4 + $0x40] sm:$0xf] }
 0x1f4   :  { %4198 = vmatpush.bf16.msrb.mxu1 %v11893_v20  ;;  %v2920_v20 = vadd.f32 %v2919_v12, %v2714_v63  ;;  %v11925_v34 = vor.u32 %v15266_v18, %v11922_v21  ;;  %v15309_v63 = vld [vmem:[#allocation4 + $0x74] sm:$0xf0]  ;;  %v12080_v21 = vld [vmem:[#allocation4 + $0x60] sm:$0xf]  ;;  %v12281_v24 = vor.u32 %v15357_v11, %v12280_v7  ;;  %v15319_v54 = vld [vmem:[#allocation4 + $0xc4] sm:$0xf0] }
 0x1f5   :  { %4211 = vmatpush.bf16.msrb.mxu2 %v11957_v23  ;;  %v2932_v23 = vpop.f32.mrf.mxu3  ;;  %v15351_v57 = vld [vmem:[#allocation4 + $0x1c4] sm:$0xf0]  ;;  %v15301_v0 = vld [vmem:[#allocation4 + $0x34] sm:$0xf0] }
 0x1f6   :  { %4224 = vmatpush.bf16.msrb.mxu3 %v12021_v29  ;;  %v15232_v29 = vld [vmem:[#allocation4 + $0x114] sm:$0xf]  ;;  %v2933_v31 = vadd.f32 %v2932_v23, %v2920_v20  ;;  %v15307_v20 = vld [vmem:[#allocation4 + $0x64] sm:$0xf0]  ;;  %v12144_v23 = vld [vmem:[#allocation4 + $0xe0] sm:$0xf] }
 0x1f7   :  { %4186 = vmatpush.bf16.msrb.mxu0 %v11821_v36  ;;  %v11786_v36 = vld [vmem:[#allocation4 + $0x118] sm:$0xf0]  ;;  %v12081_v32 = vor.u32 %v15307_v20, %v12080_v21  ;;  %v15317_v2 = vld [vmem:[#allocation4 + $0xb4] sm:$0xf0] }
 0x1f8   :  { %4199 = vmatpush.bf16.msrb.mxu1 %v11885_v38  ;;  %v11850_v38 = vld [vmem:[#allocation4 + $0x198] sm:$0xf0]  ;;  %v11789_v46 = vor.u32 %v15232_v29, %v11786_v36  ;;  %v15339_v29 = vld [vmem:[#allocation4 + $0x164] sm:$0xf0]  ;;  %v15333_v7 = vld [vmem:[#allocation4 + $0x134] sm:$0xf0] }
 0x1f9   :  { %4212 = vmatpush.bf16.msrb.mxu2 %v11949_v39  ;;  %v2908_v39 = vpop.f32.mrf.mxu1  ;;  %v11853_v50 = vor.u32 %v15248_v37, %v11850_v38  ;;  %v15305_v37 = vld [vmem:[#allocation4 + $0x54] sm:$0xf0]  ;;  %v12136_v38 = vld [vmem:[#allocation4 + $0xd0] sm:$0xf] }
 0x1fa   :  { %4225 = vmatpush.bf16.msrb.mxu3 %v12013_v43  ;;  %v2937_v43 = vmax.f32 %v2933_v31, 0.0  ;;  %v15355_v31 = vld [vmem:[#allocation4 + $0x1e4] sm:$0xf0]  ;;  %v15321_v39 = vld [vmem:[#allocation4 + $0xd4] sm:$0xf0] }
 0x1fb   :  { %4187 = vmatpush.bf16.msrb.mxu0 %v11813_v49  ;;  %v2921_v55 = vpop.f32.mrf.mxu2 }
 0x1fc   :  { %4200 = vmatpush.bf16.msrb.mxu1 %v11877_v52  ;;  %v18892_v49 = vpack.c.bf16 %v2937_v43, %v2936_v30  ;;  %v15246_v52 = vld [vmem:[#allocation4 + $0x184] sm:$0xf]  ;;  %v12272_v30 = vld [vmem:[#allocation4 + $0x1e0] sm:$0xf]  ;;  %v15335_v55 = vld [vmem:[#allocation4 + $0x144] sm:$0xf0] }
 0x1fd   :  { %4213 = vmatpush.bf16.msrb.mxu2 %v11941_v53  ;;  %v11842_v53 = vld [vmem:[#allocation4 + $0x188] sm:$0xf0]  ;;  %v2934_v60 = vpop.f32.mrf.mxu3  ;;  %v2973_v43 = vld [vmem:[%s19209_s2] sm:$0x3] }
 0x1fe   :  { %4226 = vmatpush.bf16.msrb.mxu3 %v12005_v59  ;;  %v11970_v59 = vld [vmem:[#allocation4 + $0x288] sm:$0xf0]  ;;  %v2976_v11 = vperm.slane %v2973_v43, 1 }
 0x1ff   :  { %4188 = vmatpush.bf16.msrb.mxu0 %v11805_v3  ;;  %v12216_v3 = vld [vmem:[#allocation4 + $0x170] sm:$0xf]  ;;  %v11973_v12 = vor.u32 %v15278_v58, %v11970_v59 }
 0x200   :  { %4201 = vmatpush.bf16.msrb.mxu1 %v11869_v4  ;;  %v15341_v4 = vld [vmem:[#allocation4 + $0x174] sm:$0xf0]  ;;  %v12056_v59 = vld [vmem:[#allocation4 + $0x30] sm:$0xf] }
 0x201   :  { %4214 = vmatpush.bf16.msrb.mxu2 %v11933_v5  ;;  %v11845_v5 = vor.u32 %v15246_v52, %v11842_v53  ;;  %v12217_v18 = vor.u32 %v15341_v4, %v12216_v3  ;;  %v2975_v52 = vperm.slane %v2973_v43, 0  ;;  %v12265_v53 = vor.u32 %v15353_v45, %v12264_v44  ;;  %v15297_v45 = vld [vmem:[#allocation4 + $0x14] sm:$0xf0] }
 0x202   :  { %4227 = vmatpush.bf16.msrb.mxu3 %v11997_v61  ;;  %v12089_v61 = vor.u32 %v15309_v63, %v12088_v62 }
 0x203   :  { %4189 = vmatpush.bf16.msrb.mxu0 %v11797_v26  ;;  %v12208_v26 = vld [vmem:[#allocation4 + $0x160] sm:$0xf] }
 0x204   :  { %4202 = vmatpush.bf16.msrb.mxu1 %v11861_v33  ;;  %v12072_v33 = vld [vmem:[#allocation4 + $0x50] sm:$0xf]  ;;  %v12209_v36 = vor.u32 %v15339_v29, %v12208_v26 }
 0x205   :  { %4215 = vmatpush.bf16.msrb.mxu2 %v11925_v34  ;;  %v12145_v34 = vor.u32 %v15323_v25, %v12144_v23  ;;  %v12048_v23 = vld [vmem:[#allocation4 + $0x20] sm:$0xf] }
 0x206   :  { %4228 = vmatpush.bf16.msrb.mxu3 %v11989_v40  ;;  %v12273_v40 = vor.u32 %v15355_v31, %v12272_v30  ;;  %v12112_v25 = vld [vmem:[#allocation4 + $0xa0] sm:$0xf]  ;;  %v15315_v30 = vld [vmem:[#allocation4 + $0xa4] sm:$0xf0] }
 0x207   :  { %4190 = vmatpush.bf16.msrb.mxu0 %v11789_v46  ;;  %v12073_v46 = vor.u32 %v15305_v37, %v12072_v33  ;;  %v12176_v31 = vld [vmem:[#allocation4 + $0x120] sm:$0xf]  ;;  %v15347_v37 = vld [vmem:[#allocation4 + $0x1a4] sm:$0xf0]  ;;  %v12113_v43 = vor.u32 %v15315_v30, %v12112_v25 }
 0x208   :  { %4203 = vmatpush.bf16.msrb.mxu1 %v11853_v50  ;;  %v15303_v50 = vld [vmem:[#allocation4 + $0x44] sm:$0xf0] }
 0x209   :  { %4216 = vmatpush.bf16.msrb.mxu2 %v11917_v51  ;;  %v12128_v51 = vld [vmem:[#allocation4 + $0xc0] sm:$0xf]  ;;  %v12065_v58 = vor.u32 %v15303_v50, %v12064_v47  ;;  %v15313_v47 = vld [vmem:[#allocation4 + $0x94] sm:$0xf0]  ;;  %v12168_v50 = vld [vmem:[#allocation4 + $0x110] sm:$0xf] }
 0x20a   :  { %4229 = vmatpush.bf16.msrb.mxu3 %v11981_v56  ;;  %v12256_v56 = vld [vmem:[#allocation4 + $0x1c0] sm:$0xf]  ;;  %v12129_v62 = vor.u32 %v15319_v54, %v12128_v51  ;;  %v15329_v51 = vld [vmem:[#allocation4 + $0x114] sm:$0xf0] }
 0x20b   :  { %4191 = vmatpush.bf16.msrb.mxu0 %v11781_v1  ;;  %v3155_v60 = vpop.f32.mrf.mxu0  ;;  %v12120_v1 = vld [vmem:[#allocation4 + $0xb0] sm:$0xf]  ;;  %v15345_v54 = vld [vmem:[#allocation4 + $0x194] sm:$0xf0] }
 0x20c   :  { %4204 = vmatpush.bf16.msrb.mxu1 %v11845_v5  ;;  %v3156_v3 = vadd.f32 %v3155_v60, %v2975_v52  ;;  %v3168_v4 = vpop.f32.mrf.mxu1  ;;  %v12257_v5 = vor.u32 %v15351_v57, %v12256_v56  ;;  %v12121_v21 = vor.u32 %v15317_v2, %v12120_v1  ;;  %v15295_v56 = vld [vmem:[#allocation4 + $0x4] sm:$0xf0]  ;;  %v12096_v60 = vld [vmem:[#allocation4 + $0x80] sm:$0xf] }
 0x20d   :  { %4217 = vmatpush.bf16.msrb.mxu2 %v11909_v6  ;;  %v12184_v6 = vld [vmem:[#allocation4 + $0x130] sm:$0xf]  ;;  %v15327_v2 = vld [vmem:[#allocation4 + $0x104] sm:$0xf0] }
 0x20e   :  { %4230 = vmatpush.bf16.msrb.mxu3 %v11973_v12  ;;  %4192 = vmatmul.bf16.vlgmr.msrb.gmra.mxu0 %v18877_v16  ;;  %v12137_v16 = vor.u32 %v15321_v39, %v12136_v38  ;;  %v12248_v12 = vld [vmem:[#allocation4 + $0x1b0] sm:$0xf]  ;;  %v12185_v20 = vor.u32 %v15333_v7, %v12184_v6  ;;  %v15373_v7 = vld [vmem:[#allocation4 + $0x274] sm:$0xf0] }
 0x20f   :  { %4846 = vmatpush.bf16.msra.mxu0 %v12089_v61  ;;  %4205 = vmatmul.bf16.vlgmr.msrb.gmra.mxu1 %v18879_v17  ;;  %v12192_v17 = vld [vmem:[#allocation4 + $0x140] sm:$0xf]  ;;  %v15349_v61 = vld [vmem:[#allocation4 + $0x1b4] sm:$0xf0]  ;;  %v12040_v39 = vld [vmem:[#allocation4 + $0x10] sm:$0xf] }
 0x210   :  { %4859 = vmatpush.bf16.msra.mxu1 %v12153_v15  ;;  %4218 = vmatmul.bf16.vlgmr.msrb.gmra.mxu2 %v18881_v22  ;;  %v12193_v63 = vor.u32 %v15335_v55, %v12192_v17  ;;  %v3169_v15 = vadd.f32 %v3168_v4, %v3156_v3  ;;  %v12249_v29 = vor.u32 %v15349_v61, %v12248_v12  ;;  %v12032_v55 = vld [vmem:[#allocation4] sm:$0xf]  ;;  %v15343_v4 = vld [vmem:[#allocation4 + $0x184] sm:$0xf0]  ;;  %v12344_v6 = vld [vmem:[#allocation4 + $0x270] sm:$0xf] }
 0x211   :  { %4872 = vmatpush.bf16.msra.mxu2 %v12217_v18  ;;  %4231 = vmatmul.bf16.vlgmr.msrb.gmra.mxu3 %v18883_v28  ;;  %v12057_v18 = vor.u32 %v15301_v0, %v12056_v59  ;;  %v12041_v17 = vor.u32 %v15297_v45, %v12040_v39  ;;  %v12169_v59 = vor.u32 %v15329_v51, %v12168_v50  ;;  %v12224_v3 = vld [vmem:[#allocation4 + $0x180] sm:$0xf]  ;;  %v15389_v61 = vld [vmem:[#allocation4 + $0x2f4] sm:$0xf0]  ;;  %v15306_v39 = vld [vmem:[#allocation4 + $0x64] sm:$0xf] }
 0x212   :  { %4885 = vmatpush.bf16.msra.mxu3 %v12281_v24  ;;  %v15299_v24 = vld [vmem:[#allocation4 + $0x24] sm:$0xf0]  ;;  %v12033_v12 = vor.u32 %v15295_v56, %v12032_v55  ;;  %v12225_v25 = vor.u32 %v15343_v4, %v12224_v3  ;;  %v12138_v55 = vld [vmem:[#allocation4 + $0xd8] sm:$0xf0]  ;;  %v15302_v3 = vld [vmem:[#allocation4 + $0x44] sm:$0xf] }
 0x213   :  { %4847 = vmatpush.bf16.msra.mxu0 %v12081_v32  ;;  %v3181_v26 = vpop.f32.mrf.mxu2  ;;  %v15331_v32 = vld [vmem:[#allocation4 + $0x124] sm:$0xf0]  ;;  %v12049_v38 = vor.u32 %v15299_v24, %v12048_v23  ;;  %v3157_v42 = vpop.f32.mrf.mxu0  ;;  %v15324_v23 = vld [vmem:[#allocation4 + $0xf4] sm:$0xf]  ;;  %v12154_v24 = vld [vmem:[#allocation4 + $0xf8] sm:$0xf0] }
 0x214   :  { %4860 = vmatpush.bf16.msra.mxu1 %v12145_v34  ;;  %v3182_v33 = vadd.f32 %v3181_v26, %v2976_v11  ;;  %v3194_v34 = vpop.f32.mrf.mxu3  ;;  %v12177_v44 = vor.u32 %v15331_v32, %v12176_v31  ;;  %v12408_v11 = vld [vmem:[#allocation4 + $0x2f0] sm:$0xf]  ;;  %v12345_v26 = vor.u32 %v15373_v7, %v12344_v6  ;;  %v12336_v32 = vld [vmem:[#allocation4 + $0x260] sm:$0xf]  ;;  %v12146_v42 = vld [vmem:[#allocation4 + $0xe8] sm:$0xf0] }
 0x215   :  { %4873 = vmatpush.bf16.msra.mxu2 %v12209_v36  ;;  %v12240_v36 = vld [vmem:[#allocation4 + $0x1a0] sm:$0xf]  ;;  %v12409_v30 = vor.u32 %v15389_v61, %v12408_v11  ;;  %v12066_v4 = vld [vmem:[#allocation4 + $0x48] sm:$0xf0]  ;;  %v12312_v11 = vld [vmem:[#allocation4 + $0x230] sm:$0xf] }
 0x216   :  { %4886 = vmatpush.bf16.msra.mxu3 %v12273_v40  ;;  %v3198_v40 = vmax.f32 %v3169_v15, 0.0  ;;  %v3195_v41 = vadd.f32 %v3194_v34, %v3182_v33  ;;  %v15308_v15 = vld [vmem:[#allocation4 + $0x74] sm:$0xf]  ;;  %v15371_v33 = vld [vmem:[#allocation4 + $0x264] sm:$0xf0] }
 0x217   :  { %4848 = vmatpush.bf16.msra.mxu0 %v12073_v46  ;;  %v12104_v46 = vld [vmem:[#allocation4 + $0x90] sm:$0xf]  ;;  %v12400_v34 = vld [vmem:[#allocation4 + $0x2e0] sm:$0xf]  ;;  %v12130_v6 = vld [vmem:[#allocation4 + $0xc8] sm:$0xf0] }
 0x218   :  { %4861 = vmatpush.bf16.msra.mxu1 %v12137_v16  ;;  %v3170_v16 = vpop.f32.mrf.mxu1  ;;  %v3199_v52 = vmax.f32 %v3195_v41, 0.0  ;;  %v15322_v41 = vld [vmem:[#allocation4 + $0xe4] sm:$0xf] }
 0x219   :  { %4874 = vmatpush.bf16.msra.mxu2 %v12201_v48  ;;  %v12241_v48 = vor.u32 %v15347_v37, %v12240_v36  ;;  %v4351_v36 = vunpack.c.h.b16 %v17648_v14  ;;  %v12157_v37 = vor.u32 %v15324_v23, %v12154_v24  ;;  %v12392_v16 = vld [vmem:[#allocation4 + $0x2d0] sm:$0xf]  ;;  %v12149_v51 = vor.u32 %v15322_v41, %v12146_v42 }
 0x21a   :  { %4887 = vmatpush.bf16.msra.mxu3 %v12265_v53  ;;  %v12232_v53 = vld [vmem:[#allocation4 + $0x190] sm:$0xf]  ;;  %v18901_v57 = vpack.c.bf16 %v3199_v52, %v3198_v40  ;;  %v12082_v40 = vld [vmem:[#allocation4 + $0x68] sm:$0xf0]  ;;  %v15304_v52 = vld [vmem:[#allocation4 + $0x54] sm:$0xf] }
 0x21b   :  { %4849 = vmatpush.bf16.msra.mxu0 %v12065_v58  ;;  %v12105_v58 = vor.u32 %v15313_v47, %v12104_v46  ;;  %v3183_v0 = vpop.f32.mrf.mxu2  ;;  %v12233_v1 = vor.u32 %v15345_v54, %v12232_v53  ;;  %v12085_v47 = vor.u32 %v15306_v39, %v12082_v40  ;;  %v18907_v50 = vpack.c.b16 %v4351_v36, %v4351_v36  ;;  %v12074_v53 = vld [vmem:[#allocation4 + $0x58] sm:$0xf0]  ;;  %v3235_v54 = vld [vmem:[%s19209_s2] sm:$0x3]  ;;  %v15363_v39 = vld [vmem:[#allocation4 + $0x224] sm:$0xf0] }
 0x21c   :  { %4862 = vmatpush.bf16.msra.mxu1 %v12129_v62  ;;  %v15311_v62 = vld [vmem:[#allocation4 + $0x84] sm:$0xf0]  ;;  %v3237_v0 = vperm.slane %v3235_v54, 0  ;;  %v12368_v40 = vld [vmem:[#allocation4 + $0x2a0] sm:$0xf] }
 0x21d   :  { %4875 = vmatpush.bf16.msra.mxu2 %v12193_v63  ;;  %v12160_v63 = vld [vmem:[#allocation4 + $0x100] sm:$0xf] }
 0x21e   :  { %4888 = vmatpush.bf16.msra.mxu3 %v12257_v5  ;;  %v3196_v5 = vpop.f32.mrf.mxu3 }
 0x21f   :  { %4850 = vmatpush.bf16.msra.mxu0 %v12057_v18  ;;  %v12090_v18 = vld [vmem:[#allocation4 + $0x78] sm:$0xf0]  ;;  %v15318_v5 = vld [vmem:[#allocation4 + $0xc4] sm:$0xf] }
 0x220   :  { %4863 = vmatpush.bf16.msra.mxu1 %v12121_v21  ;;  %v12097_v21 = vor.u32 %v15311_v62, %v12096_v60  ;;  %v12093_v31 = vor.u32 %v15308_v15, %v12090_v18  ;;  %v12077_v60 = vor.u32 %v15304_v52, %v12074_v53  ;;  %v15367_v62 = vld [vmem:[#allocation4 + $0x244] sm:$0xf0]  ;;  %v12069_v15 = vor.u32 %v15302_v3, %v12066_v4  ;;  %v15365_v18 = vld [vmem:[#allocation4 + $0x234] sm:$0xf0]  ;;  %v12296_v52 = vld [vmem:[#allocation4 + $0x210] sm:$0xf] }
 0x221   :  { %4876 = vmatpush.bf16.msra.mxu2 %v12185_v20  ;;  %v12161_v20 = vor.u32 %v15327_v2, %v12160_v63  ;;  %v12384_v63 = vld [vmem:[#allocation4 + $0x2c0] sm:$0xf]  ;;  %v15383_v2 = vld [vmem:[#allocation4 + $0x2c4] sm:$0xf0]  ;;  %v15312_v3 = vld [vmem:[#allocation4 + $0x94] sm:$0xf] }
 0x222   :  { %4889 = vmatpush.bf16.msra.mxu3 %v12249_v29  ;;  %v4350_v29 = vunpack.c.l.b16 %v17648_v14  ;;  %v15369_v14 = vld [vmem:[#allocation4 + $0x254] sm:$0xf0]  ;;  %v12385_v61 = vor.u32 %v15383_v2, %v12384_v63  ;;  %v12106_v4 = vld [vmem:[#allocation4 + $0x98] sm:$0xf0] }
 0x223   :  { %4851 = vmatpush.bf16.msra.mxu0 %v12049_v38  ;;  %v15387_v38 = vld [vmem:[#allocation4 + $0x2e4] sm:$0xf0] }
 0x224   :  { %4864 = vmatpush.bf16.msra.mxu1 %v12113_v43  ;;  %v12337_v43 = vor.u32 %v15371_v33, %v12336_v32  ;;  %v18905_v45 = vpack.c.b16 %v4350_v29, %v4350_v29  ;;  %v12401_v46 = vor.u32 %v15387_v38, %v12400_v34  ;;  %v12058_v29 = vld [vmem:[#allocation4 + $0x38] sm:$0xf0]  ;;  %v12313_v34 = vor.u32 %v15365_v18, %v12312_v11  ;;  %v12304_v38 = vld [vmem:[#allocation4 + $0x220] sm:$0xf]  ;;  %v15375_v18 = vld [vmem:[#allocation4 + $0x284] sm:$0xf0] }
 0x225   :  { %4877 = vmatpush.bf16.msra.mxu2 %v12177_v44  ;;  %v12328_v44 = vld [vmem:[#allocation4 + $0x250] sm:$0xf]  ;;  %v12122_v32 = vld [vmem:[#allocation4 + $0xb8] sm:$0xf0] }
 0x226   :  { %4890 = vmatpush.bf16.msra.mxu3 %v12241_v48  ;;  %v15385_v48 = vld [vmem:[#allocation4 + $0x2d4] sm:$0xf0]  ;;  %v12329_v56 = vor.u32 %v15369_v14, %v12328_v44  ;;  %v15298_v44 = vld [vmem:[#allocation4 + $0x24] sm:$0xf] }
 0x227   :  { %4852 = vmatpush.bf16.msra.mxu0 %v12041_v17  ;;  %v15320_v17 = vld [vmem:[#allocation4 + $0xd4] sm:$0xf] }
 0x228   :  { %4865 = vmatpush.bf16.msra.mxu1 %v12105_v58  ;;  %v12320_v58 = vld [vmem:[#allocation4 + $0x240] sm:$0xf] }
 0x229   :  { %4878 = vmatpush.bf16.msra.mxu2 %v12169_v59  ;;  %v12393_v59 = vor.u32 %v15385_v48, %v12392_v16  ;;  %v12321_v7 = vor.u32 %v15367_v62, %v12320_v58  ;;  %v15314_v16 = vld [vmem:[#allocation4 + $0xa4] sm:$0xf]  ;;  %v12114_v48 = vld [vmem:[#allocation4 + $0xa8] sm:$0xf0]  ;;  %v15361_v58 = vld [vmem:[#allocation4 + $0x214] sm:$0xf0] }
 0x22a   :  { %4891 = vmatpush.bf16.msra.mxu3 %v12233_v1  ;;  %v12141_v1 = vor.u32 %v15320_v17, %v12138_v55  ;;  %v12117_v63 = vor.u32 %v15314_v16, %v12114_v48  ;;  %v15338_v16 = vld [vmem:[#allocation4 + $0x164] sm:$0xf]  ;;  %v12210_v48 = vld [vmem:[#allocation4 + $0x168] sm:$0xf0] }
 0x22b   :  { %4853 = vmatpush.bf16.msra.mxu0 %v12033_v12  ;;  %v3417_v12 = vpop.f32.mrf.mxu0 }
 0x22c   :  { %4866 = vmatpush.bf16.msra.mxu1 %v12097_v21  ;;  %v12376_v21 = vld [vmem:[#allocation4 + $0x2b0] sm:$0xf]  ;;  %v3418_v23 = vadd.f32 %v3417_v12, %v3237_v0  ;;  %v3430_v24 = vpop.f32.mrf.mxu1  ;;  %v15296_v0 = vld [vmem:[#allocation4 + $0x14] sm:$0xf] }
 0x22d   :  { %4879 = vmatpush.bf16.msra.mxu2 %v12161_v20  ;;  %v15381_v20 = vld [vmem:[#allocation4 + $0x2b4] sm:$0xf0] }
 0x22e   :  { %4892 = vmatpush.bf16.msra.mxu3 %v12225_v25  ;;  %4854 = vmatmul.bf16.vlgmr.msra.gmra.mxu0 %v18881_v22  ;;  %v12133_v25 = vor.u32 %v15318_v5, %v12130_v6  ;;  %v3431_v33 = vadd.f32 %v3430_v24, %v3418_v23  ;;  %v12377_v36 = vor.u32 %v15381_v20, %v12376_v21  ;;  %v12288_v6 = vld [vmem:[#allocation4 + $0x200] sm:$0xf]  ;;  %v15294_v21 = vld [vmem:[#allocation4 + $0x4] sm:$0xf]  ;;  %v12034_v24 = vld [vmem:[#allocation4 + $0x8] sm:$0xf0] }
 0x22f   :  { %4898 = vmatpush.bf16.msrb.mxu0 %v12345_v26  ;;  %4867 = vmatmul.bf16.vlgmr.msra.gmra.mxu1 %v18883_v28  ;;  %v15300_v26 = vld [vmem:[#allocation4 + $0x34] sm:$0xf]  ;;  %v12297_v5 = vor.u32 %v15361_v58, %v12296_v52  ;;  %v12109_v23 = vor.u32 %v15312_v3, %v12106_v4  ;;  %v12266_v4 = vld [vmem:[#allocation4 + $0x1d8] sm:$0xf0] }
 0x230   :  { %4911 = vmatpush.bf16.msrb.mxu1 %v12409_v30  ;;  %4880 = vmatmul.bf16.vlgmr.msra.gmra.mxu2 %v18905_v45  ;;  %v3238_v30 = vperm.slane %v3235_v54, 1  ;;  %v3460_v53 = vmax.f32 %v3431_v33, 0.0 }
 0x231   :  { %4924 = vmatpush.bf16.msrb.mxu2 %v12093_v31  ;;  %4893 = vmatmul.bf16.vlgmr.msra.gmra.mxu3 %v18907_v50  ;;  %v15316_v31 = vld [vmem:[#allocation4 + $0xb4] sm:$0xf] }
 0x232   :  { %4937 = vmatpush.bf16.msrb.mxu3 %v12157_v37  ;;  %v12061_v37 = vor.u32 %v15300_v26, %v12058_v29  ;;  %v12125_v42 = vor.u32 %v15316_v31, %v12122_v32  ;;  %v12098_v26 = vld [vmem:[#allocation4 + $0x88] sm:$0xf0]  ;;  %v12218_v31 = vld [vmem:[#allocation4 + $0x178] sm:$0xf0]  ;;  %v15356_v32 = vld [vmem:[#allocation4 + $0x1f4] sm:$0xf] }
 0x233   :  { %4899 = vmatpush.bf16.msrb.mxu0 %v12337_v43  ;;  %v3443_v41 = vpop.f32.mrf.mxu2  ;;  %v15379_v43 = vld [vmem:[#allocation4 + $0x2a4] sm:$0xf0]  ;;  %v3419_v17 = vpop.f32.mrf.mxu0 }
 0x234   :  { %4912 = vmatpush.bf16.msrb.mxu1 %v12401_v46  ;;  %v12050_v46 = vld [vmem:[#allocation4 + $0x28] sm:$0xf0]  ;;  %v3456_v14 = vpop.f32.mrf.mxu3  ;;  %v12369_v55 = vor.u32 %v15379_v43, %v12368_v40  ;;  %v3432_v62 = vpop.f32.mrf.mxu1  ;;  %v15388_v40 = vld [vmem:[#allocation4 + $0x2f4] sm:$0xf] }
 0x235   :  { %4925 = vmatpush.bf16.msrb.mxu2 %v12085_v47  ;;  %v3444_v47 = vadd.f32 %v3443_v41, %v3238_v30  ;;  %v15340_v30 = vld [vmem:[#allocation4 + $0x174] sm:$0xf]  ;;  %v12410_v41 = vld [vmem:[#allocation4 + $0x2f8] sm:$0xf0]  ;;  %v12338_v17 = vld [vmem:[#allocation4 + $0x268] sm:$0xf0] }
 0x236   :  { %4938 = vmatpush.bf16.msrb.mxu3 %v12149_v51  ;;  %v12305_v51 = vor.u32 %v15363_v39, %v12304_v38  ;;  %v12037_v39 = vor.u32 %v15294_v21, %v12034_v24  ;;  %v12413_v52 = vor.u32 %v15388_v40, %v12410_v41  ;;  %v15350_v24 = vld [vmem:[#allocation4 + $0x1c4] sm:$0xf]  ;;  %v15348_v40 = vld [vmem:[#allocation4 + $0x1b4] sm:$0xf] }
 0x237   :  { %4900 = vmatpush.bf16.msrb.mxu0 %v12329_v56  ;;  %v3457_v54 = vadd.f32 %v3456_v14, %v3444_v47  ;;  %v12053_v56 = vor.u32 %v15298_v44, %v12050_v46  ;;  %v12221_v44 = vor.u32 %v15340_v30, %v12218_v31  ;;  %v4353_v46 = vunpack.c.h.b16 %v17848_v10  ;;  %v15382_v30 = vld [vmem:[#allocation4 + $0x2c4] sm:$0xf]  ;;  %v12386_v31 = vld [vmem:[#allocation4 + $0x2c8] sm:$0xf0] }
 0x238   :  { %4913 = vmatpush.bf16.msrb.mxu1 %v12393_v59  ;;  %v12360_v59 = vld [vmem:[#allocation4 + $0x290] sm:$0xf]  ;;  %v12389_v41 = vor.u32 %v15382_v30, %v12386_v31  ;;  %v15326_v31 = vld [vmem:[#allocation4 + $0x104] sm:$0xf] }
 0x239   :  { %4926 = vmatpush.bf16.msrb.mxu2 %v12077_v60  ;;  %v15377_v60 = vld [vmem:[#allocation4 + $0x294] sm:$0xf0]  ;;  %v3461_v2 = vmax.f32 %v3457_v54, 0.0  ;;  %v15370_v54 = vld [vmem:[#allocation4 + $0x264] sm:$0xf] }
 0x23a   :  { %4939 = vmatpush.bf16.msrb.mxu3 %v12141_v1  ;;  %v12042_v1 = vld [vmem:[#allocation4 + $0x18] sm:$0xf0]  ;;  %v12361_v12 = vor.u32 %v15377_v60, %v12360_v59  ;;  %v12213_v59 = vor.u32 %v15338_v16, %v12210_v48  ;;  %v18922_v60 = vpack.c.b16 %v4353_v46, %v4353_v46 }
 0x23b   :  { %4901 = vmatpush.bf16.msrb.mxu0 %v12321_v7  ;;  %v15359_v7 = vld [vmem:[#allocation4 + $0x204] sm:$0xf0]  ;;  %v18916_v11 = vpack.c.bf16 %v3461_v2, %v3460_v53  ;;  %v3445_v20 = vpop.f32.mrf.mxu2  ;;  %v12274_v53 = vld [vmem:[#allocation4 + $0x1e8] sm:$0xf0]  ;;  %v18927_v2 = vld [vmem:[%s19209_s2] sm:$0x3] }
 0x23c   :  { %4914 = vmatpush.bf16.msrb.mxu1 %v12385_v61  ;;  %v12045_v61 = vor.u32 %v15296_v0, %v12042_v1  ;;  %v3458_v29 = vpop.f32.mrf.mxu3  ;;  %v12289_v33 = vor.u32 %v15359_v7, %v12288_v6  ;;  %v12202_v0 = vld [vmem:[#allocation4 + $0x158] sm:$0xf0]  ;;  %v15352_v1 = vld [vmem:[#allocation4 + $0x1d4] sm:$0xf]  ;;  %v15334_v20 = vld [vmem:[#allocation4 + $0x144] sm:$0xf] }
 0x23d   :  { %4927 = vmatpush.bf16.msrb.mxu2 %v12069_v15  ;;  %v12352_v15 = vld [vmem:[#allocation4 + $0x280] sm:$0xf]  ;;  %v12330_v6 = vld [vmem:[#allocation4 + $0x258] sm:$0xf0]  ;;  %v15384_v7 = vld [vmem:[#allocation4 + $0x2d4] sm:$0xf] }
 0x23e   :  { %4940 = vmatpush.bf16.msrb.mxu3 %v12133_v25  ;;  %v15310_v25 = vld [vmem:[#allocation4 + $0x84] sm:$0xf]  ;;  %v12353_v38 = vor.u32 %v15375_v18, %v12352_v15  ;;  %v3499_v15 = vperm.slane %v18927_v2, 0  ;;  %v12269_v18 = vor.u32 %v15352_v1, %v12266_v4  ;;  %v3500_v16 = vperm.slane %v18927_v2, 1 }
 0x23f   :  { %4902 = vmatpush.bf16.msrb.mxu0 %v12313_v34  ;;  %v12282_v34 = vld [vmem:[#allocation4 + $0x1f8] sm:$0xf0]  ;;  %v12101_v43 = vor.u32 %v15310_v25, %v12098_v26  ;;  %v12258_v26 = vld [vmem:[#allocation4 + $0x1c8] sm:$0xf0]  ;;  %v15366_v29 = vld [vmem:[#allocation4 + $0x244] sm:$0xf] }
 0x240   :  { %4915 = vmatpush.bf16.msrb.mxu1 %v12377_v36  ;;  %v15372_v36 = vld [vmem:[#allocation4 + $0x274] sm:$0xf]  ;;  %v12285_v47 = vor.u32 %v15356_v32, %v12282_v34 }
 0x241   :  { %4928 = vmatpush.bf16.msrb.mxu2 %v12061_v37  ;;  %v12346_v37 = vld [vmem:[#allocation4 + $0x278] sm:$0xf0] }
 0x242   :  { %4941 = vmatpush.bf16.msrb.mxu3 %v12125_v42  ;;  %v4352_v42 = vunpack.c.l.b16 %v17848_v10  ;;  %v12349_v14 = vor.u32 %v15372_v36, %v12346_v37  ;;  %v15336_v10 = vld [vmem:[#allocation4 + $0x154] sm:$0xf]  ;;  %v12261_v36 = vor.u32 %v15350_v24, %v12258_v26 }
 0x243   :  { %4903 = vmatpush.bf16.msrb.mxu0 %v12305_v51  ;;  %v15354_v51 = vld [vmem:[#allocation4 + $0x1e4] sm:$0xf]  ;;  %v15360_v24 = vld [vmem:[#allocation4 + $0x214] sm:$0xf] }
 0x244   :  { %4916 = vmatpush.bf16.msrb.mxu1 %v12369_v55  ;;  %v15386_v55 = vld [vmem:[#allocation4 + $0x2e4] sm:$0xf]  ;;  %v18920_v58 = vpack.c.b16 %v4352_v42, %v4352_v42  ;;  %v12277_v62 = vor.u32 %v15354_v51, %v12274_v53  ;;  %v12250_v42 = vld [vmem:[#allocation4 + $0x1b8] sm:$0xf0]  ;;  %v15376_v26 = vld [vmem:[#allocation4 + $0x294] sm:$0xf] }
 0x245   :  { %4929 = vmatpush.bf16.msrb.mxu2 %v12053_v56  ;;  %v12402_v56 = vld [vmem:[#allocation4 + $0x2e8] sm:$0xf0]  ;;  %v12253_v51 = vor.u32 %v15348_v40, %v12250_v42  ;;  %v15330_v53 = vld [vmem:[#allocation4 + $0x124] sm:$0xf] }
 0x246   :  { %4942 = vmatpush.bf16.msrb.mxu3 %v12117_v63  ;;  %v12341_v63 = vor.u32 %v15370_v54, %v12338_v17  ;;  %v12405_v3 = vor.u32 %v15386_v55, %v12402_v56  ;;  %v12178_v54 = vld [vmem:[#allocation4 + $0x128] sm:$0xf0]  ;;  %v15346_v17 = vld [vmem:[#allocation4 + $0x1a4] sm:$0xf] }
 0x247   :  { %4904 = vmatpush.bf16.msrb.mxu0 %v12297_v5  ;;  %v15368_v5 = vld [vmem:[#allocation4 + $0x254] sm:$0xf]  ;;  %v12242_v56 = vld [vmem:[#allocation4 + $0x1a8] sm:$0xf0]  ;;  %v12181_v4 = vor.u32 %v15330_v53, %v12178_v54 }
 0x248   :  { %4917 = vmatpush.bf16.msrb.mxu1 %v12361_v12  ;;  %v12394_v12 = vld [vmem:[#allocation4 + $0x2d8] sm:$0xf0]  ;;  %v12333_v21 = vor.u32 %v15368_v5, %v12330_v6  ;;  %v15328_v5 = vld [vmem:[#allocation4 + $0x114] sm:$0xf]  ;;  %v12290_v40 = vld [vmem:[#allocation4 + $0x208] sm:$0xf0] }
 0x249   :  { %4930 = vmatpush.bf16.msrb.mxu2 %v12045_v61  ;;  %v12205_v61 = vor.u32 %v15336_v10, %v12202_v0  ;;  %v12397_v25 = vor.u32 %v15384_v7, %v12394_v12  ;;  %v12306_v10 = vld [vmem:[#allocation4 + $0x228] sm:$0xf0]  ;;  %v12245_v7 = vor.u32 %v15346_v17, %v12242_v56  ;;  %v12664_v17 = vld [vmem:[#allocation4 + $0x1f0] sm:$0xf] }
 0x24a   :  { %4943 = vmatpush.bf16.msrb.mxu3 %v12109_v23  ;;  %v12194_v23 = vld [vmem:[#allocation4 + $0x148] sm:$0xf0] }
 0x24b   :  { %4905 = vmatpush.bf16.msrb.mxu0 %v12289_v33  ;;  %v3679_v32 = vpop.f32.mrf.mxu0  ;;  %v12370_v0 = vld [vmem:[#allocation4 + $0x2a8] sm:$0xf0] }
 0x24c   :  { %4918 = vmatpush.bf16.msrb.mxu1 %v12353_v38  ;;  %v3680_v33 = vadd.f32 %v3679_v32, %v3499_v15  ;;  %v3692_v34 = vpop.f32.mrf.mxu1  ;;  %v15332_v38 = vld [vmem:[#allocation4 + $0x134] sm:$0xf]  ;;  %v12170_v15 = vld [vmem:[#allocation4 + $0x118] sm:$0xf0]  ;;  %v12162_v32 = vld [vmem:[#allocation4 + $0x108] sm:$0xf0] }
 0x24d   :  { %4931 = vmatpush.bf16.msrb.mxu2 %v12037_v39  ;;  %v12186_v39 = vld [vmem:[#allocation4 + $0x138] sm:$0xf0]  ;;  %v12173_v30 = vor.u32 %v15328_v5, %v12170_v15  ;;  %v12354_v42 = vld [vmem:[#allocation4 + $0x288] sm:$0xf0]  ;;  %v15435_v5 = vld [vmem:[#allocation4 + $0x164] sm:$0xf0] }
 0x24e   :  { %4944 = vmatpush.bf16.msrb.mxu3 %v12101_v43  ;;  %4906 = vmatmul.bf16.vlgmr.msrb.gmra.mxu0 %v18920_v58  ;;  %v15364_v43 = vld [vmem:[#allocation4 + $0x234] sm:$0xf]  ;;  %v3693_v46 = vadd.f32 %v3692_v34, %v3680_v33  ;;  %v12189_v48 = vor.u32 %v15332_v38, %v12186_v39  ;;  %v15342_v34 = vld [vmem:[#allocation4 + $0x184] sm:$0xf] }
 0x24f   :  { %4950 = vmatpush.bf16.msra.mxu0 %v12221_v44  ;;  %4919 = vmatmul.bf16.vlgmr.msrb.gmra.mxu1 %v18922_v60  ;;  %v12314_v44 = vld [vmem:[#allocation4 + $0x238] sm:$0xf0] }
 0x250   :  { %4963 = vmatpush.bf16.msra.mxu1 %v12285_v47  ;;  %4932 = vmatmul.bf16.vlgmr.msrb.gmra.mxu2 %v18881_v22  ;;  %v12322_v22 = vld [vmem:[#allocation4 + $0x248] sm:$0xf0]  ;;  %v15380_v47 = vld [vmem:[#allocation4 + $0x2b4] sm:$0xf] }
 0x251   :  { %4976 = vmatpush.bf16.msra.mxu2 %v12349_v14  ;;  %4945 = vmatmul.bf16.vlgmr.msrb.gmra.mxu3 %v18883_v28  ;;  %v12197_v28 = vor.u32 %v15334_v20, %v12194_v23  ;;  %v12325_v37 = vor.u32 %v15366_v29, %v12322_v22  ;;  %v12378_v14 = vld [vmem:[#allocation4 + $0x2b8] sm:$0xf0] }
 0x252   :  { %4989 = vmatpush.bf16.msra.mxu3 %v12413_v52  ;;  %v12317_v52 = vor.u32 %v15364_v43, %v12314_v44  ;;  %v12381_v55 = vor.u32 %v15380_v47, %v12378_v14  ;;  %v12234_v23 = vld [vmem:[#allocation4 + $0x198] sm:$0xf0]  ;;  %v12472_v44 = vld [vmem:[#allocation4 + $0x70] sm:$0xf] }
 0x253   :  { %4951 = vmatpush.bf16.msra.mxu0 %v12213_v59  ;;  %v15362_v59 = vld [vmem:[#allocation4 + $0x224] sm:$0xf]  ;;  %v3681_v2 = vpop.f32.mrf.mxu0  ;;  %v12362_v29 = vld [vmem:[#allocation4 + $0x298] sm:$0xf0]  ;;  %v12536_v47 = vld [vmem:[#allocation4 + $0xf0] sm:$0xf] }
 0x254   :  { %4964 = vmatpush.bf16.msra.mxu1 %v12277_v62  ;;  %v3705_v62 = vpop.f32.mrf.mxu2  ;;  %v3694_v6 = vpop.f32.mrf.mxu1  ;;  %v12309_v12 = vor.u32 %v15362_v59, %v12306_v10  ;;  %v12365_v39 = vor.u32 %v15376_v26, %v12362_v29  ;;  %v15419_v2 = vld [vmem:[#allocation4 + $0xe4] sm:$0xf0]  ;;  %v12584_v26 = vld [vmem:[#allocation4 + $0x150] sm:$0xf]  ;;  %v15433_v29 = vld [vmem:[#allocation4 + $0x154] sm:$0xf0] }
 0x255   :  { %4977 = vmatpush.bf16.msra.mxu2 %v12341_v63  ;;  %v15378_v63 = vld [vmem:[#allocation4 + $0x2a4] sm:$0xf]  ;;  %v3706_v1 = vadd.f32 %v3705_v62, %v3500_v16  ;;  %v12165_v16 = vor.u32 %v15326_v31, %v12162_v32  ;;  %v12656_v6 = vld [vmem:[#allocation4 + $0x1e0] sm:$0xf] }
 0x256   :  { %4990 = vmatpush.bf16.msra.mxu3 %v12405_v3  ;;  %v3718_v3 = vpop.f32.mrf.mxu3  ;;  %v12373_v20 = vor.u32 %v15378_v63, %v12370_v0  ;;  %v12464_v63 = vld [vmem:[#allocation4 + $0x60] sm:$0xf]  ;;  %v15403_v0 = vld [vmem:[#allocation4 + $0x64] sm:$0xf0] }
 0x257   :  { %4952 = vmatpush.bf16.msra.mxu0 %v12205_v61  ;;  %v3722_v61 = vmax.f32 %v3693_v46, 0.0  ;;  %v15405_v46 = vld [vmem:[#allocation4 + $0x74] sm:$0xf0] }
 0x258   :  { %4965 = vmatpush.bf16.msra.mxu1 %v12269_v18  ;;  %v15344_v18 = vld [vmem:[#allocation4 + $0x194] sm:$0xf]  ;;  %v12473_v59 = vor.u32 %v15405_v46, %v12472_v44 }
 0x259   :  { %4978 = vmatpush.bf16.msra.mxu2 %v12333_v21  ;;  %v3719_v21 = vadd.f32 %v3718_v3, %v3706_v1  ;;  %v12528_v1 = vld [vmem:[#allocation4 + $0xe0] sm:$0xf] }
 0x25a   :  { %4991 = vmatpush.bf16.msra.mxu3 %v12397_v25  ;;  %v12298_v25 = vld [vmem:[#allocation4 + $0x218] sm:$0xf0]  ;;  %v12529_v15 = vor.u32 %v15419_v2, %v12528_v1  ;;  %v12432_v1 = vld [vmem:[#allocation4 + $0x20] sm:$0xf] }
 0x25b   :  { %4953 = vmatpush.bf16.msra.mxu0 %v12197_v28  ;;  %v3723_v22 = vmax.f32 %v3719_v21, 0.0  ;;  %v12237_v28 = vor.u32 %v15344_v18, %v12234_v23  ;;  %v12301_v33 = vor.u32 %v15360_v24, %v12298_v25  ;;  %v15401_v21 = vld [vmem:[#allocation4 + $0x54] sm:$0xf0]  ;;  %v18940_v23 = vld [vmem:[%s19211_s4] sm:$0x3] }
 0x25c   :  { %4966 = vmatpush.bf16.msra.mxu1 %v12261_v36  ;;  %v12226_v36 = vld [vmem:[#allocation4 + $0x188] sm:$0xf0]  ;;  %v3707_v43 = vpop.f32.mrf.mxu2  ;;  %v15417_v25 = vld [vmem:[#allocation4 + $0xd4] sm:$0xf0]  ;;  %v3794_v32 = vperm.slane %v18940_v23, 0 }
 0x25d   :  { %4979 = vmatpush.bf16.msra.mxu2 %v12325_v37  ;;  %v15358_v37 = vld [vmem:[#allocation4 + $0x204] sm:$0xf]  ;;  %v18935_v38 = vpack.c.bf16 %v3723_v22, %v3722_v61  ;;  %v12229_v53 = vor.u32 %v15342_v34, %v12226_v36  ;;  %v12456_v61 = vld [vmem:[#allocation4 + $0x50] sm:$0xf]  ;;  %v15399_v34 = vld [vmem:[#allocation4 + $0x44] sm:$0xf0] }
 0x25e   :  { %4992 = vmatpush.bf16.msra.mxu3 %v12389_v41  ;;  %v15374_v41 = vld [vmem:[#allocation4 + $0x284] sm:$0xf]  ;;  %v3720_v14 = vpop.f32.mrf.mxu3  ;;  %v12293_v54 = vor.u32 %v15358_v37, %v12290_v40  ;;  %v12648_v22 = vld [vmem:[#allocation4 + $0x1d0] sm:$0xf]  ;;  %v12457_v31 = vor.u32 %v15401_v21, %v12456_v61  ;;  %v12512_v36 = vld [vmem:[#allocation4 + $0xc0] sm:$0xf] }
 0x25f   :  { %4954 = vmatpush.bf16.msra.mxu0 %v12189_v48  ;;  %v15421_v48 = vld [vmem:[#allocation4 + $0xf4] sm:$0xf0]  ;;  %v12357_v56 = vor.u32 %v15374_v41, %v12354_v42  ;;  %v15431_v40 = vld [vmem:[#allocation4 + $0x144] sm:$0xf0]  ;;  %v12640_v42 = vld [vmem:[#allocation4 + $0x1c0] sm:$0xf] }
 0x260   :  { %4967 = vmatpush.bf16.msra.mxu1 %v12253_v51  ;;  %v12600_v51 = vld [vmem:[#allocation4 + $0x170] sm:$0xf]  ;;  %v12537_v10 = vor.u32 %v15421_v48, %v12536_v47  ;;  %v15447_v43 = vld [vmem:[#allocation4 + $0x1c4] sm:$0xf0]  ;;  %v12496_v2 = vld [vmem:[#allocation4 + $0xa0] sm:$0xf] }
 0x261   :  { %4980 = vmatpush.bf16.msra.mxu2 %v12317_v52  ;;  %v15437_v52 = vld [vmem:[#allocation4 + $0x174] sm:$0xf0]  ;;  %v12440_v48 = vld [vmem:[#allocation4 + $0x30] sm:$0xf]  ;;  %v12624_v21 = vld [vmem:[#allocation4 + $0x1a0] sm:$0xf] }
 0x262   :  { %4993 = vmatpush.bf16.msra.mxu3 %v12381_v55  ;;  %v15453_v55 = vld [vmem:[#allocation4 + $0x1f4] sm:$0xf0]  ;;  %v12601_v62 = vor.u32 %v15437_v52, %v12600_v51  ;;  %v12504_v52 = vld [vmem:[#allocation4 + $0xb0] sm:$0xf] }
 0x263   :  { %4955 = vmatpush.bf16.msra.mxu0 %v12181_v4  ;;  %v12665_v3 = vor.u32 %v15453_v55, %v12664_v17  ;;  %v12592_v4 = vld [vmem:[#allocation4 + $0x160] sm:$0xf]  ;;  %v15397_v51 = vld [vmem:[#allocation4 + $0x34] sm:$0xf0]  ;;  %v12568_v55 = vld [vmem:[#allocation4 + $0x130] sm:$0xf] }
 0x264   :  { %4968 = vmatpush.bf16.msra.mxu1 %v12245_v7  ;;  %v15451_v7 = vld [vmem:[#allocation4 + $0x1e4] sm:$0xf0]  ;;  %v12593_v18 = vor.u32 %v15435_v5, %v12592_v4  ;;  %v15413_v17 = vld [vmem:[#allocation4 + $0xb4] sm:$0xf0] }
 0x265   :  { %4981 = vmatpush.bf16.msra.mxu2 %v12309_v12  ;;  %v12465_v12 = vor.u32 %v15403_v0, %v12464_v63  ;;  %v12657_v24 = vor.u32 %v15451_v7, %v12656_v6  ;;  %v12505_v63 = vor.u32 %v15413_v17, %v12504_v52  ;;  %v15411_v6 = vld [vmem:[#allocation4 + $0xa4] sm:$0xf0]  ;;  %v12560_v7 = vld [vmem:[#allocation4 + $0x120] sm:$0xf]  ;;  %v12792_v17 = vld [vmem:[#allocation4 + $0x2f0] sm:$0xf] }
 0x266   :  { %4994 = vmatpush.bf16.msra.mxu3 %v12373_v20  ;;  %v12520_v20 = vld [vmem:[#allocation4 + $0xd0] sm:$0xf] }
 0x267   :  { %4956 = vmatpush.bf16.msra.mxu0 %v12173_v30  ;;  %v15449_v30 = vld [vmem:[#allocation4 + $0x1d4] sm:$0xf0] }
 0x268   :  { %4969 = vmatpush.bf16.msra.mxu1 %v12237_v28  ;;  %v12521_v28 = vor.u32 %v15417_v25, %v12520_v20  ;;  %v12649_v37 = vor.u32 %v15449_v30, %v12648_v22  ;;  %v15443_v20 = vld [vmem:[#allocation4 + $0x1a4] sm:$0xf0]  ;;  %v12424_v30 = vld [vmem:[#allocation4 + $0x10] sm:$0xf] }
 0x269   :  { %4982 = vmatpush.bf16.msra.mxu2 %v12301_v33  ;;  %v12448_v33 = vld [vmem:[#allocation4 + $0x40] sm:$0xf] }
 0x26a   :  { %4995 = vmatpush.bf16.msra.mxu3 %v12365_v39  ;;  %v12576_v39 = vld [vmem:[#allocation4 + $0x140] sm:$0xf]  ;;  %v12449_v47 = vor.u32 %v15399_v34, %v12448_v33  ;;  %v12552_v33 = vld [vmem:[#allocation4 + $0x110] sm:$0xf]  ;;  %v15425_v34 = vld [vmem:[#allocation4 + $0x114] sm:$0xf0] }
 0x26b   :  { %4957 = vmatpush.bf16.msra.mxu0 %v12165_v16  ;;  %v4141_v41 = vpop.f32.mrf.mxu0  ;;  %v12577_v16 = vor.u32 %v15431_v40, %v12576_v39  ;;  %v12416_v39 = vld [vmem:[#allocation4] sm:$0xf]  ;;  %v15391_v40 = vld [vmem:[#allocation4 + $0x4] sm:$0xf0] }
 0x26c   :  { %4970 = vmatpush.bf16.msra.mxu1 %v12229_v53  ;;  %v4142_v44 = vadd.f32 %v4141_v41, %v3794_v32  ;;  %v4154_v46 = vpop.f32.mrf.mxu1  ;;  %v12488_v32 = vld [vmem:[#allocation4 + $0x90] sm:$0xf] }
 0x26d   :  { %4983 = vmatpush.bf16.msra.mxu2 %v12293_v54  ;;  %v12641_v54 = vor.u32 %v15447_v43, %v12640_v42  ;;  %v12553_v42 = vor.u32 %v15425_v34, %v12552_v33  ;;  %v12480_v43 = vld [vmem:[#allocation4 + $0x80] sm:$0xf] }
 0x26e   :  { %4996 = vmatpush.bf16.msra.mxu3 %v12357_v56  ;;  %4958 = vmatmul.bf16.vlgmr.msra.gmra.mxu0 %v18905_v45  ;;  %v12585_v45 = vor.u32 %v15433_v29, %v12584_v26  ;;  %v4155_v53 = vadd.f32 %v4154_v46, %v4142_v44  ;;  %v15429_v56 = vld [vmem:[#allocation4 + $0x134] sm:$0xf0]  ;;  %v12497_v29 = vor.u32 %v15411_v6, %v12496_v2  ;;  %v15407_v44 = vld [vmem:[#allocation4 + $0x84] sm:$0xf0]  ;;  %v12544_v46 = vld [vmem:[#allocation4 + $0x100] sm:$0xf] }
 0x26f   :  { %5612 = vmatpush.bf16.msrb.mxu0 %v12473_v59  ;;  %4971 = vmatmul.bf16.vlgmr.msra.gmra.mxu1 %v18907_v50  ;;  %v15415_v50 = vld [vmem:[#allocation4 + $0xc4] sm:$0xf0]  ;;  %v12632_v59 = vld [vmem:[#allocation4 + $0x1b0] sm:$0xf]  ;;  %v12569_v0 = vor.u32 %v15429_v56, %v12568_v55  ;;  %v12417_v55 = vor.u32 %v15391_v40, %v12416_v39  ;;  %v15485_v56 = vld [vmem:[#allocation4 + $0x2f4] sm:$0xf0] }
 0x270   :  { %5625 = vmatpush.bf16.msrb.mxu1 %v12537_v10  ;;  %4984 = vmatmul.bf16.vlgmr.msra.gmra.mxu2 %v18920_v58  ;;  %v12513_v14 = vor.u32 %v15415_v50, %v12512_v36  ;;  %v15445_v10 = vld [vmem:[#allocation4 + $0x1b4] sm:$0xf0]  ;;  %v12616_v36 = vld [vmem:[#allocation4 + $0x190] sm:$0xf]  ;;  %v15416_v39 = vld [vmem:[#allocation4 + $0xd4] sm:$0xf] }
 0x271   :  { %5638 = vmatpush.bf16.msrb.mxu2 %v12601_v62  ;;  %4997 = vmatmul.bf16.vlgmr.msra.gmra.mxu3 %v18922_v60  ;;  %v12441_v62 = vor.u32 %v15397_v51, %v12440_v48  ;;  %v12633_v4 = vor.u32 %v15445_v10, %v12632_v59  ;;  %v12608_v48 = vld [vmem:[#allocation4 + $0x180] sm:$0xf]  ;;  %v15439_v51 = vld [vmem:[#allocation4 + $0x184] sm:$0xf0]  ;;  %v15404_v59 = vld [vmem:[#allocation4 + $0x74] sm:$0xf] }
 0x272   :  { %5651 = vmatpush.bf16.msrb.mxu3 %v12665_v3  ;;  %v15395_v3 = vld [vmem:[#allocation4 + $0x24] sm:$0xf0]  ;;  %v12474_v10 = vld [vmem:[#allocation4 + $0x78] sm:$0xf0] }
 0x273   :  { %5613 = vmatpush.bf16.msrb.mxu0 %v12465_v12  ;;  %v4167_v5 = vpop.f32.mrf.mxu2  ;;  %v15427_v12 = vld [vmem:[#allocation4 + $0x124] sm:$0xf0]  ;;  %v12433_v25 = vor.u32 %v15395_v3, %v12432_v1  ;;  %v12538_v1 = vld [vmem:[#allocation4 + $0xf8] sm:$0xf0]  ;;  %v12609_v3 = vor.u32 %v15439_v51, %v12608_v48  ;;  %v12477_v6 = vor.u32 %v15404_v59, %v12474_v10  ;;  %v15398_v51 = vld [vmem:[#allocation4 + $0x44] sm:$0xf] }
 0x274   :  { %5626 = vmatpush.bf16.msrb.mxu1 %v12529_v15  ;;  %v4168_v61 = vadd.f32 %v4167_v5, %v4155_v53  ;;  %v4180_v15 = vpop.f32.mrf.mxu3  ;;  %v12561_v22 = vor.u32 %v15427_v12, %v12560_v7  ;;  %v12728_v53 = vld [vmem:[#allocation4 + $0x270] sm:$0xf]  ;;  %v12793_v5 = vor.u32 %v15485_v56, %v12792_v17  ;;  %v12720_v7 = vld [vmem:[#allocation4 + $0x260] sm:$0xf]  ;;  %v15467_v12 = vld [vmem:[#allocation4 + $0x264] sm:$0xf0] }
 0x275   :  { %5639 = vmatpush.bf16.msrb.mxu2 %v12593_v18  ;;  %v4143_v18 = vpop.f32.mrf.mxu0  ;;  %v12522_v40 = vld [vmem:[#allocation4 + $0xd8] sm:$0xf0]  ;;  %v15479_v48 = vld [vmem:[#allocation4 + $0x2c4] sm:$0xf0]  ;;  %v12514_v17 = vld [vmem:[#allocation4 + $0xc8] sm:$0xf0] }
 0x276   :  { %5652 = vmatpush.bf16.msrb.mxu3 %v12657_v24  ;;  %v4156_v24 = vpop.f32.mrf.mxu1  ;;  %v18947_v26 = vadd.f32 %v4180_v15, %v4168_v61  ;;  %v12784_v61 = vld [vmem:[#allocation4 + $0x2e0] sm:$0xf]  ;;  %v5117_v15 = vunpack.c.h.b16 %v18048_v8 }
 0x277   :  { %5614 = vmatpush.bf16.msrb.mxu0 %v12457_v31  ;;  %v15393_v31 = vld [vmem:[#allocation4 + $0x14] sm:$0xf0]  ;;  %v12466_v24 = vld [vmem:[#allocation4 + $0x68] sm:$0xf0] }
 0x278   :  { %5627 = vmatpush.bf16.msrb.mxu1 %v12521_v28  ;;  %v12625_v28 = vor.u32 %v15443_v20, %v12624_v21  ;;  %v12425_v50 = vor.u32 %v15393_v31, %v12424_v30  ;;  %v15483_v21 = vld [vmem:[#allocation4 + $0x2e4] sm:$0xf0]  ;;  %v15402_v20 = vld [vmem:[#allocation4 + $0x64] sm:$0xf]  ;;  %v18953_v33 = vpack.c.b16 %v5117_v15, %v5117_v15 }
 0x279   :  { %5640 = vmatpush.bf16.msrb.mxu2 %v12585_v45  ;;  %v15409_v45 = vld [vmem:[#allocation4 + $0x94] sm:$0xf0]  ;;  %v12785_v31 = vor.u32 %v15483_v21, %v12784_v61  ;;  %v15459_v21 = vld [vmem:[#allocation4 + $0x224] sm:$0xf0] }
 0x27a   :  { %5653 = vmatpush.bf16.msrb.mxu3 %v12649_v37  ;;  %v15441_v37 = vld [vmem:[#allocation4 + $0x194] sm:$0xf0]  ;;  %v12489_v41 = vor.u32 %v15409_v45, %v12488_v32  ;;  %v12469_v32 = vor.u32 %v15402_v20, %v12466_v24  ;;  %v12776_v45 = vld [vmem:[#allocation4 + $0x2d0] sm:$0xf]  ;;  %v12752_v20 = vld [vmem:[#allocation4 + $0x2a0] sm:$0xf] }
 0x27b   :  { %5615 = vmatpush.bf16.msrb.mxu0 %v12449_v47  ;;  %v12617_v47 = vor.u32 %v15441_v37, %v12616_v36  ;;  %v15481_v36 = vld [vmem:[#allocation4 + $0x2d4] sm:$0xf0]  ;;  %v15400_v37 = vld [vmem:[#allocation4 + $0x54] sm:$0xf] }
 0x27c   :  { %5628 = vmatpush.bf16.msrb.mxu1 %v12513_v14  ;;  %v4169_v14 = vpop.f32.mrf.mxu2  ;;  %v4182_v52 = vpop.f32.mrf.mxu3 }
 0x27d   :  { %5641 = vmatpush.bf16.msrb.mxu2 %v12577_v16  ;;  %v15423_v16 = vld [vmem:[#allocation4 + $0x104] sm:$0xf0]  ;;  %v12768_v14 = vld [vmem:[#allocation4 + $0x2c0] sm:$0xf]  ;;  %v12450_v52 = vld [vmem:[#allocation4 + $0x48] sm:$0xf0] }
 0x27e   :  { %5654 = vmatpush.bf16.msrb.mxu3 %v12641_v54  ;;  %v15469_v54 = vld [vmem:[#allocation4 + $0x274] sm:$0xf0]  ;;  %v12453_v10 = vor.u32 %v15398_v51, %v12450_v52  ;;  %v15408_v51 = vld [vmem:[#allocation4 + $0x94] sm:$0xf]  ;;  %v12490_v52 = vld [vmem:[#allocation4 + $0x98] sm:$0xf0] }
 0x27f   :  { %5616 = vmatpush.bf16.msrb.mxu0 %v12441_v62  ;;  %v12481_v62 = vor.u32 %v15407_v44, %v12480_v43  ;;  %v12729_v2 = vor.u32 %v15469_v54, %v12728_v53  ;;  %v12777_v43 = vor.u32 %v15481_v36, %v12776_v45  ;;  %v15414_v54 = vld [vmem:[#allocation4 + $0xc4] sm:$0xf] }
 0x280   :  { %5629 = vmatpush.bf16.msrb.mxu1 %v12505_v63  ;;  %v12545_v63 = vor.u32 %v15423_v16, %v12544_v46  ;;  %v12704_v46 = vld [vmem:[#allocation4 + $0x240] sm:$0xf]  ;;  %v12525_v16 = vor.u32 %v15416_v39, %v12522_v40  ;;  %v15410_v45 = vld [vmem:[#allocation4 + $0xa4] sm:$0xf] }
 0x281   :  { %5642 = vmatpush.bf16.msrb.mxu2 %v12569_v0  ;;  %v15420_v0 = vld [vmem:[#allocation4 + $0xf4] sm:$0xf] }
 0x282   :  { %5655 = vmatpush.bf16.msrb.mxu3 %v12633_v4  ;;  %v5116_v4 = vunpack.c.l.b16 %v18048_v8  ;;  %v12541_v18 = vor.u32 %v15420_v0, %v12538_v1  ;;  %v15465_v8 = vld [vmem:[#allocation4 + $0x254] sm:$0xf0]  ;;  %v12760_v0 = vld [vmem:[#allocation4 + $0x2b0] sm:$0xf] }
 0x283   :  { %5617 = vmatpush.bf16.msrb.mxu0 %v12433_v25  ;;  %v15418_v25 = vld [vmem:[#allocation4 + $0xe4] sm:$0xf] }
 0x284   :  { %5630 = vmatpush.bf16.msrb.mxu1 %v12497_v29  ;;  %v12530_v29 = vld [vmem:[#allocation4 + $0xe8] sm:$0xf0]  ;;  %v18951_v30 = vpack.c.b16 %v5116_v4, %v5116_v4  ;;  %v15396_v4 = vld [vmem:[#allocation4 + $0x34] sm:$0xf] }
 0x285   :  { %5643 = vmatpush.bf16.msrb.mxu2 %v12561_v22  ;;  %v12721_v22 = vor.u32 %v15467_v12, %v12720_v7  ;;  %v12533_v34 = vor.u32 %v15418_v25, %v12530_v29  ;;  %v12506_v7 = vld [vmem:[#allocation4 + $0xb8] sm:$0xf0]  ;;  %v15475_v29 = vld [vmem:[#allocation4 + $0x2a4] sm:$0xf0] }
 0x286   :  { %5656 = vmatpush.bf16.msrb.mxu3 %v12625_v28  ;;  %v12712_v28 = vld [vmem:[#allocation4 + $0x250] sm:$0xf]  ;;  %v12753_v39 = vor.u32 %v15475_v29, %v12752_v20  ;;  %v15484_v20 = vld [vmem:[#allocation4 + $0x2f4] sm:$0xf] }
 0x287   :  { %5618 = vmatpush.bf16.msrb.mxu0 %v12425_v50  ;;  %v12458_v50 = vld [vmem:[#allocation4 + $0x58] sm:$0xf0] }
 0x288   :  { %5631 = vmatpush.bf16.msrb.mxu1 %v12489_v41  ;;  %v12713_v41 = vor.u32 %v15465_v8, %v12712_v28  ;;  %v12461_v44 = vor.u32 %v15400_v37, %v12458_v50 }
 0x289   :  { %5644 = vmatpush.bf16.msrb.mxu2 %v12553_v42  ;;  %v3795_v42 = vperm.slane %v18940_v23, 1  ;;  %v12769_v23 = vor.u32 %v15479_v48, %v12768_v14  ;;  %v12426_v14 = vld [vmem:[#allocation4 + $0x18] sm:$0xf0] }
 0x28a   :  { %5657 = vmatpush.bf16.msrb.mxu3 %v12617_v47  ;;  %v15463_v47 = vld [vmem:[#allocation4 + $0x244] sm:$0xf0] }
 0x28b   :  { %5619 = vmatpush.bf16.msrb.mxu0 %v12417_v55  ;;  %v4193_v53 = vpop.f32.mrf.mxu0  ;;  %v12705_v59 = vor.u32 %v15463_v47, %v12704_v46  ;;  %v15473_v46 = vld [vmem:[#allocation4 + $0x294] sm:$0xf0]  ;;  %v15392_v47 = vld [vmem:[#allocation4 + $0x14] sm:$0xf] }
 0x28c   :  { %5632 = vmatpush.bf16.msrb.mxu1 %v12481_v62  ;;  %v4194_v55 = vadd.f32 %v4193_v53, %v3795_v42  ;;  %v4206_v56 = vpop.f32.mrf.mxu1  ;;  %v12696_v62 = vld [vmem:[#allocation4 + $0x230] sm:$0xf]  ;;  %v15457_v42 = vld [vmem:[#allocation4 + $0x214] sm:$0xf0] }
 0x28d   :  { %5645 = vmatpush.bf16.msrb.mxu2 %v12545_v63  ;;  %v15461_v63 = vld [vmem:[#allocation4 + $0x234] sm:$0xf0] }
 0x28e   :  { %5658 = vmatpush.bf16.msrb.mxu3 %v12609_v3  ;;  %5620 = vmatmul.bf16.vlgmr.msrb.gmra.mxu0 %v18920_v58  ;;  %v4207_v1 = vadd.f32 %v4206_v56, %v4194_v55  ;;  %v12517_v3 = vor.u32 %v15414_v54, %v12514_v17  ;;  %v12697_v12 = vor.u32 %v15461_v63, %v12696_v62  ;;  %v12672_v54 = vld [vmem:[#allocation4 + $0x200] sm:$0xf]  ;;  %v15455_v17 = vld [vmem:[#allocation4 + $0x204] sm:$0xf0]  ;;  %v15390_v62 = vld [vmem:[#allocation4 + $0x4] sm:$0xf] }
 0x28f   :  { %5664 = vmatpush.bf16.msra.mxu0 %v12729_v2  ;;  %5633 = vmatmul.bf16.vlgmr.msrb.gmra.mxu1 %v18922_v60  ;;  %v15477_v2 = vld [vmem:[#allocation4 + $0x2b4] sm:$0xf0]  ;;  %v12493_v63 = vor.u32 %v15408_v51, %v12490_v52  ;;  %v12650_v52 = vld [vmem:[#allocation4 + $0x1d8] sm:$0xf0] }
 0x290   :  { %5677 = vmatpush.bf16.msra.mxu1 %v12793_v5  ;;  %5646 = vmatmul.bf16.vlgmr.msrb.gmra.mxu2 %v18951_v30  ;;  %v12442_v5 = vld [vmem:[#allocation4 + $0x38] sm:$0xf0]  ;;  %v12761_v61 = vor.u32 %v15477_v2, %v12760_v0 }
 0x291   :  { %5690 = vmatpush.bf16.msra.mxu2 %v12477_v6  ;;  %5659 = vmatmul.bf16.vlgmr.msrb.gmra.mxu3 %v18953_v33  ;;  %v15412_v6 = vld [vmem:[#allocation4 + $0xb4] sm:$0xf]  ;;  %v12445_v15 = vor.u32 %v15396_v4, %v12442_v5  ;;  %v12602_v5 = vld [vmem:[#allocation4 + $0x178] sm:$0xf0] }
 0x292   :  { %5703 = vmatpush.bf16.msra.mxu3 %v12541_v18  ;;  %v12688_v18 = vld [vmem:[#allocation4 + $0x220] sm:$0xf]  ;;  %v12509_v24 = vor.u32 %v15412_v6, %v12506_v7  ;;  %v15436_v4 = vld [vmem:[#allocation4 + $0x174] sm:$0xf]  ;;  %v12673_v7 = vor.u32 %v15455_v17, %v12672_v54  ;;  %v12714_v54 = vld [vmem:[#allocation4 + $0x258] sm:$0xf0] }
 0x293   :  { %5665 = vmatpush.bf16.msra.mxu0 %v12721_v22  ;;  %v4219_v25 = vpop.f32.mrf.mxu2  ;;  %v15394_v22 = vld [vmem:[#allocation4 + $0x24] sm:$0xf]  ;;  %v4195_v8 = vpop.f32.mrf.mxu0  ;;  %v12689_v37 = vor.u32 %v15459_v21, %v12688_v18  ;;  %v15452_v6 = vld [vmem:[#allocation4 + $0x1f4] sm:$0xf] }
 0x294   :  { %5678 = vmatpush.bf16.msra.mxu1 %v12785_v31  ;;  %v12434_v31 = vld [vmem:[#allocation4 + $0x28] sm:$0xf0]  ;;  %v4232_v28 = vpop.f32.mrf.mxu3  ;;  %v4208_v36 = vpop.f32.mrf.mxu1  ;;  %v15434_v8 = vld [vmem:[#allocation4 + $0x164] sm:$0xf]  ;;  %v15480_v17 = vld [vmem:[#allocation4 + $0x2d4] sm:$0xf] }
 0x295   :  { %5691 = vmatpush.bf16.msra.mxu2 %v12469_v32  ;;  %v4220_v32 = vadd.f32 %v4219_v25, %v4207_v1  ;;  %v12437_v40 = vor.u32 %v15394_v22, %v12434_v31  ;;  %v15406_v1 = vld [vmem:[#allocation4 + $0x84] sm:$0xf]  ;;  %v5118_v25 = vunpack.c.l.b16 %v18248_v9  ;;  %v12605_v22 = vor.u32 %v15436_v4, %v12602_v5 }
 0x296   :  { %5704 = vmatpush.bf16.msra.mxu3 %v12533_v34  ;;  %v12498_v34 = vld [vmem:[#allocation4 + $0xa8] sm:$0xf0]  ;;  %v5119_v31 = vunpack.c.h.b16 %v18248_v9  ;;  %v15432_v9 = vld [vmem:[#allocation4 + $0x154] sm:$0xf]  ;;  %v15478_v5 = vld [vmem:[#allocation4 + $0x2c4] sm:$0xf] }
 0x297   :  { %5666 = vmatpush.bf16.msra.mxu0 %v12713_v41  ;;  %v4233_v50 = vadd.f32 %v4232_v28, %v4220_v32  ;;  %v12680_v41 = vld [vmem:[#allocation4 + $0x210] sm:$0xf] }
 0x298   :  { %5679 = vmatpush.bf16.msra.mxu1 %v12777_v43  ;;  %v12744_v43 = vld [vmem:[#allocation4 + $0x290] sm:$0xf]  ;;  %v12681_v53 = vor.u32 %v15457_v42, %v12680_v41  ;;  %v12786_v41 = vld [vmem:[#allocation4 + $0x2e8] sm:$0xf0]  ;;  %v18965_v42 = vpack.c.b16 %v5118_v25, %v5118_v25 }
 0x299   :  { %5692 = vmatpush.bf16.msra.mxu2 %v12461_v44  ;;  %v12501_v44 = vor.u32 %v15410_v45, %v12498_v34  ;;  %v4237_v48 = vmax.f32 %v4233_v50, 0.0  ;;  %v12745_v56 = vor.u32 %v15473_v46, %v12744_v43  ;;  %v12594_v45 = vld [vmem:[#allocation4 + $0x168] sm:$0xf0]  ;;  %v15450_v34 = vld [vmem:[#allocation4 + $0x1e4] sm:$0xf] }
 0x29a   :  { %5705 = vmatpush.bf16.msra.mxu3 %v12525_v16  ;;  %v4236_v16 = vmax.f32 %v18947_v26, 0.0  ;;  %v12418_v26 = vld [vmem:[#allocation4 + $0x8] sm:$0xf0]  ;;  %v15466_v50 = vld [vmem:[#allocation4 + $0x264] sm:$0xf]  ;;  %v12597_v43 = vor.u32 %v15434_v8, %v12594_v45 }
 0x29b   :  { %5667 = vmatpush.bf16.msra.mxu0 %v12705_v59  ;;  %v12429_v59 = vor.u32 %v15392_v47, %v12426_v14  ;;  %v4221_v0 = vpop.f32.mrf.mxu2  ;;  %v12421_v21 = vor.u32 %v15390_v62, %v12418_v26  ;;  %v12586_v14 = vld [vmem:[#allocation4 + $0x158] sm:$0xf0]  ;;  %v15446_v26 = vld [vmem:[#allocation4 + $0x1c4] sm:$0xf] }
 0x29c   :  { %5680 = vmatpush.bf16.msra.mxu1 %v12769_v23  ;;  %v18961_v55 = vpack.c.bf16 %v4237_v48, %v4236_v16  ;;  %v12736_v23 = vld [vmem:[#allocation4 + $0x280] sm:$0xf]  ;;  %v4234_v2 = vpop.f32.mrf.mxu3  ;;  %v15448_v16 = vld [vmem:[#allocation4 + $0x1d4] sm:$0xf]  ;;  %v12578_v0 = vld [vmem:[#allocation4 + $0x148] sm:$0xf0] }
 0x29d   :  { %5693 = vmatpush.bf16.msra.mxu2 %v12453_v10  ;;  %v15471_v10 = vld [vmem:[#allocation4 + $0x284] sm:$0xf0]  ;;  %v18972_v48 = vld [vmem:[%s19211_s4] sm:$0x3]  ;;  %v15462_v2 = vld [vmem:[#allocation4 + $0x244] sm:$0xf] }
 0x29e   :  { %5706 = vmatpush.bf16.msra.mxu3 %v12517_v3  ;;  %v12482_v3 = vld [vmem:[#allocation4 + $0x88] sm:$0xf0]  ;;  %v12737_v18 = vor.u32 %v15471_v10, %v12736_v23  ;;  %v4341_v23 = vperm.slane %v18972_v48, 0  ;;  %v12653_v10 = vor.u32 %v15448_v16, %v12650_v52  ;;  %v15474_v16 = vld [vmem:[#allocation4 + $0x2a4] sm:$0xf] }
 0x29f   :  { %5668 = vmatpush.bf16.msra.mxu0 %v12697_v12  ;;  %v12666_v12 = vld [vmem:[#allocation4 + $0x1f8] sm:$0xf0]  ;;  %v12485_v29 = vor.u32 %v15406_v1, %v12482_v3  ;;  %v12642_v3 = vld [vmem:[#allocation4 + $0x1c8] sm:$0xf0] }
 0x2a0   :  { %5681 = vmatpush.bf16.msra.mxu1 %v12761_v61  ;;  %v15468_v61 = vld [vmem:[#allocation4 + $0x274] sm:$0xf]  ;;  %v12669_v32 = vor.u32 %v15452_v6, %v12666_v12  ;;  %v12770_v6 = vld [vmem:[#allocation4 + $0x2c8] sm:$0xf0] }
 0x2a1   :  { %5694 = vmatpush.bf16.msra.mxu2 %v12445_v15  ;;  %v12730_v15 = vld [vmem:[#allocation4 + $0x278] sm:$0xf0]  ;;  %v12773_v25 = vor.u32 %v15478_v5, %v12770_v6 }
 0x2a2   :  { %5707 = vmatpush.bf16.msra.mxu3 %v12509_v24  ;;  %v12794_v24 = vld [vmem:[#allocation4 + $0x2f8] sm:$0xf0]  ;;  %v12733_v28 = vor.u32 %v15468_v61, %v12730_v15  ;;  %v12645_v61 = vor.u32 %v15446_v26, %v12642_v3 }
 0x2a3   :  { %5669 = vmatpush.bf16.msra.mxu0 %v12689_v37  ;;  %v12797_v36 = vor.u32 %v15484_v20, %v12794_v24  ;;  %v12658_v37 = vld [vmem:[#allocation4 + $0x1e8] sm:$0xf0]  ;;  %v15444_v20 = vld [vmem:[#allocation4 + $0x1b4] sm:$0xf]  ;;  %v12682_v26 = vld [vmem:[#allocation4 + $0x218] sm:$0xf0] }
 0x2a4   :  { %5682 = vmatpush.bf16.msra.mxu1 %v12753_v39  ;;  %v12722_v39 = vld [vmem:[#allocation4 + $0x268] sm:$0xf0]  ;;  %v12661_v46 = vor.u32 %v15450_v34, %v12658_v37  ;;  %v12746_v3 = vld [vmem:[#allocation4 + $0x298] sm:$0xf0] }
 0x2a5   :  { %5695 = vmatpush.bf16.msra.mxu2 %v12437_v40  ;;  %v15482_v40 = vld [vmem:[#allocation4 + $0x2e4] sm:$0xf]  ;;  %v12725_v47 = vor.u32 %v15466_v50, %v12722_v39  ;;  %v12562_v37 = vld [vmem:[#allocation4 + $0x128] sm:$0xf0] }
 0x2a6   :  { %5708 = vmatpush.bf16.msra.mxu3 %v12501_v44  ;;  %v18967_v44 = vpack.c.b16 %v5119_v31, %v5119_v31  ;;  %v12789_v51 = vor.u32 %v15482_v40, %v12786_v41  ;;  %v12698_v31 = vld [vmem:[#allocation4 + $0x238] sm:$0xf0]  ;;  %v15442_v50 = vld [vmem:[#allocation4 + $0x1a4] sm:$0xf]  ;;  %v12626_v41 = vld [vmem:[#allocation4 + $0x1a8] sm:$0xf0] }
 0x2a7   :  { %5670 = vmatpush.bf16.msra.mxu0 %v12681_v53  ;;  %v15464_v53 = vld [vmem:[#allocation4 + $0x254] sm:$0xf] }
 0x2a8   :  { %5683 = vmatpush.bf16.msra.mxu1 %v12745_v56  ;;  %v12778_v56 = vld [vmem:[#allocation4 + $0x2d8] sm:$0xf0]  ;;  %v12717_v62 = vor.u32 %v15464_v53, %v12714_v54 }
 0x2a9   :  { %5696 = vmatpush.bf16.msra.mxu2 %v12429_v59  ;;  %v12589_v59 = vor.u32 %v15432_v9, %v12586_v14  ;;  %v12781_v1 = vor.u32 %v15480_v17, %v12778_v56  ;;  %v12690_v9 = vld [vmem:[#allocation4 + $0x228] sm:$0xf0]  ;;  %v12629_v17 = vor.u32 %v15442_v50, %v12626_v41 }
 0x2aa   :  { %5709 = vmatpush.bf16.msra.mxu3 %v12493_v63  ;;  %v15430_v63 = vld [vmem:[#allocation4 + $0x144] sm:$0xf] }
 0x2ab   :  { %5671 = vmatpush.bf16.msra.mxu0 %v12673_v7  ;;  %v4855_v4 = vpop.f32.mrf.mxu0  ;;  %v12581_v12 = vor.u32 %v15430_v63, %v12578_v0  ;;  %v12618_v63 = vld [vmem:[#allocation4 + $0x198] sm:$0xf0]  ;;  %v15456_v0 = vld [vmem:[#allocation4 + $0x214] sm:$0xf] }
 0x2ac   :  { %5684 = vmatpush.bf16.msra.mxu1 %v12737_v18  ;;  %v4868_v7 = vpop.f32.mrf.mxu1  ;;  %v15428_v18 = vld [vmem:[#allocation4 + $0x134] sm:$0xf]  ;;  %v12685_v6 = vor.u32 %v15456_v0, %v12682_v26  ;;  %v15513_v0 = vld [vmem:[#allocation4 + $0xd4] sm:$0xf0]  ;;  %v12968_v26 = vld [vmem:[#allocation4 + $0x150] sm:$0xf] }
 0x2ad   :  { %5697 = vmatpush.bf16.msra.mxu2 %v12421_v21  ;;  %v12570_v21 = vld [vmem:[#allocation4 + $0x138] sm:$0xf0] }
 0x2ae   :  { %5710 = vmatpush.bf16.msra.mxu3 %v12485_v29  ;;  %5672 = vmatmul.bf16.vlgmr.msra.gmra.mxu0 %v18965_v42  ;;  %v12634_v29 = vld [vmem:[#allocation4 + $0x1b8] sm:$0xf0]  ;;  %v12573_v8 = vor.u32 %v15428_v18, %v12570_v21  ;;  %v12674_v18 = vld [vmem:[#allocation4 + $0x208] sm:$0xf0]  ;;  %v15470_v21 = vld [vmem:[#allocation4 + $0x284] sm:$0xf] }
 0x2af   :  { %5716 = vmatpush.bf16.msrb.mxu0 %v12605_v22  ;;  %5685 = vmatmul.bf16.vlgmr.msra.gmra.mxu1 %v18967_v44  ;;  %v15460_v22 = vld [vmem:[#allocation4 + $0x234] sm:$0xf]  ;;  %v12637_v45 = vor.u32 %v15444_v20, %v12634_v29  ;;  %v12738_v20 = vld [vmem:[#allocation4 + $0x288] sm:$0xf0]  ;;  %v15501_v29 = vld [vmem:[#allocation4 + $0x74] sm:$0xf0] }
 0x2b0   :  { %5729 = vmatpush.bf16.msrb.mxu1 %v12669_v32  ;;  %5698 = vmatmul.bf16.vlgmr.msra.gmra.mxu2 %v18920_v58  ;;  %v12706_v58 = vld [vmem:[#allocation4 + $0x248] sm:$0xf0]  ;;  %v15476_v32 = vld [vmem:[#allocation4 + $0x2b4] sm:$0xf]  ;;  %v12701_v34 = vor.u32 %v15460_v22, %v12698_v31  ;;  %v12920_v22 = vld [vmem:[#allocation4 + $0xf0] sm:$0xf]  ;;  %v12741_v50 = vor.u32 %v15470_v21, %v12738_v20 }
 0x2b1   :  { %5742 = vmatpush.bf16.msrb.mxu2 %v12733_v28  ;;  %5711 = vmatmul.bf16.vlgmr.msra.gmra.mxu3 %v18922_v60  ;;  %v4856_v60 = vadd.f32 %v4855_v4, %v4341_v23  ;;  %v12709_v15 = vor.u32 %v15462_v2, %v12706_v58  ;;  %v12762_v28 = vld [vmem:[#allocation4 + $0x2b8] sm:$0xf0]  ;;  %v15422_v58 = vld [vmem:[#allocation4 + $0x104] sm:$0xf]  ;;  %v12546_v4 = vld [vmem:[#allocation4 + $0x108] sm:$0xf0] }
 0x2b2   :  { %5755 = vmatpush.bf16.msrb.mxu3 %v12797_v36  ;;  %v15426_v36 = vld [vmem:[#allocation4 + $0x124] sm:$0xf]  ;;  %v12765_v39 = vor.u32 %v15476_v32, %v12762_v28  ;;  %v12554_v23 = vld [vmem:[#allocation4 + $0x118] sm:$0xf0]  ;;  %v12549_v31 = vor.u32 %v15422_v58, %v12546_v4  ;;  %v15517_v32 = vld [vmem:[#allocation4 + $0xf4] sm:$0xf0] }
 0x2b3   :  { %5717 = vmatpush.bf16.msrb.mxu0 %v12597_v43  ;;  %v4869_v24 = vadd.f32 %v4868_v7, %v4856_v60  ;;  %v4881_v40 = vpop.f32.mrf.mxu2  ;;  %v15458_v43 = vld [vmem:[#allocation4 + $0x224] sm:$0xf]  ;;  %v4857_v14 = vpop.f32.mrf.mxu0  ;;  %v12565_v53 = vor.u32 %v15426_v36, %v12562_v37  ;;  %v12610_v7 = vld [vmem:[#allocation4 + $0x188] sm:$0xf0]  ;;  %v12984_v28 = vld [vmem:[#allocation4 + $0x170] sm:$0xf] }
 0x2b4   :  { %5730 = vmatpush.bf16.msrb.mxu1 %v12661_v46  ;;  %v4870_v52 = vpop.f32.mrf.mxu1  ;;  %v12693_v56 = vor.u32 %v15458_v43, %v12690_v9  ;;  %v15438_v60 = vld [vmem:[#allocation4 + $0x184] sm:$0xf]  ;;  %v13048_v36 = vld [vmem:[#allocation4 + $0x1f0] sm:$0xf]  ;;  %v15549_v37 = vld [vmem:[#allocation4 + $0x1f4] sm:$0xf0] }
 0x2b5   :  { %5743 = vmatpush.bf16.msrb.mxu2 %v12725_v47  ;;  %v4882_v46 = vadd.f32 %v4881_v40, %v4869_v24  ;;  %v4894_v47 = vpop.f32.mrf.mxu3  ;;  %v12921_v40 = vor.u32 %v15517_v32, %v12920_v22  ;;  %v12848_v43 = vld [vmem:[#allocation4 + $0x60] sm:$0xf]  ;;  %v15499_v9 = vld [vmem:[#allocation4 + $0x64] sm:$0xf0]  ;;  %v15493_v32 = vld [vmem:[#allocation4 + $0x34] sm:$0xf0] }
 0x2b6   :  { %5756 = vmatpush.bf16.msrb.mxu3 %v12789_v51  ;;  %v12754_v51 = vld [vmem:[#allocation4 + $0x2a8] sm:$0xf0]  ;;  %v15515_v14 = vld [vmem:[#allocation4 + $0xe4] sm:$0xf0]  ;;  %v13040_v52 = vld [vmem:[#allocation4 + $0x1e0] sm:$0xf] }
 0x2b7   :  { %5718 = vmatpush.bf16.msrb.mxu0 %v12589_v59  ;;  %v18979_v54 = vadd.f32 %v4894_v47, %v4882_v46  ;;  %v15424_v59 = vld [vmem:[#allocation4 + $0x114] sm:$0xf]  ;;  %v12912_v46 = vld [vmem:[#allocation4 + $0xe0] sm:$0xf]  ;;  %v13049_v47 = vor.u32 %v15549_v37, %v13048_v36  ;;  %v15543_v21 = vld [vmem:[#allocation4 + $0x1c4] sm:$0xf0] }
 0x2b8   :  { %5731 = vmatpush.bf16.msrb.mxu1 %v12653_v10  ;;  %v15440_v10 = vld [vmem:[#allocation4 + $0x194] sm:$0xf]  ;;  %v12557_v2 = vor.u32 %v15424_v59, %v12554_v23  ;;  %v12840_v23 = vld [vmem:[#allocation4 + $0x50] sm:$0xf]  ;;  %v15525_v37 = vld [vmem:[#allocation4 + $0x134] sm:$0xf0] }
 0x2b9   :  { %5744 = vmatpush.bf16.msrb.mxu2 %v12717_v62  ;;  %v12757_v62 = vor.u32 %v15474_v16, %v12754_v51  ;;  %v12621_v5 = vor.u32 %v15440_v10, %v12618_v63  ;;  %v12976_v16 = vld [vmem:[#allocation4 + $0x160] sm:$0xf]  ;;  %v15531_v51 = vld [vmem:[#allocation4 + $0x164] sm:$0xf0]  ;;  %v15497_v10 = vld [vmem:[#allocation4 + $0x54] sm:$0xf0] }
 0x2ba   :  { %5757 = vmatpush.bf16.msrb.mxu3 %v12781_v1  ;;  %v15472_v1 = vld [vmem:[#allocation4 + $0x294] sm:$0xf]  ;;  %v12977_v59 = vor.u32 %v15531_v51, %v12976_v16  ;;  %v12841_v58 = vor.u32 %v15497_v10, %v12840_v23  ;;  %v12952_v36 = vld [vmem:[#allocation4 + $0x130] sm:$0xf]  ;;  %v15507_v51 = vld [vmem:[#allocation4 + $0xa4] sm:$0xf0] }
 0x2bb   :  { %5719 = vmatpush.bf16.msrb.mxu0 %v12581_v12  ;;  %v15454_v12 = vld [vmem:[#allocation4 + $0x204] sm:$0xf]  ;;  %v13008_v23 = vld [vmem:[#allocation4 + $0x1a0] sm:$0xf] }
 0x2bc   :  { %5732 = vmatpush.bf16.msrb.mxu1 %v12645_v61  ;;  %v12749_v61 = vor.u32 %v15472_v1, %v12746_v3  ;;  %v15529_v1 = vld [vmem:[#allocation4 + $0x154] sm:$0xf0]  ;;  %v13032_v3 = vld [vmem:[#allocation4 + $0x1d0] sm:$0xf] }
 0x2bd   :  { %5745 = vmatpush.bf16.msrb.mxu2 %v12709_v15  ;;  %v4883_v15 = vpop.f32.mrf.mxu2  ;;  %v4896_v24 = vpop.f32.mrf.mxu3 }
 0x2be   :  { %5758 = vmatpush.bf16.msrb.mxu3 %v12773_v25  ;;  %v12856_v25 = vld [vmem:[#allocation4 + $0x70] sm:$0xf] }
 0x2bf   :  { %5720 = vmatpush.bf16.msrb.mxu0 %v12573_v8  ;;  %v15533_v8 = vld [vmem:[#allocation4 + $0x174] sm:$0xf0] }
 0x2c0   :  { %5733 = vmatpush.bf16.msrb.mxu1 %v12637_v45  ;;  %v12613_v45 = vor.u32 %v15438_v60, %v12610_v7  ;;  %v12985_v41 = vor.u32 %v15533_v8, %v12984_v28  ;;  %v12896_v60 = vld [vmem:[#allocation4 + $0xc0] sm:$0xf]  ;;  %v12888_v28 = vld [vmem:[#allocation4 + $0xb0] sm:$0xf] }
 0x2c1   :  { %5746 = vmatpush.bf16.msrb.mxu2 %v12701_v34  ;;  %v12677_v34 = vor.u32 %v15454_v12, %v12674_v18  ;;  %v15511_v12 = vld [vmem:[#allocation4 + $0xc4] sm:$0xf0]  ;;  %v13024_v18 = vld [vmem:[#allocation4 + $0x1c0] sm:$0xf] }
 0x2c2   :  { %5759 = vmatpush.bf16.msrb.mxu3 %v12765_v39  ;;  %v12857_v39 = vor.u32 %v15501_v29, %v12856_v25  ;;  %v12897_v29 = vor.u32 %v15511_v12, %v12896_v60  ;;  %v15537_v60 = vld [vmem:[#allocation4 + $0x194] sm:$0xf0]  ;;  %v12800_v12 = vld [vmem:[#allocation4] sm:$0xf] }
 0x2c3   :  { %5721 = vmatpush.bf16.msrb.mxu0 %v12565_v53  ;;  %v15547_v53 = vld [vmem:[#allocation4 + $0x1e4] sm:$0xf0] }
 0x2c4   :  { %5734 = vmatpush.bf16.msrb.mxu1 %v12629_v17  ;;  %v12849_v17 = vor.u32 %v15499_v9, %v12848_v43  ;;  %v13041_v63 = vor.u32 %v15547_v53, %v13040_v52  ;;  %v12953_v43 = vor.u32 %v15525_v37, %v12952_v36  ;;  %v12816_v9 = vld [vmem:[#allocation4 + $0x20] sm:$0xf]  ;;  %v15523_v53 = vld [vmem:[#allocation4 + $0x124] sm:$0xf0]  ;;  %v15581_v37 = vld [vmem:[#allocation4 + $0x2f4] sm:$0xf0] }
 0x2c5   :  { %5747 = vmatpush.bf16.msrb.mxu2 %v12693_v56  ;;  %v12913_v56 = vor.u32 %v15515_v14, %v12912_v46  ;;  %v15491_v46 = vld [vmem:[#allocation4 + $0x24] sm:$0xf0]  ;;  %v12944_v52 = vld [vmem:[#allocation4 + $0x120] sm:$0xf] }
 0x2c6   :  { %5760 = vmatpush.bf16.msrb.mxu3 %v12757_v62  ;;  %v12904_v62 = vld [vmem:[#allocation4 + $0xd0] sm:$0xf] }
 0x2c7   :  { %5722 = vmatpush.bf16.msrb.mxu0 %v12557_v2  ;;  %v15545_v2 = vld [vmem:[#allocation4 + $0x1d4] sm:$0xf0]  ;;  %v12905_v4 = vor.u32 %v15513_v0, %v12904_v62  ;;  %v12817_v62 = vor.u32 %v15491_v46, %v12816_v9 }
 0x2c8   :  { %5735 = vmatpush.bf16.msrb.mxu1 %v12621_v5  ;;  %v12969_v5 = vor.u32 %v15529_v1, %v12968_v26  ;;  %v13033_v7 = vor.u32 %v15545_v2, %v13032_v3  ;;  %v12945_v26 = vor.u32 %v15523_v53, %v12944_v52  ;;  %v12808_v1 = vld [vmem:[#allocation4 + $0x10] sm:$0xf]  ;;  %v15489_v3 = vld [vmem:[#allocation4 + $0x14] sm:$0xf0]  ;;  %v15563_v52 = vld [vmem:[#allocation4 + $0x264] sm:$0xf0] }
 0x2c9   :  { %5748 = vmatpush.bf16.msrb.mxu2 %v12685_v6  ;;  %v12832_v6 = vld [vmem:[#allocation4 + $0x40] sm:$0xf]  ;;  %v12872_v2 = vld [vmem:[#allocation4 + $0x90] sm:$0xf] }
 0x2ca   :  { %5761 = vmatpush.bf16.msrb.mxu3 %v12749_v61  ;;  %v12960_v61 = vld [vmem:[#allocation4 + $0x140] sm:$0xf] }
 0x2cb   :  { %5723 = vmatpush.bf16.msrb.mxu0 %v12549_v31  ;;  %v4907_v15 = vpop.f32.mrf.mxu0  ;;  %v12824_v31 = vld [vmem:[#allocation4 + $0x30] sm:$0xf]  ;;  %v13168_v53 = vld [vmem:[#allocation4 + $0x2e0] sm:$0xf] }
 0x2cc   :  { %5736 = vmatpush.bf16.msrb.mxu1 %v12613_v45  ;;  %v4908_v20 = vadd.f32 %v4907_v15, %v18979_v54  ;;  %v4920_v24 = vpop.f32.mrf.mxu1  ;;  %v13025_v45 = vor.u32 %v15543_v21, %v13024_v18  ;;  %v4342_v54 = vperm.slane %v18972_v48, 1  ;;  %v15539_v48 = vld [vmem:[#allocation4 + $0x1a4] sm:$0xf0]  ;;  %v12864_v18 = vld [vmem:[#allocation4 + $0x80] sm:$0xf] }
 0x2cd   :  { %5749 = vmatpush.bf16.msrb.mxu2 %v12677_v34  ;;  %v15509_v34 = vld [vmem:[#allocation4 + $0xb4] sm:$0xf0]  ;;  %v15503_v21 = vld [vmem:[#allocation4 + $0x84] sm:$0xf0] }
 0x2ce   :  { %5762 = vmatpush.bf16.msrb.mxu3 %v12741_v50  ;;  %5724 = vmatmul.bf16.vlgmr.msrb.gmra.mxu0 %v18951_v30  ;;  %v15495_v30 = vld [vmem:[#allocation4 + $0x44] sm:$0xf0]  ;;  %v18986_v8 = vadd.f32 %v4920_v24, %v4908_v20  ;;  %v13016_v50 = vld [vmem:[#allocation4 + $0x1b0] sm:$0xf]  ;;  %v12928_v20 = vld [vmem:[#allocation4 + $0x100] sm:$0xf] }
 0x2cf   :  { %6378 = vmatpush.bf16.msra.mxu0 %v12857_v39  ;;  %5737 = vmatmul.bf16.vlgmr.msrb.gmra.mxu1 %v18953_v33  ;;  %v15527_v33 = vld [vmem:[#allocation4 + $0x144] sm:$0xf0]  ;;  %v12833_v25 = vor.u32 %v15495_v30, %v12832_v6  ;;  %v15541_v39 = vld [vmem:[#allocation4 + $0x1b4] sm:$0xf0]  ;;  %v13000_v30 = vld [vmem:[#allocation4 + $0x190] sm:$0xf] }
 0x2d0   :  { %6391 = vmatpush.bf16.msra.mxu1 %v12921_v40  ;;  %5750 = vmatmul.bf16.vlgmr.msrb.gmra.mxu2 %v18965_v42  ;;  %v12961_v22 = vor.u32 %v15527_v33, %v12960_v61  ;;  %v12825_v40 = vor.u32 %v15493_v32, %v12824_v31  ;;  %v13017_v14 = vor.u32 %v15541_v39, %v13016_v50  ;;  %v15521_v6 = vld [vmem:[#allocation4 + $0x114] sm:$0xf0]  ;;  %v15487_v61 = vld [vmem:[#allocation4 + $0x4] sm:$0xf0]  ;;  %v15500_v50 = vld [vmem:[#allocation4 + $0x74] sm:$0xf] }
 0x2d1   :  { %6404 = vmatpush.bf16.msra.mxu2 %v12985_v41  ;;  %5763 = vmatmul.bf16.vlgmr.msrb.gmra.mxu3 %v18967_v44  ;;  %v12889_v41 = vor.u32 %v15509_v34, %v12888_v28  ;;  %v13001_v24 = vor.u32 %v15537_v60, %v13000_v30  ;;  %v15535_v31 = vld [vmem:[#allocation4 + $0x184] sm:$0xf0]  ;;  %v13112_v28 = vld [vmem:[#allocation4 + $0x270] sm:$0xf]  ;;  %v12801_v36 = vor.u32 %v15487_v61, %v12800_v12  ;;  %v12858_v39 = vld [vmem:[#allocation4 + $0x78] sm:$0xf0] }
 0x2d2   :  { %6417 = vmatpush.bf16.msra.mxu3 %v13049_v47  ;;  %v12880_v47 = vld [vmem:[#allocation4 + $0xa0] sm:$0xf]  ;;  %v13176_v34 = vld [vmem:[#allocation4 + $0x2f0] sm:$0xf]  ;;  %v15496_v30 = vld [vmem:[#allocation4 + $0x54] sm:$0xf] }
 0x2d3   :  { %6379 = vmatpush.bf16.msra.mxu0 %v12849_v17  ;;  %v4933_v16 = vpop.f32.mrf.mxu2  ;;  %v12881_v0 = vor.u32 %v15507_v51, %v12880_v47  ;;  %v5882_v47 = vunpack.c.l.b16 %v18448_v13  ;;  %v13104_v51 = vld [vmem:[#allocation4 + $0x260] sm:$0xf]  ;;  %v12842_v60 = vld [vmem:[#allocation4 + $0x58] sm:$0xf0] }
 0x2d4   :  { %6392 = vmatpush.bf16.msra.mxu1 %v12913_v56  ;;  %v4934_v17 = vadd.f32 %v4933_v16, %v4342_v54  ;;  %v4946_v56 = vpop.f32.mrf.mxu3  ;;  %v4922_v10 = vpop.f32.mrf.mxu1  ;;  %v12865_v54 = vor.u32 %v15503_v21, %v12864_v18  ;;  %v12861_v16 = vor.u32 %v15500_v50, %v12858_v39  ;;  %v12906_v12 = vld [vmem:[#allocation4 + $0xd8] sm:$0xf0]  ;;  %v13088_v18 = vld [vmem:[#allocation4 + $0x240] sm:$0xf]  ;;  %v15559_v21 = vld [vmem:[#allocation4 + $0x244] sm:$0xf0] }
 0x2d5   :  { %6405 = vmatpush.bf16.msra.mxu2 %v12977_v59  ;;  %v4909_v59 = vpop.f32.mrf.mxu0  ;;  %v15514_v10 = vld [vmem:[#allocation4 + $0xe4] sm:$0xf]  ;;  %v13080_v39 = vld [vmem:[#allocation4 + $0x230] sm:$0xf] }
 0x2d6   :  { %6418 = vmatpush.bf16.msra.mxu3 %v13041_v63  ;;  %v18989_v63 = vadd.f32 %v4946_v56, %v4934_v17  ;;  %v5883_v17 = vunpack.c.h.b16 %v18448_v13  ;;  %v15579_v59 = vld [vmem:[#allocation4 + $0x2e4] sm:$0xf0]  ;;  %v15561_v13 = vld [vmem:[#allocation4 + $0x254] sm:$0xf0] }
 0x2d7   :  { %6380 = vmatpush.bf16.msra.mxu0 %v12841_v58  ;;  %v13009_v58 = vor.u32 %v15539_v48, %v13008_v23  ;;  %v15498_v23 = vld [vmem:[#allocation4 + $0x64] sm:$0xf]  ;;  %v12850_v48 = vld [vmem:[#allocation4 + $0x68] sm:$0xf0] }
 0x2d8   :  { %6393 = vmatpush.bf16.msra.mxu1 %v12905_v4  ;;  %v15505_v4 = vld [vmem:[#allocation4 + $0x94] sm:$0xf0] }
 0x2d9   :  { %6406 = vmatpush.bf16.msra.mxu2 %v12969_v5  ;;  %v12936_v5 = vld [vmem:[#allocation4 + $0x110] sm:$0xf]  ;;  %v12873_v33 = vor.u32 %v15505_v4, %v12872_v2  ;;  %v18995_v4 = vpack.c.b16 %v5883_v17, %v5883_v17  ;;  %v15555_v17 = vld [vmem:[#allocation4 + $0x224] sm:$0xf0] }
 0x2da   :  { %6419 = vmatpush.bf16.msra.mxu3 %v13033_v7  ;;  %v12809_v7 = vor.u32 %v15489_v3, %v12808_v1  ;;  %v12937_v15 = vor.u32 %v15521_v6, %v12936_v5  ;;  %v13169_v1 = vor.u32 %v15579_v59, %v13168_v53  ;;  %v12853_v3 = vor.u32 %v15498_v23, %v12850_v48  ;;  %v13096_v2 = vld [vmem:[#allocation4 + $0x250] sm:$0xf]  ;;  %v15577_v6 = vld [vmem:[#allocation4 + $0x2d4] sm:$0xf0]  ;;  %v13072_v53 = vld [vmem:[#allocation4 + $0x220] sm:$0xf] }
 0x2db   :  { %6381 = vmatpush.bf16.msra.mxu0 %v12833_v25  ;;  %v4935_v25 = vpop.f32.mrf.mxu2  ;;  %v13097_v61 = vor.u32 %v15561_v13, %v13096_v2  ;;  %v15571_v48 = vld [vmem:[#allocation4 + $0x2a4] sm:$0xf0]  ;;  %v15506_v2 = vld [vmem:[#allocation4 + $0xa4] sm:$0xf]  ;;  %v12882_v13 = vld [vmem:[#allocation4 + $0xa8] sm:$0xf0] }
 0x2dc   :  { %6394 = vmatpush.bf16.msra.mxu1 %v12897_v29  ;;  %v15519_v29 = vld [vmem:[#allocation4 + $0x104] sm:$0xf0]  ;;  %v4948_v32 = vpop.f32.mrf.mxu3 }
 0x2dd   :  { %6407 = vmatpush.bf16.msra.mxu2 %v12961_v22  ;;  %v12992_v22 = vld [vmem:[#allocation4 + $0x180] sm:$0xf]  ;;  %v15575_v25 = vld [vmem:[#allocation4 + $0x2c4] sm:$0xf0]  ;;  %v15510_v32 = vld [vmem:[#allocation4 + $0xc4] sm:$0xf] }
 0x2de   :  { %6420 = vmatpush.bf16.msra.mxu3 %v13025_v45  ;;  %v15565_v45 = vld [vmem:[#allocation4 + $0x274] sm:$0xf0]  ;;  %v12993_v9 = vor.u32 %v15535_v31, %v12992_v22  ;;  %v12834_v22 = vld [vmem:[#allocation4 + $0x48] sm:$0xf0] }
 0x2df   :  { %6382 = vmatpush.bf16.msra.mxu0 %v12825_v40  ;;  %v12929_v40 = vor.u32 %v15519_v29, %v12928_v20  ;;  %v13113_v46 = vor.u32 %v15565_v45, %v13112_v28  ;;  %v13152_v20 = vld [vmem:[#allocation4 + $0x2c0] sm:$0xf]  ;;  %v15494_v29 = vld [vmem:[#allocation4 + $0x44] sm:$0xf]  ;;  %v12898_v28 = vld [vmem:[#allocation4 + $0xc8] sm:$0xf0] }
 0x2e0   :  { %6395 = vmatpush.bf16.msra.mxu1 %v12889_v41  ;;  %v15516_v41 = vld [vmem:[#allocation4 + $0xf4] sm:$0xf]  ;;  %v12837_v50 = vor.u32 %v15494_v29, %v12834_v22  ;;  %v12874_v29 = vld [vmem:[#allocation4 + $0x98] sm:$0xf0] }
 0x2e1   :  { %6408 = vmatpush.bf16.msra.mxu2 %v12953_v43  ;;  %v12922_v43 = vld [vmem:[#allocation4 + $0xf8] sm:$0xf0] }
 0x2e2   :  { %6421 = vmatpush.bf16.msra.mxu3 %v13017_v14  ;;  %v13177_v14 = vor.u32 %v15581_v37, %v13176_v34  ;;  %v12925_v56 = vor.u32 %v15516_v41, %v12922_v43  ;;  %v13153_v37 = vor.u32 %v15575_v25, %v13152_v20  ;;  %v12901_v43 = vor.u32 %v15510_v32, %v12898_v28  ;;  %v15504_v25 = vld [vmem:[#allocation4 + $0x94] sm:$0xf]  ;;  %v15551_v32 = vld [vmem:[#allocation4 + $0x204] sm:$0xf0] }
 0x2e3   :  { %6383 = vmatpush.bf16.msra.mxu0 %v12817_v62  ;;  %v12914_v62 = vld [vmem:[#allocation4 + $0xe8] sm:$0xf0]  ;;  %v5002_v20 = vmax.f32 %v18986_v8, 0.0 }
 0x2e4   :  { %6396 = vmatpush.bf16.msra.mxu1 %v12881_v0  ;;  %v13105_v0 = vor.u32 %v15563_v52, %v13104_v51  ;;  %v12917_v5 = vor.u32 %v15514_v10, %v12914_v62  ;;  %v15490_v10 = vld [vmem:[#allocation4 + $0x24] sm:$0xf]  ;;  %v12818_v62 = vld [vmem:[#allocation4 + $0x28] sm:$0xf0] }
 0x2e5   :  { %6409 = vmatpush.bf16.msra.mxu2 %v12945_v26  ;;  %v18993_v26 = vpack.c.b16 %v5882_v47, %v5882_v47  ;;  %v12826_v47 = vld [vmem:[#allocation4 + $0x38] sm:$0xf0]  ;;  %v12802_v8 = vld [vmem:[#allocation4 + $0x8] sm:$0xf0] }
 0x2e6   :  { %6422 = vmatpush.bf16.msra.mxu3 %v13009_v58  ;;  %v13160_v58 = vld [vmem:[#allocation4 + $0x2d0] sm:$0xf] }
 0x2e7   :  { %6384 = vmatpush.bf16.msra.mxu0 %v12809_v7  ;;  %v15512_v7 = vld [vmem:[#allocation4 + $0xd4] sm:$0xf] }
 0x2e8   :  { %6397 = vmatpush.bf16.msra.mxu1 %v12873_v33  ;;  %v13161_v33 = vor.u32 %v15577_v6, %v13160_v58 }
 0x2e9   :  { %6410 = vmatpush.bf16.msra.mxu2 %v12937_v15  ;;  %v12845_v15 = vor.u32 %v15496_v30, %v12842_v60  ;;  %v12821_v60 = vor.u32 %v15490_v10, %v12818_v62  ;;  %v5885_v10 = vunpack.c.h.b16 %v18648_v19 }
 0x2ea   :  { %6423 = vmatpush.bf16.msra.mxu3 %v13001_v24  ;;  %v12909_v24 = vor.u32 %v15512_v7, %v12906_v12  ;;  %v13064_v7 = vld [vmem:[#allocation4 + $0x210] sm:$0xf]  ;;  %v15553_v12 = vld [vmem:[#allocation4 + $0x214] sm:$0xf0] }
 0x2eb   :  { %6385 = vmatpush.bf16.msra.mxu0 %v12801_v36  ;;  %v4959_v31 = vpop.f32.mrf.mxu0  ;;  %v13089_v36 = vor.u32 %v15559_v21, %v13088_v18  ;;  %v15488_v18 = vld [vmem:[#allocation4 + $0x14] sm:$0xf]  ;;  %v12810_v21 = vld [vmem:[#allocation4 + $0x18] sm:$0xf0]  ;;  %v13065_v22 = vor.u32 %v15553_v12, %v13064_v7 }
 0x2ec   :  { %6398 = vmatpush.bf16.msra.mxu1 %v12865_v54  ;;  %v4960_v45 = vadd.f32 %v4959_v31, %v18989_v63  ;;  %v4972_v34 = vpop.f32.mrf.mxu1  ;;  %v15557_v54 = vld [vmem:[#allocation4 + $0x234] sm:$0xf0]  ;;  %v13056_v31 = vld [vmem:[#allocation4 + $0x200] sm:$0xf] }
 0x2ed   :  { %6411 = vmatpush.bf16.msra.mxu2 %v12929_v40  ;;  %v13144_v40 = vld [vmem:[#allocation4 + $0x2b0] sm:$0xf]  ;;  %v13081_v51 = vor.u32 %v15557_v54, %v13080_v39  ;;  %v12877_v39 = vor.u32 %v15504_v25, %v12874_v29  ;;  %v13034_v25 = vld [vmem:[#allocation4 + $0x1d8] sm:$0xf0]  ;;  %v15560_v29 = vld [vmem:[#allocation4 + $0x254] sm:$0xf] }
 0x2ee   :  { %6424 = vmatpush.bf16.msra.mxu3 %v12993_v9  ;;  %6386 = vmatmul.bf16.vlgmr.msra.gmra.mxu0 %v18965_v42  ;;  %v4973_v41 = vadd.f32 %v4972_v34, %v4960_v45  ;;  %v15573_v9 = vld [vmem:[#allocation4 + $0x2b4] sm:$0xf0]  ;;  %v12813_v34 = vor.u32 %v15488_v18, %v12810_v21  ;;  %v12970_v18 = vld [vmem:[#allocation4 + $0x158] sm:$0xf0]  ;;  %v15544_v21 = vld [vmem:[#allocation4 + $0x1d4] sm:$0xf] }
 0x2ef   :  { %6430 = vmatpush.bf16.msrb.mxu0 %v13113_v46  ;;  %6399 = vmatmul.bf16.vlgmr.msra.gmra.mxu1 %v18967_v44  ;;  %v15492_v46 = vld [vmem:[#allocation4 + $0x34] sm:$0xf]  ;;  %v13145_v63 = vor.u32 %v15573_v9, %v13144_v40  ;;  %v15502_v40 = vld [vmem:[#allocation4 + $0x84] sm:$0xf] }
 0x2f0   :  { %6443 = vmatpush.bf16.msrb.mxu1 %v13177_v14  ;;  %6412 = vmatmul.bf16.vlgmr.msra.gmra.mxu2 %v18993_v26  ;;  %v15508_v14 = vld [vmem:[#allocation4 + $0xb4] sm:$0xf]  ;;  %v12829_v52 = vor.u32 %v15492_v46, %v12826_v47  ;;  %v12986_v46 = vld [vmem:[#allocation4 + $0x178] sm:$0xf0] }
 0x2f1   :  { %6456 = vmatpush.bf16.msrb.mxu2 %v12861_v16  ;;  %6425 = vmatmul.bf16.vlgmr.msra.gmra.mxu3 %v18995_v4  ;;  %v12890_v16 = vld [vmem:[#allocation4 + $0xb8] sm:$0xf0]  ;;  %v15532_v9 = vld [vmem:[#allocation4 + $0x174] sm:$0xf] }
 0x2f2   :  { %6469 = vmatpush.bf16.msrb.mxu3 %v12925_v56  ;;  %v13136_v56 = vld [vmem:[#allocation4 + $0x2a0] sm:$0xf]  ;;  %v12893_v59 = vor.u32 %v15508_v14, %v12890_v16  ;;  %v15548_v47 = vld [vmem:[#allocation4 + $0x1f4] sm:$0xf]  ;;  %v13057_v14 = vor.u32 %v15551_v32, %v13056_v31  ;;  %v13050_v16 = vld [vmem:[#allocation4 + $0x1f8] sm:$0xf0] }
 0x2f3   :  { %6431 = vmatpush.bf16.msrb.mxu0 %v13105_v0  ;;  %v4985_v23 = vpop.f32.mrf.mxu2  ;;  %v13137_v30 = vor.u32 %v15571_v48, %v13136_v56  ;;  %v13178_v56 = vld [vmem:[#allocation4 + $0x2f8] sm:$0xf0]  ;;  %v12989_v48 = vor.u32 %v15532_v9, %v12986_v46  ;;  %v13053_v62 = vor.u32 %v15548_v47, %v13050_v16  ;;  %v15576_v31 = vld [vmem:[#allocation4 + $0x2d4] sm:$0xf]  ;;  %v15574_v9 = vld [vmem:[#allocation4 + $0x2c4] sm:$0xf] }
 0x2f4   :  { %6444 = vmatpush.bf16.msrb.mxu1 %v13169_v1  ;;  %v4986_v0 = vadd.f32 %v4985_v23, %v4973_v41  ;;  %v4998_v1 = vpop.f32.mrf.mxu3  ;;  %v4974_v58 = vpop.f32.mrf.mxu1  ;;  %v12866_v41 = vld [vmem:[#allocation4 + $0x88] sm:$0xf0]  ;;  %v13162_v32 = vld [vmem:[#allocation4 + $0x2d8] sm:$0xf0] }
 0x2f5   :  { %6457 = vmatpush.bf16.msrb.mxu2 %v12853_v3  ;;  %v4961_v3 = vpop.f32.mrf.mxu0  ;;  %v12869_v23 = vor.u32 %v15502_v40, %v12866_v41  ;;  %v13042_v58 = vld [vmem:[#allocation4 + $0x1e8] sm:$0xf0]  ;;  %v15558_v41 = vld [vmem:[#allocation4 + $0x244] sm:$0xf] }
 0x2f6   :  { %6470 = vmatpush.bf16.msrb.mxu3 %v12917_v5  ;;  %v13073_v5 = vor.u32 %v15555_v17, %v13072_v53  ;;  %v4999_v6 = vadd.f32 %v4998_v1, %v4986_v0  ;;  %v15580_v17 = vld [vmem:[#allocation4 + $0x2f4] sm:$0xf]  ;;  %v15530_v1 = vld [vmem:[#allocation4 + $0x164] sm:$0xf]  ;;  %v12978_v3 = vld [vmem:[#allocation4 + $0x168] sm:$0xf0] }
 0x2f7   :  { %6432 = vmatpush.bf16.msrb.mxu0 %v13097_v61  ;;  %v13128_v61 = vld [vmem:[#allocation4 + $0x290] sm:$0xf]  ;;  %v12981_v12 = vor.u32 %v15530_v1, %v12978_v3  ;;  %v13026_v40 = vld [vmem:[#allocation4 + $0x1c8] sm:$0xf0] }
 0x2f8   :  { %6445 = vmatpush.bf16.msrb.mxu1 %v13161_v33  ;;  %v12885_v33 = vor.u32 %v15506_v2, %v12882_v13  ;;  %v15546_v2 = vld [vmem:[#allocation4 + $0x1e4] sm:$0xf]  ;;  %v13181_v13 = vor.u32 %v15580_v17, %v13178_v56  ;;  %v13154_v46 = vld [vmem:[#allocation4 + $0x2c8] sm:$0xf0] }
 0x2f9   :  { %6458 = vmatpush.bf16.msrb.mxu2 %v12845_v15  ;;  %v15569_v15 = vld [vmem:[#allocation4 + $0x294] sm:$0xf0]  ;;  %v13157_v56 = vor.u32 %v15574_v9, %v13154_v46  ;;  %v15534_v46 = vld [vmem:[#allocation4 + $0x184] sm:$0xf] }
 0x2fa   :  { %6471 = vmatpush.bf16.msrb.mxu3 %v12909_v24  ;;  %v5003_v24 = vmax.f32 %v4999_v6, 0.0  ;;  %v13129_v45 = vor.u32 %v15569_v15, %v13128_v61  ;;  %v13106_v6 = vld [vmem:[#allocation4 + $0x268] sm:$0xf0]  ;;  %v19009_v61 = vpack.c.b16 %v5885_v10, %v5885_v10  ;;  %v15572_v10 = vld [vmem:[#allocation4 + $0x2b4] sm:$0xf] }
 0x2fb   :  { %6433 = vmatpush.bf16.msrb.mxu0 %v13089_v36  ;;  %v13120_v36 = vld [vmem:[#allocation4 + $0x280] sm:$0xf]  ;;  %v4987_v54 = vpop.f32.mrf.mxu2 }
 0x2fc   :  { %6446 = vmatpush.bf16.msrb.mxu1 %v13153_v37  ;;  %v19003_v28 = vpack.c.bf16 %v5003_v24, %v5002_v20  ;;  %v15567_v37 = vld [vmem:[#allocation4 + $0x284] sm:$0xf0]  ;;  %v19014_v20 = vld [vmem:[%s19211_s4] sm:$0x3]  ;;  %v15542_v54 = vld [vmem:[#allocation4 + $0x1c4] sm:$0xf] }
 0x2fd   :  { %6459 = vmatpush.bf16.msrb.mxu2 %v12837_v50  ;;  %v15486_v50 = vld [vmem:[#allocation4 + $0x4] sm:$0xf]  ;;  %v13029_v16 = vor.u32 %v15542_v54, %v13026_v40  ;;  %v15568_v54 = vld [vmem:[#allocation4 + $0x294] sm:$0xf] }
 0x2fe   :  { %6472 = vmatpush.bf16.msrb.mxu3 %v12901_v43  ;;  %v5000_v43 = vpop.f32.mrf.mxu3  ;;  %v12805_v53 = vor.u32 %v15486_v50, %v12802_v8  ;;  %v15526_v50 = vld [vmem:[#allocation4 + $0x144] sm:$0xf]  ;;  %v13165_v8 = vor.u32 %v15576_v31, %v13162_v32  ;;  %v15520_v32 = vld [vmem:[#allocation4 + $0x114] sm:$0xf] }
 0x2ff   :  { %6434 = vmatpush.bf16.msrb.mxu0 %v13081_v51  ;;  %v15564_v51 = vld [vmem:[#allocation4 + $0x274] sm:$0xf] }
 0x300   :  { %6447 = vmatpush.bf16.msrb.mxu1 %v13145_v63  ;;  %v13114_v63 = vld [vmem:[#allocation4 + $0x278] sm:$0xf0] }
 0x301   :  { %6460 = vmatpush.bf16.msrb.mxu2 %v12829_v52  ;;  %v13121_v52 = vor.u32 %v15567_v37, %v13120_v36  ;;  %v13117_v0 = vor.u32 %v15564_v51, %v13114_v63  ;;  %v13037_v36 = vor.u32 %v15544_v21, %v13034_v25  ;;  %v15524_v63 = vld [vmem:[#allocation4 + $0x134] sm:$0xf]  ;;  %v13138_v21 = vld [vmem:[#allocation4 + $0x2a8] sm:$0xf0] }
 0x302   :  { %6473 = vmatpush.bf16.msrb.mxu3 %v12893_v59  ;;  %v5884_v59 = vunpack.c.l.b16 %v18648_v19  ;;  %v15528_v19 = vld [vmem:[#allocation4 + $0x154] sm:$0xf] }
 0x303   :  { %6435 = vmatpush.bf16.msrb.mxu0 %v13073_v5  ;;  %v15562_v5 = vld [vmem:[#allocation4 + $0x264] sm:$0xf] }
 0x304   :  { %6448 = vmatpush.bf16.msrb.mxu1 %v13137_v30  ;;  %v15578_v30 = vld [vmem:[#allocation4 + $0x2e4] sm:$0xf]  ;;  %v19007_v7 = vpack.c.b16 %v5884_v59, %v5884_v59  ;;  %v13109_v15 = vor.u32 %v15562_v5, %v13106_v6  ;;  %v13018_v59 = vld [vmem:[#allocation4 + $0x1b8] sm:$0xf0] }
 0x305   :  { %6461 = vmatpush.bf16.msrb.mxu2 %v12821_v60  ;;  %v13170_v60 = vld [vmem:[#allocation4 + $0x2e8] sm:$0xf0] }
 0x306   :  { %6474 = vmatpush.bf16.msrb.mxu3 %v12885_v33  ;;  %v13045_v33 = vor.u32 %v15546_v2, %v13042_v58  ;;  %v13173_v24 = vor.u32 %v15578_v30, %v13170_v60  ;;  %v15522_v2 = vld [vmem:[#allocation4 + $0x124] sm:$0xf]  ;;  %v13010_v30 = vld [vmem:[#allocation4 + $0x1a8] sm:$0xf0] }
 0x307   :  { %6436 = vmatpush.bf16.msrb.mxu0 %v13065_v22  ;;  %v13098_v22 = vld [vmem:[#allocation4 + $0x258] sm:$0xf0]  ;;  %v15538_v58 = vld [vmem:[#allocation4 + $0x1a4] sm:$0xf] }
 0x308   :  { %6449 = vmatpush.bf16.msrb.mxu1 %v13129_v45  ;;  %v12973_v45 = vor.u32 %v15528_v19, %v12970_v18  ;;  %v13101_v37 = vor.u32 %v15560_v29, %v13098_v22  ;;  %v15554_v60 = vld [vmem:[#allocation4 + $0x224] sm:$0xf]  ;;  %v13013_v22 = vor.u32 %v15538_v58, %v13010_v30  ;;  %v13232_v30 = vld [vmem:[#allocation4 + $0x60] sm:$0xf] }
 0x309   :  { %6462 = vmatpush.bf16.msrb.mxu2 %v12813_v34  ;;  %v5107_v34 = vperm.slane %v19014_v20, 0  ;;  %v15570_v18 = vld [vmem:[#allocation4 + $0x2a4] sm:$0xf] }
 0x30a   :  { %6475 = vmatpush.bf16.msrb.mxu3 %v12877_v39  ;;  %v12962_v39 = vld [vmem:[#allocation4 + $0x148] sm:$0xf0] }
 0x30b   :  { %6437 = vmatpush.bf16.msrb.mxu0 %v13057_v14  ;;  %v5621_v43 = vpop.f32.mrf.mxu0  ;;  %v12965_v14 = vor.u32 %v15526_v50, %v12962_v39  ;;  %v15552_v50 = vld [vmem:[#allocation4 + $0x214] sm:$0xf]  ;;  %v13066_v39 = vld [vmem:[#allocation4 + $0x218] sm:$0xf0] }
 0x30c   :  { %6450 = vmatpush.bf16.msrb.mxu1 %v13121_v52  ;;  %v5634_v47 = vpop.f32.mrf.mxu1  ;;  %v12954_v52 = vld [vmem:[#allocation4 + $0x138] sm:$0xf0]  ;;  %v13069_v9 = vor.u32 %v15552_v50, %v13066_v39  ;;  %v13352_v50 = vld [vmem:[#allocation4 + $0x150] sm:$0xf]  ;;  %v15625_v39 = vld [vmem:[#allocation4 + $0x154] sm:$0xf0] }
 0x30d   :  { %6463 = vmatpush.bf16.msrb.mxu2 %v12805_v53  ;;  %v15540_v53 = vld [vmem:[#allocation4 + $0x1b4] sm:$0xf] }
 0x30e   :  { %6476 = vmatpush.bf16.msrb.mxu3 %v12869_v23  ;;  %6438 = vmatmul.bf16.vlgmr.msrb.gmra.mxu0 %v19007_v7  ;;  %v15556_v23 = vld [vmem:[#allocation4 + $0x234] sm:$0xf]  ;;  %v13021_v1 = vor.u32 %v15540_v53, %v13018_v59  ;;  %v13304_v59 = vld [vmem:[#allocation4 + $0xf0] sm:$0xf] }
 0x30f   :  { %6482 = vmatpush.bf16.msra.mxu0 %v12989_v48  ;;  %6451 = vmatmul.bf16.vlgmr.msrb.gmra.mxu1 %v19009_v61  ;;  %v13082_v48 = vld [vmem:[#allocation4 + $0x238] sm:$0xf0] }
 0x310   :  { %6495 = vmatpush.bf16.msra.mxu1 %v13053_v62  ;;  %6464 = vmatmul.bf16.vlgmr.msrb.gmra.mxu2 %v18965_v42  ;;  %v13090_v42 = vld [vmem:[#allocation4 + $0x248] sm:$0xf0]  ;;  %v13146_v62 = vld [vmem:[#allocation4 + $0x2b8] sm:$0xf0]  ;;  %v13085_v3 = vor.u32 %v15556_v23, %v13082_v48  ;;  %v15613_v48 = vld [vmem:[#allocation4 + $0xf4] sm:$0xf0] }
 0x311   :  { %6508 = vmatpush.bf16.msra.mxu2 %v13117_v0  ;;  %6477 = vmatmul.bf16.vlgmr.msrb.gmra.mxu3 %v18967_v44  ;;  %v5622_v44 = vadd.f32 %v5621_v43, %v5107_v34  ;;  %v13093_v51 = vor.u32 %v15558_v41, %v13090_v42  ;;  %v12957_v0 = vor.u32 %v15524_v63, %v12954_v52  ;;  %v15536_v34 = vld [vmem:[#allocation4 + $0x194] sm:$0xf]  ;;  %v15518_v41 = vld [vmem:[#allocation4 + $0x104] sm:$0xf]  ;;  %v12930_v42 = vld [vmem:[#allocation4 + $0x108] sm:$0xf0] }
 0x312   :  { %6521 = vmatpush.bf16.msra.mxu3 %v13181_v13  ;;  %v12946_v13 = vld [vmem:[#allocation4 + $0x128] sm:$0xf0]  ;;  %v13149_v5 = vor.u32 %v15572_v10, %v13146_v62  ;;  %v15566_v63 = vld [vmem:[#allocation4 + $0x284] sm:$0xf]  ;;  %v12933_v23 = vor.u32 %v15518_v41, %v12930_v42  ;;  %v13368_v10 = vld [vmem:[#allocation4 + $0x170] sm:$0xf]  ;;  %v13353_v42 = vor.u32 %v15625_v39, %v13352_v50 }
 0x313   :  { %6483 = vmatpush.bf16.msra.mxu0 %v12981_v12  ;;  %v5635_v17 = vadd.f32 %v5634_v47, %v5622_v44  ;;  %v5647_v6 = vpop.f32.mrf.mxu2  ;;  %v13074_v12 = vld [vmem:[#allocation4 + $0x228] sm:$0xf0]  ;;  %v12949_v25 = vor.u32 %v15522_v2, %v12946_v13  ;;  %v15550_v47 = vld [vmem:[#allocation4 + $0x204] sm:$0xf]  ;;  %v15629_v62 = vld [vmem:[#allocation4 + $0x174] sm:$0xf0] }
 0x314   :  { %6496 = vmatpush.bf16.msra.mxu1 %v13045_v33  ;;  %v5660_v33 = vpop.f32.mrf.mxu3  ;;  %v13077_v31 = vor.u32 %v15554_v60, %v13074_v12  ;;  %v12994_v44 = vld [vmem:[#allocation4 + $0x188] sm:$0xf0]  ;;  %v15645_v2 = vld [vmem:[#allocation4 + $0x1f4] sm:$0xf0]  ;;  %v15595_v60 = vld [vmem:[#allocation4 + $0x64] sm:$0xf0] }
 0x315   :  { %6509 = vmatpush.bf16.msra.mxu2 %v13109_v15  ;;  %v5648_v19 = vadd.f32 %v5647_v6, %v5635_v17  ;;  %v5623_v15 = vpop.f32.mrf.mxu0  ;;  %v13122_v52 = vld [vmem:[#allocation4 + $0x288] sm:$0xf0]  ;;  %v13240_v17 = vld [vmem:[#allocation4 + $0x70] sm:$0xf]  ;;  %v13369_v6 = vor.u32 %v15629_v62, %v13368_v10  ;;  %v13296_v12 = vld [vmem:[#allocation4 + $0xe0] sm:$0xf] }
 0x316   :  { %6522 = vmatpush.bf16.msra.mxu3 %v13173_v24  ;;  %v5636_v24 = vpop.f32.mrf.mxu1  ;;  %v13125_v13 = vor.u32 %v15566_v63, %v13122_v52  ;;  %v13360_v15 = vld [vmem:[#allocation4 + $0x160] sm:$0xf]  ;;  %v13192_v50 = vld [vmem:[#allocation4 + $0x10] sm:$0xf]  ;;  %v15585_v39 = vld [vmem:[#allocation4 + $0x14] sm:$0xf0] }
 0x317   :  { %6484 = vmatpush.bf16.msra.mxu0 %v12973_v45  ;;  %v19021_v29 = vadd.f32 %v5660_v33, %v5648_v19  ;;  %v12938_v45 = vld [vmem:[#allocation4 + $0x118] sm:$0xf0]  ;;  %v15611_v33 = vld [vmem:[#allocation4 + $0xe4] sm:$0xf0] }
 0x318   :  { %6497 = vmatpush.bf16.msra.mxu1 %v13037_v36  ;;  %v13141_v36 = vor.u32 %v15570_v18, %v13138_v21  ;;  %v12941_v40 = vor.u32 %v15520_v32, %v12938_v45  ;;  %v15627_v18 = vld [vmem:[#allocation4 + $0x164] sm:$0xf0]  ;;  %v13424_v21 = vld [vmem:[#allocation4 + $0x1e0] sm:$0xf]  ;;  %v13224_v32 = vld [vmem:[#allocation4 + $0x50] sm:$0xf] }
 0x319   :  { %6510 = vmatpush.bf16.msra.mxu2 %v13101_v37  ;;  %v13002_v37 = vld [vmem:[#allocation4 + $0x198] sm:$0xf0]  ;;  %v15643_v24 = vld [vmem:[#allocation4 + $0x1e4] sm:$0xf0]  ;;  %v15593_v45 = vld [vmem:[#allocation4 + $0x54] sm:$0xf0] }
 0x31a   :  { %6523 = vmatpush.bf16.msra.mxu3 %v13165_v8  ;;  %v13130_v8 = vld [vmem:[#allocation4 + $0x298] sm:$0xf0]  ;;  %v13005_v43 = vor.u32 %v15536_v34, %v13002_v37  ;;  %v13288_v34 = vld [vmem:[#allocation4 + $0xd0] sm:$0xf]  ;;  %v15609_v37 = vld [vmem:[#allocation4 + $0xd4] sm:$0xf0] }
 0x31b   :  { %6485 = vmatpush.bf16.msra.mxu0 %v12965_v14  ;;  %v13133_v14 = vor.u32 %v15568_v54, %v13130_v8  ;;  %v13416_v54 = vld [vmem:[#allocation4 + $0x1d0] sm:$0xf]  ;;  %v15641_v8 = vld [vmem:[#allocation4 + $0x1d4] sm:$0xf0]  ;;  %v13289_v41 = vor.u32 %v15609_v37, %v13288_v34 }
 0x31c   :  { %6498 = vmatpush.bf16.msra.mxu1 %v13029_v16  ;;  %v5649_v16 = vpop.f32.mrf.mxu2  ;;  %v5662_v53 = vpop.f32.mrf.mxu3 }
 0x31d   :  { %6511 = vmatpush.bf16.msra.mxu2 %v13093_v51  ;;  %v13058_v51 = vld [vmem:[#allocation4 + $0x208] sm:$0xf0]  ;;  %v13408_v16 = vld [vmem:[#allocation4 + $0x1c0] sm:$0xf] }
 0x31e   :  { %6524 = vmatpush.bf16.msra.mxu3 %v13157_v56  ;;  %v15597_v56 = vld [vmem:[#allocation4 + $0x74] sm:$0xf0] }
 0x31f   :  { %6486 = vmatpush.bf16.msra.mxu0 %v12957_v0  ;;  %v12997_v0 = vor.u32 %v15534_v46, %v12994_v44  ;;  %v13241_v58 = vor.u32 %v15597_v56, %v13240_v17  ;;  %v13417_v46 = vor.u32 %v15641_v8, %v13416_v54  ;;  %v15607_v44 = vld [vmem:[#allocation4 + $0xc4] sm:$0xf0]  ;;  %v13256_v54 = vld [vmem:[#allocation4 + $0x90] sm:$0xf] }
 0x320   :  { %6499 = vmatpush.bf16.msra.mxu1 %v13021_v1  ;;  %v13061_v1 = vor.u32 %v15550_v47, %v13058_v51  ;;  %v13344_v47 = vld [vmem:[#allocation4 + $0x140] sm:$0xf]  ;;  %v15639_v51 = vld [vmem:[#allocation4 + $0x1c4] sm:$0xf0] }
 0x321   :  { %6512 = vmatpush.bf16.msra.mxu2 %v13085_v3  ;;  %v13432_v3 = vld [vmem:[#allocation4 + $0x1f0] sm:$0xf]  ;;  %v13409_v62 = vor.u32 %v15639_v51, %v13408_v16  ;;  %v15599_v16 = vld [vmem:[#allocation4 + $0x84] sm:$0xf0]  ;;  %v13312_v51 = vld [vmem:[#allocation4 + $0x100] sm:$0xf] }
 0x322   :  { %6525 = vmatpush.bf16.msra.mxu3 %v13149_v5  ;;  %v13305_v5 = vor.u32 %v15613_v48, %v13304_v59  ;;  %v13433_v19 = vor.u32 %v15645_v2, %v13432_v3  ;;  %v13208_v59 = vld [vmem:[#allocation4 + $0x30] sm:$0xf]  ;;  %v15621_v3 = vld [vmem:[#allocation4 + $0x134] sm:$0xf0] }
 0x323   :  { %6487 = vmatpush.bf16.msra.mxu0 %v12949_v25  ;;  %v13233_v25 = vor.u32 %v15595_v60, %v13232_v30  ;;  %v13272_v48 = vld [vmem:[#allocation4 + $0xb0] sm:$0xf]  ;;  %v13200_v30 = vld [vmem:[#allocation4 + $0x20] sm:$0xf]  ;;  %v15587_v60 = vld [vmem:[#allocation4 + $0x24] sm:$0xf0] }
 0x324   :  { %6500 = vmatpush.bf16.msra.mxu1 %v13013_v22  ;;  %v13297_v22 = vor.u32 %v15611_v33, %v13296_v12  ;;  %v13400_v2 = vld [vmem:[#allocation4 + $0x1b0] sm:$0xf]  ;;  %v13264_v12 = vld [vmem:[#allocation4 + $0xa0] sm:$0xf] }
 0x325   :  { %6513 = vmatpush.bf16.msra.mxu2 %v13077_v31  ;;  %v13361_v31 = vor.u32 %v15627_v18, %v13360_v15  ;;  %v15603_v15 = vld [vmem:[#allocation4 + $0xa4] sm:$0xf0]  ;;  %v13328_v18 = vld [vmem:[#allocation4 + $0x120] sm:$0xf] }
 0x326   :  { %6526 = vmatpush.bf16.msra.mxu3 %v13141_v36  ;;  %v13425_v36 = vor.u32 %v15643_v24, %v13424_v21  ;;  %v15619_v21 = vld [vmem:[#allocation4 + $0x124] sm:$0xf0] }
 0x327   :  { %6488 = vmatpush.bf16.msra.mxu0 %v12941_v40  ;;  %v13225_v40 = vor.u32 %v15593_v45, %v13224_v32  ;;  %v13201_v45 = vor.u32 %v15587_v60, %v13200_v30  ;;  %v13329_v37 = vor.u32 %v15619_v21, %v13328_v18  ;;  %v6648_v60 = vunpack.c.l.b16 %v18848_v27  ;;  %v13552_v18 = vld [vmem:[#allocation4 + $0x2e0] sm:$0xf] }
 0x328   :  { %6501 = vmatpush.bf16.msra.mxu1 %v13005_v43  ;;  %v13216_v43 = vld [vmem:[#allocation4 + $0x40] sm:$0xf]  ;;  %v6649_v21 = vunpack.c.h.b16 %v18848_v27  ;;  %v15657_v27 = vld [vmem:[#allocation4 + $0x254] sm:$0xf0] }
 0x329   :  { %6514 = vmatpush.bf16.msra.mxu2 %v13069_v9  ;;  %v13280_v9 = vld [vmem:[#allocation4 + $0xc0] sm:$0xf] }
 0x32a   :  { %6527 = vmatpush.bf16.msra.mxu3 %v13133_v14  ;;  %v13281_v17 = vor.u32 %v15607_v44, %v13280_v9  ;;  %v13193_v9 = vor.u32 %v15585_v39, %v13192_v50  ;;  %v15583_v44 = vld [vmem:[#allocation4 + $0x4] sm:$0xf0]  ;;  %v13480_v39 = vld [vmem:[#allocation4 + $0x250] sm:$0xf] }
 0x32b   :  { %6489 = vmatpush.bf16.msra.mxu0 %v12933_v23  ;;  %v5673_v14 = vpop.f32.mrf.mxu0  ;;  %v15589_v23 = vld [vmem:[#allocation4 + $0x34] sm:$0xf0] }
 0x32c   :  { %6502 = vmatpush.bf16.msra.mxu1 %v12997_v0  ;;  %v5674_v63 = vadd.f32 %v5673_v14, %v19021_v29  ;;  %v5686_v52 = vpop.f32.mrf.mxu1  ;;  %v15605_v0 = vld [vmem:[#allocation4 + $0xb4] sm:$0xf0]  ;;  %v5108_v29 = vperm.slane %v19014_v20, 1  ;;  %v15635_v20 = vld [vmem:[#allocation4 + $0x1a4] sm:$0xf0] }
 0x32d   :  { %6515 = vmatpush.bf16.msra.mxu2 %v13061_v1  ;;  %v13336_v1 = vld [vmem:[#allocation4 + $0x130] sm:$0xf]  ;;  %v13248_v14 = vld [vmem:[#allocation4 + $0x80] sm:$0xf] }
 0x32e   :  { %6528 = vmatpush.bf16.msra.mxu3 %v13125_v13  ;;  %6490 = vmatmul.bf16.vlgmr.msra.gmra.mxu0 %v18993_v26  ;;  %v15591_v26 = vld [vmem:[#allocation4 + $0x44] sm:$0xf0]  ;;  %v19028_v10 = vadd.f32 %v5686_v52, %v5674_v63  ;;  %v15637_v13 = vld [vmem:[#allocation4 + $0x1b4] sm:$0xf0] }
 0x32f   :  { %7144 = vmatpush.bf16.msrb.mxu0 %v13241_v58  ;;  %6503 = vmatmul.bf16.vlgmr.msra.gmra.mxu1 %v18995_v4  ;;  %v15623_v4 = vld [vmem:[#allocation4 + $0x144] sm:$0xf0]  ;;  %v13217_v53 = vor.u32 %v15591_v26, %v13216_v43  ;;  %v13209_v58 = vor.u32 %v15589_v23, %v13208_v59  ;;  %v13384_v43 = vld [vmem:[#allocation4 + $0x190] sm:$0xf]  ;;  %v15633_v26 = vld [vmem:[#allocation4 + $0x194] sm:$0xf0] }
 0x330   :  { %7157 = vmatpush.bf16.msrb.mxu1 %v13305_v5  ;;  %6516 = vmatmul.bf16.vlgmr.msra.gmra.mxu2 %v19007_v7  ;;  %v13345_v56 = vor.u32 %v15623_v4, %v13344_v47  ;;  %v13273_v5 = vor.u32 %v15605_v0, %v13272_v48  ;;  %v13385_v63 = vor.u32 %v15633_v26, %v13384_v43  ;;  %v13496_v23 = vld [vmem:[#allocation4 + $0x270] sm:$0xf]  ;;  %v15661_v48 = vld [vmem:[#allocation4 + $0x274] sm:$0xf0]  ;;  %v13226_v43 = vld [vmem:[#allocation4 + $0x58] sm:$0xf0] }
 0x331   :  { %7170 = vmatpush.bf16.msrb.mxu2 %v13369_v6  ;;  %6529 = vmatmul.bf16.vlgmr.msra.gmra.mxu3 %v19009_v61  ;;  %v13337_v6 = vor.u32 %v15621_v3, %v13336_v1  ;;  %v15677_v1 = vld [vmem:[#allocation4 + $0x2f4] sm:$0xf0]  ;;  %v15596_v3 = vld [vmem:[#allocation4 + $0x74] sm:$0xf]  ;;  %v13497_v30 = vor.u32 %v15661_v48, %v13496_v23 }
 0x332   :  { %7183 = vmatpush.bf16.msrb.mxu3 %v13433_v19  ;;  %v13401_v19 = vor.u32 %v15637_v13, %v13400_v2  ;;  %v13242_v2 = vld [vmem:[#allocation4 + $0x78] sm:$0xf0]  ;;  %v13249_v13 = vor.u32 %v15599_v16, %v13248_v14  ;;  %v15608_v26 = vld [vmem:[#allocation4 + $0xd4] sm:$0xf]  ;;  %v15655_v14 = vld [vmem:[#allocation4 + $0x244] sm:$0xf0] }
 0x333   :  { %7145 = vmatpush.bf16.msrb.mxu0 %v13233_v25  ;;  %v5699_v33 = vpop.f32.mrf.mxu2  ;;  %v13536_v16 = vld [vmem:[#allocation4 + $0x2c0] sm:$0xf] }
 0x334   :  { %7158 = vmatpush.bf16.msrb.mxu1 %v13297_v22  ;;  %v5700_v24 = vadd.f32 %v5699_v33, %v5108_v29  ;;  %v5712_v25 = vpop.f32.mrf.mxu3  ;;  %v5675_v22 = vpop.f32.mrf.mxu0  ;;  %v13488_v33 = vld [vmem:[#allocation4 + $0x260] sm:$0xf] }
 0x335   :  { %7171 = vmatpush.bf16.msrb.mxu2 %v13361_v31  ;;  %v13392_v31 = vld [vmem:[#allocation4 + $0x1a0] sm:$0xf]  ;;  %v5688_v32 = vpop.f32.mrf.mxu1  ;;  %v15594_v22 = vld [vmem:[#allocation4 + $0x64] sm:$0xf] }
 0x336   :  { %7184 = vmatpush.bf16.msrb.mxu3 %v13425_v36  ;;  %v19031_v34 = vadd.f32 %v5712_v25, %v5700_v24  ;;  %v13265_v36 = vor.u32 %v15603_v15, %v13264_v12  ;;  %v13393_v8 = vor.u32 %v15635_v20, %v13392_v31  ;;  %v15659_v15 = vld [vmem:[#allocation4 + $0x264] sm:$0xf0]  ;;  %v13234_v31 = vld [vmem:[#allocation4 + $0x68] sm:$0xf0]  ;;  %v15610_v20 = vld [vmem:[#allocation4 + $0xe4] sm:$0xf] }
 0x337   :  { %7146 = vmatpush.bf16.msrb.mxu0 %v13225_v40  ;;  %v15601_v40 = vld [vmem:[#allocation4 + $0x94] sm:$0xf0]  ;;  %v15675_v25 = vld [vmem:[#allocation4 + $0x2e4] sm:$0xf0]  ;;  %v13298_v32 = vld [vmem:[#allocation4 + $0xe8] sm:$0xf0]  ;;  %v13237_v50 = vor.u32 %v15594_v22, %v13234_v31 }
 0x338   :  { %7159 = vmatpush.bf16.msrb.mxu1 %v13289_v41  ;;  %v13320_v41 = vld [vmem:[#allocation4 + $0x110] sm:$0xf]  ;;  %v13257_v47 = vor.u32 %v15601_v40, %v13256_v54  ;;  %v13301_v40 = vor.u32 %v15610_v20, %v13298_v32  ;;  %v15667_v22 = vld [vmem:[#allocation4 + $0x2a4] sm:$0xf0]  ;;  %v15586_v31 = vld [vmem:[#allocation4 + $0x24] sm:$0xf] }
 0x339   :  { %7172 = vmatpush.bf16.msrb.mxu2 %v13353_v42  ;;  %v15617_v42 = vld [vmem:[#allocation4 + $0x114] sm:$0xf0]  ;;  %v13544_v54 = vld [vmem:[#allocation4 + $0x2d0] sm:$0xf]  ;;  %v13202_v20 = vld [vmem:[#allocation4 + $0x28] sm:$0xf0] }
 0x33a   :  { %7185 = vmatpush.bf16.msrb.mxu3 %v13417_v46  ;;  %v13184_v46 = vld [vmem:[#allocation4] sm:$0xf]  ;;  %v13321_v4 = vor.u32 %v15617_v42, %v13320_v41  ;;  %v15673_v41 = vld [vmem:[#allocation4 + $0x2d4] sm:$0xf0]  ;;  %v15592_v42 = vld [vmem:[#allocation4 + $0x54] sm:$0xf] }
 0x33b   :  { %7147 = vmatpush.bf16.msrb.mxu0 %v13217_v53  ;;  %v5701_v52 = vpop.f32.mrf.mxu2  ;;  %v15615_v53 = vld [vmem:[#allocation4 + $0x104] sm:$0xf0]  ;;  %v13185_v0 = vor.u32 %v15583_v44, %v13184_v46  ;;  %v13481_v46 = vor.u32 %v15657_v27, %v13480_v39  ;;  %v13545_v44 = vor.u32 %v15673_v41, %v13544_v54  ;;  %v13266_v39 = vld [vmem:[#allocation4 + $0xa8] sm:$0xf0] }
 0x33c   :  { %7160 = vmatpush.bf16.msrb.mxu1 %v13281_v17  ;;  %v13376_v17 = vld [vmem:[#allocation4 + $0x180] sm:$0xf]  ;;  %v5714_v59 = vpop.f32.mrf.mxu3  ;;  %v13313_v29 = vor.u32 %v15615_v53, %v13312_v51  ;;  %v15590_v52 = vld [vmem:[#allocation4 + $0x44] sm:$0xf]  ;;  %v13218_v53 = vld [vmem:[#allocation4 + $0x48] sm:$0xf0] }
 0x33d   :  { %7173 = vmatpush.bf16.msrb.mxu2 %v13345_v56  ;;  %v15631_v56 = vld [vmem:[#allocation4 + $0x184] sm:$0xf0]  ;;  %v13282_v59 = vld [vmem:[#allocation4 + $0xc8] sm:$0xf0] }
 0x33e   :  { %7186 = vmatpush.bf16.msrb.mxu3 %v13409_v62  ;;  %v13560_v62 = vld [vmem:[#allocation4 + $0x2f0] sm:$0xf] }
 0x33f   :  { %7148 = vmatpush.bf16.msrb.mxu0 %v13209_v58  ;;  %v15612_v58 = vld [vmem:[#allocation4 + $0xf4] sm:$0xf]  ;;  %v13561_v12 = vor.u32 %v15677_v1, %v13560_v62  ;;  %v13221_v1 = vor.u32 %v15590_v52, %v13218_v53  ;;  %v13440_v53 = vld [vmem:[#allocation4 + $0x200] sm:$0xf] }
 0x340   :  { %7161 = vmatpush.bf16.msrb.mxu1 %v13273_v5  ;;  %v13306_v5 = vld [vmem:[#allocation4 + $0xf8] sm:$0xf0] }
 0x341   :  { %7174 = vmatpush.bf16.msrb.mxu2 %v13337_v6  ;;  %v13377_v6 = vor.u32 %v15631_v56, %v13376_v17  ;;  %v13309_v24 = vor.u32 %v15612_v58, %v13306_v5  ;;  %v15606_v56 = vld [vmem:[#allocation4 + $0xc4] sm:$0xf]  ;;  %v15669_v5 = vld [vmem:[#allocation4 + $0x2b4] sm:$0xf0] }
 0x342   :  { %7187 = vmatpush.bf16.msrb.mxu3 %v13401_v19  ;;  %v13245_v19 = vor.u32 %v15596_v3, %v13242_v2  ;;  %v13464_v3 = vld [vmem:[#allocation4 + $0x230] sm:$0xf]  ;;  %v15653_v2 = vld [vmem:[#allocation4 + $0x234] sm:$0xf0]  ;;  %v13285_v58 = vor.u32 %v15606_v56, %v13282_v59 }
 0x343   :  { %7149 = vmatpush.bf16.msrb.mxu0 %v13201_v45  ;;  %v13489_v45 = vor.u32 %v15659_v15, %v13488_v33  ;;  %v13456_v15 = vld [vmem:[#allocation4 + $0x220] sm:$0xf] }
 0x344   :  { %7162 = vmatpush.bf16.msrb.mxu1 %v13265_v36  ;;  %v19035_v36 = vpack.c.b16 %v6648_v60, %v6648_v60  ;;  %v15604_v60 = vld [vmem:[#allocation4 + $0xb4] sm:$0xf] }
 0x345   :  { %7175 = vmatpush.bf16.msrb.mxu2 %v13329_v37  ;;  %v13553_v37 = vor.u32 %v15675_v25, %v13552_v18  ;;  %v15651_v18 = vld [vmem:[#allocation4 + $0x224] sm:$0xf0] }
 0x346   :  { %7188 = vmatpush.bf16.msrb.mxu3 %v13393_v8  ;;  %v19037_v8 = vpack.c.b16 %v6649_v21, %v6649_v21  ;;  %v13520_v21 = vld [vmem:[#allocation4 + $0x2a0] sm:$0xf]  ;;  %v13457_v54 = vor.u32 %v15651_v18, %v13456_v15  ;;  %v15676_v15 = vld [vmem:[#allocation4 + $0x2f4] sm:$0xf]  ;;  %v13562_v18 = vld [vmem:[#allocation4 + $0x2f8] sm:$0xf0] }
 0x347   :  { %7150 = vmatpush.bf16.msrb.mxu0 %v13193_v9  ;;  %v13290_v9 = vld [vmem:[#allocation4 + $0xd8] sm:$0xf0]  ;;  %v13521_v41 = vor.u32 %v15667_v22, %v13520_v21  ;;  %v6650_v21 = vunpack.c.l.b16 %v18871_v35  ;;  %v6651_v22 = vunpack.c.h.b16 %v18871_v35  ;;  %v15624_v35 = vld [vmem:[#allocation4 + $0x154] sm:$0xf] }
 0x348   :  { %7163 = vmatpush.bf16.msrb.mxu1 %v13257_v47  ;;  %v13229_v47 = vor.u32 %v15592_v42, %v13226_v43  ;;  %v13293_v51 = vor.u32 %v15608_v26, %v13290_v9  ;;  %v13205_v42 = vor.u32 %v15586_v31, %v13202_v20  ;;  %v13448_v43 = vld [vmem:[#allocation4 + $0x210] sm:$0xf]  ;;  %v15649_v26 = vld [vmem:[#allocation4 + $0x214] sm:$0xf0] }
 0x349   :  { %7176 = vmatpush.bf16.msrb.mxu2 %v13321_v4  ;;  %v13472_v4 = vld [vmem:[#allocation4 + $0x240] sm:$0xf]  ;;  %v13512_v9 = vld [vmem:[#allocation4 + $0x290] sm:$0xf]  ;;  %v13449_v52 = vor.u32 %v15649_v26, %v13448_v43  ;;  %v19051_v26 = vpack.c.b16 %v6651_v22, %v6651_v22  ;;  %v13530_v22 = vld [vmem:[#allocation4 + $0x2b8] sm:$0xf0] }
 0x34a   :  { %7189 = vmatpush.bf16.msrb.mxu3 %v13385_v63  ;;  %v15671_v63 = vld [vmem:[#allocation4 + $0x2c4] sm:$0xf0]  ;;  %v13473_v62 = vor.u32 %v15655_v14, %v13472_v4  ;;  %v13194_v4 = vld [vmem:[#allocation4 + $0x18] sm:$0xf0]  ;;  %v5768_v14 = vmax.f32 %v19028_v10, 0.0 }
 0x34b   :  { %7151 = vmatpush.bf16.msrb.mxu0 %v13185_v0  ;;  %v5725_v17 = vpop.f32.mrf.mxu0  ;;  %v13537_v0 = vor.u32 %v15671_v63, %v13536_v16  ;;  %v13258_v63 = vld [vmem:[#allocation4 + $0x98] sm:$0xf0]  ;;  %v13186_v10 = vld [vmem:[#allocation4 + $0x8] sm:$0xf0] }
 0x34c   :  { %7164 = vmatpush.bf16.msrb.mxu1 %v13249_v13  ;;  %v5726_v23 = vadd.f32 %v5725_v17, %v19031_v34  ;;  %v5738_v48 = vpop.f32.mrf.mxu1  ;;  %v13528_v13 = vld [vmem:[#allocation4 + $0x2b0] sm:$0xf]  ;;  %v15647_v17 = vld [vmem:[#allocation4 + $0x204] sm:$0xf0] }
 0x34d   :  { %7177 = vmatpush.bf16.msrb.mxu2 %v13313_v29  ;;  %v13529_v34 = vor.u32 %v15669_v5, %v13528_v13  ;;  %v13250_v13 = vld [vmem:[#allocation4 + $0x88] sm:$0xf0]  ;;  %v13370_v5 = vld [vmem:[#allocation4 + $0x178] sm:$0xf0] }
 0x34e   :  { %7190 = vmatpush.bf16.msrb.mxu3 %v13377_v6  ;;  %7152 = vmatmul.bf16.vlgmr.msrb.gmra.mxu0 %v19007_v7  ;;  %v5739_v29 = vadd.f32 %v5738_v48, %v5726_v23  ;;  %v15588_v6 = vld [vmem:[#allocation4 + $0x34] sm:$0xf]  ;;  %v13504_v48 = vld [vmem:[#allocation4 + $0x280] sm:$0xf] }
 0x34f   :  { %7196 = vmatpush.bf16.msra.mxu0 %v13497_v30  ;;  %7165 = vmatmul.bf16.vlgmr.msrb.gmra.mxu1 %v19009_v61  ;;  %v13210_v30 = vld [vmem:[#allocation4 + $0x38] sm:$0xf0] }
 0x350   :  { %7209 = vmatpush.bf16.msra.mxu1 %v13561_v12  ;;  %7178 = vmatmul.bf16.vlgmr.msrb.gmra.mxu2 %v19035_v36  ;;  %v13274_v12 = vld [vmem:[#allocation4 + $0xb8] sm:$0xf0]  ;;  %v13213_v33 = vor.u32 %v15588_v6, %v13210_v30  ;;  %v15644_v6 = vld [vmem:[#allocation4 + $0x1f4] sm:$0xf]  ;;  %v13441_v30 = vor.u32 %v15647_v17, %v13440_v53 }
 0x351   :  { %7222 = vmatpush.bf16.msra.mxu2 %v13245_v19  ;;  %7191 = vmatmul.bf16.vlgmr.msrb.gmra.mxu3 %v19037_v8  ;;  %v13465_v19 = vor.u32 %v15653_v2, %v13464_v3  ;;  %v15598_v2 = vld [vmem:[#allocation4 + $0x84] sm:$0xf]  ;;  %v13546_v53 = vld [vmem:[#allocation4 + $0x2d8] sm:$0xf0] }
 0x352   :  { %7235 = vmatpush.bf16.msra.mxu3 %v13309_v24  ;;  %v13277_v24 = vor.u32 %v15604_v60, %v13274_v12  ;;  %v13434_v60 = vld [vmem:[#allocation4 + $0x1f8] sm:$0xf0]  ;;  %v15660_v12 = vld [vmem:[#allocation4 + $0x274] sm:$0xf] }
 0x353   :  { %7197 = vmatpush.bf16.msra.mxu0 %v13489_v45  ;;  %v5751_v25 = vpop.f32.mrf.mxu2  ;;  %v13437_v31 = vor.u32 %v15644_v6, %v13434_v60 }
 0x354   :  { %7210 = vmatpush.bf16.msra.mxu1 %v13553_v37  ;;  %v5752_v32 = vadd.f32 %v5751_v25, %v5739_v29  ;;  %v5764_v45 = vpop.f32.mrf.mxu3  ;;  %v5727_v37 = vpop.f32.mrf.mxu0 }
 0x355   :  { %7223 = vmatpush.bf16.msra.mxu2 %v13237_v50  ;;  %v15602_v50 = vld [vmem:[#allocation4 + $0xa4] sm:$0xf]  ;;  %v5740_v27 = vpop.f32.mrf.mxu1 }
 0x356   :  { %7236 = vmatpush.bf16.msra.mxu3 %v13301_v40  ;;  %v5765_v40 = vadd.f32 %v5764_v45, %v5752_v32  ;;  %v15626_v32 = vld [vmem:[#allocation4 + $0x164] sm:$0xf]  ;;  %v13362_v45 = vld [vmem:[#allocation4 + $0x168] sm:$0xf0] }
 0x357   :  { %7198 = vmatpush.bf16.msra.mxu0 %v13481_v46  ;;  %v13269_v46 = vor.u32 %v15602_v50, %v13266_v39  ;;  %v15642_v37 = vld [vmem:[#allocation4 + $0x1e4] sm:$0xf]  ;;  %v13565_v50 = vor.u32 %v15676_v15, %v13562_v18  ;;  %v13426_v39 = vld [vmem:[#allocation4 + $0x1e8] sm:$0xf0]  ;;  %v13365_v43 = vor.u32 %v15626_v32, %v13362_v45  ;;  %v13402_v18 = vld [vmem:[#allocation4 + $0x1b8] sm:$0xf0] }
 0x358   :  { %7211 = vmatpush.bf16.msra.mxu1 %v13545_v44  ;;  %v15665_v44 = vld [vmem:[#allocation4 + $0x294] sm:$0xf0]  ;;  %v5769_v16 = vmax.f32 %v5765_v40, 0.0  ;;  %v15658_v27 = vld [vmem:[#allocation4 + $0x264] sm:$0xf] }
 0x359   :  { %7224 = vmatpush.bf16.msra.mxu2 %v13229_v47  ;;  %v15584_v47 = vld [vmem:[#allocation4 + $0x14] sm:$0xf]  ;;  %v13513_v59 = vor.u32 %v15665_v44, %v13512_v9  ;;  %v15674_v40 = vld [vmem:[#allocation4 + $0x2e4] sm:$0xf]  ;;  %v13429_v9 = vor.u32 %v15642_v37, %v13426_v39  ;;  %v13354_v44 = vld [vmem:[#allocation4 + $0x158] sm:$0xf0] }
 0x35a   :  { %7237 = vmatpush.bf16.msra.mxu3 %v13293_v51  ;;  %v15600_v51 = vld [vmem:[#allocation4 + $0x94] sm:$0xf]  ;;  %v19045_v56 = vpack.c.bf16 %v5769_v16, %v5768_v14  ;;  %v13197_v23 = vor.u32 %v15584_v47, %v13194_v4  ;;  %v19056_v4 = vld [vmem:[%s19211_s4] sm:$0x3]  ;;  %v13418_v16 = vld [vmem:[#allocation4 + $0x1d8] sm:$0xf0]  ;;  %v13357_v17 = vor.u32 %v15624_v35, %v13354_v44 }
 0x35b   :  { %7199 = vmatpush.bf16.msra.mxu0 %v13473_v62  ;;  %v15663_v62 = vld [vmem:[#allocation4 + $0x284] sm:$0xf0]  ;;  %v5753_v3 = vpop.f32.mrf.mxu2  ;;  %v15640_v47 = vld [vmem:[#allocation4 + $0x1d4] sm:$0xf]  ;;  %v15618_v45 = vld [vmem:[#allocation4 + $0x124] sm:$0xf] }
 0x35c   :  { %7212 = vmatpush.bf16.msra.mxu1 %v13537_v0  ;;  %v15582_v0 = vld [vmem:[#allocation4 + $0x4] sm:$0xf]  ;;  %v5766_v29 = vpop.f32.mrf.mxu3  ;;  %v13330_v37 = vld [vmem:[#allocation4 + $0x128] sm:$0xf0] }
 0x35d   :  { %7225 = vmatpush.bf16.msra.mxu2 %v13221_v1  ;;  %v13261_v1 = vor.u32 %v15600_v51, %v13258_v63  ;;  %v15656_v51 = vld [vmem:[#allocation4 + $0x254] sm:$0xf]  ;;  %v13482_v63 = vld [vmem:[#allocation4 + $0x258] sm:$0xf0]  ;;  %v15670_v29 = vld [vmem:[#allocation4 + $0x2c4] sm:$0xf] }
 0x35e   :  { %7238 = vmatpush.bf16.msra.mxu3 %v13285_v58  ;;  %v15628_v58 = vld [vmem:[#allocation4 + $0x174] sm:$0xf]  ;;  %v13522_v44 = vld [vmem:[#allocation4 + $0x2a8] sm:$0xf0] }
 0x35f   :  { %7200 = vmatpush.bf16.msra.mxu0 %v13465_v19  ;;  %v13498_v19 = vld [vmem:[#allocation4 + $0x278] sm:$0xf0]  ;;  %v13373_v25 = vor.u32 %v15628_v58, %v13370_v5  ;;  %v13538_v58 = vld [vmem:[#allocation4 + $0x2c8] sm:$0xf0] }
 0x360   :  { %7213 = vmatpush.bf16.msra.mxu1 %v13529_v34  ;;  %v13505_v34 = vor.u32 %v15663_v62, %v13504_v48  ;;  %v13501_v20 = vor.u32 %v15660_v12, %v13498_v19  ;;  %v13485_v48 = vor.u32 %v15656_v51, %v13482_v63  ;;  %v15622_v62 = vld [vmem:[#allocation4 + $0x144] sm:$0xf]  ;;  %v15620_v12 = vld [vmem:[#allocation4 + $0x134] sm:$0xf]  ;;  %v13338_v19 = vld [vmem:[#allocation4 + $0x138] sm:$0xf0]  ;;  %v13541_v15 = vor.u32 %v15670_v29, %v13538_v58 }
 0x361   :  { %7226 = vmatpush.bf16.msra.mxu2 %v13213_v33  ;;  %v13189_v33 = vor.u32 %v15582_v0, %v13186_v10  ;;  %v13346_v0 = vld [vmem:[#allocation4 + $0x148] sm:$0xf0]  ;;  %v15630_v29 = vld [vmem:[#allocation4 + $0x184] sm:$0xf] }
 0x362   :  { %7239 = vmatpush.bf16.msra.mxu3 %v13277_v24  ;;  %v13253_v24 = vor.u32 %v15598_v2, %v13250_v13  ;;  %v13410_v10 = vld [vmem:[#allocation4 + $0x1c8] sm:$0xf0]  ;;  %v15654_v2 = vld [vmem:[#allocation4 + $0x244] sm:$0xf]  ;;  %v13349_v6 = vor.u32 %v15622_v62, %v13346_v0  ;;  %v13450_v62 = vld [vmem:[#allocation4 + $0x218] sm:$0xf0] }
 0x363   :  { %7201 = vmatpush.bf16.msra.mxu0 %v13457_v54  ;;  %v13490_v54 = vld [vmem:[#allocation4 + $0x268] sm:$0xf0]  ;;  %v15664_v0 = vld [vmem:[#allocation4 + $0x294] sm:$0xf] }
 0x364   :  { %7214 = vmatpush.bf16.msra.mxu1 %v13521_v41  ;;  %v13554_v41 = vld [vmem:[#allocation4 + $0x2e8] sm:$0xf0] }
 0x365   :  { %7227 = vmatpush.bf16.msra.mxu2 %v13205_v42  ;;  %v19049_v42 = vpack.c.b16 %v6650_v21, %v6650_v21  ;;  %v13557_v14 = vor.u32 %v15674_v40, %v13554_v41  ;;  %v15652_v21 = vld [vmem:[#allocation4 + $0x234] sm:$0xf]  ;;  %v15650_v40 = vld [vmem:[#allocation4 + $0x224] sm:$0xf]  ;;  %v13458_v41 = vld [vmem:[#allocation4 + $0x228] sm:$0xf0] }
 0x366   :  { %7240 = vmatpush.bf16.msra.mxu3 %v13269_v46  ;;  %v13493_v46 = vor.u32 %v15658_v27, %v13490_v54  ;;  %v13394_v54 = vld [vmem:[#allocation4 + $0x1a8] sm:$0xf0]  ;;  %v13461_v63 = vor.u32 %v15650_v40, %v13458_v41  ;;  %v13680_v40 = vld [vmem:[#allocation4 + $0xe0] sm:$0xf] }
 0x367   :  { %7202 = vmatpush.bf16.msra.mxu0 %v13449_v52  ;;  %v15672_v52 = vld [vmem:[#allocation4 + $0x2d4] sm:$0xf]  ;;  %v13378_v58 = vld [vmem:[#allocation4 + $0x188] sm:$0xf0] }
 0x368   :  { %7215 = vmatpush.bf16.msra.mxu1 %v13513_v59  ;;  %v5873_v59 = vperm.slane %v19056_v4, 0  ;;  %v13549_v3 = vor.u32 %v15672_v52, %v13546_v53  ;;  %v15616_v52 = vld [vmem:[#allocation4 + $0x114] sm:$0xf]  ;;  %v13322_v53 = vld [vmem:[#allocation4 + $0x118] sm:$0xf0] }
 0x369   :  { %7228 = vmatpush.bf16.msra.mxu2 %v13197_v23  ;;  %v13421_v23 = vor.u32 %v15640_v47, %v13418_v16 }
 0x36a   :  { %7241 = vmatpush.bf16.msra.mxu3 %v13261_v1  ;;  %v15638_v1 = vld [vmem:[#allocation4 + $0x1c4] sm:$0xf] }
 0x36b   :  { %7203 = vmatpush.bf16.msra.mxu0 %v13441_v30  ;;  %v6387_v13 = vpop.f32.mrf.mxu0  ;;  %v13413_v30 = vor.u32 %v15638_v1, %v13410_v10  ;;  %v13514_v1 = vld [vmem:[#allocation4 + $0x298] sm:$0xf0]  ;;  %v15614_v10 = vld [vmem:[#allocation4 + $0x104] sm:$0xf] }
 0x36c   :  { %7216 = vmatpush.bf16.msra.mxu1 %v13505_v34  ;;  %v6400_v5 = vpop.f32.mrf.mxu1  ;;  %v15636_v34 = vld [vmem:[#allocation4 + $0x1b4] sm:$0xf] }
 0x36d   :  { %7229 = vmatpush.bf16.msra.mxu2 %v13189_v33 }
 0x36e   :  { %7242 = vmatpush.bf16.msra.mxu3 %v13253_v24  ;;  %7204 = vmatmul.bf16.vlgmr.msra.gmra.mxu0 %v19049_v42  ;;  %v13466_v24 = vld [vmem:[#allocation4 + $0x238] sm:$0xf0] }
 0x36f   :  { %7248 = vmatpush.bf16.msrb.mxu0 %v13373_v25  ;;  %7217 = vmatmul.bf16.vlgmr.msra.gmra.mxu1 %v19051_v26  ;;  %v15668_v25 = vld [vmem:[#allocation4 + $0x2b4] sm:$0xf]  ;;  %v13469_v32 = vor.u32 %v15652_v21, %v13466_v24  ;;  %v15709_v21 = vld [vmem:[#allocation4 + $0xf4] sm:$0xf0]  ;;  %v13752_v24 = vld [vmem:[#allocation4 + $0x170] sm:$0xf] }
 0x370   :  { %7261 = vmatpush.bf16.msrb.mxu1 %v13437_v31  ;;  %7230 = vmatmul.bf16.vlgmr.msra.gmra.mxu2 %v19007_v7  ;;  %v13474_v7 = vld [vmem:[#allocation4 + $0x248] sm:$0xf0]  ;;  %v13341_v31 = vor.u32 %v15620_v12, %v13338_v19  ;;  %v13533_v39 = vor.u32 %v15668_v25, %v13530_v22  ;;  %v15725_v25 = vld [vmem:[#allocation4 + $0x174] sm:$0xf0]  ;;  %v13381_v22 = vor.u32 %v15630_v29, %v13378_v58  ;;  %v15703_v29 = vld [vmem:[#allocation4 + $0xc4] sm:$0xf0] }
 0x371   :  { %7274 = vmatpush.bf16.msrb.mxu2 %v13501_v20  ;;  %7243 = vmatmul.bf16.vlgmr.msra.gmra.mxu3 %v19009_v61  ;;  %v6388_v61 = vadd.f32 %v6387_v13, %v5873_v59  ;;  %v13477_v60 = vor.u32 %v15654_v2, %v13474_v7  ;;  %v13405_v20 = vor.u32 %v15636_v34, %v13402_v18  ;;  %v13314_v2 = vld [vmem:[#allocation4 + $0x108] sm:$0xf0]  ;;  %v13624_v34 = vld [vmem:[#allocation4 + $0x70] sm:$0xf]  ;;  %v13728_v58 = vld [vmem:[#allocation4 + $0x140] sm:$0xf] }
 0x372   :  { %7287 = vmatpush.bf16.msrb.mxu3 %v13565_v50  ;;  %v15634_v50 = vld [vmem:[#allocation4 + $0x1a4] sm:$0xf]  ;;  %v13506_v12 = vld [vmem:[#allocation4 + $0x288] sm:$0xf0]  ;;  %v13317_v18 = vor.u32 %v15614_v10, %v13314_v2  ;;  %v13600_v2 = vld [vmem:[#allocation4 + $0x40] sm:$0xf] }
 0x373   :  { %7249 = vmatpush.bf16.msrb.mxu0 %v13365_v43  ;;  %v6401_v33 = vadd.f32 %v6400_v5, %v6388_v61  ;;  %v6413_v27 = vpop.f32.mrf.mxu2  ;;  %v13397_v51 = vor.u32 %v15634_v50, %v13394_v54  ;;  %v15646_v61 = vld [vmem:[#allocation4 + $0x204] sm:$0xf]  ;;  %v13517_v5 = vor.u32 %v15664_v0, %v13514_v1  ;;  %v15691_v54 = vld [vmem:[#allocation4 + $0x64] sm:$0xf0]  ;;  %v15737_v0 = vld [vmem:[#allocation4 + $0x1d4] sm:$0xf0] }
 0x374   :  { %7262 = vmatpush.bf16.msrb.mxu1 %v13429_v9  ;;  %v6426_v35 = vpop.f32.mrf.mxu3  ;;  %v6389_v9 = vpop.f32.mrf.mxu0 }
 0x375   :  { %7275 = vmatpush.bf16.msrb.mxu2 %v13493_v46  ;;  %v6414_v43 = vadd.f32 %v6413_v27, %v6401_v33  ;;  %v15666_v46 = vld [vmem:[#allocation4 + $0x2a4] sm:$0xf]  ;;  %v6402_v47 = vpop.f32.mrf.mxu1  ;;  %v15693_v33 = vld [vmem:[#allocation4 + $0x74] sm:$0xf0]  ;;  %v13616_v27 = vld [vmem:[#allocation4 + $0x60] sm:$0xf] }
 0x376   :  { %7288 = vmatpush.bf16.msrb.mxu3 %v13557_v14  ;;  %v13333_v14 = vor.u32 %v15618_v45, %v13330_v37  ;;  %v13525_v59 = vor.u32 %v15666_v46, %v13522_v44  ;;  %v13625_v37 = vor.u32 %v15693_v33, %v13624_v34  ;;  %v15723_v9 = vld [vmem:[#allocation4 + $0x164] sm:$0xf0]  ;;  %v13808_v46 = vld [vmem:[#allocation4 + $0x1e0] sm:$0xf]  ;;  %v13617_v47 = vor.u32 %v15691_v54, %v13616_v27  ;;  %v13592_v33 = vld [vmem:[#allocation4 + $0x30] sm:$0xf] }
 0x377   :  { %7250 = vmatpush.bf16.msrb.mxu0 %v13357_v17  ;;  %v19063_v16 = vadd.f32 %v6426_v35, %v6414_v43  ;;  %v15632_v17 = vld [vmem:[#allocation4 + $0x194] sm:$0xf]  ;;  %v15707_v43 = vld [vmem:[#allocation4 + $0xe4] sm:$0xf0]  ;;  %v13744_v35 = vld [vmem:[#allocation4 + $0x160] sm:$0xf] }
 0x378   :  { %7263 = vmatpush.bf16.msrb.mxu1 %v13421_v23  ;;  %v13386_v23 = vld [vmem:[#allocation4 + $0x198] sm:$0xf0]  ;;  %v15739_v44 = vld [vmem:[#allocation4 + $0x1e4] sm:$0xf0]  ;;  %v13648_v54 = vld [vmem:[#allocation4 + $0xa0] sm:$0xf] }
 0x379   :  { %7276 = vmatpush.bf16.msrb.mxu2 %v13485_v48  ;;  %v15648_v48 = vld [vmem:[#allocation4 + $0x214] sm:$0xf]  ;;  %v13389_v7 = vor.u32 %v15632_v17, %v13386_v23  ;;  %v13809_v17 = vor.u32 %v15739_v44, %v13808_v46  ;;  %v13736_v23 = vld [vmem:[#allocation4 + $0x150] sm:$0xf]  ;;  %v15683_v27 = vld [vmem:[#allocation4 + $0x24] sm:$0xf0] }
 0x37a   :  { %7289 = vmatpush.bf16.msrb.mxu3 %v13549_v3  ;;  %v13325_v3 = vor.u32 %v15616_v52, %v13322_v53  ;;  %v13453_v13 = vor.u32 %v15648_v48, %v13450_v62  ;;  %v15689_v52 = vld [vmem:[#allocation4 + $0x54] sm:$0xf0]  ;;  %v13672_v53 = vld [vmem:[#allocation4 + $0xd0] sm:$0xf] }
 0x37b   :  { %7251 = vmatpush.bf16.msrb.mxu0 %v13349_v6  ;;  %v6415_v6 = vpop.f32.mrf.mxu2  ;;  %v15721_v48 = vld [vmem:[#allocation4 + $0x154] sm:$0xf0]  ;;  %v13800_v62 = vld [vmem:[#allocation4 + $0x1d0] sm:$0xf] }
 0x37c   :  { %7264 = vmatpush.bf16.msrb.mxu1 %v13413_v30  ;;  %v13442_v30 = vld [vmem:[#allocation4 + $0x208] sm:$0xf0]  ;;  %v6428_v19 = vpop.f32.mrf.mxu3  ;;  %v13737_v10 = vor.u32 %v15721_v48, %v13736_v23  ;;  %v15735_v6 = vld [vmem:[#allocation4 + $0x1c4] sm:$0xf0]  ;;  %v15681_v23 = vld [vmem:[#allocation4 + $0x14] sm:$0xf0] }
 0x37d   :  { %7277 = vmatpush.bf16.msrb.mxu2 %v13477_v60  ;;  %v15662_v60 = vld [vmem:[#allocation4 + $0x284] sm:$0xf]  ;;  %v13640_v48 = vld [vmem:[#allocation4 + $0x90] sm:$0xf] }
 0x37e   :  { %7290 = vmatpush.bf16.msrb.mxu3 %v13541_v15  ;;  %v13688_v15 = vld [vmem:[#allocation4 + $0xf0] sm:$0xf]  ;;  %v13509_v45 = vor.u32 %v15662_v60, %v13506_v12 }
 0x37f   :  { %7252 = vmatpush.bf16.msrb.mxu0 %v13341_v31  ;;  %v13445_v31 = vor.u32 %v15646_v61, %v13442_v30  ;;  %v13689_v50 = vor.u32 %v15709_v21, %v13688_v15  ;;  %v15685_v15 = vld [vmem:[#allocation4 + $0x34] sm:$0xf0] }
 0x380   :  { %7265 = vmatpush.bf16.msrb.mxu1 %v13405_v20  ;;  %v13816_v20 = vld [vmem:[#allocation4 + $0x1f0] sm:$0xf] }
 0x381   :  { %7278 = vmatpush.bf16.msrb.mxu2 %v13469_v32  ;;  %v15741_v32 = vld [vmem:[#allocation4 + $0x1f4] sm:$0xf0] }
 0x382   :  { %7291 = vmatpush.bf16.msrb.mxu3 %v13533_v39  ;;  %v13753_v39 = vor.u32 %v15725_v25, %v13752_v24  ;;  %v13817_v41 = vor.u32 %v15741_v32, %v13816_v20  ;;  %v15701_v25 = vld [vmem:[#allocation4 + $0xb4] sm:$0xf0]  ;;  %v13784_v20 = vld [vmem:[#allocation4 + $0x1b0] sm:$0xf] }
 0x383   :  { %7253 = vmatpush.bf16.msrb.mxu0 %v13333_v14  ;;  %v13681_v14 = vor.u32 %v15707_v43, %v13680_v40  ;;  %v15733_v32 = vld [vmem:[#allocation4 + $0x1b4] sm:$0xf0]  ;;  %v15699_v43 = vld [vmem:[#allocation4 + $0xa4] sm:$0xf0] }
 0x384   :  { %7266 = vmatpush.bf16.msrb.mxu1 %v13397_v51  ;;  %v13745_v51 = vor.u32 %v15723_v9, %v13744_v35  ;;  %v13785_v40 = vor.u32 %v15733_v32, %v13784_v20  ;;  %v13712_v35 = vld [vmem:[#allocation4 + $0x120] sm:$0xf]  ;;  %v15715_v9 = vld [vmem:[#allocation4 + $0x124] sm:$0xf0] }
 0x385   :  { %7279 = vmatpush.bf16.msrb.mxu2 %v13461_v63  ;;  %v13608_v63 = vld [vmem:[#allocation4 + $0x50] sm:$0xf] }
 0x386   :  { %7292 = vmatpush.bf16.msrb.mxu3 %v13525_v59  ;;  %v15705_v59 = vld [vmem:[#allocation4 + $0xd4] sm:$0xf0]  ;;  %v13609_v1 = vor.u32 %v15689_v52, %v13608_v63 }
 0x387   :  { %7254 = vmatpush.bf16.msrb.mxu0 %v13325_v3  ;;  %v13673_v3 = vor.u32 %v15705_v59, %v13672_v53  ;;  %v13649_v53 = vor.u32 %v15699_v43, %v13648_v54  ;;  %v13576_v59 = vld [vmem:[#allocation4 + $0x10] sm:$0xf]  ;;  %v13936_v43 = vld [vmem:[#allocation4 + $0x2e0] sm:$0xf] }
 0x388   :  { %7267 = vmatpush.bf16.msrb.mxu1 %v13389_v7  ;;  %v13664_v7 = vld [vmem:[#allocation4 + $0xc0] sm:$0xf] }
 0x389   :  { %7280 = vmatpush.bf16.msrb.mxu2 %v13453_v13  ;;  %v13801_v13 = vor.u32 %v15737_v0, %v13800_v62  ;;  %v13665_v19 = vor.u32 %v15703_v29, %v13664_v7  ;;  %v15697_v0 = vld [vmem:[#allocation4 + $0x94] sm:$0xf0]  ;;  %v13568_v7 = vld [vmem:[#allocation4] sm:$0xf] }
 0x38a   :  { %7293 = vmatpush.bf16.msrb.mxu3 %v13517_v5  ;;  %v13792_v5 = vld [vmem:[#allocation4 + $0x1c0] sm:$0xf]  ;;  %v13641_v29 = vor.u32 %v15697_v0, %v13640_v48  ;;  %v15769_v0 = vld [vmem:[#allocation4 + $0x2d4] sm:$0xf0] }
 0x38b   :  { %7255 = vmatpush.bf16.msrb.mxu0 %v13317_v18  ;;  %v6439_v61 = vpop.f32.mrf.mxu0  ;;  %v13656_v18 = vld [vmem:[#allocation4 + $0xb0] sm:$0xf]  ;;  %v13793_v24 = vor.u32 %v15735_v6, %v13792_v5  ;;  %v13696_v5 = vld [vmem:[#allocation4 + $0x100] sm:$0xf] }
 0x38c   :  { %7268 = vmatpush.bf16.msrb.mxu1 %v13381_v22  ;;  %v6440_v30 = vadd.f32 %v6439_v61, %v19063_v16  ;;  %v6452_v60 = vpop.f32.mrf.mxu1  ;;  %v13720_v22 = vld [vmem:[#allocation4 + $0x130] sm:$0xf]  ;;  %v5874_v16 = vperm.slane %v19056_v4, 1  ;;  %v15731_v4 = vld [vmem:[#allocation4 + $0x1a4] sm:$0xf0] }
 0x38d   :  { %7281 = vmatpush.bf16.msrb.mxu2 %v13445_v31  ;;  %v15717_v31 = vld [vmem:[#allocation4 + $0x134] sm:$0xf0]  ;;  %v15695_v61 = vld [vmem:[#allocation4 + $0x84] sm:$0xf0] }
 0x38e   :  { %7294 = vmatpush.bf16.msrb.mxu3 %v13509_v45  ;;  %7256 = vmatmul.bf16.vlgmr.msrb.gmra.mxu0 %v19035_v36  ;;  %v15687_v36 = vld [vmem:[#allocation4 + $0x44] sm:$0xf0]  ;;  %v19070_v21 = vadd.f32 %v6452_v60, %v6440_v30  ;;  %v13593_v45 = vor.u32 %v15685_v15, %v13592_v33  ;;  %v13880_v33 = vld [vmem:[#allocation4 + $0x270] sm:$0xf]  ;;  %v15757_v15 = vld [vmem:[#allocation4 + $0x274] sm:$0xf0] }
 0x38f   :  { %7910 = vmatpush.bf16.msra.mxu0 %v13625_v37  ;;  %7269 = vmatmul.bf16.vlgmr.msrb.gmra.mxu1 %v19037_v8  ;;  %v15719_v8 = vld [vmem:[#allocation4 + $0x144] sm:$0xf0]  ;;  %v13601_v12 = vor.u32 %v15687_v36, %v13600_v2  ;;  %v13657_v37 = vor.u32 %v15701_v25, %v13656_v18  ;;  %v15729_v2 = vld [vmem:[#allocation4 + $0x194] sm:$0xf0]  ;;  %v13577_v36 = vor.u32 %v15681_v23, %v13576_v59  ;;  %v13944_v18 = vld [vmem:[#allocation4 + $0x2f0] sm:$0xf] }
 0x390   :  { %7923 = vmatpush.bf16.msra.mxu1 %v13689_v50  ;;  %7282 = vmatmul.bf16.vlgmr.msrb.gmra.mxu2 %v19049_v42  ;;  %v13729_v34 = vor.u32 %v15719_v8, %v13728_v58  ;;  %v13721_v50 = vor.u32 %v15717_v31, %v13720_v22  ;;  %v13632_v8 = vld [vmem:[#allocation4 + $0x80] sm:$0xf]  ;;  %v15711_v60 = vld [vmem:[#allocation4 + $0x104] sm:$0xf0]  ;;  %v15773_v25 = vld [vmem:[#allocation4 + $0x2f4] sm:$0xf0] }
 0x391   :  { %7936 = vmatpush.bf16.msra.mxu2 %v13753_v39  ;;  %7295 = vmatmul.bf16.vlgmr.msrb.gmra.mxu3 %v19051_v26  ;;  %v13584_v39 = vld [vmem:[#allocation4 + $0x20] sm:$0xf]  ;;  %v15692_v22 = vld [vmem:[#allocation4 + $0x74] sm:$0xf]  ;;  %v13626_v31 = vld [vmem:[#allocation4 + $0x78] sm:$0xf0]  ;;  %v13633_v20 = vor.u32 %v15695_v61, %v13632_v8  ;;  %v13697_v32 = vor.u32 %v15711_v60, %v13696_v5 }
 0x392   :  { %7949 = vmatpush.bf16.msra.mxu3 %v13817_v41  ;;  %v13585_v63 = vor.u32 %v15683_v27, %v13584_v39  ;;  %v7414_v39 = vunpack.c.l.b16 %v18892_v49  ;;  %v13945_v27 = vor.u32 %v15773_v25, %v13944_v18  ;;  %v13629_v54 = vor.u32 %v15692_v22, %v13626_v31  ;;  %v13864_v59 = vld [vmem:[#allocation4 + $0x250] sm:$0xf]  ;;  %v13920_v8 = vld [vmem:[#allocation4 + $0x2c0] sm:$0xf]  ;;  %v15767_v5 = vld [vmem:[#allocation4 + $0x2c4] sm:$0xf0] }
 0x393   :  { %7911 = vmatpush.bf16.msra.mxu0 %v13617_v47  ;;  %v6465_v41 = vpop.f32.mrf.mxu2  ;;  %v6441_v47 = vpop.f32.mrf.mxu0  ;;  %v13928_v23 = vld [vmem:[#allocation4 + $0x2d0] sm:$0xf]  ;;  %v13921_v18 = vor.u32 %v15767_v5, %v13920_v8  ;;  %v15749_v22 = vld [vmem:[#allocation4 + $0x234] sm:$0xf0]  ;;  %v15696_v8 = vld [vmem:[#allocation4 + $0x94] sm:$0xf] }
 0x394   :  { %7924 = vmatpush.bf16.msra.mxu1 %v13681_v14  ;;  %v6466_v46 = vadd.f32 %v6465_v41, %v5874_v16  ;;  %v6478_v44 = vpop.f32.mrf.mxu3  ;;  %v13776_v14 = vld [vmem:[#allocation4 + $0x1a0] sm:$0xf]  ;;  %v15708_v16 = vld [vmem:[#allocation4 + $0xf4] sm:$0xf]  ;;  %v15755_v41 = vld [vmem:[#allocation4 + $0x264] sm:$0xf0] }
 0x395   :  { %7937 = vmatpush.bf16.msra.mxu2 %v13745_v51  ;;  %v6454_v51 = vpop.f32.mrf.mxu1  ;;  %v13777_v62 = vor.u32 %v15731_v4, %v13776_v14  ;;  %v13618_v47 = vld [vmem:[#allocation4 + $0x68] sm:$0xf0]  ;;  %v15706_v14 = vld [vmem:[#allocation4 + $0xe4] sm:$0xf]  ;;  %v13848_v25 = vld [vmem:[#allocation4 + $0x230] sm:$0xf] }
 0x396   :  { %7950 = vmatpush.bf16.msra.mxu3 %v13809_v17  ;;  %v19073_v52 = vadd.f32 %v6478_v44, %v6466_v46  ;;  %v13713_v17 = vor.u32 %v15715_v9, %v13712_v35  ;;  %v7415_v35 = vunpack.c.h.b16 %v18892_v49  ;;  %v15771_v46 = vld [vmem:[#allocation4 + $0x2e4] sm:$0xf0]  ;;  %v15690_v44 = vld [vmem:[#allocation4 + $0x64] sm:$0xf]  ;;  %v13682_v4 = vld [vmem:[#allocation4 + $0xe8] sm:$0xf0] }
 0x397   :  { %7912 = vmatpush.bf16.msra.mxu0 %v13609_v1  ;;  %v13704_v1 = vld [vmem:[#allocation4 + $0x110] sm:$0xf]  ;;  %v15753_v49 = vld [vmem:[#allocation4 + $0x254] sm:$0xf0] }
 0x398   :  { %7925 = vmatpush.bf16.msra.mxu1 %v13673_v3  ;;  %v15713_v3 = vld [vmem:[#allocation4 + $0x114] sm:$0xf0]  ;;  %v19079_v48 = vpack.c.b16 %v7415_v35, %v7415_v35  ;;  %v13912_v31 = vld [vmem:[#allocation4 + $0x2b0] sm:$0xf] }
 0x399   :  { %7938 = vmatpush.bf16.msra.mxu2 %v13737_v10  ;;  %v13768_v10 = vld [vmem:[#allocation4 + $0x190] sm:$0xf]  ;;  %v13705_v58 = vor.u32 %v15713_v3, %v13704_v1  ;;  %v15688_v1 = vld [vmem:[#allocation4 + $0x54] sm:$0xf]  ;;  %v13610_v3 = vld [vmem:[#allocation4 + $0x58] sm:$0xf0] }
 0x39a   :  { %7951 = vmatpush.bf16.msra.mxu3 %v13801_v13  ;;  %v15679_v13 = vld [vmem:[#allocation4 + $0x4] sm:$0xf0]  ;;  %v13769_v6 = vor.u32 %v15729_v2, %v13768_v10  ;;  %v15704_v10 = vld [vmem:[#allocation4 + $0xd4] sm:$0xf]  ;;  %v13674_v2 = vld [vmem:[#allocation4 + $0xd8] sm:$0xf0] }
 0x39b   :  { %7913 = vmatpush.bf16.msra.mxu0 %v13601_v12  ;;  %v6467_v30 = vpop.f32.mrf.mxu2  ;;  %v13760_v12 = vld [vmem:[#allocation4 + $0x180] sm:$0xf]  ;;  %v13677_v61 = vor.u32 %v15704_v10, %v13674_v2  ;;  %v13896_v10 = vld [vmem:[#allocation4 + $0x290] sm:$0xf] }
 0x39c   :  { %7926 = vmatpush.bf16.msra.mxu1 %v13665_v19  ;;  %v15727_v19 = vld [vmem:[#allocation4 + $0x184] sm:$0xf0]  ;;  %v13602_v30 = vld [vmem:[#allocation4 + $0x48] sm:$0xf0] }
 0x39d   :  { %7939 = vmatpush.bf16.msra.mxu2 %v13729_v34  ;;  %v6480_v34 = vpop.f32.mrf.mxu3 }
 0x39e   :  { %7952 = vmatpush.bf16.msra.mxu3 %v13793_v24  ;;  %v13569_v24 = vor.u32 %v15679_v13, %v13568_v7  ;;  %v13929_v7 = vor.u32 %v15769_v0, %v13928_v23  ;;  %v13613_v13 = vor.u32 %v15688_v1, %v13610_v3  ;;  %v13832_v1 = vld [vmem:[#allocation4 + $0x210] sm:$0xf]  ;;  %v15745_v3 = vld [vmem:[#allocation4 + $0x214] sm:$0xf0] }
 0x39f   :  { %7914 = vmatpush.bf16.msra.mxu0 %v13593_v45  ;;  %v13690_v45 = vld [vmem:[#allocation4 + $0xf8] sm:$0xf0]  ;;  %v13833_v5 = vor.u32 %v15745_v3, %v13832_v1 }
 0x3a0   :  { %7927 = vmatpush.bf16.msra.mxu1 %v13657_v37  ;;  %v13761_v37 = vor.u32 %v15727_v19, %v13760_v12  ;;  %v13693_v9 = vor.u32 %v15708_v16, %v13690_v45  ;;  %v15702_v12 = vld [vmem:[#allocation4 + $0xc4] sm:$0xf]  ;;  %v13666_v19 = vld [vmem:[#allocation4 + $0xc8] sm:$0xf0]  ;;  %v15765_v16 = vld [vmem:[#allocation4 + $0x2b4] sm:$0xf0] }
 0x3a1   :  { %7940 = vmatpush.bf16.msra.mxu2 %v13721_v50  ;;  %v13881_v50 = vor.u32 %v15757_v15, %v13880_v33  ;;  %v15684_v45 = vld [vmem:[#allocation4 + $0x34] sm:$0xf] }
 0x3a2   :  { %7953 = vmatpush.bf16.msra.mxu3 %v13785_v40  ;;  %v13872_v40 = vld [vmem:[#allocation4 + $0x260] sm:$0xf] }
 0x3a3   :  { %7915 = vmatpush.bf16.msra.mxu0 %v13585_v63  ;;  %v13873_v51 = vor.u32 %v15755_v41, %v13872_v40  ;;  %v19077_v63 = vpack.c.b16 %v7414_v39, %v7414_v39  ;;  %v13658_v39 = vld [vmem:[#allocation4 + $0xb8] sm:$0xf0]  ;;  %v13840_v40 = vld [vmem:[#allocation4 + $0x220] sm:$0xf]  ;;  %v15747_v41 = vld [vmem:[#allocation4 + $0x224] sm:$0xf0] }
 0x3a4   :  { %7928 = vmatpush.bf16.msra.mxu1 %v13649_v53  ;;  %v13937_v53 = vor.u32 %v15771_v46, %v13936_v43  ;;  %v13904_v43 = vld [vmem:[#allocation4 + $0x2a0] sm:$0xf]  ;;  %v15763_v46 = vld [vmem:[#allocation4 + $0x2a4] sm:$0xf0] }
 0x3a5   :  { %7941 = vmatpush.bf16.msra.mxu2 %v13713_v17  ;;  %v13621_v17 = vor.u32 %v15690_v44, %v13618_v47  ;;  %v15682_v44 = vld [vmem:[#allocation4 + $0x24] sm:$0xf]  ;;  %v13586_v47 = vld [vmem:[#allocation4 + $0x28] sm:$0xf0] }
 0x3a6   :  { %7954 = vmatpush.bf16.msra.mxu3 %v13777_v62  ;;  %v13685_v62 = vor.u32 %v15706_v14, %v13682_v4  ;;  %v13589_v0 = vor.u32 %v15682_v44, %v13586_v47  ;;  %v15722_v47 = vld [vmem:[#allocation4 + $0x164] sm:$0xf] }
 0x3a7   :  { %7916 = vmatpush.bf16.msra.mxu0 %v13577_v36  ;;  %v13865_v36 = vor.u32 %v15753_v49, %v13864_v59  ;;  %v13841_v49 = vor.u32 %v15747_v41, %v13840_v40  ;;  %v13946_v40 = vld [vmem:[#allocation4 + $0x2f8] sm:$0xf0]  ;;  %v7416_v41 = vunpack.c.l.b16 %v18901_v57 }
 0x3a8   :  { %7929 = vmatpush.bf16.msra.mxu1 %v13641_v29  ;;  %v13856_v29 = vld [vmem:[#allocation4 + $0x240] sm:$0xf] }
 0x3a9   :  { %7942 = vmatpush.bf16.msra.mxu2 %v13705_v58  ;;  %v15751_v58 = vld [vmem:[#allocation4 + $0x244] sm:$0xf0] }
 0x3aa   :  { %7955 = vmatpush.bf16.msra.mxu3 %v13769_v6  ;;  %v15686_v6 = vld [vmem:[#allocation4 + $0x44] sm:$0xf]  ;;  %v13857_v15 = vor.u32 %v15751_v58, %v13856_v29  ;;  %v6534_v29 = vmax.f32 %v19070_v21, 0.0  ;;  %v13570_v21 = vld [vmem:[#allocation4 + $0x8] sm:$0xf0] }
 0x3ab   :  { %7917 = vmatpush.bf16.msra.mxu0 %v13569_v24  ;;  %v6491_v60 = vpop.f32.mrf.mxu0  ;;  %v13605_v24 = vor.u32 %v15686_v6, %v13602_v30  ;;  %v13824_v6 = vld [vmem:[#allocation4 + $0x200] sm:$0xf]  ;;  %v15743_v30 = vld [vmem:[#allocation4 + $0x204] sm:$0xf0] }
 0x3ac   :  { %7930 = vmatpush.bf16.msra.mxu1 %v13633_v20  ;;  %v6492_v34 = vadd.f32 %v6491_v60, %v19073_v52  ;;  %v6504_v33 = vpop.f32.mrf.mxu1  ;;  %v13913_v52 = vor.u32 %v15765_v16, %v13912_v31  ;;  %v15740_v16 = vld [vmem:[#allocation4 + $0x1f4] sm:$0xf] }
 0x3ad   :  { %7943 = vmatpush.bf16.msra.mxu2 %v13697_v32  ;;  %v13669_v32 = vor.u32 %v15702_v12, %v13666_v19 }
 0x3ae   :  { %7956 = vmatpush.bf16.msra.mxu3 %v13761_v37  ;;  %7918 = vmatmul.bf16.vlgmr.msra.gmra.mxu0 %v19049_v42  ;;  %v6505_v20 = vadd.f32 %v6504_v33, %v6492_v34  ;;  %v13594_v37 = vld [vmem:[#allocation4 + $0x38] sm:$0xf0]  ;;  %v13888_v34 = vld [vmem:[#allocation4 + $0x280] sm:$0xf]  ;;  %v15759_v33 = vld [vmem:[#allocation4 + $0x284] sm:$0xf0] }
 0x3af   :  { %7962 = vmatpush.bf16.msrb.mxu0 %v13881_v50  ;;  %7931 = vmatmul.bf16.vlgmr.msra.gmra.mxu1 %v19051_v26  ;;  %v15700_v50 = vld [vmem:[#allocation4 + $0xb4] sm:$0xf] }
 0x3b0   :  { %7975 = vmatpush.bf16.msrb.mxu1 %v13945_v27  ;;  %7944 = vmatmul.bf16.vlgmr.msra.gmra.mxu2 %v19077_v63  ;;  %v13849_v27 = vor.u32 %v15749_v22, %v13848_v25  ;;  %v13661_v35 = vor.u32 %v15700_v50, %v13658_v39  ;;  %v15694_v25 = vld [vmem:[#allocation4 + $0x84] sm:$0xf]  ;;  %v13634_v22 = vld [vmem:[#allocation4 + $0x88] sm:$0xf0]  ;;  %v15756_v50 = vld [vmem:[#allocation4 + $0x274] sm:$0xf] }
 0x3b1   :  { %7988 = vmatpush.bf16.msrb.mxu2 %v13629_v54  ;;  %7957 = vmatmul.bf16.vlgmr.msra.gmra.mxu3 %v19079_v48  ;;  %v13597_v54 = vor.u32 %v15684_v45, %v13594_v37  ;;  %v13825_v45 = vor.u32 %v15743_v30, %v13824_v6  ;;  %v13818_v37 = vld [vmem:[#allocation4 + $0x1f8] sm:$0xf0] }
 0x3b2   :  { %8001 = vmatpush.bf16.msrb.mxu3 %v13693_v9  ;;  %v13882_v39 = vld [vmem:[#allocation4 + $0x278] sm:$0xf0] }
 0x3b3   :  { %7963 = vmatpush.bf16.msrb.mxu0 %v13873_v51  ;;  %v6517_v9 = vpop.f32.mrf.mxu2  ;;  %v6493_v51 = vpop.f32.mrf.mxu0  ;;  %v13885_v44 = vor.u32 %v15756_v50, %v13882_v39  ;;  %v13722_v50 = vld [vmem:[#allocation4 + $0x138] sm:$0xf0]  ;;  %v15732_v39 = vld [vmem:[#allocation4 + $0x1b4] sm:$0xf] }
 0x3b4   :  { %7976 = vmatpush.bf16.msrb.mxu1 %v13937_v53  ;;  %v6518_v14 = vadd.f32 %v6517_v9, %v6505_v20  ;;  %v6530_v4 = vpop.f32.mrf.mxu3  ;;  %v15698_v53 = vld [vmem:[#allocation4 + $0xa4] sm:$0xf]  ;;  %v6506_v59 = vpop.f32.mrf.mxu1  ;;  %v15724_v20 = vld [vmem:[#allocation4 + $0x174] sm:$0xf]  ;;  %v7417_v9 = vunpack.c.h.b16 %v18901_v57 }
 0x3b5   :  { %7989 = vmatpush.bf16.msrb.mxu2 %v13621_v17  ;;  %v13650_v17 = vld [vmem:[#allocation4 + $0xa8] sm:$0xf0]  ;;  %v15720_v57 = vld [vmem:[#allocation4 + $0x154] sm:$0xf] }
 0x3b6   :  { %8002 = vmatpush.bf16.msrb.mxu3 %v13685_v62  ;;  %v6531_v23 = vadd.f32 %v6530_v4, %v6518_v14  ;;  %v13905_v62 = vor.u32 %v15763_v46, %v13904_v43  ;;  %v13653_v2 = vor.u32 %v15698_v53, %v13650_v17  ;;  %v13637_v43 = vor.u32 %v15694_v25, %v13634_v22  ;;  %v13746_v14 = vld [vmem:[#allocation4 + $0x168] sm:$0xf0]  ;;  %v15738_v4 = vld [vmem:[#allocation4 + $0x1e4] sm:$0xf] }
 0x3b7   :  { %7964 = vmatpush.bf16.msrb.mxu0 %v13865_v36  ;;  %v15761_v36 = vld [vmem:[#allocation4 + $0x294] sm:$0xf0]  ;;  %v13821_v46 = vor.u32 %v15740_v16, %v13818_v37  ;;  %v13810_v53 = vld [vmem:[#allocation4 + $0x1e8] sm:$0xf0]  ;;  %v15754_v17 = vld [vmem:[#allocation4 + $0x264] sm:$0xf]  ;;  %v19093_v1 = vpack.c.b16 %v7417_v9, %v7417_v9 }
 0x3b8   :  { %7977 = vmatpush.bf16.msrb.mxu1 %v13929_v7  ;;  %v15680_v7 = vld [vmem:[#allocation4 + $0x14] sm:$0xf]  ;;  %v6535_v58 = vmax.f32 %v6531_v23, 0.0  ;;  %v13897_v12 = vor.u32 %v15761_v36, %v13896_v10  ;;  %v13874_v59 = vld [vmem:[#allocation4 + $0x268] sm:$0xf0]  ;;  %v13813_v3 = vor.u32 %v15738_v4, %v13810_v53 }
 0x3b9   :  { %7990 = vmatpush.bf16.msrb.mxu2 %v13613_v13  ;;  %v13578_v13 = vld [vmem:[#allocation4 + $0x18] sm:$0xf0]  ;;  %v13938_v23 = vld [vmem:[#allocation4 + $0x2e8] sm:$0xf0]  ;;  %v13877_v10 = vor.u32 %v15754_v17, %v13874_v59  ;;  %v15736_v36 = vld [vmem:[#allocation4 + $0x1d4] sm:$0xf] }
 0x3ba   :  { %8003 = vmatpush.bf16.msrb.mxu3 %v13677_v61  ;;  %v13642_v61 = vld [vmem:[#allocation4 + $0x98] sm:$0xf0]  ;;  %v19087_v60 = vpack.c.bf16 %v6535_v58, %v6534_v29  ;;  %v13581_v19 = vor.u32 %v15680_v7, %v13578_v13  ;;  %v19098_v7 = vld [vmem:[%s19211_s4] sm:$0x3]  ;;  %v15752_v58 = vld [vmem:[#allocation4 + $0x254] sm:$0xf] }
 0x3bb   :  { %7965 = vmatpush.bf16.msrb.mxu0 %v13857_v15  ;;  %v15678_v15 = vld [vmem:[#allocation4 + $0x4] sm:$0xf]  ;;  %v13802_v29 = vld [vmem:[#allocation4 + $0x1d8] sm:$0xf0]  ;;  %v6639_v30 = vperm.slane %v19098_v7, 0 }
 0x3bc   :  { %7978 = vmatpush.bf16.msrb.mxu1 %v13921_v18  ;;  %v13645_v18 = vor.u32 %v15696_v8, %v13642_v61  ;;  %v6532_v31 = vpop.f32.mrf.mxu3  ;;  %v13866_v8 = vld [vmem:[#allocation4 + $0x258] sm:$0xf0]  ;;  %v15768_v61 = vld [vmem:[#allocation4 + $0x2d4] sm:$0xf]  ;;  %v15766_v22 = vld [vmem:[#allocation4 + $0x2c4] sm:$0xf] }
 0x3bd   :  { %7991 = vmatpush.bf16.msrb.mxu2 %v13605_v24  ;;  %v6519_v24 = vpop.f32.mrf.mxu2  ;;  %v13922_v31 = vld [vmem:[#allocation4 + $0x2c8] sm:$0xf0]  ;;  %v15716_v37 = vld [vmem:[#allocation4 + $0x134] sm:$0xf]  ;;  %v15730_v4 = vld [vmem:[#allocation4 + $0x1a4] sm:$0xf] }
 0x3be   :  { %8004 = vmatpush.bf16.msrb.mxu3 %v13669_v32  ;;  %v13754_v32 = vld [vmem:[#allocation4 + $0x178] sm:$0xf0]  ;;  %v13794_v24 = vld [vmem:[#allocation4 + $0x1c8] sm:$0xf0]  ;;  %v13725_v9 = vor.u32 %v15716_v37, %v13722_v50  ;;  %v15746_v59 = vld [vmem:[#allocation4 + $0x224] sm:$0xf] }
 0x3bf   :  { %7966 = vmatpush.bf16.msrb.mxu0 %v13849_v27  ;;  %v13889_v27 = vor.u32 %v15759_v33, %v13888_v34  ;;  %v15718_v34 = vld [vmem:[#allocation4 + $0x144] sm:$0xf]  ;;  %v13730_v33 = vld [vmem:[#allocation4 + $0x148] sm:$0xf0]  ;;  %v14008_v50 = vld [vmem:[#allocation4 + $0x70] sm:$0xf] }
 0x3c0   :  { %7979 = vmatpush.bf16.msrb.mxu1 %v13913_v52  ;;  %v13573_v52 = vor.u32 %v15678_v15, %v13570_v21  ;;  %v15734_v15 = vld [vmem:[#allocation4 + $0x1c4] sm:$0xf]  ;;  %v13778_v17 = vld [vmem:[#allocation4 + $0x1a8] sm:$0xf0] }
 0x3c1   :  { %7992 = vmatpush.bf16.msrb.mxu2 %v13597_v54  ;;  %v15772_v54 = vld [vmem:[#allocation4 + $0x2f4] sm:$0xf]  ;;  %v15750_v21 = vld [vmem:[#allocation4 + $0x244] sm:$0xf]  ;;  %v13797_v16 = vor.u32 %v15734_v15, %v13794_v24  ;;  %v13698_v24 = vld [vmem:[#allocation4 + $0x108] sm:$0xf0] }
 0x3c2   :  { %8005 = vmatpush.bf16.msrb.mxu3 %v13661_v35  ;;  %v13757_v35 = vor.u32 %v15724_v20, %v13754_v32  ;;  %v13949_v51 = vor.u32 %v15772_v54, %v13946_v40  ;;  %v13733_v32 = vor.u32 %v15718_v34, %v13730_v33  ;;  %v13786_v54 = vld [vmem:[#allocation4 + $0x1b8] sm:$0xf0]  ;;  %v15748_v40 = vld [vmem:[#allocation4 + $0x234] sm:$0xf] }
 0x3c3   :  { %7967 = vmatpush.bf16.msrb.mxu0 %v13841_v49  ;;  %v15770_v49 = vld [vmem:[#allocation4 + $0x2e4] sm:$0xf]  ;;  %v15760_v34 = vld [vmem:[#allocation4 + $0x294] sm:$0xf]  ;;  %v13898_v33 = vld [vmem:[#allocation4 + $0x298] sm:$0xf0] }
 0x3c4   :  { %7980 = vmatpush.bf16.msrb.mxu1 %v13905_v62  ;;  %v19091_v62 = vpack.c.b16 %v7416_v41, %v7416_v41  ;;  %v13941_v13 = vor.u32 %v15770_v49, %v13938_v23  ;;  %v13850_v41 = vld [vmem:[#allocation4 + $0x238] sm:$0xf0]  ;;  %v13842_v49 = vld [vmem:[#allocation4 + $0x228] sm:$0xf0] }
 0x3c5   :  { %7993 = vmatpush.bf16.msrb.mxu2 %v13589_v0  ;;  %v13749_v0 = vor.u32 %v15722_v47, %v13746_v14  ;;  %v15714_v47 = vld [vmem:[#allocation4 + $0x124] sm:$0xf]  ;;  %v13714_v14 = vld [vmem:[#allocation4 + $0x128] sm:$0xf0] }
 0x3c6   :  { %8006 = vmatpush.bf16.msrb.mxu3 %v13653_v2  ;;  %v13738_v2 = vld [vmem:[#allocation4 + $0x158] sm:$0xf0] }
 0x3c7   :  { %7968 = vmatpush.bf16.msrb.mxu0 %v13833_v5  ;;  %v13930_v5 = vld [vmem:[#allocation4 + $0x2d8] sm:$0xf0]  ;;  %v13741_v6 = vor.u32 %v15720_v57, %v13738_v2 }
 0x3c8   :  { %7981 = vmatpush.bf16.msrb.mxu1 %v13897_v12  ;;  %v13805_v12 = vor.u32 %v15736_v36, %v13802_v29  ;;  %v13717_v36 = vor.u32 %v15714_v47, %v13714_v14  ;;  %v13781_v29 = vor.u32 %v15730_v4, %v13778_v17  ;;  %v14064_v17 = vld [vmem:[#allocation4 + $0xe0] sm:$0xf] }
 0x3c9   :  { %7994 = vmatpush.bf16.msrb.mxu2 %v13581_v19  ;;  %v13869_v19 = vor.u32 %v15752_v58, %v13866_v8  ;;  %v13845_v58 = vor.u32 %v15746_v59, %v13842_v49  ;;  %v15712_v8 = vld [vmem:[#allocation4 + $0x114] sm:$0xf]  ;;  %v15803_v49 = vld [vmem:[#allocation4 + $0xe4] sm:$0xf0] }
 0x3ca   :  { %8007 = vmatpush.bf16.msrb.mxu3 %v13645_v18  ;;  %v13933_v18 = vor.u32 %v15768_v61, %v13930_v5  ;;  %v13706_v61 = vld [vmem:[#allocation4 + $0x118] sm:$0xf0]  ;;  %v15728_v5 = vld [vmem:[#allocation4 + $0x194] sm:$0xf] }
 0x3cb   :  { %7969 = vmatpush.bf16.msrb.mxu0 %v13825_v45  ;;  %v7153_v25 = vpop.f32.mrf.mxu0  ;;  %v13709_v15 = vor.u32 %v15712_v8, %v13706_v61  ;;  %v14056_v8 = vld [vmem:[#allocation4 + $0xd0] sm:$0xf] }
 0x3cc   :  { %7982 = vmatpush.bf16.msrb.mxu1 %v13889_v27  ;;  %v7166_v20 = vpop.f32.mrf.mxu1 }
 0x3cd   :  { %7995 = vmatpush.bf16.msrb.mxu2 %v13573_v52  ;;  %v13925_v52 = vor.u32 %v15766_v22, %v13922_v31  ;;  %v13762_v22 = vld [vmem:[#allocation4 + $0x188] sm:$0xf0]  ;;  %v15742_v31 = vld [vmem:[#allocation4 + $0x204] sm:$0xf] }
 0x3ce   :  { %8008 = vmatpush.bf16.msrb.mxu3 %v13637_v43  ;;  %7970 = vmatmul.bf16.vlgmr.msrb.gmra.mxu0 %v19091_v62  ;;  %v15764_v43 = vld [vmem:[#allocation4 + $0x2b4] sm:$0xf] }
 0x3cf   :  { %8014 = vmatpush.bf16.msra.mxu0 %v13757_v35  ;;  %7983 = vmatmul.bf16.vlgmr.msrb.gmra.mxu1 %v19093_v1  ;;  %v13914_v35 = vld [vmem:[#allocation4 + $0x2b8] sm:$0xf0] }
 0x3d0   :  { %8027 = vmatpush.bf16.msra.mxu1 %v13821_v46  ;;  %7996 = vmatmul.bf16.vlgmr.msrb.gmra.mxu2 %v19049_v42  ;;  %v13858_v42 = vld [vmem:[#allocation4 + $0x248] sm:$0xf0]  ;;  %v13789_v46 = vor.u32 %v15732_v39, %v13786_v54  ;;  %v15789_v39 = vld [vmem:[#allocation4 + $0x74] sm:$0xf0] }
 0x3d1   :  { %8040 = vmatpush.bf16.msra.mxu2 %v13885_v44  ;;  %8009 = vmatmul.bf16.vlgmr.msrb.gmra.mxu3 %v19051_v26  ;;  %v7154_v26 = vadd.f32 %v7153_v25, %v6639_v30  ;;  %v13861_v45 = vor.u32 %v15750_v21, %v13858_v42  ;;  %v13853_v44 = vor.u32 %v15748_v40, %v13850_v41  ;;  %v13770_v30 = vld [vmem:[#allocation4 + $0x198] sm:$0xf0]  ;;  %v15726_v25 = vld [vmem:[#allocation4 + $0x184] sm:$0xf]  ;;  %v15805_v54 = vld [vmem:[#allocation4 + $0xf4] sm:$0xf0] }
 0x3d2   :  { %8053 = vmatpush.bf16.msra.mxu3 %v13949_v51  ;;  %v13917_v51 = vor.u32 %v15764_v43, %v13914_v35  ;;  %v13773_v21 = vor.u32 %v15728_v5, %v13770_v30  ;;  %v14136_v40 = vld [vmem:[#allocation4 + $0x170] sm:$0xf]  ;;  %v15821_v41 = vld [vmem:[#allocation4 + $0x174] sm:$0xf0]  ;;  %v13765_v43 = vor.u32 %v15726_v25, %v13762_v22  ;;  %v14009_v47 = vor.u32 %v15789_v39, %v14008_v50  ;;  %v14112_v25 = vld [vmem:[#allocation4 + $0x140] sm:$0xf] }
 0x3d3   :  { %8015 = vmatpush.bf16.msra.mxu0 %v13749_v0  ;;  %v7167_v27 = vadd.f32 %v7166_v20, %v7154_v26  ;;  %v7179_v53 = vpop.f32.mrf.mxu2  ;;  %v7155_v57 = vpop.f32.mrf.mxu0  ;;  %v13901_v26 = vor.u32 %v15760_v34, %v13898_v33  ;;  %v14137_v4 = vor.u32 %v15821_v41, %v14136_v40  ;;  %v15801_v5 = vld [vmem:[#allocation4 + $0xd4] sm:$0xf0]  ;;  %v13976_v50 = vld [vmem:[#allocation4 + $0x30] sm:$0xf] }
 0x3d4   :  { %8028 = vmatpush.bf16.msra.mxu1 %v13813_v3  ;;  %v7192_v0 = vpop.f32.mrf.mxu3  ;;  %v15762_v3 = vld [vmem:[#allocation4 + $0x2a4] sm:$0xf]  ;;  %v7168_v2 = vpop.f32.mrf.mxu1  ;;  %v14192_v57 = vld [vmem:[#allocation4 + $0x1e0] sm:$0xf]  ;;  %v15817_v30 = vld [vmem:[#allocation4 + $0x154] sm:$0xf0]  ;;  %v14057_v33 = vor.u32 %v15801_v5, %v14056_v8 }
 0x3d5   :  { %8041 = vmatpush.bf16.msra.mxu2 %v13877_v10  ;;  %v7180_v23 = vadd.f32 %v7179_v53, %v7167_v27  ;;  %v13906_v10 = vld [vmem:[#allocation4 + $0x2a8] sm:$0xf0]  ;;  %v14072_v27 = vld [vmem:[#allocation4 + $0xf0] sm:$0xf]  ;;  %v15787_v53 = vld [vmem:[#allocation4 + $0x64] sm:$0xf0]  ;;  %v14065_v2 = vor.u32 %v15803_v49, %v14064_v17 }
 0x3d6   :  { %8054 = vmatpush.bf16.msra.mxu3 %v13941_v13  ;;  %v14073_v14 = vor.u32 %v15805_v54, %v14072_v27  ;;  %v15781_v39 = vld [vmem:[#allocation4 + $0x34] sm:$0xf0]  ;;  %v14040_v27 = vld [vmem:[#allocation4 + $0xb0] sm:$0xf]  ;;  %v14096_v49 = vld [vmem:[#allocation4 + $0x120] sm:$0xf] }
 0x3d7   :  { %8016 = vmatpush.bf16.msra.mxu0 %v13741_v6  ;;  %v19105_v13 = vadd.f32 %v7192_v0, %v7180_v23  ;;  %v13909_v6 = vor.u32 %v15762_v3, %v13906_v10  ;;  %v14128_v23 = vld [vmem:[#allocation4 + $0x160] sm:$0xf]  ;;  %v15819_v0 = vld [vmem:[#allocation4 + $0x164] sm:$0xf0]  ;;  %v15797_v40 = vld [vmem:[#allocation4 + $0xb4] sm:$0xf0] }
 0x3d8   :  { %8029 = vmatpush.bf16.msra.mxu1 %v13805_v12  ;;  %v15744_v12 = vld [vmem:[#allocation4 + $0x214] sm:$0xf]  ;;  %v15835_v3 = vld [vmem:[#allocation4 + $0x1e4] sm:$0xf0]  ;;  %v14104_v41 = vld [vmem:[#allocation4 + $0x130] sm:$0xf] }
 0x3d9   :  { %8042 = vmatpush.bf16.msra.mxu2 %v13869_v19  ;;  %v13834_v19 = vld [vmem:[#allocation4 + $0x218] sm:$0xf0]  ;;  %v14193_v61 = vor.u32 %v15835_v3, %v14192_v57  ;;  %v15777_v5 = vld [vmem:[#allocation4 + $0x14] sm:$0xf0] }
 0x3da   :  { %8055 = vmatpush.bf16.msra.mxu3 %v13933_v18  ;;  %v15710_v18 = vld [vmem:[#allocation4 + $0x104] sm:$0xf]  ;;  %v13837_v42 = vor.u32 %v15744_v12, %v13834_v19  ;;  %v14184_v12 = vld [vmem:[#allocation4 + $0x1d0] sm:$0xf]  ;;  %v15833_v19 = vld [vmem:[#allocation4 + $0x1d4] sm:$0xf0] }
 0x3db   :  { %8017 = vmatpush.bf16.msra.mxu0 %v13733_v32  ;;  %v7181_v20 = vpop.f32.mrf.mxu2  ;;  %v13826_v32 = vld [vmem:[#allocation4 + $0x208] sm:$0xf0] }
 0x3dc   :  { %8030 = vmatpush.bf16.msra.mxu1 %v13797_v16  ;;  %v15758_v16 = vld [vmem:[#allocation4 + $0x284] sm:$0xf]  ;;  %v7194_v37 = vpop.f32.mrf.mxu3  ;;  %v13829_v35 = vor.u32 %v15742_v31, %v13826_v32  ;;  %v14176_v31 = vld [vmem:[#allocation4 + $0x1c0] sm:$0xf] }
 0x3dd   :  { %8043 = vmatpush.bf16.msra.mxu2 %v13861_v45  ;;  %v13890_v45 = vld [vmem:[#allocation4 + $0x288] sm:$0xf0] }
 0x3de   :  { %8056 = vmatpush.bf16.msra.mxu3 %v13925_v52  ;;  %v13701_v52 = vor.u32 %v15710_v18, %v13698_v24  ;;  %v13984_v18 = vld [vmem:[#allocation4 + $0x40] sm:$0xf] }
 0x3df   :  { %8018 = vmatpush.bf16.msra.mxu0 %v13725_v9  ;;  %v14200_v9 = vld [vmem:[#allocation4 + $0x1f0] sm:$0xf]  ;;  %v14048_v24 = vld [vmem:[#allocation4 + $0xc0] sm:$0xf] }
 0x3e0   :  { %8031 = vmatpush.bf16.msra.mxu1 %v13789_v46  ;;  %v15837_v46 = vld [vmem:[#allocation4 + $0x1f4] sm:$0xf0] }
 0x3e1   :  { %8044 = vmatpush.bf16.msra.mxu2 %v13853_v44  ;;  %v13893_v44 = vor.u32 %v15758_v16, %v13890_v45  ;;  %v14201_v59 = vor.u32 %v15837_v46, %v14200_v9  ;;  %v15829_v9 = vld [vmem:[#allocation4 + $0x1b4] sm:$0xf0]  ;;  %v13977_v46 = vor.u32 %v15781_v39, %v13976_v50  ;;  %v14328_v39 = vld [vmem:[#allocation4 + $0x2f0] sm:$0xf] }
 0x3e2   :  { %8057 = vmatpush.bf16.msra.mxu3 %v13917_v51  ;;  %v14000_v51 = vld [vmem:[#allocation4 + $0x60] sm:$0xf]  ;;  %v15853_v50 = vld [vmem:[#allocation4 + $0x274] sm:$0xf0] }
 0x3e3   :  { %8019 = vmatpush.bf16.msra.mxu0 %v13717_v36  ;;  %v14001_v10 = vor.u32 %v15787_v53, %v14000_v51  ;;  %v14129_v36 = vor.u32 %v15819_v0, %v14128_v23  ;;  %v14032_v51 = vld [vmem:[#allocation4 + $0xa0] sm:$0xf]  ;;  %v15811_v23 = vld [vmem:[#allocation4 + $0x124] sm:$0xf0] }
 0x3e4   :  { %8032 = vmatpush.bf16.msra.mxu1 %v13781_v29  ;;  %v13992_v29 = vld [vmem:[#allocation4 + $0x50] sm:$0xf]  ;;  %v14097_v8 = vor.u32 %v15811_v23, %v14096_v49  ;;  %v15867_v23 = vld [vmem:[#allocation4 + $0x2e4] sm:$0xf0] }
 0x3e5   :  { %8045 = vmatpush.bf16.msra.mxu2 %v13845_v58  ;;  %v15785_v58 = vld [vmem:[#allocation4 + $0x54] sm:$0xf0] }
 0x3e6   :  { %8058 = vmatpush.bf16.msra.mxu3 %v13909_v6  ;;  %v14120_v6 = vld [vmem:[#allocation4 + $0x150] sm:$0xf]  ;;  %v13993_v34 = vor.u32 %v15785_v58, %v13992_v29 }
 0x3e7   :  { %8020 = vmatpush.bf16.msra.mxu0 %v13709_v15  ;;  %v14121_v15 = vor.u32 %v15817_v30, %v14120_v6  ;;  %v14024_v6 = vld [vmem:[#allocation4 + $0x90] sm:$0xf] }
 0x3e8   :  { %8033 = vmatpush.bf16.msra.mxu1 %v13773_v21  ;;  %v14185_v21 = vor.u32 %v15833_v19, %v14184_v12  ;;  %v15793_v12 = vld [vmem:[#allocation4 + $0x94] sm:$0xf0]  ;;  %v14088_v19 = vld [vmem:[#allocation4 + $0x110] sm:$0xf] }
 0x3e9   :  { %8046 = vmatpush.bf16.msra.mxu2 %v13837_v42  ;;  %v15799_v42 = vld [vmem:[#allocation4 + $0xc4] sm:$0xf0] }
 0x3ea   :  { %8059 = vmatpush.bf16.msra.mxu3 %v13901_v26  ;;  %v15831_v26 = vld [vmem:[#allocation4 + $0x1c4] sm:$0xf0]  ;;  %v14049_v45 = vor.u32 %v15799_v42, %v14048_v24 }
 0x3eb   :  { %8021 = vmatpush.bf16.msra.mxu0 %v13701_v52  ;;  %v7205_v22 = vpop.f32.mrf.mxu0  ;;  %v14177_v54 = vor.u32 %v15831_v26, %v14176_v31  ;;  %v15775_v24 = vld [vmem:[#allocation4 + $0x4] sm:$0xf0] }
 0x3ec   :  { %8034 = vmatpush.bf16.msra.mxu1 %v13765_v43  ;;  %v7206_v20 = vadd.f32 %v7205_v22, %v19105_v13  ;;  %v7218_v32 = vpop.f32.mrf.mxu1  ;;  %v15813_v43 = vld [vmem:[#allocation4 + $0x134] sm:$0xf0]  ;;  %v6640_v13 = vperm.slane %v19098_v7, 1  ;;  %v15827_v7 = vld [vmem:[#allocation4 + $0x1a4] sm:$0xf0] }
 0x3ed   :  { %8047 = vmatpush.bf16.msra.mxu2 %v13829_v35  ;;  %v14168_v35 = vld [vmem:[#allocation4 + $0x1b0] sm:$0xf]  ;;  %v14080_v22 = vld [vmem:[#allocation4 + $0x100] sm:$0xf] }
 0x3ee   :  { %8060 = vmatpush.bf16.msra.mxu3 %v13893_v44  ;;  %8022 = vmatmul.bf16.vlgmr.msra.gmra.mxu0 %v19077_v63  ;;  %v15783_v63 = vld [vmem:[#allocation4 + $0x44] sm:$0xf0]  ;;  %v19112_v52 = vadd.f32 %v7218_v32, %v7206_v20  ;;  %v14041_v44 = vor.u32 %v15797_v40, %v14040_v27  ;;  %v14169_v53 = vor.u32 %v15829_v9, %v14168_v35  ;;  %v14144_v32 = vld [vmem:[#allocation4 + $0x180] sm:$0xf]  ;;  %v15788_v40 = vld [vmem:[#allocation4 + $0x74] sm:$0xf] }
 0x3ef   :  { %8676 = vmatpush.bf16.msrb.mxu0 %v14009_v47  ;;  %8035 = vmatmul.bf16.vlgmr.msra.gmra.mxu1 %v19079_v48  ;;  %v15815_v48 = vld [vmem:[#allocation4 + $0x144] sm:$0xf0]  ;;  %v13985_v16 = vor.u32 %v15783_v63, %v13984_v18  ;;  %v14105_v47 = vor.u32 %v15813_v43, %v14104_v41  ;;  %v13952_v63 = vld [vmem:[#allocation4] sm:$0xf]  ;;  %v14010_v41 = vld [vmem:[#allocation4 + $0x78] sm:$0xf0] }
 0x3f0   :  { %8689 = vmatpush.bf16.msrb.mxu1 %v14073_v14  ;;  %8048 = vmatmul.bf16.vlgmr.msra.gmra.mxu2 %v19091_v62  ;;  %v14113_v37 = vor.u32 %v15815_v48, %v14112_v25  ;;  %v13968_v14 = vld [vmem:[#allocation4 + $0x20] sm:$0xf]  ;;  %v15791_v48 = vld [vmem:[#allocation4 + $0x84] sm:$0xf0]  ;;  %v13953_v27 = vor.u32 %v15775_v24, %v13952_v63  ;;  %v15804_v9 = vld [vmem:[#allocation4 + $0xf4] sm:$0xf] }
 0x3f1   :  { %8702 = vmatpush.bf16.msrb.mxu2 %v14137_v4  ;;  %8061 = vmatmul.bf16.vlgmr.msra.gmra.mxu3 %v19093_v1  ;;  %v15779_v4 = vld [vmem:[#allocation4 + $0x24] sm:$0xf0]  ;;  %v14016_v25 = vld [vmem:[#allocation4 + $0x80] sm:$0xf] }
 0x3f2   :  { %8715 = vmatpush.bf16.msrb.mxu3 %v14201_v59  ;;  %v15795_v59 = vld [vmem:[#allocation4 + $0xa4] sm:$0xf0]  ;;  %v14017_v43 = vor.u32 %v15791_v48, %v14016_v25  ;;  %v14240_v24 = vld [vmem:[#allocation4 + $0x240] sm:$0xf] }
 0x3f3   :  { %8677 = vmatpush.bf16.msrb.mxu0 %v14001_v10  ;;  %v7231_v17 = vpop.f32.mrf.mxu2  ;;  %v7207_v3 = vpop.f32.mrf.mxu0  ;;  %v14160_v10 = vld [vmem:[#allocation4 + $0x1a0] sm:$0xf]  ;;  %v14033_v58 = vor.u32 %v15795_v59, %v14032_v51  ;;  %v15807_v20 = vld [vmem:[#allocation4 + $0x104] sm:$0xf0]  ;;  %v8181_v59 = vunpack.c.h.b16 %v18916_v11 }
 0x3f4   :  { %8690 = vmatpush.bf16.msrb.mxu1 %v14065_v2  ;;  %v7232_v0 = vadd.f32 %v7231_v17, %v6640_v13  ;;  %v7244_v57 = vpop.f32.mrf.mxu3  ;;  %v7220_v2 = vpop.f32.mrf.mxu1  ;;  %v14161_v30 = vor.u32 %v15827_v7, %v14160_v10  ;;  %v14081_v35 = vor.u32 %v15807_v20, %v14080_v22  ;;  %v14074_v13 = vld [vmem:[#allocation4 + $0xf8] sm:$0xf0]  ;;  %v14256_v51 = vld [vmem:[#allocation4 + $0x260] sm:$0xf]  ;;  %v15802_v3 = vld [vmem:[#allocation4 + $0xe4] sm:$0xf] }
 0x3f5   :  { %8703 = vmatpush.bf16.msrb.mxu2 %v14129_v36  ;;  %v13969_v36 = vor.u32 %v15779_v4, %v13968_v14  ;;  %v14013_v4 = vor.u32 %v15788_v40, %v14010_v41  ;;  %v14320_v17 = vld [vmem:[#allocation4 + $0x2e0] sm:$0xf]  ;;  %v14077_v49 = vor.u32 %v15804_v9, %v14074_v13  ;;  %v14066_v10 = vld [vmem:[#allocation4 + $0xe8] sm:$0xf0]  ;;  %v15863_v48 = vld [vmem:[#allocation4 + $0x2c4] sm:$0xf0] }
 0x3f6   :  { %8716 = vmatpush.bf16.msrb.mxu3 %v14193_v61  ;;  %v19115_v29 = vadd.f32 %v7244_v57, %v7232_v0  ;;  %v13960_v61 = vld [vmem:[#allocation4 + $0x10] sm:$0xf]  ;;  %v15786_v0 = vld [vmem:[#allocation4 + $0x64] sm:$0xf]  ;;  %v14002_v57 = vld [vmem:[#allocation4 + $0x68] sm:$0xf0] }
 0x3f7   :  { %8678 = vmatpush.bf16.msrb.mxu0 %v13993_v34  ;;  %v15809_v34 = vld [vmem:[#allocation4 + $0x114] sm:$0xf0]  ;;  %v13961_v18 = vor.u32 %v15777_v5, %v13960_v61  ;;  %v14312_v61 = vld [vmem:[#allocation4 + $0x2d0] sm:$0xf]  ;;  %v19121_v5 = vpack.c.b16 %v8181_v59, %v8181_v59  ;;  %v15782_v22 = vld [vmem:[#allocation4 + $0x44] sm:$0xf] }
 0x3f8   :  { %8691 = vmatpush.bf16.msrb.mxu1 %v14057_v33  ;;  %v14152_v33 = vld [vmem:[#allocation4 + $0x190] sm:$0xf]  ;;  %v14089_v42 = vor.u32 %v15809_v34, %v14088_v19  ;;  %v13994_v19 = vld [vmem:[#allocation4 + $0x58] sm:$0xf0]  ;;  %v15800_v34 = vld [vmem:[#allocation4 + $0xd4] sm:$0xf] }
 0x3f9   :  { %8704 = vmatpush.bf16.msrb.mxu2 %v14121_v15  ;;  %v15825_v15 = vld [vmem:[#allocation4 + $0x194] sm:$0xf0]  ;;  %v15798_v20 = vld [vmem:[#allocation4 + $0xc4] sm:$0xf]  ;;  %v14296_v40 = vld [vmem:[#allocation4 + $0x2b0] sm:$0xf] }
 0x3fa   :  { %8717 = vmatpush.bf16.msrb.mxu3 %v14185_v21  ;;  %v14025_v21 = vor.u32 %v15793_v12, %v14024_v6  ;;  %v14153_v31 = vor.u32 %v15825_v15, %v14152_v33  ;;  %v14069_v6 = vor.u32 %v15802_v3, %v14066_v10  ;;  %v15784_v12 = vld [vmem:[#allocation4 + $0x54] sm:$0xf]  ;;  %v14058_v33 = vld [vmem:[#allocation4 + $0xd8] sm:$0xf0] }
 0x3fb   :  { %8679 = vmatpush.bf16.msrb.mxu0 %v13985_v16  ;;  %v7233_v26 = vpop.f32.mrf.mxu2  ;;  %v15823_v16 = vld [vmem:[#allocation4 + $0x184] sm:$0xf0]  ;;  %v13997_v63 = vor.u32 %v15784_v12, %v13994_v19  ;;  %v14061_v25 = vor.u32 %v15800_v34, %v14058_v33  ;;  %v15780_v9 = vld [vmem:[#allocation4 + $0x34] sm:$0xf]  ;;  %v13978_v13 = vld [vmem:[#allocation4 + $0x38] sm:$0xf0] }
 0x3fc   :  { %8692 = vmatpush.bf16.msrb.mxu1 %v14049_v45  ;;  %v7246_v45 = vpop.f32.mrf.mxu3  ;;  %v15841_v12 = vld [vmem:[#allocation4 + $0x214] sm:$0xf0]  ;;  %v14280_v19 = vld [vmem:[#allocation4 + $0x290] sm:$0xf] }
 0x3fd   :  { %8705 = vmatpush.bf16.msrb.mxu2 %v14113_v37  ;;  %v14264_v37 = vld [vmem:[#allocation4 + $0x270] sm:$0xf]  ;;  %v15857_v33 = vld [vmem:[#allocation4 + $0x294] sm:$0xf0] }
 0x3fe   :  { %8718 = vmatpush.bf16.msrb.mxu3 %v14177_v54  ;;  %v15869_v54 = vld [vmem:[#allocation4 + $0x2f4] sm:$0xf0] }
 0x3ff   :  { %8680 = vmatpush.bf16.msrb.mxu0 %v13977_v46  ;;  %v14145_v46 = vor.u32 %v15823_v16, %v14144_v32  ;;  %v14329_v14 = vor.u32 %v15869_v54, %v14328_v39  ;;  %v14050_v32 = vld [vmem:[#allocation4 + $0xc8] sm:$0xf0]  ;;  %v15845_v54 = vld [vmem:[#allocation4 + $0x234] sm:$0xf0] }
 0x400   :  { %8693 = vmatpush.bf16.msrb.mxu1 %v14041_v44  ;;  %v14265_v44 = vor.u32 %v15853_v50, %v14264_v37 }
 0x401   :  { %8706 = vmatpush.bf16.msrb.mxu2 %v14105_v47  ;;  %v8180_v47 = vunpack.c.l.b16 %v18916_v11  ;;  %v15849_v11 = vld [vmem:[#allocation4 + $0x254] sm:$0xf0] }
 0x402   :  { %8719 = vmatpush.bf16.msrb.mxu3 %v14169_v53  ;;  %v15851_v53 = vld [vmem:[#allocation4 + $0x264] sm:$0xf0] }
 0x403   :  { %8681 = vmatpush.bf16.msrb.mxu0 %v13969_v36  ;;  %v14257_v7 = vor.u32 %v15851_v53, %v14256_v51  ;;  %v19119_v2 = vpack.c.b16 %v8180_v47, %v8180_v47  ;;  %v14321_v36 = vor.u32 %v15867_v23, %v14320_v17  ;;  %v15843_v51 = vld [vmem:[#allocation4 + $0x224] sm:$0xf0]  ;;  %v14288_v53 = vld [vmem:[#allocation4 + $0x2a0] sm:$0xf]  ;;  %v15778_v23 = vld [vmem:[#allocation4 + $0x24] sm:$0xf] }
 0x404   :  { %8694 = vmatpush.bf16.msrb.mxu1 %v14033_v58  ;;  %v14005_v58 = vor.u32 %v15786_v0, %v14002_v57  ;;  %v13970_v0 = vld [vmem:[#allocation4 + $0x28] sm:$0xf0] }
 0x405   :  { %8707 = vmatpush.bf16.msrb.mxu2 %v14097_v8  ;;  %v14248_v8 = vld [vmem:[#allocation4 + $0x250] sm:$0xf] }
 0x406   :  { %8720 = vmatpush.bf16.msrb.mxu3 %v14161_v30  ;;  %v15865_v30 = vld [vmem:[#allocation4 + $0x2d4] sm:$0xf0]  ;;  %v14249_v15 = vor.u32 %v15849_v11, %v14248_v8 }
 0x407   :  { %8682 = vmatpush.bf16.msrb.mxu0 %v13961_v18  ;;  %v14313_v18 = vor.u32 %v15865_v30, %v14312_v61  ;;  %v14216_v30 = vld [vmem:[#allocation4 + $0x210] sm:$0xf] }
 0x408   :  { %8695 = vmatpush.bf16.msrb.mxu1 %v14025_v21  ;;  %v15847_v21 = vld [vmem:[#allocation4 + $0x244] sm:$0xf0] }
 0x409   :  { %8708 = vmatpush.bf16.msrb.mxu2 %v14089_v42  ;;  %v14304_v42 = vld [vmem:[#allocation4 + $0x2c0] sm:$0xf]  ;;  %v14241_v37 = vor.u32 %v15847_v21, %v14240_v24  ;;  %v15792_v21 = vld [vmem:[#allocation4 + $0x94] sm:$0xf] }
 0x40a   :  { %8721 = vmatpush.bf16.msrb.mxu3 %v14153_v31  ;;  %v13986_v31 = vld [vmem:[#allocation4 + $0x48] sm:$0xf0]  ;;  %v14305_v50 = vor.u32 %v15863_v48, %v14304_v42  ;;  %v14026_v42 = vld [vmem:[#allocation4 + $0x98] sm:$0xf0]  ;;  %v14208_v48 = vld [vmem:[#allocation4 + $0x200] sm:$0xf] }
 0x40b   :  { %8683 = vmatpush.bf16.msrb.mxu0 %v13953_v27  ;;  %v7257_v26 = vpop.f32.mrf.mxu0  ;;  %v13989_v39 = vor.u32 %v15782_v22, %v13986_v31  ;;  %v14232_v27 = vld [vmem:[#allocation4 + $0x230] sm:$0xf]  ;;  %v15839_v22 = vld [vmem:[#allocation4 + $0x204] sm:$0xf0] }
 0x40c   :  { %8696 = vmatpush.bf16.msrb.mxu1 %v14017_v43  ;;  %v7258_v16 = vadd.f32 %v7257_v26, %v19115_v29  ;;  %v7270_v45 = vpop.f32.mrf.mxu1  ;;  %v14053_v43 = vor.u32 %v15798_v20, %v14050_v32  ;;  %v14233_v47 = vor.u32 %v15845_v54, %v14232_v27  ;;  %v14281_v26 = vor.u32 %v15857_v33, %v14280_v19  ;;  %v14272_v32 = vld [vmem:[#allocation4 + $0x280] sm:$0xf]  ;;  %v14018_v27 = vld [vmem:[#allocation4 + $0x88] sm:$0xf0]  ;;  %v14122_v19 = vld [vmem:[#allocation4 + $0x158] sm:$0xf0] }
 0x40d   :  { %8709 = vmatpush.bf16.msrb.mxu2 %v14081_v35  ;;  %v15861_v35 = vld [vmem:[#allocation4 + $0x2b4] sm:$0xf0]  ;;  %v19140_v33 = vld [vmem:[%s19211_s4] sm:$0x3] }
 0x40e   :  { %8722 = vmatpush.bf16.msrb.mxu3 %v14145_v46  ;;  %8684 = vmatmul.bf16.vlgmr.msrb.gmra.mxu0 %v19091_v62  ;;  %v7271_v41 = vadd.f32 %v7270_v45, %v7258_v16  ;;  %v15796_v46 = vld [vmem:[#allocation4 + $0xb4] sm:$0xf]  ;;  %v14297_v29 = vor.u32 %v15861_v35, %v14296_v40  ;;  %v15855_v16 = vld [vmem:[#allocation4 + $0x284] sm:$0xf0]  ;;  %v15774_v45 = vld [vmem:[#allocation4 + $0x4] sm:$0xf]  ;;  %v14209_v35 = vor.u32 %v15839_v22, %v14208_v48 }
 0x40f   :  { %8728 = vmatpush.bf16.msra.mxu0 %v14265_v44  ;;  %8697 = vmatmul.bf16.vlgmr.msrb.gmra.mxu1 %v19093_v1  ;;  %v14042_v44 = vld [vmem:[#allocation4 + $0xb8] sm:$0xf0]  ;;  %v15820_v40 = vld [vmem:[#allocation4 + $0x174] sm:$0xf]  ;;  %v7405_v48 = vperm.slane %v19140_v33, 0 }
 0x410   :  { %8741 = vmatpush.bf16.msra.mxu1 %v14329_v14  ;;  %8710 = vmatmul.bf16.vlgmr.msrb.gmra.mxu2 %v19119_v2  ;;  %v13981_v14 = vor.u32 %v15780_v9, %v13978_v13  ;;  %v14045_v17 = vor.u32 %v15796_v46, %v14042_v44  ;;  %v14202_v9 = vld [vmem:[#allocation4 + $0x1f8] sm:$0xf0]  ;;  %v15852_v13 = vld [vmem:[#allocation4 + $0x274] sm:$0xf]  ;;  %v14273_v44 = vor.u32 %v15855_v16, %v14272_v32  ;;  %v14114_v32 = vld [vmem:[#allocation4 + $0x148] sm:$0xf0] }
 0x411   :  { %8754 = vmatpush.bf16.msra.mxu2 %v14013_v4  ;;  %8723 = vmatmul.bf16.vlgmr.msrb.gmra.mxu3 %v19121_v5  ;;  %v14224_v4 = vld [vmem:[#allocation4 + $0x220] sm:$0xf]  ;;  %v14266_v46 = vld [vmem:[#allocation4 + $0x278] sm:$0xf0]  ;;  %v15830_v16 = vld [vmem:[#allocation4 + $0x1c4] sm:$0xf] }
 0x412   :  { %8767 = vmatpush.bf16.msra.mxu3 %v14077_v49  ;;  %v15859_v49 = vld [vmem:[#allocation4 + $0x2a4] sm:$0xf0]  ;;  %v14225_v8 = vor.u32 %v15843_v51, %v14224_v4  ;;  %v8182_v4 = vunpack.c.l.b16 %v18935_v38 }
 0x413   :  { %8729 = vmatpush.bf16.msra.mxu0 %v14257_v7  ;;  %v7283_v59 = vpop.f32.mrf.mxu2  ;;  %v7259_v10 = vpop.f32.mrf.mxu0  ;;  %v15794_v7 = vld [vmem:[#allocation4 + $0xa4] sm:$0xf]  ;;  %v14289_v61 = vor.u32 %v15859_v49, %v14288_v53  ;;  %v14269_v49 = vor.u32 %v15852_v13, %v14266_v46  ;;  %v15828_v13 = vld [vmem:[#allocation4 + $0x1b4] sm:$0xf] }
 0x414   :  { %8742 = vmatpush.bf16.msra.mxu1 %v14321_v36  ;;  %v7284_v57 = vadd.f32 %v7283_v59, %v7271_v41  ;;  %v7296_v3 = vpop.f32.mrf.mxu3  ;;  %v14034_v36 = vld [vmem:[#allocation4 + $0xa8] sm:$0xf0]  ;;  %v14138_v41 = vld [vmem:[#allocation4 + $0x178] sm:$0xf0] }
 0x415   :  { %8755 = vmatpush.bf16.msra.mxu2 %v14005_v58  ;;  %v7272_v58 = vpop.f32.mrf.mxu1  ;;  %v14037_v34 = vor.u32 %v15794_v7, %v14034_v36  ;;  %v14141_v53 = vor.u32 %v15820_v40, %v14138_v41  ;;  %v14194_v10 = vld [vmem:[#allocation4 + $0x1e8] sm:$0xf0]  ;;  %v15850_v7 = vld [vmem:[#allocation4 + $0x264] sm:$0xf] }
 0x416   :  { %8768 = vmatpush.bf16.msra.mxu3 %v14069_v6  ;;  %v7297_v11 = vadd.f32 %v7296_v3, %v7284_v57  ;;  %v13973_v6 = vor.u32 %v15778_v23, %v13970_v0  ;;  %v15818_v23 = vld [vmem:[#allocation4 + $0x164] sm:$0xf]  ;;  %v14130_v0 = vld [vmem:[#allocation4 + $0x168] sm:$0xf0] }
 0x417   :  { %8730 = vmatpush.bf16.msra.mxu0 %v14249_v15  ;;  %v15776_v15 = vld [vmem:[#allocation4 + $0x14] sm:$0xf]  ;;  %v15834_v57 = vld [vmem:[#allocation4 + $0x1e4] sm:$0xf]  ;;  %v14258_v36 = vld [vmem:[#allocation4 + $0x268] sm:$0xf0] }
 0x418   :  { %8743 = vmatpush.bf16.msra.mxu1 %v14313_v18  ;;  %v13962_v18 = vld [vmem:[#allocation4 + $0x18] sm:$0xf0]  ;;  %v7301_v24 = vmax.f32 %v7297_v11, 0.0  ;;  %v15866_v58 = vld [vmem:[#allocation4 + $0x2e4] sm:$0xf]  ;;  %v19133_v11 = vpack.c.b16 %v8182_v4, %v8182_v4 }
 0x419   :  { %8756 = vmatpush.bf16.msra.mxu2 %v13997_v63  ;;  %v7300_v63 = vmax.f32 %v19112_v52, 0.0  ;;  %v13965_v20 = vor.u32 %v15776_v15, %v13962_v18  ;;  %v13954_v52 = vld [vmem:[#allocation4 + $0x8] sm:$0xf0]  ;;  %v14186_v18 = vld [vmem:[#allocation4 + $0x1d8] sm:$0xf0] }
 0x41a   :  { %8769 = vmatpush.bf16.msra.mxu3 %v14061_v25  ;;  %v14217_v25 = vor.u32 %v15841_v12, %v14216_v30  ;;  %v14197_v30 = vor.u32 %v15834_v57, %v14194_v10  ;;  %v14261_v12 = vor.u32 %v15850_v7, %v14258_v36  ;;  %v15860_v4 = vld [vmem:[#allocation4 + $0x2b4] sm:$0xf]  ;;  %v14162_v10 = vld [vmem:[#allocation4 + $0x1a8] sm:$0xf0]  ;;  %v15842_v7 = vld [vmem:[#allocation4 + $0x224] sm:$0xf] }
 0x41b   :  { %8731 = vmatpush.bf16.msra.mxu0 %v14241_v37  ;;  %v19129_v31 = vpack.c.bf16 %v7301_v24, %v7300_v63  ;;  %v14029_v37 = vor.u32 %v15792_v21, %v14026_v42  ;;  %v15848_v63 = vld [vmem:[#allocation4 + $0x254] sm:$0xf]  ;;  %v14250_v24 = vld [vmem:[#allocation4 + $0x258] sm:$0xf0]  ;;  %v14226_v36 = vld [vmem:[#allocation4 + $0x228] sm:$0xf0] }
 0x41c   :  { %8744 = vmatpush.bf16.msra.mxu1 %v14305_v50  ;;  %v7285_v50 = vpop.f32.mrf.mxu2  ;;  %v7298_v54 = vpop.f32.mrf.mxu3  ;;  %v15864_v21 = vld [vmem:[#allocation4 + $0x2d4] sm:$0xf]  ;;  %v14314_v42 = vld [vmem:[#allocation4 + $0x2d8] sm:$0xf0] }
 0x41d   :  { %8757 = vmatpush.bf16.msra.mxu2 %v13989_v39  ;;  %v15790_v39 = vld [vmem:[#allocation4 + $0x84] sm:$0xf] }
 0x41e   :  { %8770 = vmatpush.bf16.msra.mxu3 %v14053_v43  ;;  %v15836_v43 = vld [vmem:[#allocation4 + $0x1f4] sm:$0xf]  ;;  %v14021_v51 = vor.u32 %v15790_v39, %v14018_v27  ;;  %v15846_v50 = vld [vmem:[#allocation4 + $0x244] sm:$0xf]  ;;  %v14306_v27 = vld [vmem:[#allocation4 + $0x2c8] sm:$0xf0] }
 0x41f   :  { %8732 = vmatpush.bf16.msra.mxu0 %v14233_v47  ;;  %v13957_v47 = vor.u32 %v15774_v45, %v13954_v52  ;;  %v14205_v59 = vor.u32 %v15836_v43, %v14202_v9  ;;  %v14317_v45 = vor.u32 %v15864_v21, %v14314_v42  ;;  %v15862_v39 = vld [vmem:[#allocation4 + $0x2c4] sm:$0xf]  ;;  %v14106_v9 = vld [vmem:[#allocation4 + $0x138] sm:$0xf0]  ;;  %v15824_v21 = vld [vmem:[#allocation4 + $0x194] sm:$0xf] }
 0x420   :  { %8745 = vmatpush.bf16.msra.mxu1 %v14297_v29  ;;  %v15868_v29 = vld [vmem:[#allocation4 + $0x2f4] sm:$0xf] }
 0x421   :  { %8758 = vmatpush.bf16.msra.mxu2 %v13981_v14  ;;  %v14330_v14 = vld [vmem:[#allocation4 + $0x2f8] sm:$0xf0] }
 0x422   :  { %8771 = vmatpush.bf16.msra.mxu3 %v14045_v17  ;;  %v8183_v17 = vunpack.c.h.b16 %v18935_v38  ;;  %v14333_v3 = vor.u32 %v15868_v29, %v14330_v14  ;;  %v15816_v38 = vld [vmem:[#allocation4 + $0x154] sm:$0xf]  ;;  %v14234_v14 = vld [vmem:[#allocation4 + $0x238] sm:$0xf0] }
 0x423   :  { %8733 = vmatpush.bf16.msra.mxu0 %v14225_v8  ;;  %v14322_v8 = vld [vmem:[#allocation4 + $0x2e8] sm:$0xf0]  ;;  %v15844_v29 = vld [vmem:[#allocation4 + $0x234] sm:$0xf] }
 0x424   :  { %8746 = vmatpush.bf16.msra.mxu1 %v14289_v61  ;;  %v14133_v61 = vor.u32 %v15818_v23, %v14130_v0  ;;  %v14325_v15 = vor.u32 %v15866_v58, %v14322_v8  ;;  %v14098_v23 = vld [vmem:[#allocation4 + $0x128] sm:$0xf0]  ;;  %v15826_v0 = vld [vmem:[#allocation4 + $0x1a4] sm:$0xf] }
 0x425   :  { %8759 = vmatpush.bf16.msra.mxu2 %v13973_v6  ;;  %v19135_v6 = vpack.c.b16 %v8183_v17, %v8183_v17 }
 0x426   :  { %8772 = vmatpush.bf16.msra.mxu3 %v14037_v34  ;;  %v15832_v34 = vld [vmem:[#allocation4 + $0x1d4] sm:$0xf] }
 0x427   :  { %8734 = vmatpush.bf16.msra.mxu0 %v14217_v25  ;;  %v14125_v25 = vor.u32 %v15816_v38, %v14122_v19  ;;  %v14189_v22 = vor.u32 %v15832_v34, %v14186_v18  ;;  %v15858_v38 = vld [vmem:[#allocation4 + $0x2a4] sm:$0xf]  ;;  %v14229_v18 = vor.u32 %v15842_v7, %v14226_v36  ;;  %v15873_v36 = vld [vmem:[#allocation6 + $0x18] sm:$0xff] }
 0x428   :  { %8747 = vmatpush.bf16.msra.mxu1 %v14281_v26  ;;  %v14253_v26 = vor.u32 %v15848_v63, %v14250_v24  ;;  %v15808_v63 = vld [vmem:[#allocation4 + $0x114] sm:$0xf]  ;;  %v14090_v24 = vld [vmem:[#allocation4 + $0x118] sm:$0xf0]  ;;  %v15898_v7 = vld [vmem:[#allocation6 + $0xe0] sm:$0xff] }
 0x429   :  { %8760 = vmatpush.bf16.msra.mxu2 %v13965_v20  ;;  %v15814_v20 = vld [vmem:[#allocation4 + $0x144] sm:$0xf] }
 0x42a   :  { %8773 = vmatpush.bf16.msra.mxu3 %v14029_v37  ;;  %v14178_v37 = vld [vmem:[#allocation4 + $0x1c8] sm:$0xf0]  ;;  %v14117_v40 = vor.u32 %v15814_v20, %v14114_v32  ;;  %v14282_v20 = vld [vmem:[#allocation4 + $0x298] sm:$0xf0]  ;;  %v14093_v32 = vor.u32 %v15808_v63, %v14090_v24  ;;  %v15896_v63 = vld [vmem:[#allocation6 + $0xd0] sm:$0xff] }
 0x42b   :  { %8735 = vmatpush.bf16.msra.mxu0 %v14209_v35  ;;  %v7919_v52 = vpop.f32.mrf.mxu0  ;;  %v14181_v41 = vor.u32 %v15830_v16, %v14178_v37  ;;  %v15812_v35 = vld [vmem:[#allocation4 + $0x134] sm:$0xf]  ;;  %v15806_v37 = vld [vmem:[#allocation4 + $0x104] sm:$0xf]  ;;  %v15871_v24 = vld [vmem:[#allocation6 + $0x8] sm:$0xff] }
 0x42c   :  { %8748 = vmatpush.bf16.msra.mxu1 %v14273_v44  ;;  %v7932_v54 = vpop.f32.mrf.mxu1  ;;  %v14309_v44 = vor.u32 %v15862_v39, %v14306_v27  ;;  %v14146_v27 = vld [vmem:[#allocation4 + $0x188] sm:$0xf0] }
 0x42d   :  { %8761 = vmatpush.bf16.msra.mxu2 %v13957_v47  ;;  %v14170_v47 = vld [vmem:[#allocation4 + $0x1b8] sm:$0xf0] }
 0x42e   :  { %8774 = vmatpush.bf16.msra.mxu3 %v14021_v51  ;;  %8736 = vmatmul.bf16.vlgmr.msra.gmra.mxu0 %v19133_v11  ;;  %v14298_v51 = vld [vmem:[#allocation4 + $0x2b8] sm:$0xf0]  ;;  %v14173_v17 = vor.u32 %v15828_v13, %v14170_v47 }
 0x42f   :  { %8780 = vmatpush.bf16.msrb.mxu0 %v14141_v53  ;;  %8749 = vmatmul.bf16.vlgmr.msra.gmra.mxu1 %v19135_v6  ;;  %v14109_v53 = vor.u32 %v15812_v35, %v14106_v9  ;;  %v14301_v57 = vor.u32 %v15860_v4, %v14298_v51  ;;  %v15885_v47 = vld [vmem:[#allocation6 + $0x78] sm:$0xff]  ;;  %v15876_v4 = vld [vmem:[#allocation6 + $0x30] sm:$0xff] }
 0x430   :  { %8793 = vmatpush.bf16.msrb.mxu1 %v14205_v59  ;;  %8762 = vmatmul.bf16.vlgmr.msra.gmra.mxu2 %v19091_v62  ;;  %v14242_v62 = vld [vmem:[#allocation4 + $0x248] sm:$0xf0]  ;;  %v14237_v59 = vor.u32 %v15844_v29, %v14234_v14  ;;  %v15893_v29 = vld [vmem:[#allocation6 + $0xb8] sm:$0xff]  ;;  %v15884_v51 = vld [vmem:[#allocation6 + $0x70] sm:$0xff] }
 0x431   :  { %8806 = vmatpush.bf16.msrb.mxu2 %v14269_v49  ;;  %8775 = vmatmul.bf16.vlgmr.msra.gmra.mxu3 %v19093_v1  ;;  %v7920_v1 = vadd.f32 %v7919_v52, %v7405_v48  ;;  %v14245_v43 = vor.u32 %v15846_v50, %v14242_v62  ;;  %v15810_v49 = vld [vmem:[#allocation4 + $0x124] sm:$0xf]  ;;  %v15840_v48 = vld [vmem:[#allocation4 + $0x214] sm:$0xf]  ;;  %v14082_v50 = vld [vmem:[#allocation4 + $0x108] sm:$0xf0] }
 0x432   :  { %8819 = vmatpush.bf16.msrb.mxu3 %v14333_v3  ;;  %v14101_v19 = vor.u32 %v15810_v49, %v14098_v23  ;;  %v15822_v62 = vld [vmem:[#allocation4 + $0x184] sm:$0xf]  ;;  %v14085_v35 = vor.u32 %v15806_v37, %v14082_v50  ;;  %v15901_v14 = vld [vmem:[#allocation6 + $0xf8] sm:$0xff]  ;;  %v15883_v49 = vld [vmem:[#allocation6 + $0x68] sm:$0xff]  ;;  %v9079_v50 = vunpack.c.h.b16 %v18961_v55 }
 0x433   :  { %8781 = vmatpush.bf16.msrb.mxu0 %v14133_v61  ;;  %v7933_v46 = vadd.f32 %v7932_v54, %v7920_v1  ;;  %v7945_v3 = vpop.f32.mrf.mxu2  ;;  %v7921_v61 = vpop.f32.mrf.mxu0  ;;  %v15838_v1 = vld [vmem:[#allocation4 + $0x204] sm:$0xf]  ;;  %v14210_v54 = vld [vmem:[#allocation4 + $0x208] sm:$0xf0]  ;;  %v14149_v9 = vor.u32 %v15822_v62, %v14146_v27  ;;  %v15909_v37 = vld [vmem:[#allocation6 + $0x138] sm:$0xff]  ;;  %v9080_v62 = vunpack.c.l.b16 %v19003_v28  ;;  %v9081_v27 = vunpack.c.h.b16 %v19003_v28 }
 0x434   :  { %8794 = vmatpush.bf16.msrb.mxu1 %v14197_v30  ;;  %v7958_v8 = vpop.f32.mrf.mxu3  ;;  %v14290_v30 = vld [vmem:[#allocation4 + $0x2a8] sm:$0xf0]  ;;  %v14213_v13 = vor.u32 %v15838_v1, %v14210_v54  ;;  %v15897_v61 = vld [vmem:[#allocation6 + $0xd8] sm:$0xff] }
 0x435   :  { %8807 = vmatpush.bf16.msrb.mxu2 %v14261_v12  ;;  %v7946_v58 = vadd.f32 %v7945_v3, %v7933_v46  ;;  %v7934_v12 = vpop.f32.mrf.mxu1  ;;  %v14293_v42 = vor.u32 %v15858_v38, %v14290_v30  ;;  %v15891_v23 = vld [vmem:[#allocation6 + $0xa8] sm:$0xff]  ;;  %v15933_v1 = vld [vmem:[#allocation6 + $0x1f8] sm:$0xff] }
 0x436   :  { %8820 = vmatpush.bf16.msrb.mxu3 %v14325_v15  ;;  %v14165_v15 = vor.u32 %v15826_v0, %v14162_v10  ;;  %v15899_v0 = vld [vmem:[#allocation6 + $0xe8] sm:$0xff]  ;;  %v15874_v10 = vld [vmem:[#allocation6 + $0x20] sm:$0xff] }
 0x437   :  { %8782 = vmatpush.bf16.msrb.mxu0 %v14125_v25  ;;  %v19147_v34 = vadd.f32 %v7958_v8, %v7946_v58  ;;  %v14154_v25 = vld [vmem:[#allocation4 + $0x198] sm:$0xf0]  ;;  %v15907_v28 = vld [vmem:[#allocation6 + $0x128] sm:$0xff] }
 0x438   :  { %8795 = vmatpush.bf16.msrb.mxu1 %v14189_v22  ;;  %v14218_v22 = vld [vmem:[#allocation4 + $0x218] sm:$0xf0]  ;;  %v14157_v16 = vor.u32 %v15824_v21, %v14154_v25  ;;  %v15879_v21 = vld [vmem:[#allocation6 + $0x48] sm:$0xff] }
 0x439   :  { %8808 = vmatpush.bf16.msrb.mxu2 %v14253_v26  ;;  %v15856_v26 = vld [vmem:[#allocation4 + $0x294] sm:$0xf]  ;;  %v15881_v58 = vld [vmem:[#allocation6 + $0x58] sm:$0xff]  ;;  %v15895_v25 = vld [vmem:[#allocation6 + $0xc8] sm:$0xff] }
 0x43a   :  { %8821 = vmatpush.bf16.msrb.mxu3 %v14317_v45  ;;  %v14221_v45 = vor.u32 %v15840_v48, %v14218_v22  ;;  %v14285_v52 = vor.u32 %v15856_v26, %v14282_v20  ;;  %v15889_v8 = vld [vmem:[#allocation6 + $0x98] sm:$0xff]  ;;  %v15870_v26 = vld [vmem:[#allocation6] sm:$0xff] }
 0x43b   :  { %8783 = vmatpush.bf16.msrb.mxu0 %v14117_v40  ;;  %v7947_v39 = vpop.f32.mrf.mxu2  ;;  %v15878_v20 = vld [vmem:[#allocation6 + $0x40] sm:$0xff] }
 0x43c   :  { %8796 = vmatpush.bf16.msrb.mxu1 %v14181_v41  ;;  %v7960_v40 = vpop.f32.mrf.mxu3  ;;  %v15854_v41 = vld [vmem:[#allocation4 + $0x284] sm:$0xf]  ;;  %v15925_v39 = vld [vmem:[#allocation6 + $0x1b8] sm:$0xff] }
 0x43d   :  { %8809 = vmatpush.bf16.msrb.mxu2 %v14245_v43  ;;  %v14274_v43 = vld [vmem:[#allocation4 + $0x288] sm:$0xf0]  ;;  %v15908_v40 = vld [vmem:[#allocation6 + $0x130] sm:$0xff] }
 0x43e   :  { %8822 = vmatpush.bf16.msrb.mxu3 %v14309_v44  ;;  %v14277_v46 = vor.u32 %v15854_v41, %v14274_v43  ;;  %v15877_v44 = vld [vmem:[#allocation6 + $0x38] sm:$0xff]  ;;  %v9093_v41 = vpack.c.b16 %v9079_v50, %v9079_v50  ;;  %v9094_v43 = vpack.c.b16 %v9080_v62, %v9080_v62 }
 0x43f   :  { %8784 = vmatpush.bf16.msrb.mxu0 %v14109_v53  ;;  %v15892_v53 = vld [vmem:[#allocation6 + $0xb0] sm:$0xff] }
 0x440   :  { %8797 = vmatpush.bf16.msrb.mxu1 %v14173_v17  ;;  %v15900_v17 = vld [vmem:[#allocation6 + $0xf0] sm:$0xff] }
 0x441   :  { %8810 = vmatpush.bf16.msrb.mxu2 %v14237_v59  ;;  %v15875_v59 = vld [vmem:[#allocation6 + $0x28] sm:$0xff] }
 0x442   :  { %8823 = vmatpush.bf16.msrb.mxu3 %v14301_v57 }
 0x443   :  { %8785 = vmatpush.bf16.msrb.mxu0 %v14101_v19 }
 0x444   :  { %8798 = vmatpush.bf16.msrb.mxu1 %v14165_v15  ;;  %v15880_v15 = vld [vmem:[#allocation6 + $0x50] sm:$0xff] }
 0x445   :  { %8811 = vmatpush.bf16.msrb.mxu2 %v14229_v18  ;;  %v15888_v18 = vld [vmem:[#allocation6 + $0x90] sm:$0xff] }
 0x446   :  { %8824 = vmatpush.bf16.msrb.mxu3 %v14293_v42  ;;  %v15887_v42 = vld [vmem:[#allocation6 + $0x88] sm:$0xff] }
 0x447   :  { %8786 = vmatpush.bf16.msrb.mxu0 %v14093_v32  ;;  %v15886_v32 = vld [vmem:[#allocation6 + $0x80] sm:$0xff] }
 0x448   :  { %8799 = vmatpush.bf16.msrb.mxu1 %v14157_v16  ;;  %v9078_v16 = vunpack.c.l.b16 %v18961_v55  ;;  %v15924_v55 = vld [vmem:[#allocation6 + $0x1b0] sm:$0xff] }
 0x449   :  { %8812 = vmatpush.bf16.msrb.mxu2 %v14221_v45  ;;  %v15894_v45 = vld [vmem:[#allocation6 + $0xc0] sm:$0xff] }
 0x44a   :  { %8825 = vmatpush.bf16.msrb.mxu3 %v14285_v52  ;;  %v15917_v52 = vld [vmem:[#allocation6 + $0x178] sm:$0xff]  ;;  %v9092_v54 = vpack.c.b16 %v9078_v16, %v9078_v16 }
 0x44b   :  { %8787 = vmatpush.bf16.msrb.mxu0 %v14085_v35  ;;  %v7971_v57 = vpop.f32.mrf.mxu0  ;;  %v15916_v35 = vld [vmem:[#allocation6 + $0x170] sm:$0xff]  ;;  %v15965_v16 = vld [vmem:[#allocation6 + $0x2f8] sm:$0xff] }
 0x44c   :  { %8800 = vmatpush.bf16.msrb.mxu1 %v14149_v9  ;;  %v7972_v3 = vadd.f32 %v7971_v57, %v19147_v34  ;;  %v15872_v34 = vld [vmem:[#allocation6 + $0x10] sm:$0xff]  ;;  %v9095_v9 = vpack.c.b16 %v9081_v27, %v9081_v27 }
 0x44d   :  { %8813 = vmatpush.bf16.msrb.mxu2 %v14213_v13  ;;  %v15932_v13 = vld [vmem:[#allocation6 + $0x1f0] sm:$0xff] }
 0x44e   :  { %8826 = vmatpush.bf16.msrb.mxu3 %v14277_v46  ;;  %8788 = vmatmul.bf16.vlgmr.msrb.gmra.mxu0 %v19119_v2  ;;  %v7984_v2 = vpop.f32.mrf.mxu1  ;;  %v15915_v46 = vld [vmem:[#allocation6 + $0x168] sm:$0xff] }
 0x44f   :  { %9792 = vmatpush.bf16.msra.mxu0 %v15877_v44  ;;  %8801 = vmatmul.bf16.vlgmr.msrb.gmra.mxu1 %v19121_v5  ;;  %v15882_v5 = vld [vmem:[#allocation6 + $0x60] sm:$0xff]  ;;  %v15923_v44 = vld [vmem:[#allocation6 + $0x1a8] sm:$0xff] }
 0x450   :  { %9805 = vmatpush.bf16.msra.mxu1 %v15885_v47  ;;  %8814 = vmatmul.bf16.vlgmr.msrb.gmra.mxu2 %v19133_v11  ;;  %v15890_v11 = vld [vmem:[#allocation6 + $0xa0] sm:$0xff]  ;;  %v15931_v47 = vld [vmem:[#allocation6 + $0x1e8] sm:$0xff] }
 0x451   :  { %9818 = vmatpush.bf16.msra.mxu2 %v15893_v29  ;;  %8827 = vmatmul.bf16.vlgmr.msrb.gmra.mxu3 %v19135_v6  ;;  %v19154_v6 = vadd.f32 %v7984_v2, %v7972_v3 }
 0x452   :  { %9831 = vmatpush.bf16.msra.mxu3 %v15901_v14 }
 0x453   :  { %9793 = vmatpush.bf16.msra.mxu0 %v15876_v4  ;;  %v19156_v38 = vpop.f32.mrf.mxu2  ;;  %v7973_v12 = vpop.f32.mrf.mxu0  ;;  %v15906_v4 = vld [vmem:[#allocation6 + $0x120] sm:$0xff] }
 0x454   :  { %9806 = vmatpush.bf16.msra.mxu1 %v15884_v51  ;;  %v19158_v30 = vpop.f32.mrf.mxu3  ;;  %v15914_v51 = vld [vmem:[#allocation6 + $0x160] sm:$0xff]  ;;  %v15927_v12 = vld [vmem:[#allocation6 + $0x1c8] sm:$0xff] }
 0x455   :  { %9819 = vmatpush.bf16.msra.mxu2 %v15892_v53  ;;  %v15922_v53 = vld [vmem:[#allocation6 + $0x1a0] sm:$0xff] }
 0x456   :  { %9832 = vmatpush.bf16.msra.mxu3 %v15900_v17  ;;  %v7986_v19 = vpop.f32.mrf.mxu1  ;;  %v15930_v17 = vld [vmem:[#allocation6 + $0x1e0] sm:$0xff] }
 0x457   :  { %9794 = vmatpush.bf16.msra.mxu0 %v15875_v59  ;;  %v15905_v59 = vld [vmem:[#allocation6 + $0x118] sm:$0xff] }
 0x458   :  { %9807 = vmatpush.bf16.msra.mxu1 %v15883_v49  ;;  %v15913_v49 = vld [vmem:[#allocation6 + $0x158] sm:$0xff] }
 0x459   :  { %9820 = vmatpush.bf16.msra.mxu2 %v15891_v23  ;;  %v15921_v23 = vld [vmem:[#allocation6 + $0x198] sm:$0xff] }
 0x45a   :  { %9833 = vmatpush.bf16.msra.mxu3 %v15899_v0  ;;  %v15929_v0 = vld [vmem:[#allocation6 + $0x1d8] sm:$0xff] }
 0x45b   :  { %9795 = vmatpush.bf16.msra.mxu0 %v15874_v10  ;;  %v7999_v48 = vpop.f32.mrf.mxu2 }
 0x45c   :  { %9808 = vmatpush.bf16.msra.mxu1 %v15882_v5  ;;  %v8012_v22 = vpop.f32.mrf.mxu3  ;;  %v15904_v5 = vld [vmem:[#allocation6 + $0x110] sm:$0xff]  ;;  %v9083_v48 = vunpack.c.h.b16 %v19045_v56 }
 0x45d   :  { %9821 = vmatpush.bf16.msra.mxu2 %v15890_v11  ;;  %v15912_v11 = vld [vmem:[#allocation6 + $0x150] sm:$0xff]  ;;  %v9084_v22 = vunpack.c.l.b16 %v19087_v60 }
 0x45e   :  { %9834 = vmatpush.bf16.msra.mxu3 %v15898_v7  ;;  %v15920_v7 = vld [vmem:[#allocation6 + $0x190] sm:$0xff]  ;;  %v9097_v50 = vpack.c.b16 %v9083_v48, %v9083_v48 }
 0x45f   :  { %9796 = vmatpush.bf16.msra.mxu0 %v15873_v36  ;;  %v15928_v36 = vld [vmem:[#allocation6 + $0x1d0] sm:$0xff]  ;;  %v9098_v62 = vpack.c.b16 %v9084_v22, %v9084_v22 }
 0x460   :  { %9809 = vmatpush.bf16.msra.mxu1 %v15881_v58  ;;  %v15903_v58 = vld [vmem:[#allocation6 + $0x108] sm:$0xff]  ;;  %v15972_v22 = vld [vmem:[#allocation6 + $0x330] sm:$0xff] }
 0x461   :  { %9822 = vmatpush.bf16.msra.mxu2 %v15889_v8  ;;  %v15911_v8 = vld [vmem:[#allocation6 + $0x148] sm:$0xff] }
 0x462   :  { %9835 = vmatpush.bf16.msra.mxu3 %v15897_v61  ;;  %v15919_v61 = vld [vmem:[#allocation6 + $0x188] sm:$0xff] }
 0x463   :  { %9797 = vmatpush.bf16.msra.mxu0 %v15872_v34 }
 0x464   :  { %9810 = vmatpush.bf16.msra.mxu1 %v15880_v15  ;;  %v7406_v15 = vperm.slane %v19140_v33, 1 }
 0x465   :  { %9823 = vmatpush.bf16.msra.mxu2 %v15888_v18  ;;  %v15902_v18 = vld [vmem:[#allocation6 + $0x100] sm:$0xff] }
 0x466   :  { %9836 = vmatpush.bf16.msra.mxu3 %v15896_v63  ;;  %v15910_v63 = vld [vmem:[#allocation6 + $0x140] sm:$0xff]  ;;  %v7998_v33 = vadd.f32 %v19156_v38, %v7406_v15 }
 0x467   :  { %9798 = vmatpush.bf16.msra.mxu0 %v15871_v24  ;;  %v15918_v24 = vld [vmem:[#allocation6 + $0x180] sm:$0xff] }
 0x468   :  { %9811 = vmatpush.bf16.msra.mxu1 %v15879_v21  ;;  %v9082_v21 = vunpack.c.l.b16 %v19045_v56  ;;  %v15948_v56 = vld [vmem:[#allocation6 + $0x270] sm:$0xff]  ;;  %v8011_v27 = vadd.f32 %v19158_v30, %v7998_v33 }
 0x469   :  { %9824 = vmatpush.bf16.msra.mxu2 %v15887_v42  ;;  %v15926_v42 = vld [vmem:[#allocation6 + $0x1c0] sm:$0xff] }
 0x46a   :  { %9837 = vmatpush.bf16.msra.mxu3 %v15895_v25  ;;  %v15941_v25 = vld [vmem:[#allocation6 + $0x238] sm:$0xff] }
 0x46b   :  { %9799 = vmatpush.bf16.msra.mxu0 %v15870_v26  ;;  %v19164_v29 = vpop.f32.mrf.mxu0  ;;  %v15949_v26 = vld [vmem:[#allocation6 + $0x278] sm:$0xff] }
 0x46c   :  { %9812 = vmatpush.bf16.msra.mxu1 %v15878_v20  ;;  %v19166_v14 = vpop.f32.mrf.mxu1  ;;  %v15957_v20 = vld [vmem:[#allocation6 + $0x2b8] sm:$0xff]  ;;  %v8024_v38 = vadd.f32 %v19164_v29, %v8011_v27 }
 0x46d   :  { %9825 = vmatpush.bf16.msra.mxu2 %v15886_v32  ;;  %v9085_v32 = vunpack.c.h.b16 %v19087_v60  ;;  %v15964_v60 = vld [vmem:[#allocation6 + $0x2f0] sm:$0xff]  ;;  %v15953_v29 = vld [vmem:[#allocation6 + $0x298] sm:$0xff] }
 0x46e   :  { %9838 = vmatpush.bf16.msra.mxu3 %v15894_v45  ;;  %9800 = vmatmul.bf16.vlgmr.msra.gmra.mxu0 %v9092_v54  ;;  %v9096_v45 = vpack.c.b16 %v9082_v21, %v9082_v21  ;;  %v15947_v54 = vld [vmem:[#allocation6 + $0x268] sm:$0xff]  ;;  %v8037_v30 = vadd.f32 %v19166_v14, %v8024_v38  ;;  %v15981_v21 = vld [vmem:[#allocation6 + $0x378] sm:$0xff]  ;;  %v15976_v38 = vld [vmem:[#allocation6 + $0x350] sm:$0xff] }
 0x46f   :  { %9844 = vmatpush.bf16.msrb.mxu0 %v15909_v37  ;;  %9813 = vmatmul.bf16.vlgmr.msra.gmra.mxu1 %v9093_v41  ;;  %v15940_v37 = vld [vmem:[#allocation6 + $0x230] sm:$0xff]  ;;  %v15963_v41 = vld [vmem:[#allocation6 + $0x2e8] sm:$0xff] }
 0x470   :  { %9857 = vmatpush.bf16.msrb.mxu1 %v15917_v52  ;;  %9826 = vmatmul.bf16.vlgmr.msra.gmra.mxu2 %v9094_v43  ;;  %v15956_v52 = vld [vmem:[#allocation6 + $0x2b0] sm:$0xff] }
 0x471   :  { %9870 = vmatpush.bf16.msrb.mxu2 %v15925_v39  ;;  %9839 = vmatmul.bf16.vlgmr.msra.gmra.mxu3 %v9095_v9  ;;  %v9099_v39 = vpack.c.b16 %v9085_v32, %v9085_v32  ;;  %v15946_v9 = vld [vmem:[#allocation6 + $0x260] sm:$0xff]  ;;  %v15979_v32 = vld [vmem:[#allocation6 + $0x368] sm:$0xff] }
 0x472   :  { %9883 = vmatpush.bf16.msrb.mxu3 %v15933_v1  ;;  %v15939_v1 = vld [vmem:[#allocation6 + $0x228] sm:$0xff] }
 0x473   :  { %9845 = vmatpush.bf16.msrb.mxu0 %v15908_v40  ;;  %v19168_v57 = vpop.f32.mrf.mxu2  ;;  %v8025_v2 = vpop.f32.mrf.mxu0  ;;  %v15955_v40 = vld [vmem:[#allocation6 + $0x2a8] sm:$0xff] }
 0x474   :  { %9858 = vmatpush.bf16.msrb.mxu1 %v15916_v35  ;;  %v19170_v3 = vpop.f32.mrf.mxu3  ;;  %v8038_v10 = vpop.f32.mrf.mxu1  ;;  %v15960_v2 = vld [vmem:[#allocation6 + $0x2d0] sm:$0xff] }
 0x475   :  { %9871 = vmatpush.bf16.msrb.mxu2 %v15924_v55  ;;  %v15938_v55 = vld [vmem:[#allocation6 + $0x220] sm:$0xff]  ;;  %v8066_v10 = vmax.f32 %v19154_v6, 0.0  ;;  %v9087_v6 = vunpack.c.h.b16 %v19129_v31 }
 0x476   :  { %9884 = vmatpush.bf16.msrb.mxu3 %v15932_v13  ;;  %v15954_v13 = vld [vmem:[#allocation6 + $0x2a0] sm:$0xff] }
 0x477   :  { %9846 = vmatpush.bf16.msrb.mxu0 %v15907_v28  ;;  %v8050_v28 = vadd.f32 %v19168_v57, %v8037_v30 }
 0x478   :  { %9859 = vmatpush.bf16.msrb.mxu1 %v15915_v46  ;;  %v15962_v46 = vld [vmem:[#allocation6 + $0x2e0] sm:$0xff] }
 0x479   :  { %9872 = vmatpush.bf16.msrb.mxu2 %v15923_v44  ;;  %v15937_v44 = vld [vmem:[#allocation6 + $0x218] sm:$0xff]  ;;  %v8063_v14 = vadd.f32 %v19170_v3, %v8050_v28  ;;  %v15935_v3 = vld [vmem:[#allocation6 + $0x208] sm:$0xff] }
 0x47a   :  { %9885 = vmatpush.bf16.msrb.mxu3 %v15931_v47  ;;  %v15945_v47 = vld [vmem:[#allocation6 + $0x258] sm:$0xff] }
 0x47b   :  { %9847 = vmatpush.bf16.msrb.mxu0 %v15906_v4  ;;  %v8051_v19 = vpop.f32.mrf.mxu2  ;;  %v15961_v4 = vld [vmem:[#allocation6 + $0x2d8] sm:$0xff]  ;;  %v8067_v57 = vmax.f32 %v8063_v14, 0.0 }
 0x47c   :  { %9860 = vmatpush.bf16.msrb.mxu1 %v15914_v51  ;;  %v8064_v34 = vpop.f32.mrf.mxu3  ;;  %v15942_v19 = vld [vmem:[#allocation6 + $0x240] sm:$0xff] }
 0x47d   :  { %9873 = vmatpush.bf16.msrb.mxu2 %v15922_v53  ;;  %v15950_v34 = vld [vmem:[#allocation6 + $0x280] sm:$0xff] }
 0x47e   :  { %9886 = vmatpush.bf16.msrb.mxu3 %v15930_v17 }
 0x47f   :  { %9848 = vmatpush.bf16.msrb.mxu0 %v15905_v59 }
 0x480   :  { %9861 = vmatpush.bf16.msrb.mxu1 %v15913_v49  ;;  %v15936_v49 = vld [vmem:[#allocation6 + $0x210] sm:$0xff] }
 0x481   :  { %9874 = vmatpush.bf16.msrb.mxu2 %v15921_v23  ;;  %v15944_v23 = vld [vmem:[#allocation6 + $0x250] sm:$0xff] }
 0x482   :  { %9887 = vmatpush.bf16.msrb.mxu3 %v15929_v0  ;;  %v15952_v0 = vld [vmem:[#allocation6 + $0x290] sm:$0xff] }
 0x483   :  { %9849 = vmatpush.bf16.msrb.mxu0 %v15904_v5  ;;  %v15943_v5 = vld [vmem:[#allocation6 + $0x248] sm:$0xff] }
 0x484   :  { %9862 = vmatpush.bf16.msrb.mxu1 %v15912_v11  ;;  %v15951_v11 = vld [vmem:[#allocation6 + $0x288] sm:$0xff] }
 0x485   :  { %9875 = vmatpush.bf16.msrb.mxu2 %v15920_v7  ;;  %v8068_v7 = vpack.c.bf16 %v8067_v57, %v8066_v10 }
 0x486   :  { %9888 = vmatpush.bf16.msrb.mxu3 %v15928_v36  ;;  %v15959_v36 = vld [vmem:[#allocation6 + $0x2c8] sm:$0xff] }
 0x487   :  { %9850 = vmatpush.bf16.msrb.mxu0 %v15903_v58  ;;  %v9088_v15 = vunpack.c.l.b16 %v8068_v7 }
 0x488   :  { %9863 = vmatpush.bf16.msrb.mxu1 %v15911_v8 }
 0x489   :  { %9876 = vmatpush.bf16.msrb.mxu2 %v15919_v61  ;;  %v15934_v61 = vld [vmem:[#allocation6 + $0x200] sm:$0xff]  ;;  %v9102_v48 = vpack.c.b16 %v9088_v15, %v9088_v15 }
 0x48a   :  { %9889 = vmatpush.bf16.msrb.mxu3 %v15927_v12  ;;  %v9086_v12 = vunpack.c.l.b16 %v19129_v31  ;;  %v15971_v31 = vld [vmem:[#allocation6 + $0x328] sm:$0xff] }
 0x48b   :  { %9851 = vmatpush.bf16.msrb.mxu0 %v15902_v18  ;;  %v19180_v43 = vpop.f32.mrf.mxu0  ;;  %v15958_v18 = vld [vmem:[#allocation6 + $0x2c0] sm:$0xff] }
 0x48c   :  { %9864 = vmatpush.bf16.msrb.mxu1 %v15910_v63  ;;  %v19183_v35 = vpop.f32.mrf.mxu1  ;;  %v15973_v63 = vld [vmem:[#allocation6 + $0x338] sm:$0xff] }
 0x48d   :  { %9877 = vmatpush.bf16.msrb.mxu2 %v15918_v24  ;;  %v9089_v24 = vunpack.c.h.b16 %v8068_v7 }
 0x48e   :  { %9890 = vmatpush.bf16.msrb.mxu3 %v15926_v42  ;;  %9852 = vmatmul.bf16.vlgmr.msrb.gmra.mxu0 %v9096_v45  ;;  %v9100_v42 = vpack.c.b16 %v9086_v12, %v9086_v12  ;;  %v15970_v45 = vld [vmem:[#allocation6 + $0x320] sm:$0xff] }
 0x48f   :  { %9896 = vmatpush.bf16.msra.mxu0 %v15941_v25  ;;  %9865 = vmatmul.bf16.vlgmr.msrb.gmra.mxu1 %v9097_v50  ;;  %v9101_v25 = vpack.c.b16 %v9087_v6, %v9087_v6  ;;  %v15969_v50 = vld [vmem:[#allocation6 + $0x318] sm:$0xff] }
 0x490   :  { %9909 = vmatpush.bf16.msra.mxu1 %v15949_v26  ;;  %9878 = vmatmul.bf16.vlgmr.msrb.gmra.mxu2 %v9098_v62  ;;  %v9103_v26 = vpack.c.b16 %v9089_v24, %v9089_v24  ;;  %v15977_v62 = vld [vmem:[#allocation6 + $0x358] sm:$0xff] }
 0x491   :  { %9922 = vmatpush.bf16.msra.mxu2 %v15957_v20  ;;  %9891 = vmatmul.bf16.vlgmr.msrb.gmra.mxu3 %v9099_v39  ;;  %v15980_v20 = vld [vmem:[#allocation6 + $0x370] sm:$0xff] }
 0x492   :  { %9935 = vmatpush.bf16.msra.mxu3 %v15965_v16 }
 0x493   :  { %9897 = vmatpush.bf16.msra.mxu0 %v15940_v37  ;;  %v19187_v51 = vpop.f32.mrf.mxu2  ;;  %v8687_v17 = vpop.f32.mrf.mxu0  ;;  %v15978_v37 = vld [vmem:[#allocation6 + $0x360] sm:$0xff] }
 0x494   :  { %9910 = vmatpush.bf16.msra.mxu1 %v15948_v56  ;;  %v19189_v53 = vpop.f32.mrf.mxu3  ;;  %v8700_v59 = vpop.f32.mrf.mxu1 }
 0x495   :  { %9923 = vmatpush.bf16.msra.mxu2 %v15956_v52 }
 0x496   :  { %9936 = vmatpush.bf16.msra.mxu3 %v15964_v60  ;;  %v15968_v60 = vld [vmem:[#allocation6 + $0x310] sm:$0xff] }
 0x497   :  { %9898 = vmatpush.bf16.msra.mxu0 %v15939_v1  ;;  %v15967_v1 = vld [vmem:[#allocation6 + $0x308] sm:$0xff] }
 0x498   :  { %9911 = vmatpush.bf16.msra.mxu1 %v15947_v54  ;;  %v15975_v54 = vld [vmem:[#allocation6 + $0x348] sm:$0xff] }
 0x499   :  { %9924 = vmatpush.bf16.msra.mxu2 %v15955_v40  ;;  %v8169_v40 = vld [vmem:[%s19211_s4] sm:$0x3] }
 0x49a   :  { %9937 = vmatpush.bf16.msra.mxu3 %v15963_v41 }
 0x49b   :  { %9899 = vmatpush.bf16.msra.mxu0 %v15938_v55  ;;  %v8713_v58 = vpop.f32.mrf.mxu2  ;;  %v15966_v55 = vld [vmem:[#allocation6 + $0x300] sm:$0xff] }
 0x49c   :  { %9912 = vmatpush.bf16.msra.mxu1 %v15946_v9  ;;  %v8726_v8 = vpop.f32.mrf.mxu3  ;;  %v8171_v9 = vperm.slane %v8169_v40, 0 }
 0x49d   :  { %9925 = vmatpush.bf16.msra.mxu2 %v15954_v13  ;;  %v15974_v13 = vld [vmem:[#allocation6 + $0x340] sm:$0xff] }
 0x49e   :  { %9938 = vmatpush.bf16.msra.mxu3 %v15962_v46  ;;  %v8686_v28 = vadd.f32 %v19180_v43, %v8171_v9  ;;  %v8172_v46 = vperm.slane %v8169_v40, 1 }
 0x49f   :  { %9900 = vmatpush.bf16.msra.mxu0 %v15937_v44 }
 0x4a0   :  { %9913 = vmatpush.bf16.msra.mxu1 %v15945_v47  ;;  %v8699_v44 = vadd.f32 %v19183_v35, %v8686_v28 }
 0x4a1   :  { %9926 = vmatpush.bf16.msra.mxu2 %v15953_v29 }
 0x4a2   :  { %9939 = vmatpush.bf16.msra.mxu3 %v15961_v4  ;;  %v8712_v29 = vadd.f32 %v19187_v51, %v8699_v44 }
 0x4a3   :  { %9901 = vmatpush.bf16.msra.mxu0 %v15936_v49 }
 0x4a4   :  { %9914 = vmatpush.bf16.msra.mxu1 %v15944_v23  ;;  %v8725_v59 = vadd.f32 %v19189_v53, %v8712_v29  ;;  %v15988_v53 = vld [vmem:[%s19213_s6] ss:$0 sm:$0xff] }
 0x4a5   :  { %9927 = vmatpush.bf16.msra.mxu2 %v15952_v0 }
 0x4a6   :  { %9940 = vmatpush.bf16.msra.mxu3 %v15960_v2 }
 0x4a7   :  { %9902 = vmatpush.bf16.msra.mxu0 %v15935_v3 }
 0x4a8   :  { %9915 = vmatpush.bf16.msra.mxu1 %v15943_v5 }
 0x4a9   :  { %9928 = vmatpush.bf16.msra.mxu2 %v15951_v11 }
 0x4aa   :  { %9941 = vmatpush.bf16.msra.mxu3 %v15959_v36 }
 0x4ab   :  { %9903 = vmatpush.bf16.msra.mxu0 %v15934_v61  ;;  %v8737_v33 = vpop.f32.mrf.mxu0 }
 0x4ac   :  { %9916 = vmatpush.bf16.msra.mxu1 %v15942_v19  ;;  %v8750_v16 = vpop.f32.mrf.mxu1  ;;  %v8738_v23 = vadd.f32 %v8737_v33, %v8725_v59 }
 0x4ad   :  { %9929 = vmatpush.bf16.msra.mxu2 %v15950_v34 }
 0x4ae   :  { %9942 = vmatpush.bf16.msra.mxu3 %v15958_v18  ;;  %9904 = vmatmul.bf16.vlgmr.msra.gmra.mxu0 %v9100_v42  ;;  %v8751_v2 = vadd.f32 %v8750_v16, %v8738_v23 }
 0x4af   :  { %9948 = vmatpush.bf16.msrb.mxu0 %v15973_v63  ;;  %9917 = vmatmul.bf16.vlgmr.msra.gmra.mxu1 %v9101_v25 }
 0x4b0   :  { %9961 = vmatpush.bf16.msrb.mxu1 %v15981_v21  ;;  %9930 = vmatmul.bf16.vlgmr.msra.gmra.mxu2 %v9102_v48  ;;  %v8832_v7 = vmax.f32 %v8751_v2, 0.0 }
 0x4b1   :  { %9943 = vmatmul.bf16.vlgmr.msra.gmra.mxu3 %v9103_v26 }
 0x4b3   :  { %9949 = vmatpush.bf16.msrb.mxu0 %v15972_v22  ;;  %v8763_v56 = vpop.f32.mrf.mxu2  ;;  %v8739_v39 = vpop.f32.mrf.mxu0 }
 0x4b4   :  { %9962 = vmatpush.bf16.msrb.mxu1 %v15980_v20  ;;  %v8776_v52 = vpop.f32.mrf.mxu3  ;;  %v8752_v27 = vpop.f32.mrf.mxu1  ;;  %v8764_v47 = vadd.f32 %v8763_v56, %v8172_v46 }
 0x4b6   :  { %v8777_v14 = vadd.f32 %v8776_v52, %v8764_v47 }
 0x4b7   :  { %9950 = vmatpush.bf16.msrb.mxu0 %v15971_v31 }
 0x4b8   :  { %9963 = vmatpush.bf16.msrb.mxu1 %v15979_v32 }
 0x4bb   :  { %9951 = vmatpush.bf16.msrb.mxu0 %v15970_v45  ;;  %v8765_v41 = vpop.f32.mrf.mxu2 }
 0x4bc   :  { %9964 = vmatpush.bf16.msrb.mxu1 %v15978_v37  ;;  %v8778_v30 = vpop.f32.mrf.mxu3 }
 0x4bf   :  { %9952 = vmatpush.bf16.msrb.mxu0 %v15969_v50 }
 0x4c0   :  { %9965 = vmatpush.bf16.msrb.mxu1 %v15977_v62 }
 0x4c3   :  { %9953 = vmatpush.bf16.msrb.mxu0 %v15968_v60 }
 0x4c4   :  { %9966 = vmatpush.bf16.msrb.mxu1 %v15976_v38 }
 0x4c7   :  { %9954 = vmatpush.bf16.msrb.mxu0 %v15967_v1 }
 0x4c8   :  { %9967 = vmatpush.bf16.msrb.mxu1 %v15975_v54 }
 0x4cb   :  { %9955 = vmatpush.bf16.msrb.mxu0 %v15966_v55  ;;  %v8789_v4 = vpop.f32.mrf.mxu0 }
 0x4cc   :  { %9968 = vmatpush.bf16.msrb.mxu1 %v15974_v13  ;;  %v8802_v17 = vpop.f32.mrf.mxu1  ;;  %v8790_v49 = vadd.f32 %v8789_v4, %v8777_v14 }
 0x4ce   :  { %v8803_v0 = vadd.f32 %v8802_v17, %v8790_v49 }
 0x4d3   :  { %v8815_v57 = vpop.f32.mrf.mxu2  ;;  %v8791_v43 = vpop.f32.mrf.mxu0 }
 0x4d4   :  { %v8816_v10 = vadd.f32 %v8815_v57, %v8803_v0  ;;  %v8828_v3 = vpop.f32.mrf.mxu3  ;;  %v8804_v5 = vpop.f32.mrf.mxu1 }
 0x4d6   :  { %v8829_v11 = vadd.f32 %v8828_v3, %v8816_v10 }
 0x4d8   :  { %v8833_v35 = vmax.f32 %v8829_v11, 0.0 }
 0x4da   :  { %v8834_v36 = vpack.c.bf16 %v8833_v35, %v8832_v7 }
 0x4db   :  { %v8817_v58 = vpop.f32.mrf.mxu2 }
 0x4dc   :  { %v9090_v51 = vunpack.c.l.b16 %v8834_v36  ;;  %v9091_v8 = vunpack.c.h.b16 %v8834_v36  ;;  %v8830_v61 = vpop.f32.mrf.mxu3 }
 0x4de   :  { %v9104_v12 = vpack.c.b16 %v9090_v51, %v9090_v51  ;;  %v9105_v19 = vpack.c.b16 %v9091_v8, %v9091_v8 }
 0x4e0   :  { %9956 = vmatmul.bf16.vlgmr.msrb.gmra.mxu0 %v9104_v12  ;;  %9969 = vmatmul.bf16.vlgmr.msrb.gmra.mxu1 %v9105_v19 }
 0x4eb   :  { %v9801_v34 = vpop.f32.mrf.mxu0 }
 0x4ec   :  { %v9802_v6 = vadd.f32 %v15988_v53, %v9801_v34  ;;  %v9814_v15 = vpop.f32.mrf.mxu1 }
 0x4ee   :  { %v9815_v18 = vadd.f32 %v9814_v15, %v9802_v6 }
 0x4f3   :  { %v9827_v63 = vpop.f32.mrf.mxu2  ;;  %v9803_v42 = vpop.f32.mrf.mxu0 }
 0x4f4   :  { %v9828_v24 = vadd.f32 %v9827_v63, %v9815_v18  ;;  %v9840_v21 = vpop.f32.mrf.mxu3  ;;  %v9816_v25 = vpop.f32.mrf.mxu1 }
 0x4f6   :  { %v9841_v48 = vadd.f32 %v9840_v21, %v9828_v24 }
 0x4fb   :  { %v9829_v22 = vpop.f32.mrf.mxu2 }
 0x4fc   :  { %v9842_v26 = vpop.f32.mrf.mxu3 }
 0x50b   :  { %v9853_v20 = vpop.f32.mrf.mxu0 }
 0x50c   :  { %v9854_v31 = vadd.f32 %v9853_v20, %v9841_v48  ;;  %v9866_v32 = vpop.f32.mrf.mxu1 }
 0x50e   :  { %v9867_v33 = vadd.f32 %v9866_v32, %v9854_v31 }
 0x513   :  { %v9879_v16 = vpop.f32.mrf.mxu2  ;;  %v9855_v50 = vpop.f32.mrf.mxu0 }
 0x514   :  { %v9880_v45 = vadd.f32 %v9879_v16, %v9867_v33  ;;  %v9892_v37 = vpop.f32.mrf.mxu3  ;;  %v9868_v62 = vpop.f32.mrf.mxu1 }
 0x516   :  { %v9893_v56 = vadd.f32 %v9892_v37, %v9880_v45 }
 0x51b   :  { %v9881_v52 = vpop.f32.mrf.mxu2 }
 0x51c   :  { %v9894_v39 = vpop.f32.mrf.mxu3 }
 0x52b   :  { %v9905_v27 = vpop.f32.mrf.mxu0 }
 0x52c   :  { %v9918_v60 = vpop.f32.mrf.mxu1  ;;  %v9906_v55 = vadd.f32 %v9905_v27, %v9893_v56 }
 0x52e   :  { %v9919_v9 = vadd.f32 %v9918_v60, %v9906_v55 }
 0x533   :  { %v9931_v38 = vpop.f32.mrf.mxu2  ;;  %v9907_v54 = vpop.f32.mrf.mxu0 }
 0x534   :  { %v9944_v1 = vpop.f32.mrf.mxu3  ;;  %v9920_v40 = vpop.f32.mrf.mxu1  ;;  %v9932_v13 = vadd.f32 %v9931_v38, %v9919_v9 }
 0x536   :  { %v9945_v28 = vadd.f32 %v9944_v1, %v9932_v13 }
 0x53b   :  { %v9933_v41 = vpop.f32.mrf.mxu2 }
 0x53c   :  { %v9946_v30 = vpop.f32.mrf.mxu3 }
 0x55d   :  { %v9957_v46 = vpop.f32.mrf.mxu0  ;;  %v9970_v44 = vpop.f32.mrf.mxu1 }
 0x55e   :  { %v9958_v47 = vadd.f32 %v9957_v46, %v9945_v28 }
 0x560   :  { %v9971_v29 = vadd.f32 %v9970_v44, %v9958_v47 }
 0x562   :  { %v9974_v14 = vmax.f32 %v9971_v29, 0.0 }
 0x564   :  { %9975 = vst [vmem:[%s19214_s7] sm:$0xff] %v9974_v14 }
 0x565   :  { %v9959_v4 = vpop.f32.mrf.mxu0  ;;  %v9972_v17 = vpop.f32.mrf.mxu1 }
 0x566   :  { %9980 = vsyncpa [#allocation5], 1 }
 0x567   :  { %9981 = vsyncpa [#allocation7], 1 }

</bundles_post_ra>
